<compile_context>
chip_gen: v7x
topology: tpu7x:2x2x1
jax: 0.10.0
libtpu: 0.0.40
codegen_flags: <defaults>
</compile_context>

<pallas_src>
import numpy as np

import jax
import jax.numpy as jnp
from jax.experimental import pallas as pl
from jax.experimental.pallas import tpu as pltpu


FLAT = 32 * 17 * 2          # 1088: the module's hard-coded flatten width
HID = 2504                  # dense1 width from the module's __init__
HID_PAD = 2560              # padded to 2 chunks of 1280 (multiple of 128)
HID_CHUNK = HID_PAD // 2
BATCH_BLK = 8               # samples per features grid step (stacked along MXU M)


def _round_up(a, b):
    return (a + b - 1) // b * b


# --------------------------- feature extractor -------------------------------

def _features_kernel(x_ref, w1_ref, b1_ref, w2_ref, b2_ref, o_ref):
    """conv1+ReLU+mp(2,2) -> conv2+ReLU+mp(2,1) for a block of BATCH_BLK samples.

    x_ref : (BB, 20, 64) f32  quad-row packed input: row m = image rows 4m..4m+3.
    w1_ref: (128, 1024) f32   structured conv1 weights.  K index = d*64 + r*16 + w
                              (input row 4m+4d+r, column w); output lane =
                              s*256 + (x%2)*128 + (x//2)*16 + c  (conv1 row 4m+s).
    b1_ref: (1, 256)  f32     conv1 bias per (x-parity, x//2, c) lane (pad lanes 0).
    w2_ref: (768, 128) f32    structured conv2 weights.  K index = d2*256 + pr*128 +
                              x1*16 + ci (pool1 row 2(j2+d2)+pr); output lane =
                              py*64 + x2*32 + co  (conv2 row 2*j2+py).
    b2_ref: (1, 64)   f32
    o_ref : (BB, 17, 64) bf16 pooled conv2 features (row j2, lane x2*32+co).
    """
    f32 = jnp.float32
    bb = x_ref.shape[0]
    x = x_ref[...]                                              # (BB, 20, 64)

    # ---- conv1: all samples stacked along M; ky folded into K (two K=64 dots) ----
    x0 = jnp.concatenate([x[b, 0:19, :] for b in range(bb)], axis=0)   # (BB*19, 64)
    x1 = jnp.concatenate([x[b, 1:20, :] for b in range(bb)], axis=0)   # (BB*19, 64)
    a1 = (jnp.dot(x0, w1_ref[0:64, :], preferred_element_type=f32) +
          jnp.dot(x1, w1_ref[64:128, :], preferred_element_type=f32))  # (BB*19, 1024)

    # mp1 y-pool: conv1 row 4m+s lives in lane group [s*256,(s+1)*256); pool pairs.
    m0 = jnp.maximum(a1[:, 0:256], a1[:, 256:512])        # pooled conv1 row 2m
    m1 = jnp.maximum(a1[:, 512:768], a1[:, 768:1024])     # pooled conv1 row 2m+1
    b1v = b1_ref[...]
    r0 = jnp.maximum(m0 + b1v, 0.0)                       # bias/ReLU commute with max
    r1 = jnp.maximum(m1 + b1v, 0.0)
    # mp1 x-pool: even conv1 x in lanes [0,128), odd x in [128,256).
    p0 = jnp.maximum(r0[:, 0:128], r0[:, 128:256])
    p1 = jnp.maximum(r1[:, 0:128], r1[:, 128:256])
    # pair-packed pool1: row (b, m) holds pooled rows 2m (lanes 0:128) and 2m+1.
    p = jnp.concatenate([p0, p1], axis=-1)                 # (BB*19, 256)

    # ---- conv2: final row j2 needs pool1 pair-rows j2..j2+2  (single K=768 dot) ----
    c2 = jnp.concatenate(
        [jnp.concatenate([p[b * 19 + d:b * 19 + d + 17, :] for d in range(3)],
                         axis=-1)                           # (17, 768), lane-aligned
         for b in range(bb)], axis=0)                       # (BB*17, 768)
    a2 = jnp.dot(c2, w2_ref[...], preferred_element_type=f32)   # (BB*17, 128)

    # mp2 y-pool: conv2 rows 2*j2 / 2*j2+1 live in lane halves; then bias + ReLU.
    r2 = jnp.maximum(jnp.maximum(a2[:, 0:64], a2[:, 64:128]) + b2_ref[...], 0.0)
    r2 = r2.astype(o_ref.dtype)                            # bf16 in-kernel

    for b in range(bb):                                    # (17, 64) slab per sample
        o_ref[b] = r2[b * 17:(b + 1) * 17, :]


def features_fwd(xq, p):
    """(N_pad, 20, 64) f32 quad-packed input -> (N_pad, 17, 64) bf16 features."""
    n_pad = xq.shape[0]
    return pl.pallas_call(
        _features_kernel,
        out_shape=jax.ShapeDtypeStruct((n_pad, 17, 64), jnp.bfloat16),
        grid=(n_pad // BATCH_BLK,),
        in_specs=[
            pl.BlockSpec((BATCH_BLK, 20, 64), lambda i: (i, 0, 0)),
            pl.BlockSpec((128, 1024), lambda i: (0, 0)),
            pl.BlockSpec((1, 256), lambda i: (0, 0)),
            pl.BlockSpec((768, 128), lambda i: (0, 0)),
            pl.BlockSpec((1, 64), lambda i: (0, 0)),
        ],
        out_specs=pl.BlockSpec((BATCH_BLK, 17, 64), lambda i: (i, 0, 0)),
        compiler_params=pltpu.CompilerParams(
            dimension_semantics=("parallel",)),
    )(xq, p["w1"], p["b1"], p["w2"], p["b2"])


# --------------------------- dense head --------------------------------------

def _dense_acc_kernel(x_ref, w1_ref, b1_ref, w2_ref, b2_ref, o_ref):
    """dense1+ReLU+dense2; hidden-dim chunks accumulate into the resident output."""
    c = pl.program_id(1)
    h = jnp.dot(x_ref[...], w1_ref[...], preferred_element_type=jnp.float32)
    h = jnp.maximum(h + b1_ref[...], 0.0)
    part = jnp.dot(h, w2_ref[...], preferred_element_type=jnp.float32)

    @pl.when(c == 0)
    def _():
        o_ref[...] = part + b2_ref[...]

    @pl.when(c != 0)
    def _():
        o_ref[...] = o_ref[...] + part


def _dense_par_kernel(x_ref, w1_ref, b1_ref, w2_ref, o_ref):
    """One hidden-dim chunk (v7x: chunks split across the two TensorCores)."""
    h = jnp.dot(x_ref[...], w1_ref[...], preferred_element_type=jnp.float32)
    h = jnp.maximum(h + b1_ref[...], 0.0)
    o_ref[...] = jnp.dot(h, w2_ref[...], preferred_element_type=jnp.float32)


def _num_parallel_cores():
    try:
        kind = jax.devices()[0].device_kind.lower()
    except Exception:
        return 1
    return 2 if "v7" in kind else 1


def dense_fwd(feats, p):
    """(N_pad, 1088) bf16 -> (N_pad, 8) f32 logits."""
    n_pad = feats.shape[0]
    n_tile = min(n_pad, 256)
    n_tiles = n_pad // n_tile
    n_chunks = HID_PAD // HID_CHUNK

    if _num_parallel_cores() >= 2:
        # v7x: split the dominant dense1-weight DMA across the two TensorCores.
        partials = pl.pallas_call(
            _dense_par_kernel,
            out_shape=jax.ShapeDtypeStruct((n_chunks, n_pad, 8), jnp.float32),
            grid=(n_chunks, n_tiles),
            in_specs=[
                pl.BlockSpec((n_tile, FLAT), lambda c, t: (t, 0)),
                pl.BlockSpec((FLAT, HID_CHUNK), lambda c, t: (0, c)),
                pl.BlockSpec((1, HID_CHUNK), lambda c, t: (0, c)),
                pl.BlockSpec((HID_CHUNK, 8), lambda c, t: (c, 0)),
            ],
            out_specs=pl.BlockSpec((None, n_tile, 8), lambda c, t: (c, t, 0)),
            compiler_params=pltpu.CompilerParams(
                dimension_semantics=("parallel", "arbitrary")),
        )(feats, p["d1w"], p["d1b"], p["d2w"])
        return jnp.sum(partials, axis=0) + p["d2b"]

    # v5e / v6e: hidden-dim chunks are a VMEM-resident reduction; no partials in HBM.
    return pl.pallas_call(
        _dense_acc_kernel,
        out_shape=jax.ShapeDtypeStruct((n_pad, 8), jnp.float32),
        grid=(n_tiles, n_chunks),
        in_specs=[
            pl.BlockSpec((n_tile, FLAT), lambda t, c: (t, 0)),
            pl.BlockSpec((FLAT, HID_CHUNK), lambda t, c: (0, c)),
            pl.BlockSpec((1, HID_CHUNK), lambda t, c: (0, c)),
            pl.BlockSpec((HID_CHUNK, 8), lambda t, c: (c, 0)),
            pl.BlockSpec((1, 8), lambda t, c: (0, 0)),
        ],
        out_specs=pl.BlockSpec((n_tile, 8), lambda t, c: (t, 0)),
        compiler_params=pltpu.CompilerParams(
            dimension_semantics=("parallel", "arbitrary")),
    )(feats, p["d1w"], p["d1b"], p["d2w"], p["d2b"])


# --------------------------- model forward -----------------------------------

def model_forward(prepped, x_nchw):
    n = x_nchw.shape[0]
    assert x_nchw.shape[1:] == (1, 80, 16), \
        "the module's reshape(-1, 32*17*2) forces input (N, 1, 80, 16)"
    n_pad = _round_up(n, BATCH_BLK)
    if n_pad > 256:
        n_pad = _round_up(n_pad, 256)

    x = x_nchw.reshape(n, 80, 16)
    if n_pad != n:
        x = jnp.pad(x, ((0, n_pad - n), (0, 0), (0, 0)))
    xq = x.reshape(n_pad, 20, 64)                    # free quad-row packing

    feats = features_fwd(xq, prepped)                # (N_pad, 17, 64) bf16
    feats = feats.reshape(n_pad, FLAT)               # free row-major bitcast
    out = dense_fwd(feats, prepped)                  # (N_pad, 8) f32
    return out[:n]


# --------------------------- parameters --------------------------------------

def init_params(key):
    """Parameters in the original PyTorch layouts."""
    ks, nrf, nr_classes = 5, 16, 8
    ls = int((nrf / 2 * 125 / 4 * 80 / 4 + nr_classes) / 2)   # 2504, as in __init__
    keys = jax.random.split(key, 8)

    def uni(k, shape, fan_in):
        bound = 1.0 / float(fan_in) ** 0.5
        return jax.random.uniform(k, shape, jnp.float32, -bound, bound)

    return {
        "conv1_w": uni(keys[0], (nrf, 1, ks, ks), 1 * ks * ks),
        "conv1_b": uni(keys[1], (nrf,), 1 * ks * ks),
        "conv2_w": uni(keys[2], (2 * nrf, nrf, ks, ks), nrf * ks * ks),
        "conv2_b": uni(keys[3], (2 * nrf,), nrf * ks * ks),
        "dense1_w": uni(keys[4], (ls, FLAT), FLAT),
        "dense1_b": uni(keys[5], (ls,), FLAT),
        "dense2_w": uni(keys[6], (nr_classes, ls), ls),
        "dense2_b": uni(keys[7], (nr_classes,), ls),
    }


def prepare_params(params):
    """One-time host-side conversion of PyTorch-layout params to kernel layouts."""
    f32 = np.float32
    W1 = np.asarray(params["conv1_w"], f32)          # (16, 1, 5, 5)   (co,ci,ky,kx)
    b1 = np.asarray(params["conv1_b"], f32)
    W2 = np.asarray(params["conv2_w"], f32)          # (32, 16, 5, 5)
    b2 = np.asarray(params["conv2_b"], f32)

    # conv1 -> (128, 1024): K = d*64 + r*16 + w  (input row 4m+4d+r, column w);
    # lane = s*256 + par*128 + x1*16 + c  (conv1 output row 4m+s, x = 2*x1+par).
    w1q = np.zeros((128, 1024), f32)
    b1p = np.zeros((1, 256), f32)
    for d in range(2):
        for r in range(4):
            dy = 4 * d + r
            for w in range(16):
                k = d * 64 + r * 16 + w
                for s in range(4):
                    ky = dy - s
                    if not 0 <= ky <= 4:
                        continue
                    for x1 in range(6):
                        for par in range(2):
                            kx = w - (2 * x1 + par)
                            if not 0 <= kx <= 4:
                                continue
                            lane0 = s * 256 + par * 128 + x1 * 16
                            w1q[k, lane0:lane0 + 16] = W1[:, 0, ky, kx]
    for x1 in range(6):
        for par in range(2):
            lane0 = par * 128 + x1 * 16
            b1p[0, lane0:lane0 + 16] = b1

    # conv2 -> (768, 128): K = d2*256 + pr*128 + x1*16 + ci (pool1 row 2(j2+d2)+pr);
    # lane = py*64 + x2*32 + co  (conv2 output row 2*j2+py).
    w2q = np.zeros((768, 128), f32)
    b2p = np.zeros((1, 64), f32)
    for d2 in range(3):
        for pr in range(2):
            dy2 = 2 * d2 + pr
            for x1 in range(6):
                for ci in range(16):
                    k2 = d2 * 256 + pr * 128 + x1 * 16 + ci
                    for py in range(2):
                        ky = dy2 - py
                        if not 0 <= ky <= 4:
                            continue
                        for x2 in range(2):
                            kx = x1 - x2
                            if not 0 <= kx <= 4:
                                continue
                            lane0 = py * 64 + x2 * 32
                            w2q[k2, lane0:lane0 + 32] = W2[:, ci, ky, kx]
    for x2 in range(2):
        b2p[0, x2 * 32:(x2 + 1) * 32] = b2

    # dense1 / dense2: permute dense1 rows to match the kernel feature order
    # (mine = y*64 + x2*32 + co) vs PyTorch NCHW flatten (torch = co*34 + y*2 + x2).
    yy, xx, cc = np.meshgrid(np.arange(17), np.arange(2), np.arange(32),
                             indexing="ij")
    perm = (cc * 34 + yy * 2 + xx).reshape(-1)

    d1 = np.asarray(params["dense1_w"], f32)          # (2504, 1088)
    d1b = np.asarray(params["dense1_b"], f32)
    d2 = np.asarray(params["dense2_w"], f32)          # (8, 2504)
    d2b = np.asarray(params["dense2_b"], f32)

    d1w = np.zeros((FLAT, HID_PAD), f32)
    d1w[:, :HID] = d1.T[perm, :]
    d1bp = np.zeros((1, HID_PAD), f32)
    d1bp[0, :HID] = d1b
    d2w = np.zeros((HID_PAD, 8), f32)
    d2w[:HID, :] = d2.T
    d2bp = d2b.reshape(1, 8)

    return {
        "w1": jnp.asarray(w1q), "b1": jnp.asarray(b1p),
        "w2": jnp.asarray(w2q), "b2": jnp.asarray(b2p),
        "d1w": jnp.asarray(d1w, dtype=jnp.bfloat16),   # halves the dominant DMA
        "d1b": jnp.asarray(d1bp),
        "d2w": jnp.asarray(d2w),
        "d2b": jnp.asarray(d2bp),
    }


# --------------------------- pure-JAX reference -------------------------------

def reference_forward(params, x):
    dn = ("NCHW", "OIHW", "NCHW")
    y = jax.lax.conv_general_dilated(x, params["conv1_w"], (1, 1), "VALID",
                                     dimension_numbers=dn)
    y = jnp.maximum(y + params["conv1_b"][None, :, None, None], 0.0)
    y = jax.lax.reduce_window(y, -jnp.inf, jax.lax.max,
                              (1, 1, 2, 2), (1, 1, 2, 2), "VALID")
    y = jax.lax.conv_general_dilated(y, params["conv2_w"], (1, 1), "VALID",
                                     dimension_numbers=dn)
    y = jnp.maximum(y + params["conv2_b"][None, :, None, None], 0.0)
    y = jax.lax.reduce_window(y, -jnp.inf, jax.lax.max,
                              (1, 1, 2, 1), (1, 1, 2, 1), "VALID")
    y = y.reshape(y.shape[0], -1)
    h = jnp.maximum(y @ params["dense1_w"].T + params["dense1_b"], 0.0)
    return h @ params["dense2_w"].T + params["dense2_b"]


# --------------------------- main ---------------------------------------------

if __name__ == "__main__":
    key = jax.random.PRNGKey(0)
    pkey, xkey = jax.random.split(key)
    torch_style_params = init_params(pkey)
    prepped = prepare_params(torch_style_params)      # one-time weight prep

    # (N, 1, 80, 16) is the only input family consistent with the module's
    # hard-coded reshape(-1, 32*17*2).
    x = jax.random.normal(xkey, (2, 1, 80, 16), jnp.float32)

    out = jax.jit(model_forward)(prepped, x)
    out = jax.block_until_ready(out)
    assert out.shape == (2, 8) and out.dtype == jnp.float32

    ref = reference_forward(torch_style_params, x)
    max_err = float(jnp.max(jnp.abs(out - ref)))
    # bf16 features / dense1 weights are an intentional precision trade; loose tol.
    assert max_err < 5e-2, f"kernel deviates from f32 reference: {max_err}"
    print("KERNEL_OK")
</pallas_src>

<mosaic_0001>
module attributes {stable_mosaic.version = 11 : i64} {
  func.func @_features_kernel(%arg0: i32, %arg1: memref<8x20x64xf32, #tpu.memory_space<vmem>>, %arg2: memref<128x1024xf32, #tpu.memory_space<vmem>>, %arg3: memref<1x256xf32, #tpu.memory_space<vmem>>, %arg4: memref<768x128xf32, #tpu.memory_space<vmem>>, %arg5: memref<1x64xf32, #tpu.memory_space<vmem>>, %arg6: memref<8x17x64xbf16, #tpu.memory_space<vmem>>) attributes {dimension_semantics = [#tpu.dimension_semantics<parallel>], iteration_bounds = array<i64: 1>, scalar_prefetch = 0 : i64, scratch_operands = 0 : i64, tpu.core_type = #tpu.core_type<tc>, window_params = [{transform_indices = @transform_0, window_bounds = array<i64: 8, 20, 64>}, {pipeline_mode = #tpu.pipeline_mode<synchronous>, transform_indices = @transform_1, window_bounds = array<i64: 128, 1024>}, {pipeline_mode = #tpu.pipeline_mode<synchronous>, transform_indices = @transform_2, window_bounds = array<i64: 1, 256>}, {pipeline_mode = #tpu.pipeline_mode<synchronous>, transform_indices = @transform_3, window_bounds = array<i64: 768, 128>}, {pipeline_mode = #tpu.pipeline_mode<synchronous>, transform_indices = @transform_4, window_bounds = array<i64: 1, 64>}, {transform_indices = @transform_5, window_bounds = array<i64: 8, 17, 64>}]} {
    %c0 = arith.constant 0 : index
    %c0_0 = arith.constant 0 : index
    %c0_1 = arith.constant 0 : index
    %0 = vector.load %arg1[%c0, %c0_0, %c0_1] : memref<8x20x64xf32, #tpu.memory_space<vmem>>, vector<8x20x64xf32>
    %1 = vector.extract_strided_slice %0 {offsets = [0, 0, 0], sizes = [1, 19, 64], strides = [1, 1, 1]} : vector<8x20x64xf32> to vector<1x19x64xf32>
    %2 = vector.shape_cast %1 : vector<1x19x64xf32> to vector<19x64xf32>
    %3 = vector.extract_strided_slice %0 {offsets = [1, 0, 0], sizes = [1, 19, 64], strides = [1, 1, 1]} : vector<8x20x64xf32> to vector<1x19x64xf32>
    %4 = vector.shape_cast %3 : vector<1x19x64xf32> to vector<19x64xf32>
    %5 = vector.extract_strided_slice %0 {offsets = [2, 0, 0], sizes = [1, 19, 64], strides = [1, 1, 1]} : vector<8x20x64xf32> to vector<1x19x64xf32>
    %6 = vector.shape_cast %5 : vector<1x19x64xf32> to vector<19x64xf32>
    %7 = vector.extract_strided_slice %0 {offsets = [3, 0, 0], sizes = [1, 19, 64], strides = [1, 1, 1]} : vector<8x20x64xf32> to vector<1x19x64xf32>
    %8 = vector.shape_cast %7 : vector<1x19x64xf32> to vector<19x64xf32>
    %9 = vector.extract_strided_slice %0 {offsets = [4, 0, 0], sizes = [1, 19, 64], strides = [1, 1, 1]} : vector<8x20x64xf32> to vector<1x19x64xf32>
    %10 = vector.shape_cast %9 : vector<1x19x64xf32> to vector<19x64xf32>
    %11 = vector.extract_strided_slice %0 {offsets = [5, 0, 0], sizes = [1, 19, 64], strides = [1, 1, 1]} : vector<8x20x64xf32> to vector<1x19x64xf32>
    %12 = vector.shape_cast %11 : vector<1x19x64xf32> to vector<19x64xf32>
    %13 = vector.extract_strided_slice %0 {offsets = [6, 0, 0], sizes = [1, 19, 64], strides = [1, 1, 1]} : vector<8x20x64xf32> to vector<1x19x64xf32>
    %14 = vector.shape_cast %13 : vector<1x19x64xf32> to vector<19x64xf32>
    %15 = vector.extract_strided_slice %0 {offsets = [7, 0, 0], sizes = [1, 19, 64], strides = [1, 1, 1]} : vector<8x20x64xf32> to vector<1x19x64xf32>
    %16 = vector.shape_cast %15 : vector<1x19x64xf32> to vector<19x64xf32>
    %17 = tpu.concatenate %2, %4, %6, %8, %10, %12, %14, %16 in 0 : vector<19x64xf32>, vector<19x64xf32>, vector<19x64xf32>, vector<19x64xf32>, vector<19x64xf32>, vector<19x64xf32>, vector<19x64xf32>, vector<19x64xf32> -> vector<152x64xf32>
    %18 = vector.extract_strided_slice %0 {offsets = [0, 1, 0], sizes = [1, 19, 64], strides = [1, 1, 1]} : vector<8x20x64xf32> to vector<1x19x64xf32>
    %19 = vector.shape_cast %18 : vector<1x19x64xf32> to vector<19x64xf32>
    %20 = vector.extract_strided_slice %0 {offsets = [1, 1, 0], sizes = [1, 19, 64], strides = [1, 1, 1]} : vector<8x20x64xf32> to vector<1x19x64xf32>
    %21 = vector.shape_cast %20 : vector<1x19x64xf32> to vector<19x64xf32>
    %22 = vector.extract_strided_slice %0 {offsets = [2, 1, 0], sizes = [1, 19, 64], strides = [1, 1, 1]} : vector<8x20x64xf32> to vector<1x19x64xf32>
    %23 = vector.shape_cast %22 : vector<1x19x64xf32> to vector<19x64xf32>
    %24 = vector.extract_strided_slice %0 {offsets = [3, 1, 0], sizes = [1, 19, 64], strides = [1, 1, 1]} : vector<8x20x64xf32> to vector<1x19x64xf32>
    %25 = vector.shape_cast %24 : vector<1x19x64xf32> to vector<19x64xf32>
    %26 = vector.extract_strided_slice %0 {offsets = [4, 1, 0], sizes = [1, 19, 64], strides = [1, 1, 1]} : vector<8x20x64xf32> to vector<1x19x64xf32>
    %27 = vector.shape_cast %26 : vector<1x19x64xf32> to vector<19x64xf32>
    %28 = vector.extract_strided_slice %0 {offsets = [5, 1, 0], sizes = [1, 19, 64], strides = [1, 1, 1]} : vector<8x20x64xf32> to vector<1x19x64xf32>
    %29 = vector.shape_cast %28 : vector<1x19x64xf32> to vector<19x64xf32>
    %30 = vector.extract_strided_slice %0 {offsets = [6, 1, 0], sizes = [1, 19, 64], strides = [1, 1, 1]} : vector<8x20x64xf32> to vector<1x19x64xf32>
    %31 = vector.shape_cast %30 : vector<1x19x64xf32> to vector<19x64xf32>
    %32 = vector.extract_strided_slice %0 {offsets = [7, 1, 0], sizes = [1, 19, 64], strides = [1, 1, 1]} : vector<8x20x64xf32> to vector<1x19x64xf32>
    %33 = vector.shape_cast %32 : vector<1x19x64xf32> to vector<19x64xf32>
    %34 = tpu.concatenate %19, %21, %23, %25, %27, %29, %31, %33 in 0 : vector<19x64xf32>, vector<19x64xf32>, vector<19x64xf32>, vector<19x64xf32>, vector<19x64xf32>, vector<19x64xf32>, vector<19x64xf32>, vector<19x64xf32> -> vector<152x64xf32>
    %c0_2 = arith.constant 0 : index
    %c0_3 = arith.constant 0 : index
    %35 = vector.load %arg2[%c0_2, %c0_3] : memref<128x1024xf32, #tpu.memory_space<vmem>>, vector<64x1024xf32>
    %cst = arith.constant dense<0.000000e+00> : vector<152x1024xf32>
    %36 = tpu.matmul %17, %35, %cst {dimension_numbers = #tpu.dot_dimension_numbers<[1], [0], [0], [1], [0, 0, 1, 1], [], []>} : vector<152x64xf32>, vector<64x1024xf32>, vector<152x1024xf32> -> vector<152x1024xf32>
    %c64 = arith.constant 64 : index
    %c0_4 = arith.constant 0 : index
    %37 = vector.load %arg2[%c64, %c0_4] : memref<128x1024xf32, #tpu.memory_space<vmem>>, vector<64x1024xf32>
    %cst_5 = arith.constant dense<0.000000e+00> : vector<152x1024xf32>
    %38 = tpu.matmul %34, %37, %cst_5 {dimension_numbers = #tpu.dot_dimension_numbers<[1], [0], [0], [1], [0, 0, 1, 1], [], []>} : vector<152x64xf32>, vector<64x1024xf32>, vector<152x1024xf32> -> vector<152x1024xf32>
    %39 = arith.addf %36, %38 : vector<152x1024xf32>
    %40 = vector.extract_strided_slice %39 {offsets = [0, 0], sizes = [152, 256], strides = [1, 1]} : vector<152x1024xf32> to vector<152x256xf32>
    %41 = vector.extract_strided_slice %39 {offsets = [0, 256], sizes = [152, 256], strides = [1, 1]} : vector<152x1024xf32> to vector<152x256xf32>
    %42 = arith.maximumf %40, %41 : vector<152x256xf32>
    %43 = vector.extract_strided_slice %39 {offsets = [0, 512], sizes = [152, 256], strides = [1, 1]} : vector<152x1024xf32> to vector<152x256xf32>
    %44 = vector.extract_strided_slice %39 {offsets = [0, 768], sizes = [152, 256], strides = [1, 1]} : vector<152x1024xf32> to vector<152x256xf32>
    %45 = arith.maximumf %43, %44 : vector<152x256xf32>
    %c0_6 = arith.constant 0 : index
    %c0_7 = arith.constant 0 : index
    %46 = vector.load %arg3[%c0_6, %c0_7] : memref<1x256xf32, #tpu.memory_space<vmem>>, vector<1x256xf32>
    %47 = vector.broadcast %46 : vector<1x256xf32> to vector<152x256xf32>
    %48 = arith.addf %42, %47 : vector<152x256xf32>
    %cst_8 = arith.constant 0.000000e+00 : f32
    %49 = vector.broadcast %cst_8 : f32 to vector<152x256xf32>
    %50 = arith.maximumf %48, %49 : vector<152x256xf32>
    %51 = vector.broadcast %46 : vector<1x256xf32> to vector<152x256xf32>
    %52 = arith.addf %45, %51 : vector<152x256xf32>
    %cst_9 = arith.constant 0.000000e+00 : f32
    %53 = vector.broadcast %cst_9 : f32 to vector<152x256xf32>
    %54 = arith.maximumf %52, %53 : vector<152x256xf32>
    %55 = vector.extract_strided_slice %50 {offsets = [0, 0], sizes = [152, 128], strides = [1, 1]} : vector<152x256xf32> to vector<152x128xf32>
    %56 = vector.extract_strided_slice %50 {offsets = [0, 128], sizes = [152, 128], strides = [1, 1]} : vector<152x256xf32> to vector<152x128xf32>
    %57 = arith.maximumf %55, %56 : vector<152x128xf32>
    %58 = vector.extract_strided_slice %54 {offsets = [0, 0], sizes = [152, 128], strides = [1, 1]} : vector<152x256xf32> to vector<152x128xf32>
    %59 = vector.extract_strided_slice %54 {offsets = [0, 128], sizes = [152, 128], strides = [1, 1]} : vector<152x256xf32> to vector<152x128xf32>
    %60 = arith.maximumf %58, %59 : vector<152x128xf32>
    %61 = tpu.concatenate %57, %60 in 1 : vector<152x128xf32>, vector<152x128xf32> -> vector<152x256xf32>
    %62 = vector.extract_strided_slice %61 {offsets = [0, 0], sizes = [17, 256], strides = [1, 1]} : vector<152x256xf32> to vector<17x256xf32>
    %63 = vector.extract_strided_slice %61 {offsets = [1, 0], sizes = [17, 256], strides = [1, 1]} : vector<152x256xf32> to vector<17x256xf32>
    %64 = vector.extract_strided_slice %61 {offsets = [2, 0], sizes = [17, 256], strides = [1, 1]} : vector<152x256xf32> to vector<17x256xf32>
    %65 = tpu.concatenate %62, %63, %64 in 1 : vector<17x256xf32>, vector<17x256xf32>, vector<17x256xf32> -> vector<17x768xf32>
    %66 = vector.extract_strided_slice %61 {offsets = [19, 0], sizes = [17, 256], strides = [1, 1]} : vector<152x256xf32> to vector<17x256xf32>
    %67 = vector.extract_strided_slice %61 {offsets = [20, 0], sizes = [17, 256], strides = [1, 1]} : vector<152x256xf32> to vector<17x256xf32>
    %68 = vector.extract_strided_slice %61 {offsets = [21, 0], sizes = [17, 256], strides = [1, 1]} : vector<152x256xf32> to vector<17x256xf32>
    %69 = tpu.concatenate %66, %67, %68 in 1 : vector<17x256xf32>, vector<17x256xf32>, vector<17x256xf32> -> vector<17x768xf32>
    %70 = vector.extract_strided_slice %61 {offsets = [38, 0], sizes = [17, 256], strides = [1, 1]} : vector<152x256xf32> to vector<17x256xf32>
    %71 = vector.extract_strided_slice %61 {offsets = [39, 0], sizes = [17, 256], strides = [1, 1]} : vector<152x256xf32> to vector<17x256xf32>
    %72 = vector.extract_strided_slice %61 {offsets = [40, 0], sizes = [17, 256], strides = [1, 1]} : vector<152x256xf32> to vector<17x256xf32>
    %73 = tpu.concatenate %70, %71, %72 in 1 : vector<17x256xf32>, vector<17x256xf32>, vector<17x256xf32> -> vector<17x768xf32>
    %74 = vector.extract_strided_slice %61 {offsets = [57, 0], sizes = [17, 256], strides = [1, 1]} : vector<152x256xf32> to vector<17x256xf32>
    %75 = vector.extract_strided_slice %61 {offsets = [58, 0], sizes = [17, 256], strides = [1, 1]} : vector<152x256xf32> to vector<17x256xf32>
    %76 = vector.extract_strided_slice %61 {offsets = [59, 0], sizes = [17, 256], strides = [1, 1]} : vector<152x256xf32> to vector<17x256xf32>
    %77 = tpu.concatenate %74, %75, %76 in 1 : vector<17x256xf32>, vector<17x256xf32>, vector<17x256xf32> -> vector<17x768xf32>
    %78 = vector.extract_strided_slice %61 {offsets = [76, 0], sizes = [17, 256], strides = [1, 1]} : vector<152x256xf32> to vector<17x256xf32>
    %79 = vector.extract_strided_slice %61 {offsets = [77, 0], sizes = [17, 256], strides = [1, 1]} : vector<152x256xf32> to vector<17x256xf32>
    %80 = vector.extract_strided_slice %61 {offsets = [78, 0], sizes = [17, 256], strides = [1, 1]} : vector<152x256xf32> to vector<17x256xf32>
    %81 = tpu.concatenate %78, %79, %80 in 1 : vector<17x256xf32>, vector<17x256xf32>, vector<17x256xf32> -> vector<17x768xf32>
    %82 = vector.extract_strided_slice %61 {offsets = [95, 0], sizes = [17, 256], strides = [1, 1]} : vector<152x256xf32> to vector<17x256xf32>
    %83 = vector.extract_strided_slice %61 {offsets = [96, 0], sizes = [17, 256], strides = [1, 1]} : vector<152x256xf32> to vector<17x256xf32>
    %84 = vector.extract_strided_slice %61 {offsets = [97, 0], sizes = [17, 256], strides = [1, 1]} : vector<152x256xf32> to vector<17x256xf32>
    %85 = tpu.concatenate %82, %83, %84 in 1 : vector<17x256xf32>, vector<17x256xf32>, vector<17x256xf32> -> vector<17x768xf32>
    %86 = vector.extract_strided_slice %61 {offsets = [114, 0], sizes = [17, 256], strides = [1, 1]} : vector<152x256xf32> to vector<17x256xf32>
    %87 = vector.extract_strided_slice %61 {offsets = [115, 0], sizes = [17, 256], strides = [1, 1]} : vector<152x256xf32> to vector<17x256xf32>
    %88 = vector.extract_strided_slice %61 {offsets = [116, 0], sizes = [17, 256], strides = [1, 1]} : vector<152x256xf32> to vector<17x256xf32>
    %89 = tpu.concatenate %86, %87, %88 in 1 : vector<17x256xf32>, vector<17x256xf32>, vector<17x256xf32> -> vector<17x768xf32>
    %90 = vector.extract_strided_slice %61 {offsets = [133, 0], sizes = [17, 256], strides = [1, 1]} : vector<152x256xf32> to vector<17x256xf32>
    %91 = vector.extract_strided_slice %61 {offsets = [134, 0], sizes = [17, 256], strides = [1, 1]} : vector<152x256xf32> to vector<17x256xf32>
    %92 = vector.extract_strided_slice %61 {offsets = [135, 0], sizes = [17, 256], strides = [1, 1]} : vector<152x256xf32> to vector<17x256xf32>
    %93 = tpu.concatenate %90, %91, %92 in 1 : vector<17x256xf32>, vector<17x256xf32>, vector<17x256xf32> -> vector<17x768xf32>
    %94 = tpu.concatenate %65, %69, %73, %77, %81, %85, %89, %93 in 0 : vector<17x768xf32>, vector<17x768xf32>, vector<17x768xf32>, vector<17x768xf32>, vector<17x768xf32>, vector<17x768xf32>, vector<17x768xf32>, vector<17x768xf32> -> vector<136x768xf32>
    %c0_10 = arith.constant 0 : index
    %c0_11 = arith.constant 0 : index
    %95 = vector.load %arg4[%c0_10, %c0_11] : memref<768x128xf32, #tpu.memory_space<vmem>>, vector<768x128xf32>
    %cst_12 = arith.constant dense<0.000000e+00> : vector<136x128xf32>
    %96 = tpu.matmul %94, %95, %cst_12 {dimension_numbers = #tpu.dot_dimension_numbers<[1], [0], [0], [1], [0, 0, 1, 1], [], []>} : vector<136x768xf32>, vector<768x128xf32>, vector<136x128xf32> -> vector<136x128xf32>
    %97 = vector.extract_strided_slice %96 {offsets = [0, 0], sizes = [136, 64], strides = [1, 1]} : vector<136x128xf32> to vector<136x64xf32>
    %98 = vector.extract_strided_slice %96 {offsets = [0, 64], sizes = [136, 64], strides = [1, 1]} : vector<136x128xf32> to vector<136x64xf32>
    %99 = arith.maximumf %97, %98 : vector<136x64xf32>
    %c0_13 = arith.constant 0 : index
    %c0_14 = arith.constant 0 : index
    %100 = vector.load %arg5[%c0_13, %c0_14] : memref<1x64xf32, #tpu.memory_space<vmem>>, vector<1x64xf32>
    %101 = vector.broadcast %100 : vector<1x64xf32> to vector<136x64xf32>
    %102 = arith.addf %99, %101 : vector<136x64xf32>
    %cst_15 = arith.constant 0.000000e+00 : f32
    %103 = vector.broadcast %cst_15 : f32 to vector<136x64xf32>
    %104 = arith.maximumf %102, %103 : vector<136x64xf32>
    %105 = arith.truncf %104 : vector<136x64xf32> to vector<136x64xbf16>
    %106 = vector.extract_strided_slice %105 {offsets = [0, 0], sizes = [17, 64], strides = [1, 1]} : vector<136x64xbf16> to vector<17x64xbf16>
    %c0_16 = arith.constant 0 : index
    %c0_17 = arith.constant 0 : index
    %c0_18 = arith.constant 0 : index
    %107 = vector.load %arg6[%c0_16, %c0_17, %c0_18] : memref<8x17x64xbf16, #tpu.memory_space<vmem>>, vector<1x17x64xbf16>
    %108 = vector.shape_cast %107 : vector<1x17x64xbf16> to vector<17x64xbf16>
    %109 = vector.shape_cast %106 : vector<17x64xbf16> to vector<1x17x64xbf16>
    tpu.vector_store %arg6[%c0_16, %c0_17, %c0_18], %109 {strides = array<i32>} : memref<8x17x64xbf16, #tpu.memory_space<vmem>>, vector<1x17x64xbf16>,
    %110 = vector.extract_strided_slice %105 {offsets = [17, 0], sizes = [17, 64], strides = [1, 1]} : vector<136x64xbf16> to vector<17x64xbf16>
    %c1 = arith.constant 1 : index
    %c0_19 = arith.constant 0 : index
    %c0_20 = arith.constant 0 : index
    %111 = vector.load %arg6[%c1, %c0_19, %c0_20] : memref<8x17x64xbf16, #tpu.memory_space<vmem>>, vector<1x17x64xbf16>
    %112 = vector.shape_cast %111 : vector<1x17x64xbf16> to vector<17x64xbf16>
    %113 = vector.shape_cast %110 : vector<17x64xbf16> to vector<1x17x64xbf16>
    tpu.vector_store %arg6[%c1, %c0_19, %c0_20], %113 {strides = array<i32>} : memref<8x17x64xbf16, #tpu.memory_space<vmem>>, vector<1x17x64xbf16>,
    %114 = vector.extract_strided_slice %105 {offsets = [34, 0], sizes = [17, 64], strides = [1, 1]} : vector<136x64xbf16> to vector<17x64xbf16>
    %c2 = arith.constant 2 : index
    %c0_21 = arith.constant 0 : index
    %c0_22 = arith.constant 0 : index
    %115 = vector.load %arg6[%c2, %c0_21, %c0_22] : memref<8x17x64xbf16, #tpu.memory_space<vmem>>, vector<1x17x64xbf16>
    %116 = vector.shape_cast %115 : vector<1x17x64xbf16> to vector<17x64xbf16>
    %117 = vector.shape_cast %114 : vector<17x64xbf16> to vector<1x17x64xbf16>
    tpu.vector_store %arg6[%c2, %c0_21, %c0_22], %117 {strides = array<i32>} : memref<8x17x64xbf16, #tpu.memory_space<vmem>>, vector<1x17x64xbf16>,
    %118 = vector.extract_strided_slice %105 {offsets = [51, 0], sizes = [17, 64], strides = [1, 1]} : vector<136x64xbf16> to vector<17x64xbf16>
    %c3 = arith.constant 3 : index
    %c0_23 = arith.constant 0 : index
    %c0_24 = arith.constant 0 : index
    %119 = vector.load %arg6[%c3, %c0_23, %c0_24] : memref<8x17x64xbf16, #tpu.memory_space<vmem>>, vector<1x17x64xbf16>
    %120 = vector.shape_cast %119 : vector<1x17x64xbf16> to vector<17x64xbf16>
    %121 = vector.shape_cast %118 : vector<17x64xbf16> to vector<1x17x64xbf16>
    tpu.vector_store %arg6[%c3, %c0_23, %c0_24], %121 {strides = array<i32>} : memref<8x17x64xbf16, #tpu.memory_space<vmem>>, vector<1x17x64xbf16>,
    %122 = vector.extract_strided_slice %105 {offsets = [68, 0], sizes = [17, 64], strides = [1, 1]} : vector<136x64xbf16> to vector<17x64xbf16>
    %c4 = arith.constant 4 : index
    %c0_25 = arith.constant 0 : index
    %c0_26 = arith.constant 0 : index
    %123 = vector.load %arg6[%c4, %c0_25, %c0_26] : memref<8x17x64xbf16, #tpu.memory_space<vmem>>, vector<1x17x64xbf16>
    %124 = vector.shape_cast %123 : vector<1x17x64xbf16> to vector<17x64xbf16>
    %125 = vector.shape_cast %122 : vector<17x64xbf16> to vector<1x17x64xbf16>
    tpu.vector_store %arg6[%c4, %c0_25, %c0_26], %125 {strides = array<i32>} : memref<8x17x64xbf16, #tpu.memory_space<vmem>>, vector<1x17x64xbf16>,
    %126 = vector.extract_strided_slice %105 {offsets = [85, 0], sizes = [17, 64], strides = [1, 1]} : vector<136x64xbf16> to vector<17x64xbf16>
    %c5 = arith.constant 5 : index
    %c0_27 = arith.constant 0 : index
    %c0_28 = arith.constant 0 : index
    %127 = vector.load %arg6[%c5, %c0_27, %c0_28] : memref<8x17x64xbf16, #tpu.memory_space<vmem>>, vector<1x17x64xbf16>
    %128 = vector.shape_cast %127 : vector<1x17x64xbf16> to vector<17x64xbf16>
    %129 = vector.shape_cast %126 : vector<17x64xbf16> to vector<1x17x64xbf16>
    tpu.vector_store %arg6[%c5, %c0_27, %c0_28], %129 {strides = array<i32>} : memref<8x17x64xbf16, #tpu.memory_space<vmem>>, vector<1x17x64xbf16>,
    %130 = vector.extract_strided_slice %105 {offsets = [102, 0], sizes = [17, 64], strides = [1, 1]} : vector<136x64xbf16> to vector<17x64xbf16>
    %c6 = arith.constant 6 : index
    %c0_29 = arith.constant 0 : index
    %c0_30 = arith.constant 0 : index
    %131 = vector.load %arg6[%c6, %c0_29, %c0_30] : memref<8x17x64xbf16, #tpu.memory_space<vmem>>, vector<1x17x64xbf16>
    %132 = vector.shape_cast %131 : vector<1x17x64xbf16> to vector<17x64xbf16>
    %133 = vector.shape_cast %130 : vector<17x64xbf16> to vector<1x17x64xbf16>
    tpu.vector_store %arg6[%c6, %c0_29, %c0_30], %133 {strides = array<i32>} : memref<8x17x64xbf16, #tpu.memory_space<vmem>>, vector<1x17x64xbf16>,
    %134 = vector.extract_strided_slice %105 {offsets = [119, 0], sizes = [17, 64], strides = [1, 1]} : vector<136x64xbf16> to vector<17x64xbf16>
    %c7 = arith.constant 7 : index
    %c0_31 = arith.constant 0 : index
    %c0_32 = arith.constant 0 : index
    %135 = vector.load %arg6[%c7, %c0_31, %c0_32] : memref<8x17x64xbf16, #tpu.memory_space<vmem>>, vector<1x17x64xbf16>
    %136 = vector.shape_cast %135 : vector<1x17x64xbf16> to vector<17x64xbf16>
    %137 = vector.shape_cast %134 : vector<17x64xbf16> to vector<1x17x64xbf16>
    tpu.vector_store %arg6[%c7, %c0_31, %c0_32], %137 {strides = array<i32>} : memref<8x17x64xbf16, #tpu.memory_space<vmem>>, vector<1x17x64xbf16>,
    return
  }
  func.func @transform_0(%arg0: i32) -> (i32, i32, i32) {
    %c0_i32 = arith.constant 0 : i32
    %c0_i32_0 = arith.constant 0 : i32
    %c0_i32_1 = arith.constant 0 : i32
    return %arg0, %c0_i32, %c0_i32_0 : i32, i32, i32
  }
  func.func @transform_1(%arg0: i32) -> (i32, i32) {
    %c0_i32 = arith.constant 0 : i32
    %c0_i32_0 = arith.constant 0 : i32
    %c0_i32_1 = arith.constant 0 : i32
    return %c0_i32, %c0_i32_0 : i32, i32
  }
  func.func @transform_2(%arg0: i32) -> (i32, i32) {
    %c0_i32 = arith.constant 0 : i32
    %c0_i32_0 = arith.constant 0 : i32
    %c0_i32_1 = arith.constant 0 : i32
    return %c0_i32, %c0_i32_0 : i32, i32
  }
  func.func @transform_3(%arg0: i32) -> (i32, i32) {
    %c0_i32 = arith.constant 0 : i32
    %c0_i32_0 = arith.constant 0 : i32
    %c0_i32_1 = arith.constant 0 : i32
    return %c0_i32, %c0_i32_0 : i32, i32
  }
  func.func @transform_4(%arg0: i32) -> (i32, i32) {
    %c0_i32 = arith.constant 0 : i32
    %c0_i32_0 = arith.constant 0 : i32
    %c0_i32_1 = arith.constant 0 : i32
    return %c0_i32, %c0_i32_0 : i32, i32
  }
  func.func @transform_5(%arg0: i32) -> (i32, i32, i32) {
    %c0_i32 = arith.constant 0 : i32
    %c0_i32_0 = arith.constant 0 : i32
    %c0_i32_1 = arith.constant 0 : i32
    return %arg0, %c0_i32, %c0_i32_0 : i32, i32, i32
  }
}

module attributes {stable_mosaic.version = 11 : i64} {
  func.func @_dense_acc_kernel(%arg0: i32, %arg1: i32, %arg2: memref<8x1088xbf16, #tpu.memory_space<vmem>>, %arg3: memref<1088x1280xbf16, #tpu.memory_space<vmem>>, %arg4: memref<1x1280xf32, #tpu.memory_space<vmem>>, %arg5: memref<1280x8xf32, #tpu.memory_space<vmem>>, %arg6: memref<1x8xf32, #tpu.memory_space<vmem>>, %arg7: memref<8x8xf32, #tpu.memory_space<vmem>>) attributes {dimension_semantics = [#tpu.dimension_semantics<parallel>, #tpu.dimension_semantics<arbitrary>], iteration_bounds = array<i64: 1, 2>, scalar_prefetch = 0 : i64, scratch_operands = 0 : i64, tpu.core_type = #tpu.core_type<tc>, window_params = [{transform_indices = @transform_0, window_bounds = array<i64: 8, 1088>}, {transform_indices = @transform_1, window_bounds = array<i64: 1088, 1280>}, {transform_indices = @transform_2, window_bounds = array<i64: 1, 1280>}, {transform_indices = @transform_3, window_bounds = array<i64: 1280, 8>}, {pipeline_mode = #tpu.pipeline_mode<synchronous>, transform_indices = @transform_4, window_bounds = array<i64: 1, 8>}, {transform_indices = @transform_5, window_bounds = array<i64: 8, 8>}]} {
    %c0 = arith.constant 0 : index
    %c0_0 = arith.constant 0 : index
    %0 = vector.load %arg2[%c0, %c0_0] : memref<8x1088xbf16, #tpu.memory_space<vmem>>, vector<8x1088xbf16>
    %c0_1 = arith.constant 0 : index
    %c0_2 = arith.constant 0 : index
    %1 = vector.load %arg3[%c0_1, %c0_2] : memref<1088x1280xbf16, #tpu.memory_space<vmem>>, vector<1088x1280xbf16>
    %cst = arith.constant dense<0.000000e+00> : vector<8x1280xf32>
    %2 = tpu.matmul %0, %1, %cst {dimension_numbers = #tpu.dot_dimension_numbers<[1], [0], [0], [1], [0, 0, 1, 1], [], []>} : vector<8x1088xbf16>, vector<1088x1280xbf16>, vector<8x1280xf32> -> vector<8x1280xf32>
    %c0_3 = arith.constant 0 : index
    %c0_4 = arith.constant 0 : index
    %3 = vector.load %arg4[%c0_3, %c0_4] : memref<1x1280xf32, #tpu.memory_space<vmem>>, vector<1x1280xf32>
    %4 = vector.broadcast %3 : vector<1x1280xf32> to vector<8x1280xf32>
    %5 = arith.addf %2, %4 : vector<8x1280xf32>
    %cst_5 = arith.constant 0.000000e+00 : f32
    %6 = vector.broadcast %cst_5 : f32 to vector<8x1280xf32>
    %7 = arith.maximumf %5, %6 : vector<8x1280xf32>
    %c0_6 = arith.constant 0 : index
    %c0_7 = arith.constant 0 : index
    %8 = vector.load %arg5[%c0_6, %c0_7] : memref<1280x8xf32, #tpu.memory_space<vmem>>, vector<1280x8xf32>
    %cst_8 = arith.constant dense<0.000000e+00> : vector<8x8xf32>
    %9 = tpu.matmul %7, %8, %cst_8 {dimension_numbers = #tpu.dot_dimension_numbers<[1], [0], [0], [1], [0, 0, 1, 1], [], []>} : vector<8x1280xf32>, vector<1280x8xf32>, vector<8x8xf32> -> vector<8x8xf32>
    %c0_i32 = arith.constant 0 : i32
    %10 = arith.cmpi eq, %arg1, %c0_i32 : i32
    %11 = arith.extui %10 : i1 to i32
    %c0_i32_9 = arith.constant 0 : i32
    %12 = arith.cmpi ne, %11, %c0_i32_9 : i32
    scf.if %12 {
      %c0_12 = arith.constant 0 : index
      %c0_13 = arith.constant 0 : index
      %16 = vector.load %arg6[%c0_12, %c0_13] : memref<1x8xf32, #tpu.memory_space<vmem>>, vector<1x8xf32>
      %17 = vector.broadcast %16 : vector<1x8xf32> to vector<8x8xf32>
      %18 = arith.addf %9, %17 : vector<8x8xf32>
      %c0_14 = arith.constant 0 : index
      %c0_15 = arith.constant 0 : index
      %19 = vector.load %arg7[%c0_14, %c0_15] : memref<8x8xf32, #tpu.memory_space<vmem>>, vector<8x8xf32>
      tpu.vector_store %arg7[%c0_14, %c0_15], %18 {strides = array<i32>} : memref<8x8xf32, #tpu.memory_space<vmem>>, vector<8x8xf32>,
    } else {
    }
    %c0_i32_10 = arith.constant 0 : i32
    %13 = arith.cmpi ne, %arg1, %c0_i32_10 : i32
    %14 = arith.extui %13 : i1 to i32
    %c0_i32_11 = arith.constant 0 : i32
    %15 = arith.cmpi ne, %14, %c0_i32_11 : i32
    scf.if %15 {
      %c0_12 = arith.constant 0 : index
      %c0_13 = arith.constant 0 : index
      %16 = vector.load %arg7[%c0_12, %c0_13] : memref<8x8xf32, #tpu.memory_space<vmem>>, vector<8x8xf32>
      %17 = arith.addf %16, %9 : vector<8x8xf32>
      %c0_14 = arith.constant 0 : index
      %c0_15 = arith.constant 0 : index
      %18 = vector.load %arg7[%c0_14, %c0_15] : memref<8x8xf32, #tpu.memory_space<vmem>>, vector<8x8xf32>
      tpu.vector_store %arg7[%c0_14, %c0_15], %17 {strides = array<i32>} : memref<8x8xf32, #tpu.memory_space<vmem>>, vector<8x8xf32>,
    } else {
    }
    return
  }
  func.func @transform_0(%arg0: i32, %arg1: i32) -> (i32, i32) {
    %c0_i32 = arith.constant 0 : i32
    %c0_i32_0 = arith.constant 0 : i32
    return %arg0, %c0_i32 : i32, i32
  }
  func.func @transform_1(%arg0: i32, %arg1: i32) -> (i32, i32) {
    %c0_i32 = arith.constant 0 : i32
    %c0_i32_0 = arith.constant 0 : i32
    return %c0_i32, %arg1 : i32, i32
  }
  func.func @transform_2(%arg0: i32, %arg1: i32) -> (i32, i32) {
    %c0_i32 = arith.constant 0 : i32
    %c0_i32_0 = arith.constant 0 : i32
    return %c0_i32, %arg1 : i32, i32
  }
  func.func @transform_3(%arg0: i32, %arg1: i32) -> (i32, i32) {
    %c0_i32 = arith.constant 0 : i32
    %c0_i32_0 = arith.constant 0 : i32
    return %arg1, %c0_i32 : i32, i32
  }
  func.func @transform_4(%arg0: i32, %arg1: i32) -> (i32, i32) {
    %c0_i32 = arith.constant 0 : i32
    %c0_i32_0 = arith.constant 0 : i32
    %c0_i32_1 = arith.constant 0 : i32
    return %c0_i32, %c0_i32_0 : i32, i32
  }
  func.func @transform_5(%arg0: i32, %arg1: i32) -> (i32, i32) {
    %c0_i32 = arith.constant 0 : i32
    %c0_i32_0 = arith.constant 0 : i32
    return %arg0, %c0_i32 : i32, i32
  }
}

</mosaic_0001>

<bundles_post_ra>
// kernel: model_forward.2
= control target key start
LH: loop header
LB: loop body
LE: loop exit
PB: predicated region body
PF: predicated region fallthrough
CT: control target
= control target key end

     0   :  { %10 = vsyncpa [#allocation3], 0  ;;  %s7029_s0 = inlined_call_operand.vmem [shape: f32[8,20,64], index: 0, kind: input, shape index: {}]   ;;  %s7030_s1 = inlined_call_operand.hbm [shape: f32[128,1024], index: 1, kind: input, shape index: {}]   ;;  %s7031_s2 = inlined_call_operand.hbm [shape: f32[1,256], index: 2, kind: input, shape index: {}]   ;;  %s7032_s3 = inlined_call_operand.hbm [shape: f32[768,128], index: 3, kind: input, shape index: {}]   ;;  %s7033_s4 = inlined_call_operand.hbm [shape: f32[1,64], index: 4, kind: input, shape index: {}]   ;;  %s7034_s5 = inlined_call_operand.vmem [shape: bf16[8,17,64], index: 5, kind: output, shape index: {}]  }
   0x1   :  { %11 = vsyncpa [#allocation5], 0 }
   0x2   :  { %12 = vsyncpa [#allocation8], 0  ;;  %s4463_s18 = smov [#allocation4]   ;;  %s4464_s20 = smov [#allocation2]  }
   0x3   :  { %s33_s19 = sshll.u32 %s4463_s18, 4  ;;  %s20_s21 = sshll.u32 %s4464_s20, 4  ;;  %s34_s19 = int_to_ptr.vmem [resolvable:$true] %s33_s19  ;;  %s4503_s21 = int_to_ptr.vmem [resolvable:$true] %s20_s21 }
   0x4   :  { %s4369_s24 = scalar_lea.hbm %s7031_s2, 32 }
   0x5   :  { %p4370_p0 = scmp.ne.s32.totalorder %s7031_s2, %s4369_s24  ;;  %p4373_p1 = scmp.lt.u32.totalorder %s4369_s24, %s7031_s2 }
   0x7   :  { %p4375_p2 = pnand %p4373_p1, %p4370_p0 }
   0x9   :  { %4378 = shalt.err (!%p4375_p2)
}
   0xa   :  { %s4379_s29 = scalar_lea.vmem %s34_s19, 32  ;;  %p4384_p4 = scmp.lt.s32.totalorder %s34_s19, %s34_s19 }
   0xb   :  { %p4380_p3 = scmp.ne.s32.totalorder %s34_s19, %s4379_s29  ;;  %p4385_p5 = scmp.lt.s32.totalorder %s4379_s29, %s4379_s29 }
   0xd   :  { %p4386_p6 = por %p4385_p5, %p4384_p4 }
   0xf   :  { %p4387_p7 = pnand %p4386_p6, %p4380_p3 }
  0x11   :  { %4390 = shalt.err (!%p4387_p7)
}
  0x12   :  { %36 = dma.hbm_to_vmem [thread:$0]  %s7031_s2, 32, %s34_s19, [#allocation5]  }
  0x13   :  { %s4391_s9 = scalar_lea.hbm %s7030_s1, 16384 }
  0x14   :  { %p4392_p8 = scmp.ne.s32.totalorder %s7030_s1, %s4391_s9  ;;  %p4395_p9 = scmp.lt.u32.totalorder %s4391_s9, %s7030_s1 }
  0x16   :  { %p4397_p10 = pnand %p4395_p9, %p4392_p8 }
  0x18   :  { %4400 = shalt.err (!%p4397_p10)
}
  0x19   :  { %s4401_s14 = scalar_lea.vmem %s4503_s21, 16384  ;;  %p4406_p12 = scmp.lt.s32.totalorder %s4503_s21, %s4503_s21 }
  0x1a   :  { %p4402_p11 = scmp.ne.s32.totalorder %s4503_s21, %s4401_s14  ;;  %p4407_p13 = scmp.lt.s32.totalorder %s4401_s14, %s4401_s14 }
  0x1c   :  { %p4408_p0 = por %p4407_p13, %p4406_p12 }
  0x1e   :  { %p4409_p1 = pnand %p4408_p0, %p4402_p11 }
  0x20   :  { %4412 = shalt.err (!%p4409_p1)
}
  0x21   :  { %s4465_s2 = smov 1024   ;;  %s4466_s15 = smov 64  }
  0x22   :  { %26 = dma.hbm_to_vmem [thread:$0]  %s7030_s1, 16384, %s4503_s21, [#allocation3], %s4465_s2, %s4465_s2, %s4466_s15  }
  0x23   :  { %s4467_s18 = smov [#allocation6]   ;;  %s4413_s23 = scalar_lea.hbm %s7032_s3, 12288 }
  0x24   :  { %s42_s19 = sshll.u32 %s4467_s18, 4  ;;  %p4414_p2 = scmp.ne.s32.totalorder %s7032_s3, %s4413_s23  ;;  %s43_s19 = int_to_ptr.vmem [resolvable:$true] %s42_s19 }
  0x25   :  { %p4417_p3 = scmp.lt.u32.totalorder %s4413_s23, %s7032_s3 }
  0x27   :  { %p4419_p4 = pnand %p4417_p3, %p4414_p2 }
  0x29   :  { %4422 = shalt.err (!%p4419_p4)
}
  0x2a   :  { %s4423_s28 = scalar_lea.vmem %s43_s19, 12288  ;;  %p4428_p6 = scmp.lt.s32.totalorder %s43_s19, %s43_s19 }
  0x2b   :  { %p4424_p5 = scmp.ne.s32.totalorder %s43_s19, %s4423_s28  ;;  %p4429_p7 = scmp.lt.s32.totalorder %s4423_s28, %s4423_s28 }
  0x2d   :  { %p4430_p8 = por %p4429_p7, %p4428_p6 }
  0x2f   :  { %p4431_p9 = pnand %p4430_p8, %p4424_p5 }
  0x31   :  { %4434 = shalt.err (!%p4431_p9)
}
  0x32   :  { %s4468_s1 = smov 128   ;;  %s4469_s21 = smov 8  }
  0x33   :  { %48 = dma.hbm_to_vmem [thread:$0]  %s7032_s3, 12288, %s43_s19, [#allocation5], %s4468_s1, %s4468_s1, %s4469_s21  }
  0x34   :  { %s4470_s6 = smov [#allocation7]   ;;  %s4435_s10 = scalar_lea.hbm %s7033_s4, 16 }
  0x35   :  { %s55_s7 = sshll.u32 %s4470_s6, 4  ;;  %p4436_p10 = scmp.ne.s32.totalorder %s7033_s4, %s4435_s10  ;;  %s56_s7 = int_to_ptr.vmem [resolvable:$true] %s55_s7 }
  0x36   :  { %p4439_p11 = scmp.lt.u32.totalorder %s4435_s10, %s7033_s4 }
  0x38   :  { %p4441_p12 = pnand %p4439_p11, %p4436_p10 }
  0x3a   :  { %4444 = shalt.err (!%p4441_p12)
}
  0x3b   :  { %s4445_s2 = scalar_lea.vmem %s56_s7, 16  ;;  %s4449_s3 = scalar_lea.vmem %s56_s7, 32 }
  0x3c   :  { %p4446_p13 = scmp.ne.s32.totalorder %s56_s7, %s4445_s2  ;;  %p4450_p0 = scmp.lt.s32.totalorder %s56_s7, %s56_s7 }
  0x3d   :  { %p4451_p1 = scmp.lt.s32.totalorder %s4449_s3, %s4445_s2 }
  0x3f   :  { %p4452_p2 = por %p4451_p1, %p4450_p0 }
  0x41   :  { %p4453_p3 = pnand %p4452_p2, %p4446_p13 }
  0x43   :  { %4456 = shalt.err (!%p4453_p3)
}
  0x44   :  { %58 = dma.hbm_to_vmem [thread:$0]  %s7033_s4, 16, %s56_s7, [#allocation8]  }
  0x45   :  { %4457 = dma.done.wait [#allocation3], 16384  }
  0x46   :  { %4458 = vsyncadd [#allocation3], 4294950912 }
  0x47   :  { %4459 = dma.done.wait [#allocation5], 12320  }
  0x48   :  { %4460 = vsyncadd [#allocation5], 4294954976 }
  0x49   :  { %4461 = dma.done.wait [#allocation8], 16  }
  0x4a   :  { %4462 = vsyncadd [#allocation8], 4294967280  ;;  %v4471_v0 = vmov 0.0   ;;  %v300_v1 = vld [vmem:[#allocation2 + $0x208] sm:$0xff]  ;;  %v299_v6 = vld [vmem:[#allocation2 + $0x200] sm:$0xff]  ;;  %vm142_vm0 = vcmask 1046528  }
  0x4b   :  { %473 = vmatprep.mubr.f32.mxu1 %v4471_v0  ;;  %831 = vmatprep.mubr.f32.mxu0 %v4471_v0  ;;  %v308_v2 = vld [vmem:[#allocation2 + $0x248] sm:$0xff]  ;;  %v307_v7 = vld [vmem:[#allocation2 + $0x240] sm:$0xff]  ;;  %v302_v49 = vld [vmem:[#allocation2 + $0x218] sm:$0xff]  ;;  %vm363_vm1 = vcmask 523264   ;;  %vm98_vm2 = vcmask 1042432   ;;  %vm153_vm3 = vcmask 1041408  }
  0x4c   :  { %v304_v3 = vld [vmem:[#allocation2 + $0x228] sm:$0xff]  ;;  %v3857_v4 = vpack.c.bf16 %v308_v2, %v300_v1  ;;  %v3859_v9 = vpack.c.bf16 %v307_v7, %v299_v6  ;;  %v303_v10 = vld [vmem:[#allocation2 + $0x220] sm:$0xff]  ;;  %v310_v50 = vld [vmem:[#allocation2 + $0x258] sm:$0xff]  ;;  %vm109_vm4 = vcmask 1045504   ;;  %vm164_vm5 = vcmask 1044480  }
  0x4d   :  { %v312_v5 = vld [vmem:[#allocation2 + $0x268] sm:$0xff]  ;;  %v311_v11 = vld [vmem:[#allocation2 + $0x260] sm:$0xff]  ;;  %v3873_v55 = vpack.c.bf16 %v310_v50, %v302_v49  ;;  %v301_v56 = vld [vmem:[#allocation2 + $0x210] sm:$0xff]  ;;  %vm120_vm6 = vcmask 1040384   ;;  %vm131_vm7 = vcmask 1043456   ;;  %vm3373_vm8 = vcmask 516096  }
  0x4e   :  { %v4561_v8 = vpack.c.bf16 %v312_v5, %v304_v3  ;;  %v316_v12 = vld [vmem:[#allocation2 + $0x288] sm:$0xff]  ;;  %3858 = vmatprep.subr.bf16.mxu1 %v3857_v4  ;;  %v4563_v13 = vpack.c.bf16 %v311_v11, %v303_v10  ;;  %v315_v19 = vld [vmem:[#allocation2 + $0x280] sm:$0xff]  ;;  %v309_v57 = vld [vmem:[#allocation2 + $0x250] sm:$0xff]  ;;  %vm3374_vm9 = vsmask.f32 256  ;;  %vm3370_vm13 = vcmask 519168  }
  0x4f   :  { %v324_v14 = vld [vmem:[#allocation2 + $0x2c8] sm:$0xff]  ;;  %3860 = vmatpush1.bf16.msra.mxu1 %v3859_v9  ;;  %v323_v20 = vld [vmem:[#allocation2 + $0x2c0] sm:$0xff]  ;;  %v4598_v58 = vld [vmem:[%s7029_s0 + $0x10] sm:$0xf]  ;;  %v3875_v62 = vpack.c.bf16 %v309_v57, %v301_v56  ;;  %vm3384_vm11 = vsmask.f32 3328 }
  0x50   :  { %v320_v15 = vld [vmem:[#allocation2 + $0x2a8] sm:$0xff]  ;;  %3890 = vmatprep.subr.bf16.mxu0 %v4561_v8  ;;  %v3861_v17 = vpack.c.bf16 %v324_v14, %v316_v12  ;;  %v319_v21 = vld [vmem:[#allocation2 + $0x2a0] sm:$0xff]  ;;  %v3863_v22 = vpack.c.bf16 %v323_v20, %v315_v19  ;;  %v318_v59 = vld [vmem:[#allocation2 + $0x298] sm:$0xff]  ;;  %v184_v63 = vrot.slane %v4598_v58, 1  ;;  %vm3385_vm12 = vsmask.f32 7440 }
  0x51   :  { %v328_v16 = vld [vmem:[#allocation2 + $0x2e8] sm:$0xff]  ;;  %3892 = vmatpush1.bf16.msra.mxu0 %v4563_v13  ;;  %v327_v23 = vld [vmem:[#allocation2 + $0x2e0] sm:$0xff]  ;;  %v326_v60 = vld [vmem:[#allocation2 + $0x2d8] sm:$0xff]  ;;  %vm3430_vm15 = vcmask 1046532  }
  0x52   :  { %v4566_v18 = vpack.c.bf16 %v328_v16, %v320_v15  ;;  %v332_v24 = vld [vmem:[#allocation2 + $0x308] sm:$0xff]  ;;  %3862 = vmatprep.subr.bf16.mxu1 %v3861_v17  ;;  %v4570_v26 = vpack.c.bf16 %v327_v23, %v319_v21  ;;  %v331_v30 = vld [vmem:[#allocation2 + $0x300] sm:$0xff]  ;;  %v4608_v1 = vld [vmem:[%s7029_s0 + $0x18] sm:$0xff]  ;;  %v3877_v5 = vpack.c.bf16 %v326_v60, %v318_v59 }
  0x53   :  { %v340_v25 = vld [vmem:[#allocation2 + $0x348] sm:$0xff]  ;;  %v339_v32 = vld [vmem:[#allocation2 + $0x340] sm:$0xff]  ;;  %3864 = vmatpush1.bf16.msra.mxu1 %v3863_v22  ;;  %v317_v2 = vld [vmem:[#allocation2 + $0x290] sm:$0xff]  ;;  %v187_v16 = vrot.slane %v4608_v1, 6 }
  0x54   :  { %3894 = vmatprep.subr.bf16.mxu0 %v4566_v18  ;;  %v3865_v27 = vpack.c.bf16 %v340_v25, %v332_v24  ;;  %v336_v28 = vld [vmem:[#allocation2 + $0x328] sm:$0xff]  ;;  %v335_v33 = vld [vmem:[#allocation2 + $0x320] sm:$0xff]  ;;  %v3867_v35 = vpack.c.bf16 %v339_v32, %v331_v30  ;;  %v325_v3 = vld [vmem:[#allocation2 + $0x2d0] sm:$0xff] }
  0x55   :  { %v344_v29 = vld [vmem:[#allocation2 + $0x368] sm:$0xff]  ;;  %v343_v34 = vld [vmem:[#allocation2 + $0x360] sm:$0xff]  ;;  %3896 = vmatpush1.bf16.msra.mxu0 %v4570_v26  ;;  %v334_v12 = vld [vmem:[#allocation2 + $0x318] sm:$0xff]  ;;  %v3879_v20 = vpack.c.bf16 %v325_v3, %v317_v2 }
  0x56   :  { %v4572_v31 = vpack.c.bf16 %v344_v29, %v336_v28  ;;  %v348_v36 = vld [vmem:[#allocation2 + $0x388] sm:$0xff]  ;;  %3866 = vmatprep.subr.bf16.mxu1 %v3865_v27  ;;  %v4575_v39 = vpack.c.bf16 %v343_v34, %v335_v33  ;;  %v347_v42 = vld [vmem:[#allocation2 + $0x380] sm:$0xff]  ;;  %v342_v14 = vld [vmem:[#allocation2 + $0x358] sm:$0xff]  ;;  %v4637_v34 = vsel %vm98_vm2, %v184_v63, %v187_v16 }
  0x57   :  { %v356_v37 = vld [vmem:[#allocation2 + $0x3c8] sm:$0xff]  ;;  %v355_v43 = vld [vmem:[#allocation2 + $0x3c0] sm:$0xff]  ;;  %3868 = vmatpush1.bf16.msra.mxu1 %v3867_v35  ;;  %v3881_v25 = vpack.c.bf16 %v342_v14, %v334_v12  ;;  %v333_v27 = vld [vmem:[#allocation2 + $0x310] sm:$0xff] }
  0x58   :  { %v352_v38 = vld [vmem:[#allocation2 + $0x3a8] sm:$0xff]  ;;  %v3869_v40 = vpack.c.bf16 %v356_v37, %v348_v36  ;;  %3898 = vmatprep.subr.bf16.mxu0 %v4572_v31  ;;  %v351_v45 = vld [vmem:[#allocation2 + $0x3a0] sm:$0xff]  ;;  %v3871_v51 = vpack.c.bf16 %v355_v43, %v347_v42  ;;  %v341_v28 = vld [vmem:[#allocation2 + $0x350] sm:$0xff] }
  0x59   :  { %v360_v41 = vld [vmem:[#allocation2 + $0x3e8] sm:$0xff]  ;;  %v359_v46 = vld [vmem:[#allocation2 + $0x3e0] sm:$0xff]  ;;  %3900 = vmatpush1.bf16.msra.mxu0 %v4575_v39  ;;  %v358_v49 = vld [vmem:[#allocation2 + $0x3d8] sm:$0xff] }
  0x5a   :  { %v4578_v44 = vpack.c.bf16 %v360_v41, %v352_v38  ;;  %v4583_v47 = vld [vmem:[%s7029_s0] sm:$0xff]  ;;  %v4588_v48 = vld [vmem:[%s7029_s0 + $0x8] sm:$0xff]  ;;  %3870 = vmatprep.subr.bf16.mxu1 %v3869_v40  ;;  %v4593_v54 = vpack.c.bf16 %v359_v46, %v351_v45  ;;  %v4644_v38 = vld [vmem:[%s7029_s0 + $0x30] sm:$0xff]  ;;  %v3883_v41 = vpack.c.bf16 %v341_v28, %v333_v27 }
  0x5b   :  { %v181_v52 = vrot.slane %v4583_v47, 1  ;;  %v182_v53 = vrot.slane %v4588_v48, 1  ;;  %3872 = vmatpush1.bf16.msra.mxu1 %v3871_v51  ;;  %v236_v4 = vld [vmem:[#allocation2 + $0x8] sm:$0xff]  ;;  %v235_v7 = vld [vmem:[#allocation2] sm:$0xff]  ;;  %v350_v46 = vld [vmem:[#allocation2 + $0x398] sm:$0xff]  ;;  %v194_v56 = vrot.slane %v4644_v38, 3 }
  0x5c   :  { %3902 = vmatprep.subr.bf16.mxu0 %v4578_v44  ;;  %3874 = vmatprep.subr.bf16.mxu1 %v3873_v55  ;;  %v244_v6 = vld [vmem:[#allocation2 + $0x48] sm:$0xff]  ;;  %v243_v9 = vld [vmem:[#allocation2 + $0x40] sm:$0xff]  ;;  %v3885_v51 = vpack.c.bf16 %v358_v49, %v350_v46  ;;  %vm6800_vm10 = vmand %vm3373_vm8, %vm3374_vm9  ;;  %vm3526_vm8 = vsmask.f32 5392 }
  0x5d   :  { %v4602_v61 = vsel %vm142_vm0, %v181_v52, %v182_v53  ;;  %3904 = vmatpush1.bf16.msra.mxu0 %v4593_v54  ;;  %v3921_v10 = vpack.c.bf16 %v244_v6, %v236_v4  ;;  %v3923_v11 = vpack.c.bf16 %v243_v9, %v235_v7  ;;  %v4616_v15 = vsel %vm142_vm0, %v182_v53, %v184_v63  ;;  %v4622_v17 = vld [vmem:[%s7029_s0 + $0x20] sm:$0xff]  ;;  %v252_v19 = vld [vmem:[#allocation2 + $0x88] sm:$0xff]  ;;  %v349_v52 = vld [vmem:[#allocation2 + $0x390] sm:$0xff] }
  0x5e   :  { %3637 = vmatmul.mubr.msk.f32.vlgmr.msra.gmra.mrb[0].mxu1 %vm363_vm1, %v4602_v61  ;;  %v260_v21 = vld [vmem:[#allocation2 + $0xc8] sm:$0xff]  ;;  %v251_v22 = vld [vmem:[#allocation2 + $0x80] sm:$0xff]  ;;  %v188_v35 = vrot.slane %v4622_v17, 6  ;;  %v357_v53 = vld [vmem:[#allocation2 + $0x3d0] sm:$0xff] }
  0x5f   :  { %3876 = vmatpush1.bf16.msra.mxu1 %v3875_v62  ;;  %479 = vmatprep.mubr.f32.mxu1 %v4471_v0  ;;  %v259_v23 = vld [vmem:[#allocation2 + $0xc0] sm:$0xff]  ;;  %v4629_v24 = vld [vmem:[%s7029_s0 + $0x28] sm:$0xf]  ;;  %v3925_v29 = vpack.c.bf16 %v260_v21, %v252_v19  ;;  %v4661_v62 = vld [vmem:[%s7029_s0 + $0x38] sm:$0xff]  ;;  %v3887_v2 = vpack.c.bf16 %v357_v53, %v349_v52 }
  0x60   :  { %3675 = vmatmul.mubr.msk.f32.vlgmr.msra.gmra.mrb[0].mxu0 %vm363_vm1, %v4602_v61  ;;  %3878 = vmatprep.subr.bf16.mxu1 %v3877_v5  ;;  %v3927_v30 = vpack.c.bf16 %v259_v23, %v251_v22  ;;  %v268_v32 = vld [vmem:[#allocation2 + $0x108] sm:$0xff]  ;;  %v267_v36 = vld [vmem:[#allocation2 + $0x100] sm:$0xff]  ;;  %v190_v40 = vrot.slane %v4629_v24, 6  ;;  %v4653_v55 = vsel %vm153_vm3, %v187_v16, %v188_v35  ;;  %v195_v7 = vrot.slane %v4661_v62, 3  ;;  %v4733_v22 = vld [vmem:[%s7029_s0 + $0x58] sm:$0xf] }
  0x61   :  { %837 = vmatprep.mubr.f32.mxu0 %v4471_v0  ;;  %3922 = vmatprep.subr.bf16.mxu0 %v3921_v10  ;;  %v276_v33 = vld [vmem:[#allocation2 + $0x148] sm:$0xff]  ;;  %v275_v37 = vld [vmem:[#allocation2 + $0x140] sm:$0xff]  ;;  %vm6816_vm14 = vmor %vm3384_vm11, %vm3385_vm12  ;;  %vm3596_vm12 = vsmask.f32 4368 }
  0x62   :  { %3638 = vmatmul.mubr.msk.f32.gmra.mrb[2].mxu1 %vm363_vm1, %v4616_v15  ;;  %3924 = vmatpush1.bf16.msra.mxu0 %v3923_v11  ;;  %v284_v42 = vld [vmem:[#allocation2 + $0x188] sm:$0xff]  ;;  %v3929_v43 = vpack.c.bf16 %v276_v33, %v268_v32  ;;  %v3931_v50 = vpack.c.bf16 %v275_v37, %v267_v36  ;;  %v283_v57 = vld [vmem:[#allocation2 + $0x180] sm:$0xff]  ;;  %v191_v60 = vsel %vm153_vm3, %v188_v35, %v190_v40 }
  0x63   :  { %485 = vmatprep.mubr.f32.mxu1 %v4471_v0  ;;  %3880 = vmatpush1.bf16.msra.mxu1 %v3879_v20  ;;  %v292_v45 = vld [vmem:[#allocation2 + $0x1c8] sm:$0xff]  ;;  %v291_v59 = vld [vmem:[#allocation2 + $0x1c0] sm:$0xff]  ;;  %v4669_v6 = vsel %vm109_vm4, %v191_v60, %v194_v56  ;;  %v4684_v11 = vsel %vm164_vm5, %v194_v56, %v195_v7  ;;  %v4726_v20 = vld [vmem:[%s7029_s0 + $0x50] sm:$0xff] }
  0x64   :  { %3676 = vmatmul.mubr.msk.f32.gmra.mrb[2].mxu0 %vm363_vm1, %v4616_v15  ;;  %3882 = vmatprep.subr.bf16.mxu1 %v3881_v25  ;;  %v3933_v63 = vpack.c.bf16 %v292_v45, %v284_v42  ;;  %v3935_v3 = vpack.c.bf16 %v291_v59, %v283_v57  ;;  %v240_v4 = vld [vmem:[#allocation2 + $0x28] sm:$0xff]  ;;  %v4676_v9 = vld [vmem:[%s7029_s0 + $0x40] sm:$0xf]  ;;  %v4743_v25 = vld [vmem:[%s7029_s0 + $0x70] sm:$0xf] }
  0x65   :  { %843 = vmatprep.mubr.f32.mxu0 %v4471_v0  ;;  %3926 = vmatprep.subr.bf16.mxu0 %v3925_v29  ;;  %v248_v5 = vld [vmem:[#allocation2 + $0x68] sm:$0xff]  ;;  %v197_v12 = vrot.slane %v4676_v9, 3  ;;  %v4716_v19 = vld [vmem:[%s7029_s0 + $0x60] sm:$0xff]  ;;  %v4759_v29 = vld [vmem:[%s7029_s0 + $0x78] sm:$0xff] }
  0x66   :  { %3639 = vmatmul.mubr.msk.f32.gmra.mrb[4].mxu1 %vm363_vm1, %v4637_v34  ;;  %3928 = vmatpush1.bf16.msra.mxu0 %v3927_v30  ;;  %v3953_v10 = vpack.c.bf16 %v248_v5, %v240_v4  ;;  %v4701_v16 = vld [vmem:[%s7029_s0 + $0x48] sm:$0xff]  ;;  %v201_v21 = vrot.slane %v4716_v19, 5  ;;  %v204_v30 = vrot.slane %v4743_v25, 5  ;;  %v208_v33 = vrot.slane %v4759_v29, 2  ;;  %v4776_v36 = vld [vmem:[%s7029_s0 + $0x80] sm:$0xff]  ;;  %v4806_v45 = vld [vmem:[%s7029_s0 + $0x90] sm:$0xff] }
  0x67   :  { %491 = vmatprep.mubr.f32.mxu1 %v4471_v0  ;;  %3884 = vmatpush1.bf16.msra.mxu1 %v3883_v41  ;;  %v4695_v14 = vsel %vm164_vm5, %v195_v7, %v197_v12  ;;  %v4738_v23 = vld [vmem:[%s7029_s0 + $0x68] sm:$0xff]  ;;  %v209_v40 = vrot.slane %v4776_v36, 2  ;;  %v239_v46 = vld [vmem:[#allocation2 + $0x20] sm:$0xff]  ;;  %v215_v53 = vrot.slane %v4806_v45, 7  ;;  %v4821_v56 = vld [vmem:[%s7029_s0 + $0x98] sm:$0xff] }
  0x68   :  { %3677 = vmatmul.mubr.msk.f32.gmra.mrb[4].mxu0 %vm363_vm1, %v4637_v34  ;;  %3930 = vmatprep.subr.bf16.mxu0 %v3929_v43  ;;  %v4752_v27 = vsel %vm131_vm7, %v4733_v22, %v201_v21  ;;  %v202_v28 = vrot.slane %v4738_v23, 5  ;;  %v4791_v41 = vld [vmem:[%s7029_s0 + $0x88] sm:$0xf]  ;;  %v247_v49 = vld [vmem:[#allocation2 + $0x60] sm:$0xff]  ;;  %v216_v7 = vrot.slane %v4821_v56, 7 }
  0x69   :  { %849 = vmatprep.mubr.f32.mxu0 %v4471_v0  ;;  %3886 = vmatprep.subr.bf16.mxu1 %v3885_v51  ;;  %v4799_v42 = vsel %vm109_vm4, %v208_v33, %v209_v40  ;;  %v211_v43 = vrot.slane %v4791_v41, 2  ;;  %v264_v51 = vld [vmem:[#allocation2 + $0xe8] sm:$0xff]  ;;  %v3955_v57 = vpack.c.bf16 %v247_v49, %v239_v46  ;;  %v4826_v59 = vld [vmem:[%s7029_s0 + $0xa0] sm:$0xf] }
  0x6a   :  { %3640 = vmatmul.mubr.msk.f32.gmra.mrb[6].mxu1 %vm363_vm1, %v4653_v55  ;;  %3932 = vmatpush1.bf16.msra.mxu0 %v3931_v50  ;;  %v4768_v32 = vsel %vm98_vm2, %v201_v21, %v202_v28  ;;  %v205_v35 = vsel %vm98_vm2, %v202_v28, %v204_v30  ;;  %v256_v50 = vld [vmem:[#allocation2 + $0xa8] sm:$0xff]  ;;  %v218_v21 = vrot.slane %v4826_v59, 7 }
  0x6b   :  { %497 = vmatprep.mubr.f32.mxu1 %v4471_v0  ;;  %3934 = vmatprep.subr.bf16.mxu0 %v3933_v63  ;;  %v4784_v37 = vsel %vm142_vm0, %v205_v35, %v208_v33  ;;  %v4814_v52 = vsel %vm109_vm4, %v209_v40, %v211_v43  ;;  %v3957_v60 = vpack.c.bf16 %v264_v51, %v256_v50  ;;  %v255_v63 = vld [vmem:[#allocation2 + $0xa0] sm:$0xff]  ;;  %v280_v4 = vld [vmem:[#allocation2 + $0x168] sm:$0xff]  ;;  %v100_v51 = vrot.slane %v4622_v17, 5 }
  0x6c   :  { %3678 = vmatmul.mubr.msk.f32.gmra.mrb[6].mxu0 %vm363_vm1, %v4653_v55  ;;  %3888 = vmatpush1.bf16.msra.mxu1 %v3887_v2  ;;  %v263_v2 = vld [vmem:[#allocation2 + $0xe0] sm:$0xff]  ;;  %v4834_v5 = vsel %vm153_vm3, %v211_v43, %v215_v53  ;;  %v288_v40 = vld [vmem:[#allocation2 + $0x1a8] sm:$0xff]  ;;  %v219_v50 = vsel %vm120_vm6, %v216_v7, %v218_v21 }
  0x6d   :  { %855 = vmatprep.mubr.f32.mxu0 %v4471_v0  ;;  %4129 = vmatprep.subr.bf16.mxu1 %v4561_v8  ;;  %v4710_v8 = vsel %vm120_vm6, %v197_v12, %v4701_v16  ;;  %v4842_v12 = vld [vmem:[%s7029_s0 + $0xa8] sm:$0xff]  ;;  %v3959_v28 = vpack.c.bf16 %v263_v2, %v255_v63  ;;  %v271_v33 = vld [vmem:[#allocation2 + $0x120] sm:$0xff] }
  0x6e   :  { %3641 = vmatmul.mubr.msk.f32.gmra.mrb[8].mxu1 %vm363_vm1, %v4669_v6  ;;  %3936 = vmatpush1.bf16.msra.mxu0 %v3935_v3  ;;  %v272_v3 = vld [vmem:[#allocation2 + $0x128] sm:$0xff]  ;;  %v279_v35 = vld [vmem:[#allocation2 + $0x160] sm:$0xff]  ;;  %v222_v46 = vrot.slane %v4842_v12, 4 }
  0x6f   :  { %503 = vmatprep.mubr.f32.mxu1 %v4471_v0  ;;  %3954 = vmatprep.subr.bf16.mxu0 %v3953_v10  ;;  %v99_v10 = vrot.slane %v4608_v1, 5  ;;  %v3961_v30 = vpack.c.bf16 %v280_v4, %v272_v3  ;;  %v296_v43 = vld [vmem:[#allocation2 + $0x1e8] sm:$0xff]  ;;  %v4851_v1 = vsel %vm120_vm6, %v215_v53, %v216_v7  ;;  %v3963_v53 = vpack.c.bf16 %v279_v35, %v271_v33  ;;  %v287_v2 = vld [vmem:[#allocation2 + $0x1a0] sm:$0xff]  ;;  %v4884_v7 = vld [vmem:[%s7029_s0 + $0xb8] sm:$0xf] }
  0x70   :  { %3679 = vmatmul.mubr.msk.f32.gmra.mrb[8].mxu0 %vm363_vm1, %v4669_v6  ;;  %v3965_v63 = vpack.c.bf16 %v296_v43, %v288_v40  ;;  %v295_v3 = vld [vmem:[#allocation2 + $0x1e0] sm:$0xff]  ;;  %v110_v4 = vrot.slane %v4644_v38, 2  ;;  %v111_v33 = vrot.slane %v4661_v62, 2  ;;  %v113_v43 = vrot.slane %v4676_v9, 2 }
  0x71   :  { %861 = vmatprep.mubr.f32.mxu0 %v4471_v0  ;;  %v4857_v49 = vsel %vm98_vm2, %v4598_v58, %v99_v10  ;;  %v4873_v58 = vsel %vm164_vm5, %v219_v50, %v222_v46  ;;  %v3967_v21 = vpack.c.bf16 %v295_v3, %v287_v2  ;;  %v121_v62 = vrot.slane %v4701_v16, 7 }
  0x72   :  { %3642 = vmatmul.mubr.msk.f32.gmra.mrb[10].mxu1 %vm363_vm1, %v4684_v11  ;;  %v4911_v40 = vsel %vm109_vm4, %v110_v4, %v111_v33  ;;  %v122_v16 = vrot.slane %v4726_v20, 7  ;;  %v124_v50 = vrot.slane %v4733_v22, 7  ;;  %v154_v2 = vrot.slane %v4806_v45, 6 }
  0x73   :  { %509 = vmatprep.mubr.f32.mxu1 %v4471_v0  ;;  %v4932_v9 = vsel %vm120_vm6, %v113_v43, %v121_v62  ;;  %v155_v3 = vrot.slane %v4821_v56, 6 }
  0x74   :  { %3680 = vmatmul.mubr.msk.f32.gmra.mrb[10].mxu0 %vm363_vm1, %v4684_v11  ;;  %v125_v22 = vsel %vm120_vm6, %v122_v16, %v124_v50  ;;  %v338_v50 = vld [vmem:[#allocation2 + $0x338] sm:$0xff] }
  0x75   :  { %867 = vmatprep.mubr.f32.mxu0 %v4471_v0  ;;  %v5023_v45 = vsel %vm153_vm3, %v154_v2, %v155_v3 }
  0x76   :  { %3643 = vmatmul.mubr.msk.f32.gmra.mrb[12].mxu1 %vm363_vm1, %v4695_v14 }
  0x77   :  { %515 = vmatprep.mubr.f32.mxu1 %v4471_v0 }
  0x78   :  { %3681 = vmatmul.mubr.msk.f32.gmra.mrb[12].mxu0 %vm363_vm1, %v4695_v14 }
  0x79   :  { %873 = vmatprep.mubr.f32.mxu0 %v4471_v0 }
  0x7a   :  { %3644 = vmatmul.mubr.msk.f32.gmra.mrb[14].mxu1 %vm363_vm1, %v4710_v8 }
  0x7b   :  { %521 = vmatprep.mubr.f32.mxu1 %v4471_v0 }
  0x7c   :  { %3682 = vmatmul.mubr.msk.f32.gmra.mrb[14].mxu0 %vm363_vm1, %v4710_v8 }
  0x7d   :  { %879 = vmatprep.mubr.f32.mxu0 %v4471_v0 }
  0x7e   :  { %3645 = vmatmul.mubr.msk.f32.gmra.mrb[16].mxu1 %vm363_vm1, %v4726_v20 }
  0x7f   :  { %527 = vmatprep.mubr.f32.mxu1 %v4471_v0 }
  0x80   :  { %3683 = vmatmul.mubr.msk.f32.gmra.mrb[16].mxu0 %vm363_vm1, %v4726_v20 }
  0x81   :  { %885 = vmatprep.mubr.f32.mxu0 %v4471_v0 }
  0x82   :  { %3646 = vmatmul.mubr.msk.f32.gmra.mrb[18].mxu1 %vm363_vm1, %v4752_v27 }
  0x83   :  { %533 = vmatprep.mubr.f32.mxu1 %v4471_v0 }
  0x84   :  { %3684 = vmatmul.mubr.msk.f32.gmra.mrb[18].mxu0 %vm363_vm1, %v4752_v27 }
  0x85   :  { %891 = vmatprep.mubr.f32.mxu0 %v4471_v0 }
  0x86   :  { %3647 = vmatmul.mubr.msk.f32.gmra.mrb[20].mxu1 %vm363_vm1, %v4768_v32 }
  0x87   :  { %539 = vmatprep.mubr.f32.mxu1 %v4471_v0 }
  0x88   :  { %3685 = vmatmul.mubr.msk.f32.gmra.mrb[20].mxu0 %vm363_vm1, %v4768_v32 }
  0x89   :  { %897 = vmatprep.mubr.f32.mxu0 %v4471_v0 }
  0x8a   :  { %3648 = vmatmul.mubr.msk.f32.gmra.mrb[22].mxu1 %vm363_vm1, %v4784_v37 }
  0x8b   :  { %545 = vmatprep.mubr.f32.mxu1 %v4471_v0 }
  0x8c   :  { %3686 = vmatmul.mubr.msk.f32.gmra.mrb[22].mxu0 %vm363_vm1, %v4784_v37 }
  0x8d   :  { %903 = vmatprep.mubr.f32.mxu0 %v4471_v0 }
  0x8e   :  { %3649 = vmatmul.mubr.msk.f32.gmra.mrb[24].mxu1 %vm363_vm1, %v4799_v42 }
  0x8f   :  { %551 = vmatprep.mubr.f32.mxu1 %v4471_v0 }
  0x90   :  { %3687 = vmatmul.mubr.msk.f32.gmra.mrb[24].mxu0 %vm363_vm1, %v4799_v42 }
  0x91   :  { %1234 = vmatprep.mubr.f32.mxu0 %v4471_v0 }
  0x92   :  { %3650 = vmatmul.mubr.msk.f32.gmra.mrb[26].mxu1 %vm363_vm1, %v4814_v52 }
  0x93   :  { %557 = vmatprep.mubr.f32.mxu1 %v4471_v0 }
  0x94   :  { %3713 = vmatmul.mubr.msk.f32.vlgmr.msra.gmra.mrb[26].mxu0 %vm363_vm1, %v4583_v47 }
  0x95   :  { %1240 = vmatprep.mubr.f32.mxu0 %v4471_v0  ;;  %3956 = vmatpush1.bf16.msra.mxu0 %v3955_v57  ;;  %v4864_v57 = vld [vmem:[%s7029_s0 + $0xb0] sm:$0xff] }
  0x96   :  { %3958 = vmatprep.subr.bf16.mxu0 %v3957_v60  ;;  %3651 = vmatmul.mubr.msk.f32.gmra.mrb[28].mxu1 %vm363_vm1, %v4834_v5  ;;  %v102_v60 = vrot.slane %v4629_v24, 5  ;;  %v223_v17 = vrot.slane %v4864_v57, 4  ;;  %v4878_v24 = vsel %vm98_vm2, %v99_v10, %v100_v51  ;;  %v225_v10 = vrot.slane %v4884_v7, 4 }
  0x97   :  { %563 = vmatprep.mubr.f32.mxu1 %v4471_v0 }
  0x98   :  { %3714 = vmatmul.mubr.msk.f32.gmra.mrb[28].mxu0 %vm363_vm1, %v4588_v48  ;;  %v4893_v38 = vsel %vm131_vm7, %v222_v46, %v223_v17  ;;  %v4907_v35 = vsel %vm131_vm7, %v223_v17, %v225_v10  ;;  %v4922_v46 = vsel %vm109_vm4, %v111_v33, %v113_v43  ;;  %v157_v17 = vrot.slane %v4826_v59, 6  ;;  %v330_v10 = vld [vmem:[#allocation2 + $0x2f8] sm:$0xff] }
  0x99   :  { %1246 = vmatprep.mubr.f32.mxu0 %v4471_v0  ;;  %3960 = vmatpush1.bf16.msra.mxu0 %v3959_v28  ;;  %v103_v28 = vsel %vm98_vm2, %v100_v51, %v102_v60  ;;  %v132_v51 = vrot.slane %v4716_v19, 4  ;;  %v166_v59 = vrot.slane %v4864_v57, 3 }
  0x9a   :  { %3962 = vmatprep.subr.bf16.mxu0 %v3961_v30  ;;  %3652 = vmatmul.mubr.msk.f32.gmra.mrb[30].mxu1 %vm363_vm1, %v4851_v1  ;;  %v4898_v30 = vsel %vm109_vm4, %v103_v28, %v110_v4  ;;  %v165_v4 = vrot.slane %v4842_v12, 3  ;;  %v168_v28 = vrot.slane %v4884_v7, 3  ;;  %v322_v7 = vld [vmem:[#allocation2 + $0x2b8] sm:$0xff] }
  0x9b   :  { %569 = vmatprep.mubr.f32.mxu1 %v4471_v0  ;;  %v4957_v19 = vsel %vm131_vm7, %v125_v22, %v132_v51  ;;  %v3909_v43 = vpack.c.bf16 %v330_v10, %v322_v7  ;;  %v253_v10 = vld [vmem:[#allocation2 + $0x90] sm:$0xff] }
  0x9c   :  { %3715 = vmatmul.mubr.msk.f32.gmra.mrb[30].mxu0 %vm363_vm1, %v4857_v49  ;;  %v5044_v12 = vsel %vm164_vm5, %v165_v4, %v166_v59  ;;  %v5054_v57 = vsel %vm164_vm5, %v166_v59, %v168_v28  ;;  %v245_v59 = vld [vmem:[#allocation2 + $0x50] sm:$0xff]  ;;  %v254_v28 = vld [vmem:[#allocation2 + $0x98] sm:$0xff] }
  0x9d   :  { %1252 = vmatprep.mubr.f32.mxu0 %v4471_v0  ;;  %3964 = vmatpush1.bf16.msra.mxu0 %v3963_v53  ;;  %v314_v53 = vld [vmem:[#allocation2 + $0x278] sm:$0xff] }
  0x9e   :  { %3966 = vmatprep.subr.bf16.mxu0 %v3965_v63  ;;  %3653 = vmatmul.mubr.msk.f32.gmra.mrb[32].mxu1 %vm363_vm1, %v4873_v58 }
  0x9f   :  { %575 = vmatprep.mubr.f32.mxu1 %v4471_v0 }
  0xa0   :  { %3716 = vmatmul.mubr.msk.f32.gmra.mrb[32].mxu0 %vm363_vm1, %v4878_v24 }
  0xa1   :  { %1258 = vmatprep.mubr.f32.mxu0 %v4471_v0  ;;  %3968 = vmatpush1.bf16.msra.mxu0 %v3967_v21  ;;  %v158_v21 = vsel %vm153_vm3, %v155_v3, %v157_v17  ;;  %v246_v3 = vld [vmem:[#allocation2 + $0x58] sm:$0xff] }
  0xa2   :  { %3654 = vmatmul.mubr.msk.f32.gmra.mrb[34].mxu1 %vm363_vm1, %v4893_v38  ;;  %v5034_v56 = vsel %vm164_vm5, %v158_v21, %v165_v4  ;;  %v237_v21 = vld [vmem:[#allocation2 + $0x10] sm:$0xff] }
  0xa3   :  { %581 = vmatprep.mubr.f32.mxu1 %v4471_v0 }
  0xa4   :  { %3717 = vmatmul.mubr.msk.f32.gmra.mrb[34].mxu0 %vm363_vm1, %v4898_v30 }
  0xa5   :  { %1264 = vmatprep.mubr.f32.mxu0 %v4471_v0 }
  0xa6   :  { %3655 = vmatmul.mubr.msk.f32.gmra.mrb[36].mxu1 %vm363_vm1, %v4907_v35 }
  0xa7   :  { %652 = vmatprep.mubr.f32.mxu1 %v4471_v0 }
  0xa8   :  { %3718 = vmatmul.mubr.msk.f32.gmra.mrb[36].mxu0 %vm363_vm1, %v4911_v40 }
  0xa9   :  { %1270 = vmatprep.mubr.f32.mxu0 %v4471_v0 }
  0xaa   :  { %3656 = vmatmul.mubr.msk.f32.vlgmr.msra.gmra.mrb[38].mxu1 %vm363_vm1, %v4602_v61 }
  0xab   :  { %4133 = vmatpush1.bf16.msra.mxu1 %v4563_v13  ;;  %658 = vmatprep.mubr.f32.mxu1 %v4471_v0  ;;  %v4944_v13 = vsel %vm120_vm6, %v121_v62, %v122_v16  ;;  %v321_v62 = vld [vmem:[#allocation2 + $0x2b0] sm:$0xff] }
  0xac   :  { %3719 = vmatmul.mubr.msk.f32.gmra.mrb[38].mxu0 %vm363_vm1, %v4922_v46  ;;  %4130 = vmatprep.subr.bf16.mxu1 %v4566_v18  ;;  %v306_v18 = vld [vmem:[#allocation2 + $0x238] sm:$0xff]  ;;  %v329_v16 = vld [vmem:[#allocation2 + $0x2f0] sm:$0xff] }
  0xad   :  { %1276 = vmatprep.mubr.f32.mxu0 %v4471_v0  ;;  %v3905_v60 = vpack.c.bf16 %v314_v53, %v306_v18  ;;  %v3911_v22 = vpack.c.bf16 %v329_v16, %v321_v62  ;;  %v337_v53 = vld [vmem:[#allocation2 + $0x330] sm:$0xff]  ;;  %v278_v62 = vld [vmem:[#allocation2 + $0x158] sm:$0xff] }
  0xae   :  { %3657 = vmatmul.mubr.msk.f32.gmra.mrb[40].mxu1 %vm363_vm1, %v4616_v15 }
  0xaf   :  { %664 = vmatprep.mubr.f32.mxu1 %v4471_v0  ;;  %4134 = vmatpush1.bf16.msra.mxu1 %v4570_v26  ;;  %v133_v26 = vrot.slane %v4738_v23, 4 }
  0xb0   :  { %3720 = vmatmul.mubr.msk.f32.gmra.mrb[40].mxu0 %vm363_vm1, %v4932_v9  ;;  %4131 = vmatprep.subr.bf16.mxu1 %v4572_v31  ;;  %v135_v31 = vrot.slane %v4743_v25, 4  ;;  %v144_v25 = vrot.slane %v4776_v36, 1 }
  0xb1   :  { %1282 = vmatprep.mubr.f32.mxu0 %v4471_v0  ;;  %v4970_v63 = vsel %vm131_vm7, %v132_v51, %v133_v26  ;;  %v346_v51 = vld [vmem:[#allocation2 + $0x378] sm:$0xff] }
  0xb2   :  { %3658 = vmatmul.mubr.msk.f32.gmra.mrb[42].mxu1 %vm363_vm1, %v4637_v34  ;;  %v3913_v18 = vpack.c.bf16 %v346_v51, %v338_v50  ;;  %v269_v51 = vld [vmem:[#allocation2 + $0x110] sm:$0xff] }
  0xb3   :  { %670 = vmatprep.mubr.f32.mxu1 %v4471_v0  ;;  %4135 = vmatpush1.bf16.msra.mxu1 %v4575_v39  ;;  %v143_v39 = vrot.slane %v4759_v29, 1  ;;  %v146_v29 = vrot.slane %v4791_v41, 1 }
  0xb4   :  { %3721 = vmatmul.mubr.msk.f32.gmra.mrb[42].mxu0 %vm363_vm1, %v4944_v13  ;;  %4132 = vmatprep.subr.bf16.mxu1 %v4578_v44  ;;  %v136_v44 = vsel %vm131_vm7, %v133_v26, %v135_v31  ;;  %v345_v26 = vld [vmem:[#allocation2 + $0x370] sm:$0xff]  ;;  %v354_v31 = vld [vmem:[#allocation2 + $0x3b8] sm:$0xff] }
  0xb5   :  { %1288 = vmatprep.mubr.f32.mxu0 %v4471_v0  ;;  %v4982_v23 = vsel %vm142_vm0, %v136_v44, %v143_v39  ;;  %v5002_v36 = vsel %vm142_vm0, %v144_v25, %v146_v29  ;;  %v5012_v41 = vsel %vm153_vm3, %v146_v29, %v154_v2  ;;  %v361_v29 = vld [vmem:[#allocation2 + $0x3f0] sm:$0xff]  ;;  %v238_v2 = vld [vmem:[#allocation2 + $0x18] sm:$0xff] }
  0xb6   :  { %3659 = vmatmul.mubr.msk.f32.gmra.mrb[44].mxu1 %vm363_vm1, %v4653_v55  ;;  %v3937_v4 = vpack.c.bf16 %v246_v3, %v238_v2 }
  0xb7   :  { %676 = vmatprep.mubr.f32.mxu1 %v4471_v0  ;;  %4136 = vmatpush1.bf16.msra.mxu1 %v4593_v54  ;;  %v4992_v54 = vsel %vm142_vm0, %v143_v39, %v144_v25  ;;  %v3915_v39 = vpack.c.bf16 %v345_v26, %v337_v53  ;;  %v353_v25 = vld [vmem:[#allocation2 + $0x3b0] sm:$0xff] }
  0xb8   :  { %3722 = vmatmul.mubr.msk.f32.gmra.mrb[44].mxu0 %vm363_vm1, %v4957_v19  ;;  %3906 = vmatprep.subr.bf16.mxu1 %v3905_v60  ;;  %v362_v60 = vld [vmem:[#allocation2 + $0x3f8] sm:$0xff]  ;;  %v3919_v17 = vpack.c.bf16 %v361_v29, %v353_v25 }
  0xb9   :  { %1294 = vmatprep.mubr.f32.mxu0 %v4471_v0  ;;  %v3917_v44 = vpack.c.bf16 %v362_v60, %v354_v31  ;;  %v285_v31 = vld [vmem:[#allocation2 + $0x190] sm:$0xff] }
  0xba   :  { %3660 = vmatmul.mubr.msk.f32.gmra.mrb[46].mxu1 %vm363_vm1, %v4669_v6  ;;  %v293_v60 = vld [vmem:[#allocation2 + $0x1d0] sm:$0xff] }
  0xbb   :  { %682 = vmatprep.mubr.f32.mxu1 %v4471_v0 }
  0xbc   :  { %3723 = vmatmul.mubr.msk.f32.gmra.mrb[46].mxu0 %vm363_vm1, %v4970_v63 }
  0xbd   :  { %1300 = vmatprep.mubr.f32.mxu0 %v4471_v0 }
  0xbe   :  { %3661 = vmatmul.mubr.msk.f32.gmra.mrb[48].mxu1 %vm363_vm1, %v4684_v11 }
  0xbf   :  { %688 = vmatprep.mubr.f32.mxu1 %v4471_v0 }
  0xc0   :  { %3724 = vmatmul.mubr.msk.f32.gmra.mrb[48].mxu0 %vm363_vm1, %v4982_v23 }
  0xc1   :  { %1306 = vmatprep.mubr.f32.mxu0 %v4471_v0 }
  0xc2   :  { %3662 = vmatmul.mubr.msk.f32.gmra.mrb[50].mxu1 %vm363_vm1, %v4695_v14 }
  0xc3   :  { %694 = vmatprep.mubr.f32.mxu1 %v4471_v0 }
  0xc4   :  { %3725 = vmatmul.mubr.msk.f32.gmra.mrb[50].mxu0 %vm363_vm1, %v4992_v54 }
  0xc5   :  { %1312 = vmatprep.mubr.f32.mxu0 %v4471_v0 }
  0xc6   :  { %3663 = vmatmul.mubr.msk.f32.gmra.mrb[52].mxu1 %vm363_vm1, %v4710_v8 }
  0xc7   :  { %700 = vmatprep.mubr.f32.mxu1 %v4471_v0 }
  0xc8   :  { %3726 = vmatmul.mubr.msk.f32.gmra.mrb[52].mxu0 %vm363_vm1, %v5002_v36 }
  0xc9   :  { %1318 = vmatprep.mubr.f32.mxu0 %v4471_v0 }
  0xca   :  { %3664 = vmatmul.mubr.msk.f32.gmra.mrb[54].mxu1 %vm363_vm1, %v4726_v20 }
  0xcb   :  { %706 = vmatprep.mubr.f32.mxu1 %v4471_v0 }
  0xcc   :  { %3727 = vmatmul.mubr.msk.f32.gmra.mrb[54].mxu0 %vm363_vm1, %v5012_v41 }
  0xcd   :  { %1324 = vmatprep.mubr.f32.mxu0 %v4471_v0 }
  0xce   :  { %3665 = vmatmul.mubr.msk.f32.gmra.mrb[56].mxu1 %vm363_vm1, %v4752_v27 }
  0xcf   :  { %712 = vmatprep.mubr.f32.mxu1 %v4471_v0 }
  0xd0   :  { %3728 = vmatmul.mubr.msk.f32.gmra.mrb[56].mxu0 %vm363_vm1, %v5023_v45 }
  0xd1   :  { %1330 = vmatprep.mubr.f32.mxu0 %v4471_v0 }
  0xd2   :  { %3666 = vmatmul.mubr.msk.f32.gmra.mrb[58].mxu1 %vm363_vm1, %v4768_v32 }
  0xd3   :  { %718 = vmatprep.mubr.f32.mxu1 %v4471_v0 }
  0xd4   :  { %3729 = vmatmul.mubr.msk.f32.gmra.mrb[58].mxu0 %vm363_vm1, %v5034_v56 }
  0xd5   :  { %1336 = vmatprep.mubr.f32.mxu0 %v4471_v0 }
  0xd6   :  { %3667 = vmatmul.mubr.msk.f32.gmra.mrb[60].mxu1 %vm363_vm1, %v4784_v37 }
  0xd7   :  { %724 = vmatprep.mubr.f32.mxu1 %v4471_v0 }
  0xd8   :  { %3730 = vmatmul.mubr.msk.f32.gmra.mrb[60].mxu0 %vm363_vm1, %v5044_v12 }
  0xd9   :  { %1342 = vmatprep.mubr.f32.mxu0 %v4471_v0 }
  0xda   :  { %3668 = vmatmul.mubr.msk.f32.gmra.mrb[62].mxu1 %vm363_vm1, %v4799_v42 }
  0xdb   :  { %730 = vmatprep.mubr.f32.mxu1 %v4471_v0 }
  0xdc   :  { %3731 = vmatmul.mubr.msk.f32.gmra.mrb[62].mxu0 %vm363_vm1, %v5054_v57 }
  0xdd   :  { %1592 = vmatprep.mubr.f32.mxu0 %v4471_v0 }
  0xde   :  { %3669 = vmatmul.mubr.msk.f32.gmra.mrb[64].mxu1 %vm363_vm1, %v4814_v52 }
  0xdf   :  { %736 = vmatprep.mubr.f32.mxu1 %v4471_v0 }
  0xe0   :  { %3751 = vmatmul.mubr.msk.f32.vlgmr.msra.gmra.mrb[0].mxu0 %vm363_vm1, %v4583_v47  ;;  %v305_v47 = vld [vmem:[#allocation2 + $0x230] sm:$0xff] }
  0xe1   :  { %1598 = vmatprep.mubr.f32.mxu0 %v4471_v0 }
  0xe2   :  { %3670 = vmatmul.mubr.msk.f32.gmra.mrb[66].mxu1 %vm363_vm1, %v4834_v5 }
  0xe3   :  { %742 = vmatprep.mubr.f32.mxu1 %v4471_v0 }
  0xe4   :  { %3752 = vmatmul.mubr.msk.f32.gmra.mrb[2].mxu0 %vm363_vm1, %v4588_v48  ;;  %v313_v48 = vld [vmem:[#allocation2 + $0x270] sm:$0xff] }
  0xe5   :  { %1604 = vmatprep.mubr.f32.mxu0 %v4471_v0  ;;  %v3907_v33 = vpack.c.bf16 %v313_v48, %v305_v47  ;;  %v262_v47 = vld [vmem:[#allocation2 + $0xd8] sm:$0xff]  ;;  %v3939_v48 = vpack.c.bf16 %v245_v59, %v237_v21  ;;  %v249_v21 = vld [vmem:[#allocation2 + $0x70] sm:$0xff] }
  0xe6   :  { %3671 = vmatmul.mubr.msk.f32.gmra.mrb[68].mxu1 %vm363_vm1, %v4851_v1  ;;  %v3941_v7 = vpack.c.bf16 %v262_v47, %v254_v28  ;;  %v258_v28 = vld [vmem:[#allocation2 + $0xb8] sm:$0xff] }
  0xe7   :  { %748 = vmatprep.mubr.f32.mxu1 %v4471_v0  ;;  %v266_v47 = vld [vmem:[#allocation2 + $0xf8] sm:$0xff] }
  0xe8   :  { %3753 = vmatmul.mubr.msk.f32.gmra.mrb[4].mxu0 %vm363_vm1, %v4857_v49 }
  0xe9   :  { %1610 = vmatprep.mubr.f32.mxu0 %v4471_v0 }
  0xea   :  { %3672 = vmatmul.mubr.msk.f32.gmra.mrb[70].mxu1 %vm363_vm1, %v4873_v58 }
  0xeb   :  { %754 = vmatprep.mubr.f32.mxu1 %v4471_v0 }
  0xec   :  { %3754 = vmatmul.mubr.msk.f32.gmra.mrb[6].mxu0 %vm363_vm1, %v4878_v24 }
  0xed   :  { %1616 = vmatprep.mubr.f32.mxu0 %v4471_v0 }
  0xee   :  { %3673 = vmatmul.mubr.msk.f32.gmra.mrb[72].mxu1 %vm363_vm1, %v4893_v38 }
  0xef   :  { %760 = vmatprep.mubr.f32.mxu1 %v4471_v0 }
  0xf0   :  { %3755 = vmatmul.mubr.msk.f32.gmra.mrb[8].mxu0 %vm363_vm1, %v4898_v30 }
  0xf1   :  { %1622 = vmatprep.mubr.f32.mxu0 %v4471_v0 }
  0xf2   :  { %3674 = vmatmul.mubr.msk.f32.gmra.mrb[74].mxu1 %vm363_vm1, %v4907_v35 }
  0xf3   :  { %909 = vmatprep.mubr.f32.mxu1 %v4471_v0 }
  0xf4   :  { %3756 = vmatmul.mubr.msk.f32.gmra.mrb[10].mxu0 %vm363_vm1, %v4911_v40 }
  0xf5   :  { %1628 = vmatprep.mubr.f32.mxu0 %v4471_v0 }
  0xf6   :  { %3688 = vmatmul.mubr.msk.f32.vlgmr.msra.gmra.mrb[76].mxu1 %vm363_vm1, %v4814_v52 }
  0xf7   :  { %3908 = vmatpush1.bf16.msra.mxu1 %v3907_v33  ;;  %915 = vmatprep.mubr.f32.mxu1 %v4471_v0  ;;  %v261_v33 = vld [vmem:[#allocation2 + $0xd0] sm:$0xff] }
  0xf8   :  { %3757 = vmatmul.mubr.msk.f32.gmra.mrb[12].mxu0 %vm363_vm1, %v4922_v46  ;;  %3910 = vmatprep.subr.bf16.mxu1 %v3909_v43  ;;  %v270_v43 = vld [vmem:[#allocation2 + $0x118] sm:$0xff]  ;;  %v3943_v16 = vpack.c.bf16 %v261_v33, %v253_v10  ;;  %v257_v10 = vld [vmem:[#allocation2 + $0xb0] sm:$0xff] }
  0xf9   :  { %1634 = vmatprep.mubr.f32.mxu0 %v4471_v0  ;;  %v3945_v50 = vpack.c.bf16 %v278_v62, %v270_v43  ;;  %v265_v33 = vld [vmem:[#allocation2 + $0xf0] sm:$0xff]  ;;  %v274_v43 = vld [vmem:[#allocation2 + $0x138] sm:$0xff] }
  0xfa   :  { %3689 = vmatmul.mubr.msk.f32.gmra.mrb[78].mxu1 %vm363_vm1, %v4834_v5  ;;  %v282_v62 = vld [vmem:[#allocation2 + $0x178] sm:$0xff] }
  0xfb   :  { %921 = vmatprep.mubr.f32.mxu1 %v4471_v0  ;;  %3912 = vmatpush1.bf16.msra.mxu1 %v3911_v22  ;;  %v277_v22 = vld [vmem:[#allocation2 + $0x150] sm:$0xff] }
  0xfc   :  { %3758 = vmatmul.mubr.msk.f32.gmra.mrb[14].mxu0 %vm363_vm1, %v4932_v9  ;;  %3914 = vmatprep.subr.bf16.mxu1 %v3913_v18  ;;  %v286_v18 = vld [vmem:[#allocation2 + $0x198] sm:$0xff]  ;;  %v3947_v53 = vpack.c.bf16 %v277_v22, %v269_v51  ;;  %v3977_v51 = vpack.c.bf16 %v282_v62, %v274_v43  ;;  %v273_v22 = vld [vmem:[#allocation2 + $0x130] sm:$0xff] }
  0xfd   :  { %1640 = vmatprep.mubr.f32.mxu0 %v4471_v0 }
  0xfe   :  { %3690 = vmatmul.mubr.msk.f32.gmra.mrb[80].mxu1 %vm363_vm1, %v4851_v1 }
  0xff   :  { %927 = vmatprep.mubr.f32.mxu1 %v4471_v0  ;;  %3916 = vmatpush1.bf16.msra.mxu1 %v3915_v39  ;;  %v242_v39 = vld [vmem:[#allocation2 + $0x38] sm:$0xff] }
 0x100   :  { %3759 = vmatmul.mubr.msk.f32.gmra.mrb[16].mxu0 %vm363_vm1, %v4944_v13  ;;  %3918 = vmatprep.subr.bf16.mxu1 %v3917_v44  ;;  %v3951_v44 = vpack.c.bf16 %v293_v60, %v285_v31  ;;  %v5270_v60 = vld [vmem:[%s7029_s0 + $0x8] sm:$0xff] }
 0x101   :  { %1646 = vmatprep.mubr.f32.mxu0 %v4471_v0 }
 0x102   :  { %3691 = vmatmul.mubr.msk.f32.gmra.mrb[82].mxu1 %vm363_vm1, %v4873_v58 }
 0x103   :  { %933 = vmatprep.mubr.f32.mxu1 %v4471_v0  ;;  %3920 = vmatpush1.bf16.msra.mxu1 %v3919_v17 }
 0x104   :  { %3760 = vmatmul.mubr.msk.f32.gmra.mrb[18].mxu0 %vm363_vm1, %v4957_v19  ;;  %3938 = vmatprep.subr.bf16.mxu1 %v3937_v4 }
 0x105   :  { %1652 = vmatprep.mubr.f32.mxu0 %v4471_v0 }
 0x106   :  { %3692 = vmatmul.mubr.msk.f32.gmra.mrb[84].mxu1 %vm363_vm1, %v4893_v38 }
 0x107   :  { %939 = vmatprep.mubr.f32.mxu1 %v4471_v0 }
 0x108   :  { %3761 = vmatmul.mubr.msk.f32.gmra.mrb[20].mxu0 %vm363_vm1, %v4970_v63 }
 0x109   :  { %1658 = vmatprep.mubr.f32.mxu0 %v4471_v0 }
 0x10a   :  { %3693 = vmatmul.mubr.msk.f32.gmra.mrb[86].mxu1 %vm363_vm1, %v4907_v35 }
 0x10b   :  { %1010 = vmatprep.mubr.f32.mxu1 %v4471_v0 }
 0x10c   :  { %3762 = vmatmul.mubr.msk.f32.gmra.mrb[22].mxu0 %vm363_vm1, %v4982_v23 }
 0x10d   :  { %1664 = vmatprep.mubr.f32.mxu0 %v4471_v0 }
 0x10e   :  { %3694 = vmatmul.mubr.msk.f32.vlgmr.msra.gmra.mrb[88].mxu1 %vm363_vm1, %v4602_v61  ;;  %v294_v61 = vld [vmem:[#allocation2 + $0x1d8] sm:$0xff] }
 0x10f   :  { %3940 = vmatpush1.bf16.msra.mxu1 %v3939_v48  ;;  %1016 = vmatprep.mubr.f32.mxu1 %v4471_v0  ;;  %v3949_v26 = vpack.c.bf16 %v294_v61, %v286_v18  ;;  %v281_v18 = vld [vmem:[#allocation2 + $0x170] sm:$0xff] }
 0x110   :  { %3763 = vmatmul.mubr.msk.f32.gmra.mrb[24].mxu0 %vm363_vm1, %v4992_v54  ;;  %3942 = vmatprep.subr.bf16.mxu1 %v3941_v7  ;;  %v3973_v7 = vpack.c.bf16 %v266_v47, %v258_v28 }
 0x111   :  { %1670 = vmatprep.mubr.f32.mxu0 %v4471_v0 }
 0x112   :  { %3695 = vmatmul.mubr.msk.f32.gmra.mrb[90].mxu1 %vm363_vm1, %v4616_v15  ;;  %v250_v15 = vld [vmem:[#allocation2 + $0x78] sm:$0xff] }
 0x113   :  { %1022 = vmatprep.mubr.f32.mxu1 %v4471_v0  ;;  %3944 = vmatpush1.bf16.msra.mxu1 %v3943_v16  ;;  %v3969_v25 = vpack.c.bf16 %v250_v15, %v242_v39  ;;  %v3979_v39 = vpack.c.bf16 %v281_v18, %v273_v22 }
 0x114   :  { %3764 = vmatmul.mubr.msk.f32.gmra.mrb[64].mxu0 %vm363_vm1, %v5002_v36  ;;  %3946 = vmatprep.subr.bf16.mxu1 %v3945_v50  ;;  %v5258_v50 = vld [vmem:[%s7029_s0] sm:$0xff] }
 0x115   :  { %1676 = vmatprep.mubr.f32.mxu0 %v4471_v0 }
 0x116   :  { %3696 = vmatmul.mubr.msk.f32.gmra.mrb[92].mxu1 %vm363_vm1, %v4637_v34 }
 0x117   :  { %1028 = vmatprep.mubr.f32.mxu1 %v4471_v0  ;;  %3948 = vmatpush1.bf16.msra.mxu1 %v3947_v53  ;;  %v290_v53 = vld [vmem:[#allocation2 + $0x1b8] sm:$0xff] }
 0x118   :  { %3765 = vmatmul.mubr.msk.f32.gmra.mrb[66].mxu0 %vm363_vm1, %v5012_v41  ;;  %3950 = vmatprep.subr.bf16.mxu1 %v3949_v26  ;;  %v298_v26 = vld [vmem:[#allocation2 + $0x1f8] sm:$0xff] }
 0x119   :  { %1682 = vmatprep.mubr.f32.mxu0 %v4471_v0  ;;  %v3981_v15 = vpack.c.bf16 %v298_v26, %v290_v53 }
 0x11a   :  { %3697 = vmatmul.mubr.msk.f32.gmra.mrb[94].mxu1 %vm363_vm1, %v4653_v55 }
 0x11b   :  { %1034 = vmatprep.mubr.f32.mxu1 %v4471_v0  ;;  %3952 = vmatpush1.bf16.msra.mxu1 %v3951_v44  ;;  %v289_v44 = vld [vmem:[#allocation2 + $0x1b0] sm:$0xff] }
 0x11c   :  { %3766 = vmatmul.mubr.msk.f32.gmra.mrb[68].mxu0 %vm363_vm1, %v5023_v45  ;;  %3970 = vmatprep.subr.bf16.mxu1 %v3969_v25  ;;  %v297_v25 = vld [vmem:[#allocation2 + $0x1f0] sm:$0xff] }
 0x11d   :  { %1688 = vmatprep.mubr.f32.mxu0 %v4471_v0  ;;  %v3983_v28 = vpack.c.bf16 %v297_v25, %v289_v44 }
 0x11e   :  { %3698 = vmatmul.mubr.msk.f32.gmra.mrb[96].mxu1 %vm363_vm1, %v4669_v6 }
 0x11f   :  { %1040 = vmatprep.mubr.f32.mxu1 %v4471_v0 }
 0x120   :  { %3767 = vmatmul.mubr.msk.f32.gmra.mrb[70].mxu0 %vm363_vm1, %v5034_v56 }
 0x121   :  { %1694 = vmatprep.mubr.f32.mxu0 %v4471_v0 }
 0x122   :  { %3699 = vmatmul.mubr.msk.f32.gmra.mrb[98].mxu1 %vm363_vm1, %v4684_v11 }
 0x123   :  { %1046 = vmatprep.mubr.f32.mxu1 %v4471_v0 }
 0x124   :  { %3768 = vmatmul.mubr.msk.f32.gmra.mrb[72].mxu0 %vm363_vm1, %v5044_v12 }
 0x125   :  { %1700 = vmatprep.mubr.f32.mxu0 %v4471_v0 }
 0x126   :  { %3700 = vmatmul.mubr.msk.f32.gmra.mrb[100].mxu1 %vm363_vm1, %v4695_v14 }
 0x127   :  { %1052 = vmatprep.mubr.f32.mxu1 %v4471_v0 }
 0x128   :  { %3769 = vmatmul.mubr.msk.f32.gmra.mrb[74].mxu0 %vm363_vm1, %v5054_v57 }
 0x12a   :  { %3701 = vmatmul.mubr.msk.f32.gmra.mrb[102].mxu1 %vm363_vm1, %v4710_v8 }
 0x12b   :  { %1058 = vmatprep.mubr.f32.mxu1 %v4471_v0 }
 0x12e   :  { %3702 = vmatmul.mubr.msk.f32.gmra.mrb[104].mxu1 %vm363_vm1, %v4726_v20 }
 0x12f   :  { %1064 = vmatprep.mubr.f32.mxu1 %v4471_v0 }
 0x131   :  { %v5181_v34 = vpop.f32.mrb[0].mxu1 }
 0x132   :  { %v5183_v55 = vpop.f32.mrb[1].mxu1  ;;  %3703 = vmatmul.mubr.msk.f32.gmra.mrb[106].mxu1 %vm363_vm1, %v4752_v27 }
 0x133   :  { %1070 = vmatprep.mubr.f32.mxu1 %v4471_v0 }
 0x135   :  { %v5188_v6 = vpop.f32.mrb[2].mxu1 }
 0x136   :  { %v5190_v11 = vpop.f32.mrb[3].mxu1  ;;  %3704 = vmatmul.mubr.msk.f32.gmra.mrb[108].mxu1 %vm363_vm1, %v4768_v32 }
 0x137   :  { %1076 = vmatprep.mubr.f32.mxu1 %v4471_v0 }
 0x139   :  { %v5195_v14 = vpop.f32.mrb[4].mxu1 }
 0x13a   :  { %v5197_v8 = vpop.f32.mrb[5].mxu1  ;;  %3705 = vmatmul.mubr.msk.f32.gmra.mrb[110].mxu1 %vm363_vm1, %v4784_v37 }
 0x13b   :  { %1082 = vmatprep.mubr.f32.mxu1 %v4471_v0 }
 0x13d   :  { %v5202_v20 = vpop.f32.mrb[6].mxu1 }
 0x13e   :  { %v5204_v27 = vpop.f32.mrb[7].mxu1  ;;  %3706 = vmatmul.mubr.msk.f32.gmra.mrb[112].mxu1 %vm363_vm1, %v4799_v42 }
 0x13f   :  { %1088 = vmatprep.mubr.f32.mxu1 %v4471_v0 }
 0x141   :  { %v5209_v32 = vpop.f32.mrb[8].mxu1 }
 0x142   :  { %v5211_v29 = vpop.f32.mrb[9].mxu1  ;;  %3707 = vmatmul.mubr.msk.f32.gmra.mrb[114].mxu1 %vm363_vm1, %v4814_v52 }
 0x143   :  { %1094 = vmatprep.mubr.f32.mxu1 %v4471_v0 }
 0x145   :  { %v5216_v37 = vpop.f32.mrb[10].mxu1 }
 0x146   :  { %v5218_v2 = vpop.f32.mrb[11].mxu1  ;;  %3708 = vmatmul.mubr.msk.f32.gmra.mrb[116].mxu1 %vm363_vm1, %v4834_v5 }
 0x147   :  { %1100 = vmatprep.mubr.f32.mxu1 %v4471_v0 }
 0x149   :  { %v5223_v42 = vpop.f32.mrb[12].mxu1 }
 0x14a   :  { %v5225_v3 = vpop.f32.mrb[13].mxu1  ;;  %3709 = vmatmul.mubr.msk.f32.gmra.mrb[118].mxu1 %vm363_vm1, %v4851_v1  ;;  %v241_v1 = vld [vmem:[#allocation2 + $0x30] sm:$0xff] }
 0x14b   :  { %1106 = vmatprep.mubr.f32.mxu1 %v4471_v0 }
 0x14d   :  { %v5230_v52 = vpop.f32.mrb[14].mxu1 }
 0x14e   :  { %v5232_v17 = vpop.f32.mrb[15].mxu1  ;;  %3710 = vmatmul.mubr.msk.f32.gmra.mrb[120].mxu1 %vm363_vm1, %v4873_v58  ;;  %v3971_v58 = vpack.c.bf16 %v249_v21, %v241_v1 }
 0x14f   :  { %1112 = vmatprep.mubr.f32.mxu1 %v4471_v0 }
 0x151   :  { %v5237_v5 = vpop.f32.mrb[16].mxu1 }
 0x152   :  { %v5239_v4 = vpop.f32.mrb[17].mxu1  ;;  %3711 = vmatmul.mubr.msk.f32.gmra.mrb[122].mxu1 %vm363_vm1, %v4893_v38 }
 0x153   :  { %1118 = vmatprep.mubr.f32.mxu1 %v4471_v0 }
 0x155   :  { %v5244_v59 = vpop.f32.mrb[18].mxu1 }
 0x156   :  { %v5246_v48 = vpop.f32.mrb[19].mxu1  ;;  %3712 = vmatmul.mubr.msk.f32.gmra.mrb[124].mxu1 %vm363_vm1, %v4907_v35  ;;  %v3975_v35 = vpack.c.bf16 %v265_v33, %v257_v10 }
 0x157   :  { %1413 = vmatprep.mubr.f32.mxu1 %v4471_v0 }
 0x159   :  { %v5251_v38 = vpop.f32.mrb[20].mxu1 }
 0x15a   :  { %v5253_v16 = vpop.f32.mrb[21].mxu1  ;;  %3732 = vmatmul.mubr.msk.f32.vlgmr.msra.gmra.mrb[38].mxu1 %vm363_vm1, %v5258_v50 }
 0x15b   :  { %3972 = vmatpush1.bf16.msra.mxu1 %v3971_v58  ;;  %1419 = vmatprep.mubr.f32.mxu1 %v4471_v0 }
 0x15c   :  { %3974 = vmatprep.subr.bf16.mxu1 %v3973_v7 }
 0x15d   :  { %v5263_v61 = vpop.f32.mrb[22].mxu1 }
 0x15e   :  { %v5265_v31 = vpop.f32.mrb[23].mxu1  ;;  %3733 = vmatmul.mubr.msk.f32.gmra.mrb[40].mxu1 %vm363_vm1, %v5270_v60 }
 0x15f   :  { %1425 = vmatprep.mubr.f32.mxu1 %v4471_v0  ;;  %3976 = vmatpush1.bf16.msra.mxu1 %v3975_v35 }
 0x160   :  { %3978 = vmatprep.subr.bf16.mxu1 %v3977_v51 }
 0x161   :  { %v5275_v1 = vpop.f32.mrb[24].mxu1 }
 0x162   :  { %v5277_v21 = vpop.f32.mrb[25].mxu1  ;;  %3734 = vmatmul.mubr.msk.f32.gmra.mrb[42].mxu1 %vm363_vm1, %v4857_v49 }
 0x163   :  { %1431 = vmatprep.mubr.f32.mxu1 %v4471_v0  ;;  %3980 = vmatpush1.bf16.msra.mxu1 %v3979_v39 }
 0x164   :  { %3982 = vmatprep.subr.bf16.mxu1 %v3981_v15 }
 0x165   :  { %v5282_v47 = vpop.f32.mrb[26].mxu1 }
 0x166   :  { %v5284_v7 = vpop.f32.mrb[27].mxu1  ;;  %3735 = vmatmul.mubr.msk.f32.gmra.mrb[44].mxu1 %vm363_vm1, %v4878_v24 }
 0x167   :  { %v1236_v58 = vpop.f32.mrb[26].mxu0  ;;  %1437 = vmatprep.mubr.f32.mxu1 %v4471_v0  ;;  %3984 = vmatpush1.bf16.msra.mxu1 %v3983_v28 }
 0x168   :  { %v5289_v10 = vadd.f32 %v1236_v58, %v5181_v34  ;;  %v1238_v33 = vpop.f32.mrb[27].mxu0 }
 0x169   :  { %v5293_v43 = vadd.f32 %v1238_v33, %v5183_v55  ;;  %v5295_v62 = vpop.f32.mrb[28].mxu1 }
 0x16a   :  { %v5297_v51 = vpop.f32.mrb[29].mxu1  ;;  %3736 = vmatmul.mubr.msk.f32.gmra.mrb[46].mxu1 %vm363_vm1, %v4898_v30 }
 0x16b   :  { %v1242_v35 = vpop.f32.mrb[28].mxu0  ;;  %1443 = vmatprep.mubr.f32.mxu1 %v4471_v0 }
 0x16c   :  { %v5302_v22 = vadd.f32 %v1242_v35, %v5188_v6  ;;  %v1244_v34 = vpop.f32.mrb[29].mxu0 }
 0x16d   :  { %v5306_v18 = vadd.f32 %v1244_v34, %v5190_v11  ;;  %v5308_v53 = vpop.f32.mrb[30].mxu1 }
 0x16e   :  { %v5310_v26 = vpop.f32.mrb[31].mxu1  ;;  %3737 = vmatmul.mubr.msk.f32.gmra.mrb[48].mxu1 %vm363_vm1, %v4911_v40 }
 0x16f   :  { %v1248_v55 = vpop.f32.mrb[30].mxu0  ;;  %1449 = vmatprep.mubr.f32.mxu1 %v4471_v0 }
 0x170   :  { %v5315_v39 = vadd.f32 %v1248_v55, %v5195_v14  ;;  %v1250_v15 = vpop.f32.mrb[31].mxu0 }
 0x171   :  { %v5319_v6 = vadd.f32 %v1250_v15, %v5197_v8  ;;  %v5321_v44 = vpop.f32.mrb[32].mxu1 }
 0x172   :  { %v5323_v25 = vpop.f32.mrb[33].mxu1  ;;  %3738 = vmatmul.mubr.msk.f32.gmra.mrb[50].mxu1 %vm363_vm1, %v4922_v46 }
 0x173   :  { %v1254_v11 = vpop.f32.mrb[32].mxu0  ;;  %1455 = vmatprep.mubr.f32.mxu1 %v4471_v0 }
 0x174   :  { %v5328_v28 = vadd.f32 %v1254_v11, %v5202_v20  ;;  %v1256_v58 = vpop.f32.mrb[33].mxu0 }
 0x175   :  { %v5332_v14 = vadd.f32 %v1256_v58, %v5204_v27  ;;  %v5334_v33 = vpop.f32.mrb[34].mxu1 }
 0x176   :  { %v5336_v35 = vpop.f32.mrb[35].mxu1  ;;  %3739 = vmatmul.mubr.msk.f32.gmra.mrb[52].mxu1 %vm363_vm1, %v4932_v9 }
 0x177   :  { %7069 = vst [vmem:[#allocation12_spill] sm:$0xff] %v5332_v14  ;;  %v1260_v8 = vpop.f32.mrb[34].mxu0  ;;  %1461 = vmatprep.mubr.f32.mxu1 %v4471_v0 }
 0x178   :  { %v5341_v34 = vadd.f32 %v1260_v8, %v5209_v32  ;;  %v1262_v55 = vpop.f32.mrb[35].mxu0 }
 0x179   :  { %v5345_v20 = vadd.f32 %v1262_v55, %v5211_v29  ;;  %v5347_v15 = vpop.f32.mrb[36].mxu1 }
 0x17a   :  { %v5349_v11 = vpop.f32.mrb[37].mxu1  ;;  %3740 = vmatmul.mubr.msk.f32.gmra.mrb[54].mxu1 %vm363_vm1, %v4944_v13 }
 0x17b   :  { %7070 = vst [vmem:[#allocation13_spill] sm:$0xff] %v5345_v20  ;;  %v1266_v27 = vpop.f32.mrb[36].mxu0  ;;  %1467 = vmatprep.mubr.f32.mxu1 %v4471_v0 }
 0x17c   :  { %v5354_v58 = vadd.f32 %v1266_v27, %v5216_v37  ;;  %v1268_v14 = vpop.f32.mrb[37].mxu0 }
 0x17d   :  { %v5358_v32 = vadd.f32 %v1268_v14, %v5218_v2 }
 0x17e   :  { %3741 = vmatmul.mubr.msk.f32.gmra.mrb[56].mxu1 %vm363_vm1, %v4957_v19 }
 0x17f   :  { %v1272_v8 = vpop.f32.mrb[38].mxu0  ;;  %1473 = vmatprep.mubr.f32.mxu1 %v4471_v0 }
 0x180   :  { %v5363_v29 = vadd.f32 %v1272_v8, %v5223_v42  ;;  %v1274_v55 = vpop.f32.mrb[39].mxu0 }
 0x181   :  { %v5367_v20 = vadd.f32 %v1274_v55, %v5225_v3 }
 0x182   :  { %3742 = vmatmul.mubr.msk.f32.gmra.mrb[58].mxu1 %vm363_vm1, %v4970_v63 }
 0x183   :  { %v1278_v37 = vpop.f32.mrb[40].mxu0  ;;  %1479 = vmatprep.mubr.f32.mxu1 %v4471_v0 }
 0x184   :  { %v5372_v2 = vadd.f32 %v1278_v37, %v5230_v52  ;;  %v1280_v14 = vpop.f32.mrb[41].mxu0 }
 0x185   :  { %v5376_v27 = vadd.f32 %v1280_v14, %v5232_v17 }
 0x186   :  { %3743 = vmatmul.mubr.msk.f32.gmra.mrb[60].mxu1 %vm363_vm1, %v4982_v23 }
 0x187   :  { %v1284_v42 = vpop.f32.mrb[42].mxu0  ;;  %1485 = vmatprep.mubr.f32.mxu1 %v4471_v0 }
 0x188   :  { %v5381_v3 = vadd.f32 %v1284_v42, %v5237_v5  ;;  %v1286_v8 = vpop.f32.mrb[43].mxu0 }
 0x189   :  { %v5385_v55 = vadd.f32 %v1286_v8, %v5239_v4 }
 0x18a   :  { %3744 = vmatmul.mubr.msk.f32.gmra.mrb[62].mxu1 %vm363_vm1, %v4992_v54 }
 0x18b   :  { %v1290_v52 = vpop.f32.mrb[44].mxu0  ;;  %1491 = vmatprep.mubr.f32.mxu1 %v4471_v0 }
 0x18c   :  { %v5390_v17 = vadd.f32 %v1290_v52, %v5244_v59  ;;  %v1292_v37 = vpop.f32.mrb[45].mxu0 }
 0x18d   :  { %v5394_v14 = vadd.f32 %v1292_v37, %v5246_v48 }
 0x18e   :  { %3745 = vmatmul.mubr.msk.f32.gmra.mrb[64].mxu1 %vm363_vm1, %v5002_v36 }
 0x18f   :  { %v1296_v5 = vpop.f32.mrb[46].mxu0  ;;  %1497 = vmatprep.mubr.f32.mxu1 %v4471_v0 }
 0x190   :  { %v5399_v4 = vadd.f32 %v1296_v5, %v5251_v38  ;;  %v1298_v42 = vpop.f32.mrb[47].mxu0 }
 0x191   :  { %v5403_v8 = vadd.f32 %v1298_v42, %v5253_v16 }
 0x192   :  { %3746 = vmatmul.mubr.msk.f32.gmra.mrb[66].mxu1 %vm363_vm1, %v5012_v41 }
 0x193   :  { %v1302_v59 = vpop.f32.mrb[48].mxu0  ;;  %1503 = vmatprep.mubr.f32.mxu1 %v4471_v0 }
 0x194   :  { %v5408_v48 = vadd.f32 %v1302_v59, %v5263_v61  ;;  %v1304_v52 = vpop.f32.mrb[49].mxu0 }
 0x195   :  { %v5412_v37 = vadd.f32 %v1304_v52, %v5265_v31 }
 0x196   :  { %3747 = vmatmul.mubr.msk.f32.gmra.mrb[68].mxu1 %vm363_vm1, %v5023_v45 }
 0x197   :  { %v1308_v38 = vpop.f32.mrb[50].mxu0  ;;  %1509 = vmatprep.mubr.f32.mxu1 %v4471_v0 }
 0x198   :  { %v5417_v16 = vadd.f32 %v1308_v38, %v5275_v1  ;;  %v1310_v5 = vpop.f32.mrb[51].mxu0 }
 0x199   :  { %v5421_v42 = vadd.f32 %v1310_v5, %v5277_v21 }
 0x19a   :  { %3748 = vmatmul.mubr.msk.f32.gmra.mrb[70].mxu1 %vm363_vm1, %v5034_v56 }
 0x19b   :  { %v1314_v61 = vpop.f32.mrb[52].mxu0  ;;  %1515 = vmatprep.mubr.f32.mxu1 %v4471_v0 }
 0x19c   :  { %v5426_v31 = vadd.f32 %v1314_v61, %v5282_v47  ;;  %v1316_v59 = vpop.f32.mrb[53].mxu0 }
 0x19d   :  { %v5430_v52 = vadd.f32 %v1316_v59, %v5284_v7 }
 0x19e   :  { %3749 = vmatmul.mubr.msk.f32.gmra.mrb[72].mxu1 %vm363_vm1, %v5044_v12 }
 0x19f   :  { %v1320_v1 = vpop.f32.mrb[54].mxu0  ;;  %1521 = vmatprep.mubr.f32.mxu1 %v4471_v0 }
 0x1a0   :  { %v5435_v21 = vadd.f32 %v1320_v1, %v5295_v62  ;;  %v1322_v38 = vpop.f32.mrb[55].mxu0 }
 0x1a1   :  { %v5439_v5 = vadd.f32 %v1322_v38, %v5297_v51 }
 0x1a2   :  { %3750 = vmatmul.mubr.msk.f32.gmra.mrb[74].mxu1 %vm363_vm1, %v5054_v57 }
 0x1a3   :  { %v1326_v47 = vpop.f32.mrb[56].mxu0  ;;  %1771 = vmatprep.mubr.f32.mxu1 %v4471_v0 }
 0x1a4   :  { %v5444_v7 = vadd.f32 %v1326_v47, %v5308_v53  ;;  %v1328_v61 = vpop.f32.mrb[57].mxu0 }
 0x1a5   :  { %v5448_v59 = vadd.f32 %v1328_v61, %v5310_v26 }
 0x1a6   :  { %3770 = vmatmul.mubr.msk.f32.vlgmr.msra.gmra.mrb[88].mxu1 %vm363_vm1, %v5258_v50 }
 0x1a7   :  { %v1332_v62 = vpop.f32.mrb[58].mxu0  ;;  %1777 = vmatprep.mubr.f32.mxu1 %v4471_v0 }
 0x1a8   :  { %v5453_v51 = vadd.f32 %v1332_v62, %v5321_v44  ;;  %v1334_v1 = vpop.f32.mrb[59].mxu0 }
 0x1a9   :  { %v5457_v38 = vadd.f32 %v1334_v1, %v5323_v25 }
 0x1aa   :  { %3771 = vmatmul.mubr.msk.f32.gmra.mrb[90].mxu1 %vm363_vm1, %v5270_v60 }
 0x1ab   :  { %v1338_v53 = vpop.f32.mrb[60].mxu0  ;;  %1783 = vmatprep.mubr.f32.mxu1 %v4471_v0 }
 0x1ac   :  { %v5462_v26 = vadd.f32 %v1338_v53, %v5334_v33  ;;  %v1340_v47 = vpop.f32.mrb[61].mxu0  ;;  %v2678_v53 = vld [vmem:[#allocation6] sm:$0xff] }
 0x1ad   :  { %v5466_v50 = vadd.f32 %v1340_v47, %v5336_v35  ;;  %v2679_v47 = vld [vmem:[#allocation6 + $0x8] sm:$0xff] }
 0x1ae   :  { %3772 = vmatmul.mubr.msk.f32.gmra.mrb[92].mxu1 %vm363_vm1, %v4857_v49 }
 0x1af   :  { %v1344_v44 = vpop.f32.mrb[62].mxu0  ;;  %1789 = vmatprep.mubr.f32.mxu1 %v4471_v0 }
 0x1b0   :  { %v5471_v25 = vadd.f32 %v1344_v44, %v5347_v15  ;;  %v1346_v61 = vpop.f32.mrb[63].mxu0  ;;  %v3986_v44 = vpack.c.bf16 %v2679_v47, %v2678_v53 }
 0x1b1   :  { %v5475_v60 = vadd.f32 %v1346_v61, %v5349_v11  ;;  %v7035_v61 = vmov 0.0|0.0  }
 0x1b2   :  { %3773 = vmatmul.mubr.msk.f32.gmra.mrb[94].mxu1 %vm363_vm1, %v4878_v24  ;;  %3985 = vmatprep.subr.bf16.mxu0 %v7035_v61 }
 0x1b3   :  { %v5479_v33 = vpop.f32.mrb[0].mxu0  ;;  %1795 = vmatprep.mubr.f32.mxu1 %v4471_v0  ;;  %3987 = vmatpush1.bf16.msra.mxu0 %v3986_v44  ;;  %v2682_v44 = vld [vmem:[#allocation6 + $0x20] sm:$0xff] }
 0x1b4   :  { %v5482_v35 = vpop.f32.mrb[1].mxu0  ;;  %3988 = vmatprep.subr.bf16.mxu0 %v7035_v61 }
 0x1b5   :  { %7071 = vst [vmem:[#allocation14_spill] sm:$0xff] %v5482_v35 }
 0x1b6   :  { %3774 = vmatmul.mubr.msk.f32.gmra.mrb[96].mxu1 %vm363_vm1, %v4898_v30 }
 0x1b7   :  { %v5486_v49 = vpop.f32.mrb[2].mxu0  ;;  %1801 = vmatprep.mubr.f32.mxu1 %v4471_v0 }
 0x1b8   :  { %7072 = vst [vmem:[#allocation15_spill] sm:$0xff] %v5486_v49  ;;  %v5489_v15 = vpop.f32.mrb[3].mxu0 }
 0x1b9   :  { %7073 = vst [vmem:[#allocation16_spill] sm:$0xff] %v5489_v15 }
 0x1ba   :  { %3775 = vmatmul.mubr.msk.f32.gmra.mrb[98].mxu1 %vm363_vm1, %v4911_v40 }
 0x1bb   :  { %v5493_v11 = vpop.f32.mrb[4].mxu0  ;;  %1807 = vmatprep.mubr.f32.mxu1 %v4471_v0 }
 0x1bc   :  { %7074 = vst [vmem:[#allocation17_spill] sm:$0xff] %v5493_v11  ;;  %v5496_v24 = vpop.f32.mrb[5].mxu0 }
 0x1bd   :  { %7075 = vst [vmem:[#allocation18_spill] sm:$0xff] %v5496_v24 }
 0x1be   :  { %3776 = vmatmul.mubr.msk.f32.gmra.mrb[100].mxu1 %vm363_vm1, %v4922_v46 }
 0x1bf   :  { %v5500_v62 = vpop.f32.mrb[6].mxu0  ;;  %1813 = vmatprep.mubr.f32.mxu1 %v4471_v0 }
 0x1c0   :  { %7076 = vst [vmem:[#allocation19_spill] sm:$0xff] %v5500_v62  ;;  %v5503_v30 = vpop.f32.mrb[7].mxu0 }
 0x1c1   :  { %7077 = vst [vmem:[#allocation20_spill] sm:$0xff] %v5503_v30 }
 0x1c2   :  { %3777 = vmatmul.mubr.msk.f32.gmra.mrb[102].mxu1 %vm363_vm1, %v4932_v9 }
 0x1c3   :  { %v5507_v1 = vpop.f32.mrb[8].mxu0  ;;  %1819 = vmatprep.mubr.f32.mxu1 %v4471_v0 }
 0x1c4   :  { %7078 = vst [vmem:[#allocation21_spill] sm:$0xff] %v5507_v1  ;;  %v5510_v40 = vpop.f32.mrb[9].mxu0  ;;  %v2680_v1 = vld [vmem:[#allocation6 + $0x10] sm:$0xff] }
 0x1c5   :  { %7079 = vst [vmem:[#allocation22_spill] sm:$0xff] %v5510_v40  ;;  %v2681_v40 = vld [vmem:[#allocation6 + $0x18] sm:$0xff] }
 0x1c6   :  { %3778 = vmatmul.mubr.msk.f32.gmra.mrb[104].mxu1 %vm363_vm1, %v4944_v13  ;;  %v3989_v30 = vpack.c.bf16 %v2681_v40, %v2680_v1 }
 0x1c7   :  { %v5515_v46 = vpop.f32.mrb[10].mxu0  ;;  %1825 = vmatprep.mubr.f32.mxu1 %v4471_v0 }
 0x1c8   :  { %7080 = vst [vmem:[#allocation23_spill] sm:$0xff] %v5515_v46  ;;  %v5518_v9 = vpop.f32.mrb[11].mxu0  ;;  %3990 = vmatpush1.bf16.msra.mxu0 %v3989_v30 }
 0x1c9   :  { %7081 = vst [vmem:[#allocation24_spill] sm:$0xff] %v5518_v9  ;;  %v5521_v62 = vpop.f32.mrb[76].mxu1  ;;  %3991 = vmatprep.subr.bf16.mxu0 %v7035_v61  ;;  %v2683_v9 = vld [vmem:[#allocation6 + $0x28] sm:$0xff] }
 0x1ca   :  { %v5523_v53 = vpop.f32.mrb[77].mxu1  ;;  %3779 = vmatmul.mubr.msk.f32.gmra.mrb[106].mxu1 %vm363_vm1, %v4957_v19  ;;  %v3992_v46 = vpack.c.bf16 %v2683_v9, %v2682_v44 }
 0x1cb   :  { %v5527_v13 = vpop.f32.mrb[12].mxu0  ;;  %1831 = vmatprep.mubr.f32.mxu1 %v4471_v0 }
 0x1cc   :  { %7082 = vst [vmem:[#allocation25_spill] sm:$0xff] %v5527_v13  ;;  %v5530_v47 = vpop.f32.mrb[13].mxu0  ;;  %3993 = vmatpush1.bf16.msra.mxu0 %v3992_v46  ;;  %v2685_v13 = vld [vmem:[#allocation6 + $0x38] sm:$0xff] }
 0x1cd   :  { %7083 = vst [vmem:[#allocation26_spill] sm:$0xff] %v5530_v47  ;;  %v5533_v1 = vpop.f32.mrb[78].mxu1  ;;  %3994 = vmatprep.subr.bf16.mxu0 %v7035_v61  ;;  %v2684_v47 = vld [vmem:[#allocation6 + $0x30] sm:$0xff] }
 0x1ce   :  { %v5535_v40 = vpop.f32.mrb[79].mxu1  ;;  %3780 = vmatmul.mubr.msk.f32.gmra.mrb[108].mxu1 %vm363_vm1, %v4970_v63  ;;  %v3995_v24 = vpack.c.bf16 %v2685_v13, %v2684_v47 }
 0x1cf   :  { %v5539_v19 = vpop.f32.mrb[14].mxu0  ;;  %1837 = vmatprep.mubr.f32.mxu1 %v4471_v0 }
 0x1d0   :  { %7084 = vst [vmem:[#allocation27_spill] sm:$0xff] %v5539_v19  ;;  %v5542_v30 = vpop.f32.mrb[15].mxu0  ;;  %3996 = vmatpush1.bf16.msra.mxu0 %v3995_v24  ;;  %v2687_v19 = vld [vmem:[#allocation6 + $0x48] sm:$0xff] }
 0x1d1   :  { %7085 = vst [vmem:[#allocation28_spill] sm:$0xff] %v5542_v30  ;;  %v5545_v9 = vpop.f32.mrb[80].mxu1  ;;  %3997 = vmatprep.subr.bf16.mxu0 %v7035_v61  ;;  %v2686_v30 = vld [vmem:[#allocation6 + $0x40] sm:$0xff] }
 0x1d2   :  { %v5547_v44 = vpop.f32.mrb[81].mxu1  ;;  %3781 = vmatmul.mubr.msk.f32.gmra.mrb[110].mxu1 %vm363_vm1, %v4982_v23  ;;  %v3998_v11 = vpack.c.bf16 %v2687_v19, %v2686_v30 }
 0x1d3   :  { %v5551_v63 = vpop.f32.mrb[16].mxu0  ;;  %1843 = vmatprep.mubr.f32.mxu1 %v4471_v0 }
 0x1d4   :  { %7086 = vst [vmem:[#allocation29_spill] sm:$0xff] %v5551_v63  ;;  %v5554_v46 = vpop.f32.mrb[17].mxu0  ;;  %3999 = vmatpush1.bf16.msra.mxu0 %v3998_v11  ;;  %v2689_v63 = vld [vmem:[#allocation6 + $0x58] sm:$0xff] }
 0x1d5   :  { %7087 = vst [vmem:[#allocation30_spill] sm:$0xff] %v5554_v46  ;;  %v5557_v13 = vpop.f32.mrb[82].mxu1  ;;  %4000 = vmatprep.subr.bf16.mxu0 %v7035_v61  ;;  %v2688_v46 = vld [vmem:[#allocation6 + $0x50] sm:$0xff] }
 0x1d6   :  { %v5559_v47 = vpop.f32.mrb[83].mxu1  ;;  %3782 = vmatmul.mubr.msk.f32.gmra.mrb[112].mxu1 %vm363_vm1, %v4992_v54  ;;  %v4001_v15 = vpack.c.bf16 %v2689_v63, %v2688_v46 }
 0x1d7   :  { %v5563_v23 = vpop.f32.mrb[18].mxu0  ;;  %1849 = vmatprep.mubr.f32.mxu1 %v4471_v0 }
 0x1d8   :  { %7088 = vst [vmem:[#allocation31_spill] sm:$0xff] %v5563_v23  ;;  %v5566_v24 = vpop.f32.mrb[19].mxu0  ;;  %4002 = vmatpush1.bf16.msra.mxu0 %v4001_v15  ;;  %v2691_v23 = vld [vmem:[#allocation6 + $0x68] sm:$0xff] }
 0x1d9   :  { %7089 = vst [vmem:[#allocation32_spill] sm:$0xff] %v5566_v24  ;;  %v5569_v19 = vpop.f32.mrb[84].mxu1  ;;  %4003 = vmatprep.subr.bf16.mxu0 %v7035_v61  ;;  %v2690_v24 = vld [vmem:[#allocation6 + $0x60] sm:$0xff] }
 0x1da   :  { %v5571_v30 = vpop.f32.mrb[85].mxu1  ;;  %3783 = vmatmul.mubr.msk.f32.gmra.mrb[114].mxu1 %vm363_vm1, %v5002_v36  ;;  %v4004_v49 = vpack.c.bf16 %v2691_v23, %v2690_v24 }
 0x1db   :  { %v5575_v54 = vpop.f32.mrb[20].mxu0  ;;  %1855 = vmatprep.mubr.f32.mxu1 %v4471_v0 }
 0x1dc   :  { %7090 = vst [vmem:[#allocation33_spill] sm:$0xff] %v5575_v54  ;;  %v5578_v11 = vpop.f32.mrb[21].mxu0  ;;  %4005 = vmatpush1.bf16.msra.mxu0 %v4004_v49  ;;  %v2693_v54 = vld [vmem:[#allocation6 + $0x78] sm:$0xff]  ;;  %v2695_v49 = vld [vmem:[#allocation6 + $0x88] sm:$0xff] }
 0x1dd   :  { %7091 = vst [vmem:[#allocation34_spill] sm:$0xff] %v5578_v11  ;;  %v5581_v63 = vpop.f32.mrb[86].mxu1  ;;  %4006 = vmatprep.subr.bf16.mxu0 %v7035_v61  ;;  %v2692_v11 = vld [vmem:[#allocation6 + $0x70] sm:$0xff] }
 0x1de   :  { %v5583_v46 = vpop.f32.mrb[87].mxu1  ;;  %3784 = vmatmul.mubr.msk.f32.gmra.mrb[116].mxu1 %vm363_vm1, %v5012_v41  ;;  %v4007_v35 = vpack.c.bf16 %v2693_v54, %v2692_v11  ;;  %v2694_v41 = vld [vmem:[#allocation6 + $0x80] sm:$0xff]  ;;  %v2697_v11 = vld [vmem:[#allocation6 + $0x98] sm:$0xff] }
 0x1df   :  { %v5587_v36 = vpop.f32.mrb[22].mxu0  ;;  %1861 = vmatprep.mubr.f32.mxu1 %v4471_v0 }
 0x1e0   :  { %7092 = vst [vmem:[#allocation35_spill] sm:$0xff] %v5587_v36  ;;  %v5590_v15 = vpop.f32.mrb[23].mxu0  ;;  %4008 = vmatpush1.bf16.msra.mxu0 %v4007_v35  ;;  %v2696_v35 = vld [vmem:[#allocation6 + $0x90] sm:$0xff] }
 0x1e1   :  { %7093 = vst [vmem:[#allocation36_spill] sm:$0xff] %v5590_v15  ;;  %4009 = vmatprep.subr.bf16.mxu0 %v7035_v61  ;;  %v4010_v15 = vpack.c.bf16 %v2695_v49, %v2694_v41 }
 0x1e2   :  { %3785 = vmatmul.mubr.msk.f32.gmra.mrb[118].mxu1 %vm363_vm1, %v5023_v45 }
 0x1e3   :  { %v5595_v23 = vpop.f32.mrb[24].mxu0  ;;  %1867 = vmatprep.mubr.f32.mxu1 %v4471_v0 }
 0x1e4   :  { %7094 = vst [vmem:[#allocation37_spill] sm:$0xff] %v5595_v23  ;;  %v5597_v24 = vpop.f32.mrb[25].mxu0  ;;  %4011 = vmatpush1.bf16.msra.mxu0 %v4010_v15  ;;  %v4013_v23 = vpack.c.bf16 %v2697_v11, %v2696_v35  ;;  %v2699_v15 = vld [vmem:[#allocation6 + $0xa8] sm:$0xff] }
 0x1e5   :  { %7095 = vst [vmem:[#allocation38_spill] sm:$0xff] %v5597_v24  ;;  %4012 = vmatprep.subr.bf16.mxu0 %v7035_v61 }
 0x1e6   :  { %3786 = vmatmul.mubr.msk.f32.gmra.mrb[120].mxu1 %vm363_vm1, %v5034_v56 }
 0x1e7   :  { %v1672_v36 = vpop.f32.mrb[64].mxu0  ;;  %1873 = vmatprep.mubr.f32.mxu1 %v4471_v0 }
 0x1e8   :  { %v5604_v54 = vadd.f32 %v1672_v36, %v5521_v62  ;;  %v1674_v45 = vpop.f32.mrb[65].mxu0  ;;  %4014 = vmatpush1.bf16.msra.mxu0 %v4013_v23  ;;  %v2698_v36 = vld [vmem:[#allocation6 + $0xa0] sm:$0xff]  ;;  %v2701_v23 = vld [vmem:[#allocation6 + $0xb8] sm:$0xff] }
 0x1e9   :  { %v5609_v24 = vadd.f32 %v1674_v45, %v5523_v53  ;;  %4015 = vmatprep.subr.bf16.mxu0 %v7035_v61  ;;  %v4016_v53 = vpack.c.bf16 %v2699_v15, %v2698_v36 }
 0x1ea   :  { %7096 = vst [vmem:[#allocation39_spill] sm:$0xff] %v5604_v54  ;;  %3787 = vmatmul.mubr.msk.f32.gmra.mrb[122].mxu1 %vm363_vm1, %v5044_v12  ;;  %v5826_v54 = vld [vmem:[#allocation6 + $0x148] sm:$0xff] }
 0x1eb   :  { %7097 = vst [vmem:[#allocation40_spill] sm:$0xff] %v5609_v24  ;;  %v1678_v41 = vpop.f32.mrb[66].mxu0  ;;  %1879 = vmatprep.mubr.f32.mxu1 %v4471_v0  ;;  %v2700_v0 = vld [vmem:[#allocation6 + $0xb0] sm:$0xff] }
 0x1ec   :  { %v5614_v56 = vadd.f32 %v1678_v41, %v5533_v1  ;;  %v1680_v62 = vpop.f32.mrb[67].mxu0  ;;  %4017 = vmatpush1.bf16.msra.mxu0 %v4016_v53  ;;  %v4019_v11 = vpack.c.bf16 %v2701_v23, %v2700_v0 }
 0x1ed   :  { %v5619_v49 = vadd.f32 %v1680_v62, %v5535_v40  ;;  %4018 = vmatprep.subr.bf16.mxu0 %v7035_v61 }
 0x1ee   :  { %7098 = vst [vmem:[#allocation41_spill] sm:$0xff] %v5614_v56  ;;  %3788 = vmatmul.mubr.msk.f32.gmra.mrb[124].mxu1 %vm363_vm1, %v5054_v57  ;;  %v2702_v57 = vld [vmem:[#allocation6 + $0xc0] sm:$0xff]  ;;  %vm3454_vm1 = vsmask.f32 2304 }
 0x1ef   :  { %7099 = vst [vmem:[#allocation42_spill] sm:$0xff] %v5619_v49  ;;  %v1684_v45 = vpop.f32.mrb[68].mxu0 }
 0x1f0   :  { %v5624_v12 = vadd.f32 %v1684_v45, %v5545_v9  ;;  %v1686_v1 = vpop.f32.mrb[69].mxu0  ;;  %4020 = vmatpush1.bf16.msra.mxu0 %v4019_v11  ;;  %v2703_v9 = vld [vmem:[#allocation6 + $0xc8] sm:$0xff] }
 0x1f1   :  { %v5628_v35 = vadd.f32 %v1686_v1, %v5547_v44  ;;  %4021 = vmatprep.subr.bf16.mxu0 %v7035_v61  ;;  %v4022_v15 = vpack.c.bf16 %v2703_v9, %v2702_v57  ;;  %v2704_v1 = vld [vmem:[#allocation6 + $0xd0] sm:$0xff] }
 0x1f2   :  { %7100 = vst [vmem:[#allocation43_spill] sm:$0xff] %v5624_v12 }
 0x1f3   :  { %7101 = vst [vmem:[#allocation44_spill] sm:$0xff] %v5628_v35  ;;  %v1690_v40 = vpop.f32.mrb[70].mxu0 }
 0x1f4   :  { %v5631_v41 = vadd.f32 %v1690_v40, %v5557_v13  ;;  %v1692_v62 = vpop.f32.mrb[71].mxu0  ;;  %4023 = vmatpush1.bf16.msra.mxu0 %v4022_v15  ;;  %v2705_v13 = vld [vmem:[#allocation6 + $0xd8] sm:$0xff] }
 0x1f5   :  { %v5635_v36 = vadd.f32 %v1692_v62, %v5559_v47  ;;  %4024 = vmatprep.subr.bf16.mxu0 %v7035_v61  ;;  %v4025_v23 = vpack.c.bf16 %v2705_v13, %v2704_v1  ;;  %v2706_v62 = vld [vmem:[#allocation6 + $0xe0] sm:$0xff]  ;;  %v2709_v15 = vld [vmem:[#allocation6 + $0xf8] sm:$0xff] }
 0x1f6   :  { %7102 = vst [vmem:[#allocation45_spill] sm:$0xff] %v5631_v41  ;;  %v1962_v13 = vld [vmem:[#allocation4] sm:$0x3] }
 0x1f7   :  { %7103 = vst [vmem:[#allocation46_spill] sm:$0xff] %v5635_v36  ;;  %v1696_v53 = vpop.f32.mrb[72].mxu0  ;;  %v5736_v36 = vld [vmem:[#allocation6 + $0x118] sm:$0xff] }
 0x1f8   :  { %v5638_v44 = vadd.f32 %v1696_v53, %v5569_v19  ;;  %v1698_v45 = vpop.f32.mrb[73].mxu0  ;;  %4026 = vmatpush1.bf16.msra.mxu0 %v4025_v23  ;;  %v2707_v19 = vld [vmem:[#allocation6 + $0xe8] sm:$0xff] }
 0x1f9   :  { %v5642_v0 = vadd.f32 %v1698_v45, %v5571_v30  ;;  %4027 = vmatprep.subr.bf16.mxu0 %v7035_v61  ;;  %v4028_v9 = vpack.c.bf16 %v2707_v19, %v2706_v62  ;;  %v2708_v30 = vld [vmem:[#allocation6 + $0xf0] sm:$0xff] }
 0x1fa   :  { %7104 = vst [vmem:[#allocation47_spill] sm:$0xff] %v5638_v44  ;;  %v4031_v53 = vpack.c.bf16 %v2709_v15, %v2708_v30 }
 0x1fb   :  { %7105 = vst [vmem:[#allocation48_spill] sm:$0xff] %v5642_v0  ;;  %v1702_v11 = vpop.f32.mrb[74].mxu0 }
 0x1fc   :  { %v5645_v47 = vadd.f32 %v1702_v11, %v5581_v63  ;;  %v1704_v40 = vpop.f32.mrb[75].mxu0  ;;  %4029 = vmatpush1.bf16.msra.mxu0 %v4028_v9  ;;  %v1964_v63 = vlaneseq }
 0x1fd   :  { %v5649_v57 = vadd.f32 %v1704_v40, %v5583_v46  ;;  %4030 = vmatprep.subr.bf16.mxu0 %v7035_v61 }
 0x1fe   :  { %7106 = vst [vmem:[#allocation49_spill] sm:$0xff] %v5645_v47  ;;  %v1965_v45 = vshrl.u32 %v1964_v63, 7 }
 0x1ff   :  { %7107 = vst [vmem:[#allocation50_spill] sm:$0xff] %v5649_v57 }
 0x200   :  { %4032 = vmatpush1.bf16.msra.mxu0 %v4031_v53  ;;  %v1966_v1 = vsub.s32 0, %v1965_v45  ;;  %v1970_v23 = vsub.s32 1, %v1965_v45 }
 0x201   :  { %4033 = vmatprep.subr.bf16.mxu0 %v7035_v61 }
 0x202   :  { %v5653_v11 = vrot.slane %v1962_v13, %v1966_v1  ;;  %v5655_v46 = vrot.slane %v1962_v13, %v1970_v23 }
 0x22d   :  { %v1415_v47 = vpop.f32.mrb[38].mxu1 }
 0x22e   :  { %v1886_v40 = vmax.f32 %v5289_v10, %v1415_v47  ;;  %v1417_v62 = vpop.f32.mrb[39].mxu1 }
 0x22f   :  { %v1887_v19 = vmax.f32 %v5293_v43, %v1417_v62 }
 0x230   :  { %v1974_v9 = vadd.f32 %v5653_v11, %v1886_v40 }
 0x231   :  { %v1975_v30 = vadd.f32 %v5655_v46, %v1887_v19  ;;  %v1421_v15 = vpop.f32.mrb[40].mxu1 }
 0x232   :  { %v2012_v53 = vmax.f32 %v1974_v9, 0.0  ;;  %v1888_v63 = vmax.f32 %v5302_v22, %v1421_v15  ;;  %v1423_v61 = vpop.f32.mrb[41].mxu1 }
 0x233   :  { %v2013_v45 = vmax.f32 %v1975_v30, 0.0  ;;  %v1889_v1 = vmax.f32 %v5306_v18, %v1423_v61 }
 0x234   :  { %v1976_v13 = vadd.f32 %v5653_v11, %v1888_v63 }
 0x235   :  { %v5664_v23 = vmax.f32 %v2012_v53, %v2013_v45  ;;  %v1977_v10 = vadd.f32 %v5655_v46, %v1889_v1  ;;  %v1427_v47 = vpop.f32.mrb[42].mxu1  ;;  %v7108_v1 = vld [vmem:[#allocation12_spill] sm:$0xff] }
 0x236   :  { %v2014_v43 = vmax.f32 %v1976_v13, 0.0  ;;  %v1890_v40 = vmax.f32 %v5315_v39, %v1427_v47  ;;  %v1429_v62 = vpop.f32.mrb[43].mxu1 }
 0x237   :  { %v2015_v19 = vmax.f32 %v1977_v10, 0.0  ;;  %v1891_v9 = vmax.f32 %v5319_v6, %v1429_v62 }
 0x238   :  { %v1978_v22 = vadd.f32 %v5653_v11, %v1890_v40 }
 0x239   :  { %v1979_v30 = vadd.f32 %v5655_v46, %v1891_v9  ;;  %v1433_v15 = vpop.f32.mrb[44].mxu1  ;;  %v5671_v18 = vmax.f32 %v2014_v43, %v2015_v19  ;;  %v7109_v43 = vld [vmem:[#allocation13_spill] sm:$0xff] }
 0x23a   :  { %v2016_v61 = vmax.f32 %v1978_v22, 0.0  ;;  %v1892_v53 = vmax.f32 %v5328_v28, %v1433_v15  ;;  %v1435_v63 = vpop.f32.mrb[45].mxu1 }
 0x23b   :  { %v2017_v45 = vmax.f32 %v1979_v30, 0.0  ;;  %v1893_v13 = vmax.f32 %v7108_v1, %v1435_v63 }
 0x23c   :  { %v1980_v39 = vadd.f32 %v5653_v11, %v1892_v53 }
 0x23d   :  { %v2128_v47 = vmax.f32 %v2016_v61, %v2017_v45  ;;  %v1981_v10 = vadd.f32 %v5655_v46, %v1893_v13  ;;  %v1439_v6 = vpop.f32.mrb[46].mxu1 }
 0x23e   :  { %v2018_v62 = vmax.f32 %v1980_v39, 0.0  ;;  %v1894_v40 = vmax.f32 %v5341_v34, %v1439_v6  ;;  %v1441_v9 = vpop.f32.mrb[47].mxu1 }
 0x23f   :  { %v2019_v57 = vmax.f32 %v1981_v10, 0.0  ;;  %v1895_v19 = vmax.f32 %v7109_v43, %v1441_v9  ;;  %v5683_v39 = vrot.slane %v2128_v47, 2 }
 0x240   :  { %v1982_v22 = vadd.f32 %v5653_v11, %v1894_v40 }
 0x241   :  { %v2129_v28 = vmax.f32 %v2018_v62, %v2019_v57  ;;  %v1983_v30 = vadd.f32 %v5655_v46, %v1895_v19  ;;  %v1445_v15 = vpop.f32.mrb[48].mxu1  ;;  %7110 = vst [vmem:[#allocation12_spill] sm:$0xff] %v5683_v39  ;;  %v5696_v19 = vrot.slane %v2128_v47, 1 }
 0x242   :  { %v2020_v63 = vmax.f32 %v1982_v22, 0.0  ;;  %v1896_v53 = vmax.f32 %v5354_v58, %v1445_v15  ;;  %v1447_v61 = vpop.f32.mrb[49].mxu1 }
 0x243   :  { %v2214_v45 = vrot.slane %v2129_v28, 2  ;;  %v2021_v1 = vmax.f32 %v1983_v30, 0.0  ;;  %v1897_v13 = vmax.f32 %v5358_v32, %v1447_v61  ;;  %v2206_v34 = vrot.slane %v2129_v28, 1  ;;  %7111 = vst [vmem:[#allocation13_spill] sm:$0xff] %v5696_v19 }
 0x244   :  { %v1984_v10 = vadd.f32 %v5653_v11, %v1896_v53 }
 0x245   :  { %v2130_v6 = vmax.f32 %v2020_v63, %v2021_v1  ;;  %v1985_v40 = vadd.f32 %v5655_v46, %v1897_v13  ;;  %v1451_v57 = vpop.f32.mrb[50].mxu1  ;;  %v5689_v62 = vsel %vm109_vm4, %v5683_v39, %v2214_v45  ;;  %v2207_v53 = vsel %vm142_vm0, %v5696_v19, %v2206_v34 }
 0x246   :  { %v2022_v9 = vmax.f32 %v1984_v10, 0.0  ;;  %v1898_v58 = vmax.f32 %v5363_v29, %v1451_v57  ;;  %v1453_v43 = vpop.f32.mrb[51].mxu1  ;;  %v5694_v32 = vsel %vm120_vm6, %v2128_v47, %v5689_v62 }
 0x247   :  { %v5698_v22 = vrot.slane %v2130_v6, 1  ;;  %v2023_v28 = vmax.f32 %v1985_v40, 0.0  ;;  %v1899_v30 = vmax.f32 %v5367_v20, %v1453_v43  ;;  %v5701_v15 = vrot.slane %v2130_v6, 2 }
 0x248   :  { %v1986_v63 = vadd.f32 %v5653_v11, %v1898_v58  ;;  %v2404_v43 = vrot.slane %v2130_v6, 4  ;;  %v5725_v6 = vld [vmem:[#allocation6 + $0x100] sm:$0xff] }
 0x249   :  { %7112 = vst [vmem:[#allocation51_spill] sm:$0xff] %v5701_v15  ;;  %v5706_v29 = vmax.f32 %v2022_v9, %v2023_v28  ;;  %v1987_v61 = vadd.f32 %v5655_v46, %v1899_v30  ;;  %v1457_v1 = vpop.f32.mrb[52].mxu1  ;;  %v5711_v47 = vsel %vm109_vm4, %v2214_v45, %v5701_v15  ;;  %v2211_v40 = vsel %vm142_vm0, %v2206_v34, %v5698_v22 }
 0x24a   :  { %7113 = vst [vmem:[#allocation52_spill] sm:$0xff] %v5711_v47  ;;  %v2024_v13 = vmax.f32 %v1986_v63, 0.0  ;;  %v1900_v10 = vmax.f32 %v5372_v2, %v1457_v1  ;;  %v1459_v20 = vpop.f32.mrb[53].mxu1  ;;  %v2366_v30 = vrot.slane %v2207_v53, 2  ;;  %v2367_v0 = vrot.slane %v2211_v40, 2 }
 0x24b   :  { %v2025_v57 = vmax.f32 %v1987_v61, 0.0  ;;  %v1901_v58 = vmax.f32 %v5376_v27, %v1459_v20  ;;  %v2405_v28 = vrot.slane %v5706_v29, 4  ;;  %v2226_v45 = vrot.slane %v5706_v29, 1 }
 0x24c   :  { %v1988_v9 = vadd.f32 %v5653_v11, %v1900_v10  ;;  %v2378_v1 = vrot.slane %v5698_v22, 2  ;;  %v5727_v10 = vld [vmem:[#allocation6 + $0x108] sm:$0xff]  ;;  %v2368_v20 = vsel %vm109_vm4, %v2366_v30, %v2367_v0 }
 0x24d   :  { %v5720_v44 = vmax.f32 %v2024_v13, %v2025_v57  ;;  %v1989_v2 = vadd.f32 %v5655_v46, %v1901_v58  ;;  %v1463_v63 = vpop.f32.mrb[54].mxu1  ;;  %v2406_v53 = vsel %vm131_vm7, %v2404_v43, %v2405_v28  ;;  %v5733_v58 = vld [vmem:[#allocation6 + $0x110] sm:$0xff] }
 0x24e   :  { %v2026_v34 = vmax.f32 %v1988_v9, 0.0  ;;  %v1902_v61 = vmax.f32 %v5381_v3, %v1463_v63  ;;  %v1465_v27 = vpop.f32.mrb[55].mxu1  ;;  %v5738_v3 = vld [vmem:[#allocation6 + $0x120] sm:$0xff]  ;;  %v5740_v63 = vld [vmem:[#allocation6 + $0x128] sm:$0xff]  ;;  %v5744_v43 = vsel %vm153_vm3, %v5701_v15, %v2406_v53  ;;  %v5757_v35 = vsel %vm109_vm4, %v2367_v0, %v2378_v1 }
 0x24f   :  { %v2230_v13 = vrot.slane %v5720_v44, 1  ;;  %v2027_v40 = vmax.f32 %v1989_v2, 0.0  ;;  %v1903_v57 = vmax.f32 %v5385_v55, %v1465_v27  ;;  %v2422_v30 = vrot.slane %v5720_v44, 4  ;;  %7115 = vst [vmem:[#allocation54_spill] sm:$0xff] %v5757_v35 }
 0x250   :  { %v1990_v9 = vadd.f32 %v5653_v11, %v1902_v61  ;;  %v5749_v2 = vsel %vm120_vm6, %v5696_v19, %v2368_v20 }
 0x251   :  { %7114 = vst [vmem:[#allocation53_spill] sm:$0xff] %v5749_v2  ;;  %v5751_v55 = vmax.f32 %v2026_v34, %v2027_v40  ;;  %v1991_v61 = vadd.f32 %v5655_v46, %v1903_v57  ;;  %v1469_v27 = vpop.f32.mrb[56].mxu1  ;;  %v5761_v56 = vsel %vm131_vm7, %v2405_v28, %v2422_v30  ;;  %v2227_v34 = vsel %vm142_vm0, %v5698_v22, %v2226_v45 }
 0x252   :  { %v2028_v12 = vmax.f32 %v1990_v9, 0.0  ;;  %v1904_v53 = vmax.f32 %v5390_v17, %v1469_v27  ;;  %v1471_v49 = vpop.f32.mrb[57].mxu1  ;;  %v2231_v28 = vsel %vm142_vm0, %v2226_v45, %v2230_v13 }
 0x253   :  { %v2029_v20 = vmax.f32 %v1991_v61, 0.0  ;;  %v1905_v40 = vmax.f32 %v5394_v14, %v1471_v49  ;;  %v2452_v27 = vrot.slane %v5751_v55, 6  ;;  %v2411_v14 = vrot.slane %v2231_v28, 4  ;;  %v5793_v28 = vld [vmem:[#allocation6 + $0x130] sm:$0xff] }
 0x254   :  { %v1992_v9 = vadd.f32 %v5653_v11, %v1904_v53  ;;  %v2426_v49 = vrot.slane %v2230_v13, 4  ;;  %v2410_v53 = vrot.slane %v2227_v34, 4  ;;  %v2250_v17 = vrot.slane %v5751_v55, 1 }
 0x255   :  { %v5774_v41 = vmax.f32 %v2028_v12, %v2029_v20  ;;  %v1993_v22 = vadd.f32 %v5655_v46, %v1905_v40  ;;  %v1475_v61 = vpop.f32.mrb[58].mxu1  ;;  %v5779_v0 = vsel %vm98_vm2, %v2422_v30, %v2452_v27 }
 0x256   :  { %v2030_v35 = vmax.f32 %v1992_v9, 0.0  ;;  %v1906_v57 = vmax.f32 %v5399_v4, %v1475_v61  ;;  %v1477_v2 = vpop.f32.mrb[59].mxu1  ;;  %7116 = vst [vmem:[#allocation55_spill] sm:$0xff] %v5779_v0  ;;  %v2412_v13 = vsel %vm131_vm7, %v2410_v53, %v2411_v14  ;;  %v5788_v4 = vsel %vm131_vm7, %v2411_v14, %v2426_v49  ;;  %v5795_v61 = vld [vmem:[#allocation6 + $0x138] sm:$0xff] }
 0x257   :  { %v2251_v19 = vrot.slane %v5774_v41, 1  ;;  %v2031_v45 = vmax.f32 %v1993_v22, 0.0  ;;  %v1907_v12 = vmax.f32 %v5403_v8, %v1477_v2  ;;  %v2458_v40 = vrot.slane %v5774_v41, 6  ;;  %7117 = vst [vmem:[#allocation56_spill] sm:$0xff] %v5788_v4 }
 0x258   :  { %v1994_v20 = vadd.f32 %v5653_v11, %v1906_v57  ;;  %v5798_v8 = vsel %vm153_vm3, %v2378_v1, %v2412_v13  ;;  %v2372_v14 = vrot.slane %v5689_v62, 2 }
 0x259   :  { %v5790_v9 = vmax.f32 %v2030_v35, %v2031_v45  ;;  %v1995_v30 = vadd.f32 %v5655_v46, %v1907_v12  ;;  %v1481_v34 = vpop.f32.mrb[60].mxu1  ;;  %7118 = vst [vmem:[#allocation57_spill] sm:$0xff] %v5798_v8  ;;  %v2252_v2 = vsel %vm142_vm0, %v2250_v17, %v2251_v19  ;;  %v5804_v35 = vsel %vm153_vm3, %v2452_v27, %v2458_v40  ;;  %v5824_v8 = vld [vmem:[#allocation6 + $0x140] sm:$0xff] }
 0x25a   :  { %v2032_v57 = vmax.f32 %v1994_v20, 0.0  ;;  %v1908_v22 = vmax.f32 %v5408_v48, %v1481_v34  ;;  %v1483_v53 = vpop.f32.mrb[61].mxu1  ;;  %7119 = vst [vmem:[#allocation58_spill] sm:$0xff] %v5804_v35  ;;  %v2454_v24 = vrot.slane %v2252_v2, 6  ;;  %v7120_v48 = vrot.slane %v5711_v47, 2  ;;  %v6006_v35 = vld [vmem:[#allocation6 + $0x1d8] sm:$0xff] }
 0x25b   :  { %v2033_v45 = vmax.f32 %v1995_v30, 0.0  ;;  %v1909_v12 = vmax.f32 %v5412_v37, %v1483_v53  ;;  %v2470_v4 = vrot.slane %v5790_v9, 6  ;;  %v2256_v20 = vrot.slane %v5790_v9, 1  ;;  %7147 = vst [vmem:[#allocation82_spill] sm:$0xff] %v6006_v35 }
 0x25c   :  { %v1996_v1 = vadd.f32 %v5653_v11, %v1908_v22  ;;  %v2374_v62 = vsel %vm109_vm4, %v2372_v14, %v7120_v48  ;;  %v5820_v34 = vsel %vm98_vm2, %v2426_v49, %v2454_v24  ;;  %v2238_v2 = vrot.slane %v5720_v44, 2 }
 0x25d   :  { %v1997_v27 = vadd.f32 %v5655_v46, %v1909_v12  ;;  %v1487_v13 = vpop.f32.mrb[62].mxu1  ;;  %v2471_v30 = vsel %vm153_vm3, %v2458_v40, %v2470_v4  ;;  %v5817_v37 = vmax.f32 %v2032_v57, %v2033_v45  ;;  %7121 = vst [vmem:[#allocation59_spill] sm:$0xff] %v5820_v34  ;;  %v2257_v49 = vsel %vm142_vm0, %v2251_v19, %v2256_v20 }
 0x25e   :  { %v2034_v22 = vmax.f32 %v1996_v1, 0.0  ;;  %v1910_v53 = vmax.f32 %v5417_v16, %v1487_v13  ;;  %v1489_v17 = vpop.f32.mrb[63].mxu1  ;;  %v5830_v14 = vsel %vm131_vm7, %v2471_v30, %v5790_v9  ;;  %v2462_v45 = vrot.slane %v2257_v49, 6 }
 0x25f   :  { %7122 = vst [vmem:[#allocation60_spill] sm:$0xff] %v5830_v14  ;;  %v2035_v40 = vmax.f32 %v1997_v27, 0.0  ;;  %v1911_v4 = vmax.f32 %v5421_v42, %v1489_v17  ;;  %v7038_v57 = vrot.slane %v5817_v37, 1  ;;  %v2474_v16 = vrot.slane %v2256_v20, 6 }
 0x260   :  { %v1998_v44 = vadd.f32 %v5653_v11, %v1910_v53  ;;  %v5838_v12 = vsel %vm120_vm6, %v5683_v39, %v2374_v62  ;;  %v2236_v17 = vrot.slane %v5706_v29, 2  ;;  %v5850_v62 = vld [vmem:[#allocation6 + $0x150] sm:$0xff] }
 0x261   :  { %7123 = vst [vmem:[#allocation61_spill] sm:$0xff] %v5838_v12  ;;  %v5840_v1 = vmax.f32 %v2034_v22, %v2035_v40  ;;  %v1999_v48 = vadd.f32 %v5655_v46, %v1911_v4  ;;  %v1493_v13 = vpop.f32.mrb[64].mxu1  ;;  %v2273_v19 = vsel %vm142_vm0, %v2256_v20, %v7038_v57  ;;  %v5852_v22 = vld [vmem:[#allocation6 + $0x158] sm:$0xff]  ;;  %v5855_v40 = vsel %vm153_vm3, %v2454_v24, %v2462_v45  ;;  %v5859_v12 = vld [vmem:[#allocation6 + $0x160] sm:$0xff]  ;;  %v5861_v20 = vld [vmem:[#allocation6 + $0x168] sm:$0xff] }
 0x262   :  { %v2036_v27 = vmax.f32 %v1998_v44, 0.0  ;;  %v1912_v30 = vmax.f32 %v5426_v31, %v1493_v13  ;;  %v1495_v53 = vpop.f32.mrb[65].mxu1  ;;  %7125 = vst [vmem:[#allocation63_spill] sm:$0xff] %v5855_v40  ;;  %v2242_v4 = vrot.slane %v5751_v55, 2  ;;  %v2475_v29 = vsel %vm153_vm3, %v2462_v45, %v2474_v16 }
 0x263   :  { %7124 = vst [vmem:[#allocation62_spill] sm:$0xff] %v5840_v1  ;;  %v2037_v49 = vmax.f32 %v1999_v48, 0.0  ;;  %v1913_v42 = vmax.f32 %v5430_v52, %v1495_v53  ;;  %v7040_v31 = vrot.slane %v5774_v41, 2  ;;  %v5867_v13 = vsel %vm131_vm7, %v2475_v29, %v2273_v19 }
 0x264   :  { %v2000_v44 = vadd.f32 %v5653_v11, %v1912_v30  ;;  %7126 = vst [vmem:[#allocation64_spill] sm:$0xff] %v5867_v13  ;;  %v2239_v24 = vsel %vm109_vm4, %v2236_v17, %v2238_v2  ;;  %v2416_v19 = vrot.slane %v2236_v17, 4  ;;  %v5900_v13 = vld [vmem:[#allocation6 + $0x170] sm:$0xff] }
 0x265   :  { %v5870_v57 = vmax.f32 %v2036_v27, %v2037_v49  ;;  %v2001_v55 = vadd.f32 %v5655_v46, %v1913_v42  ;;  %v1499_v52 = vpop.f32.mrb[66].mxu1  ;;  %v2417_v53 = vrot.slane %v2239_v24, 4  ;;  %v5883_v42 = vrot.slane %v5840_v1, 2 }
 0x266   :  { %v2038_v39 = vmax.f32 %v2000_v44, 0.0  ;;  %v1914_v45 = vmax.f32 %v5435_v21, %v1499_v52  ;;  %v1501_v16 = vpop.f32.mrb[67].mxu1  ;;  %v2243_v21 = vsel %vm109_vm4, %v2238_v2, %v2242_v4  ;;  %v5891_v24 = vsel %vm109_vm4, %v2242_v4, %v7040_v31  ;;  %v5907_v31 = vld [vmem:[#allocation6 + $0x178] sm:$0xff] }
 0x267   :  { %v5879_v29 = vrot.slane %v5870_v57, 2  ;;  %v2039_v27 = vmax.f32 %v2001_v55, 0.0  ;;  %v1915_v49 = vmax.f32 %v5439_v5, %v1501_v16  ;;  %7128 = vst [vmem:[#allocation66_spill] sm:$0xff] %v5883_v42  ;;  %v2418_v44 = vsel %vm131_vm7, %v2416_v19, %v2417_v53  ;;  %v5911_v16 = vld [vmem:[#allocation6 + $0x188] sm:$0xff] }
 0x268   :  { %v2002_v48 = vadd.f32 %v5653_v11, %v1914_v45  ;;  %v2306_v45 = vrot.slane %v5870_v57, 1 }
 0x269   :  { %7127 = vst [vmem:[#allocation65_spill] sm:$0xff] %v5879_v29  ;;  %v2139_v17 = vmax.f32 %v2038_v39, %v2039_v27  ;;  %v2003_v52 = vadd.f32 %v5655_v46, %v1915_v49  ;;  %v1505_v55 = vpop.f32.mrb[68].mxu1  ;;  %v2500_v5 = vsel %vm109_vm4, %v5883_v42, %v5879_v29  ;;  %v5909_v42 = vld [vmem:[#allocation6 + $0x180] sm:$0xff] }
 0x26a   :  { %v2040_v19 = vmax.f32 %v2002_v48, 0.0  ;;  %v1916_v2 = vmax.f32 %v5444_v7, %v1505_v55  ;;  %v1507_v30 = vpop.f32.mrb[69].mxu1  ;;  %v5904_v39 = vsel %vm164_vm5, %v5840_v1, %v2500_v5  ;;  %v7130_v48 = vrot.slane %v5701_v15, 2 }
 0x26b   :  { %7129 = vst [vmem:[#allocation67_spill] sm:$0xff] %v5904_v39  ;;  %v2308_v4 = vrot.slane %v2139_v17, 1  ;;  %v2041_v27 = vmax.f32 %v2003_v52, 0.0  ;;  %v1917_v49 = vmax.f32 %v5448_v59, %v1507_v30  ;;  %v5913_v57 = vrot.slane %v2139_v17, 2 }
 0x26c   :  { %v2004_v7 = vadd.f32 %v5653_v11, %v1916_v2  ;;  %v5919_v55 = vsel %vm153_vm3, %v7130_v48, %v2418_v44  ;;  %v2430_v5 = vrot.slane %v2243_v21, 4  ;;  %v2170_v39 = vrot.slane %v5664_v23, 1 }
 0x26d   :  { %7131 = vst [vmem:[#allocation68_spill] sm:$0xff] %v5919_v55  ;;  %v5922_v40 = vmax.f32 %v2040_v19, %v2041_v27  ;;  %v2005_v59 = vadd.f32 %v5655_v46, %v1917_v49  ;;  %v1511_v30 = vpop.f32.mrb[70].mxu1  ;;  %v5928_v17 = vsel %vm109_vm4, %v5879_v29, %v5913_v57  ;;  %v2309_v2 = vsel %vm142_vm0, %v2306_v45, %v2308_v4 }
 0x26e   :  { %7132 = vst [vmem:[#allocation69_spill] sm:$0xff] %v5928_v17  ;;  %v2042_v34 = vmax.f32 %v2004_v7, 0.0  ;;  %v1918_v15 = vmax.f32 %v5453_v51, %v1511_v30  ;;  %v1513_v44 = vpop.f32.mrb[71].mxu1  ;;  %v2503_v55 = vrot.slane %v2309_v2, 2  ;;  %v5942_v51 = vsel %vm131_vm7, %v2417_v53, %v2430_v5 }
 0x26f   :  { %v2312_v27 = vrot.slane %v5922_v40, 1  ;;  %v2043_v49 = vmax.f32 %v2005_v59, 0.0  ;;  %v1919_v48 = vmax.f32 %v5457_v38, %v1513_v44  ;;  %v2540_v7 = vrot.slane %v5922_v40, 4  ;;  %7133 = vst [vmem:[#allocation70_spill] sm:$0xff] %v5942_v51 }
 0x270   :  { %v2006_v29 = vadd.f32 %v5653_v11, %v1918_v15  ;;  %v7134_v59 = vrot.slane %v5891_v24, 6  ;;  %v7046_v51 = vrot.slane %v5840_v1, 1  ;;  %v6004_v1 = vld [vmem:[#allocation6 + $0x1d0] sm:$0xff] }
 0x271   :  { %v5944_v30 = vmax.f32 %v2042_v34, %v2043_v49  ;;  %v2007_v21 = vadd.f32 %v5655_v46, %v1919_v48  ;;  %v1517_v19 = vpop.f32.mrb[72].mxu1  ;;  %v2313_v17 = vsel %vm142_vm0, %v2308_v4, %v2312_v27  ;;  %v5956_v53 = vsel %vm109_vm4, %v5913_v57, %v2540_v7  ;;  %v5960_v4 = vld [vmem:[#allocation6 + $0x190] sm:$0xff]  ;;  %7146 = vst [vmem:[#allocation81_spill] sm:$0xff] %v6004_v1 }
 0x272   :  { %v5951_v38 = vsel %vm98_vm2, %v2430_v5, %v7134_v59  ;;  %v2044_v44 = vmax.f32 %v2006_v29, 0.0  ;;  %v1920_v15 = vmax.f32 %v5462_v26, %v1517_v19  ;;  %v1519_v52 = vpop.f32.mrb[73].mxu1  ;;  %7136 = vst [vmem:[#allocation72_spill] sm:$0xff] %v5956_v53  ;;  %v2502_v34 = vrot.slane %v2306_v45, 2  ;;  %7137 = vst [vmem:[#allocation73_spill] sm:$0xff] %v5960_v4  ;;  %v5964_v29 = vld [vmem:[#allocation6 + $0x198] sm:$0xff] }
 0x273   :  { %7135 = vst [vmem:[#allocation71_spill] sm:$0xff] %v5951_v38  ;;  %v2330_v2 = vrot.slane %v5944_v30, 1  ;;  %v2045_v49 = vmax.f32 %v2007_v21, 0.0  ;;  %v1921_v48 = vmax.f32 %v5466_v50, %v1519_v52  ;;  %7138 = vst [vmem:[#allocation74_spill] sm:$0xff] %v5964_v29  ;;  %v5966_v26 = vld [vmem:[#allocation6 + $0x1a0] sm:$0xff]  ;;  %v5968_v19 = vld [vmem:[#allocation6 + $0x1a8] sm:$0xff] }
 0x274   :  { %v2008_v5 = vadd.f32 %v5653_v11, %v1920_v15  ;;  %7139 = vst [vmem:[#allocation75_spill] sm:$0xff] %v5966_v26  ;;  %7140 = vst [vmem:[#allocation76_spill] sm:$0xff] %v5968_v19  ;;  %v2504_v45 = vsel %vm109_vm4, %v2502_v34, %v2503_v55  ;;  %v2514_v38 = vrot.slane %v2313_v17, 2  ;;  %v5985_v17 = vld [vmem:[#allocation6 + $0x1b0] sm:$0xff]  ;;  %v6024_v19 = vld [vmem:[#allocation6 + $0x1f8] sm:$0xff] }
 0x275   :  { %v5972_v21 = vmax.f32 %v2044_v44, %v2045_v49  ;;  %v2009_v50 = vadd.f32 %v5655_v46, %v1921_v48  ;;  %v1523_v52 = vpop.f32.mrb[74].mxu1  ;;  %v5978_v15 = vsel %vm164_vm5, %v7046_v51, %v2504_v45  ;;  %v5981_v53 = vsel %vm142_vm0, %v2312_v27, %v2330_v2  ;;  %7142 = vst [vmem:[#allocation78_spill] sm:$0xff] %v5985_v17  ;;  %v5987_v44 = vld [vmem:[#allocation6 + $0x1b8] sm:$0xff]  ;;  %v6022_v26 = vld [vmem:[#allocation6 + $0x1f0] sm:$0xff] }
 0x276   :  { %7141 = vst [vmem:[#allocation77_spill] sm:$0xff] %v5978_v15  ;;  %v2046_v14 = vmax.f32 %v2008_v5, 0.0  ;;  %v1922_v59 = vmax.f32 %v5471_v25, %v1523_v52  ;;  %v1525_v34 = vpop.f32.mrb[75].mxu1  ;;  %7143 = vst [vmem:[#allocation79_spill] sm:$0xff] %v5987_v44  ;;  %v7144_v49 = vrot.slane %v5944_v30, 4  ;;  %v5999_v25 = vld [vmem:[#allocation6 + $0x1c0] sm:$0xff] }
 0x277   :  { %v2047_v45 = vmax.f32 %v2009_v50, 0.0  ;;  %v1923_v51 = vmax.f32 %v5475_v60, %v1525_v34  ;;  %v6001_v52 = vld [vmem:[#allocation6 + $0x1c8] sm:$0xff]  ;;  %v6011_v60 = vsel %vm109_vm4, %v2503_v55, %v2514_v38  ;;  %v2542_v50 = vrot.slane %v5981_v53, 4  ;;  %7149 = vst [vmem:[#allocation84_spill] sm:$0xff] %v6022_v26  ;;  %7150 = vst [vmem:[#allocation85_spill] sm:$0xff] %v6024_v19  ;;  %v7154_v4 = vld [vmem:[#allocation14_spill] sm:$0xff] }
 0x278   :  { %v5992_v48 = vsel %vm131_vm7, %v2540_v7, %v7144_v49  ;;  %v2010_v15 = vadd.f32 %v5653_v11, %v1922_v59  ;;  %v6008_v7 = vld [vmem:[#allocation6 + $0x1e0] sm:$0xff]  ;;  %7148 = vst [vmem:[#allocation83_spill] sm:$0xff] %v6011_v60  ;;  %v2334_v34 = vrot.slane %v5972_v21, 1  ;;  %v7151_v55 = vrot.slane %v5671_v18, 1 }
 0x279   :  { %7145 = vst [vmem:[#allocation80_spill] sm:$0xff] %v5992_v48  ;;  %v6015_v49 = vmax.f32 %v2046_v14, %v2047_v45  ;;  %v2011_v5 = vadd.f32 %v5655_v46, %v1923_v51  ;;  %v1773_v27 = vpop.f32.mrb[88].mxu1  ;;  %v6020_v48 = vld [vmem:[#allocation6 + $0x1e8] sm:$0xff]  ;;  %v6035_v59 = vsel %vm109_vm4, %v2514_v38, %v2542_v50 }
 0x27a   :  { %v6029_v53 = vsel %vm142_vm0, %v2170_v39, %v7151_v55  ;;  %v2048_v60 = vmax.f32 %v2010_v15, 0.0  ;;  %v1924_v14 = vmax.f32 %v5479_v33, %v1773_v27  ;;  %v1775_v45 = vpop.f32.mrb[89].mxu1  ;;  %7153 = vst [vmem:[#allocation87_spill] sm:$0xff] %v6035_v59  ;;  %v6041_v39 = vld [vmem:[#allocation6 + $0x200] sm:$0xff]  ;;  %v6043_v15 = vld [vmem:[#allocation6 + $0x208] sm:$0xff]  ;;  %v2335_v55 = vsel %vm142_vm0, %v2330_v2, %v2334_v34 }
 0x27b   :  { %7152 = vst [vmem:[#allocation86_spill] sm:$0xff] %v6029_v53  ;;  %v2350_v17 = vrot.slane %v6015_v49, 1  ;;  %v2049_v44 = vmax.f32 %v2011_v5, 0.0  ;;  %v1925_v29 = vmax.f32 %v7154_v4, %v1775_v45  ;;  %7155 = vst [vmem:[#allocation14_spill] sm:$0xff] %v6041_v39  ;;  %v2550_v0 = vrot.slane %v2335_v55, 4  ;;  %v7158_v53 = vld [vmem:[#allocation15_spill] sm:$0xff] }
 0x27c   :  { %7156 = vst [vmem:[#allocation88_spill] sm:$0xff] %v6043_v15  ;;  %v2050_v33 = vadd.f32 %v5653_v11, %v1924_v14  ;;  %v2562_v51 = vrot.slane %v2334_v34, 4  ;;  %v7159_v2 = vld [vmem:[#allocation16_spill] sm:$0xff] }
 0x27d   :  { %v6051_v5 = vmax.f32 %v2048_v60, %v2049_v44  ;;  %v2051_v4 = vadd.f32 %v5655_v46, %v1925_v29  ;;  %v1779_v45 = vpop.f32.mrb[90].mxu1  ;;  %v2351_v27 = vsel %vm142_vm0, %v2334_v34, %v2350_v17  ;;  %v6061_v60 = vrot.slane %v5790_v9, 2 }
 0x27e   :  { %v2088_v59 = vmax.f32 %v2050_v33, 0.0  ;;  %v1926_v1 = vmax.f32 %v7158_v53, %v1779_v45  ;;  %v1781_v35 = vpop.f32.mrb[91].mxu1  ;;  %v7062_v33 = vrot.slane %v6015_v49, 6  ;;  %v6067_v55 = vsel %vm131_vm7, %v2542_v50, %v2550_v0 }
 0x27f   :  { %7157 = vst [vmem:[#allocation89_spill] sm:$0xff] %v6051_v5  ;;  %v2354_v38 = vrot.slane %v6051_v5, 1  ;;  %v2089_v26 = vmax.f32 %v2051_v4, 0.0  ;;  %v1927_v44 = vmax.f32 %v7159_v2, %v1781_v35  ;;  %v2606_v53 = vrot.slane %v6051_v5, 6  ;;  %7160 = vst [vmem:[#allocation15_spill] sm:$0xff] %v6067_v55  ;;  %v7161_v2 = vld [vmem:[#allocation17_spill] sm:$0xff] }
 0x280   :  { %v2052_v29 = vadd.f32 %v5653_v11, %v1926_v1  ;;  %v2563_v4 = vsel %vm131_vm7, %v2550_v0, %v2562_v51  ;;  %v2590_v39 = vrot.slane %v2351_v27, 6  ;;  %v2322_v50 = vrot.slane %v5922_v40, 2  ;;  %v7180_v40 = vld [vmem:[#allocation25_spill] sm:$0xff] }
 0x281   :  { %v2053_v45 = vadd.f32 %v5655_v46, %v1927_v44  ;;  %v1785_v34 = vpop.f32.mrb[92].mxu1  ;;  %v2145_v14 = vmax.f32 %v2088_v59, %v2089_v26  ;;  %v6075_v1 = vsel %vm153_vm3, %v7062_v33, %v2606_v53  ;;  %v2355_v5 = vsel %vm142_vm0, %v2350_v17, %v2354_v38  ;;  %v7162_v44 = vld [vmem:[#allocation18_spill] sm:$0xff] }
 0x282   :  { %v2090_v35 = vmax.f32 %v2052_v29, 0.0  ;;  %v1928_v9 = vmax.f32 %v7161_v2, %v1785_v34  ;;  %v1787_v15 = vpop.f32.mrb[93].mxu1  ;;  %v6081_v0 = vsel %vm142_vm0, %v2563_v4, %v2590_v39  ;;  %v2598_v51 = vrot.slane %v2355_v5, 6 }
 0x283   :  { %v2091_v55 = vmax.f32 %v2053_v45, 0.0  ;;  %v1929_v19 = vmax.f32 %v7162_v44, %v1787_v15  ;;  %2838 = vmatprep.mubr.f32.mxu0 %v2145_v14  ;;  %v2173_v59 = vrot.slane %v2145_v14, 1  ;;  %v2610_v27 = vrot.slane %v2354_v38, 6 }
 0x284   :  { %v2054_v26 = vadd.f32 %v5653_v11, %v1928_v9  ;;  %2839 = vmatmul.mubr.f32.vlgmr.msra.gmra.mrb[76].mxu0 %v5664_v23  ;;  %v7163_v45 = vpack.c.bf16 %v5727_v10, %v5725_v6  ;;  %v2189_v15 = vrot.slane %v2145_v14, 2  ;;  %v7164_v34 = vrot.slane %v5774_v41, 2  ;;  %v7165_v9 = vld [vmem:[#allocation19_spill] sm:$0xff]  ;;  %v7167_v10 = vld [vmem:[#allocation20_spill] sm:$0xff] }
 0x285   :  { %v2055_v29 = vadd.f32 %v5655_v46, %v1929_v19  ;;  %v1791_v53 = vpop.f32.mrb[94].mxu1  ;;  %v2146_v17 = vmax.f32 %v2090_v35, %v2091_v55  ;;  %v7166_v5 = vmov 0.0|0.0   ;;  %v6096_v19 = vsel %vm153_vm3, %v2590_v39, %v2598_v51 }
 0x286   :  { %4035 = vmatpush1.bf16.msra.mxu0 %v7163_v45  ;;  %v2265_v4 = vsel %vm109_vm4, %v7164_v34, %v6061_v60  ;;  %v2092_v2 = vmax.f32 %v2054_v26, 0.0  ;;  %v1930_v44 = vmax.f32 %v7165_v9, %v1791_v53  ;;  %v1793_v33 = vpop.f32.mrb[95].mxu1  ;;  %v6099_v38 = vsel %vm153_vm3, %v2598_v51, %v2610_v27  ;;  %v7169_v9 = vld [vmem:[#allocation21_spill] sm:$0xff] }
 0x287   :  { %4036 = vmatprep.subr.bf16.mxu0 %v7166_v5  ;;  %v2093_v6 = vmax.f32 %v2055_v29, 0.0  ;;  %v1931_v14 = vmax.f32 %v7167_v10, %v1793_v33  ;;  %2843 = vmatprep.mubr.f32.mxu0 %v2146_v17  ;;  %v2174_v55 = vrot.slane %v2146_v17, 1  ;;  %v2190_v41 = vrot.slane %v2146_v17, 2 }
 0x288   :  { %v2056_v35 = vadd.f32 %v5653_v11, %v1930_v44  ;;  %2844 = vmatmul.mubr.f32.gmra.mrb[78].mxu0 %v5671_v18  ;;  %v2466_v26 = vrot.slane %v2265_v4, 6  ;;  %v7063_v53 = vrot.slane %v5817_v37, 2  ;;  %v2478_v45 = vrot.slane %v6061_v60, 6 }
 0x289   :  { %v2147_v34 = vmax.f32 %v2092_v2, %v2093_v6  ;;  %v2057_v51 = vadd.f32 %v5655_v46, %v1931_v14  ;;  %v1797_v27 = vpop.f32.mrb[96].mxu1  ;;  %v7168_v33 = vpack.c.bf16 %v5736_v36, %v5733_v58  ;;  %v6112_v29 = vsel %vm142_vm0, %v2173_v59, %v2174_v55  ;;  %v7172_v36 = vld [vmem:[#allocation22_spill] sm:$0xff] }
 0x28a   :  { %v2094_v17 = vmax.f32 %v2056_v35, 0.0  ;;  %v1932_v4 = vmax.f32 %v7169_v9, %v1797_v27  ;;  %v1799_v44 = vpop.f32.mrb[97].mxu1  ;;  %v6117_v10 = vsel %vm109_vm4, %v2189_v15, %v2190_v41  ;;  %v7170_v2 = vrot.slane %v5891_v24, 6 }
 0x28b   :  { %4038 = vmatpush1.bf16.msra.mxu0 %v7168_v33  ;;  %v2095_v14 = vmax.f32 %v2057_v51, 0.0  ;;  %v1933_v58 = vmax.f32 %v7172_v36, %v1799_v44  ;;  %v6125_v33 = vrot.slane %v2147_v34, 2  ;;  %v6127_v59 = vrot.slane %v2147_v34, 1 }
 0x28c   :  { %4039 = vmatprep.subr.bf16.mxu0 %v7166_v5  ;;  %v6122_v6 = vsel %vm153_vm3, %v7170_v2, %v2466_v26  ;;  %v2058_v35 = vadd.f32 %v5653_v11, %v1932_v4  ;;  %v2558_v27 = vrot.slane %v5972_v21, 4  ;;  %v2287_v15 = vsel %vm109_vm4, %v6061_v60, %v7063_v53  ;;  %v7174_v60 = vld [vmem:[#allocation23_spill] sm:$0xff] }
 0x28d   :  { %7171 = vst [vmem:[#allocation16_spill] sm:$0xff] %v6122_v6  ;;  %v2479_v24 = vsel %vm153_vm3, %v2466_v26, %v2478_v45  ;;  %v2148_v9 = vmax.f32 %v2094_v17, %v2095_v14  ;;  %v2059_v51 = vadd.f32 %v5655_v46, %v1933_v58  ;;  %v1803_v2 = vpop.f32.mrb[98].mxu1  ;;  %v7173_v44 = vpack.c.bf16 %v5740_v63, %v5738_v3 }
 0x28e   :  { %v6142_v4 = vsel %vm142_vm0, %v2174_v55, %v6127_v59  ;;  %v6146_v36 = vsel %vm109_vm4, %v2190_v41, %v6125_v33  ;;  %v2096_v39 = vmax.f32 %v2058_v35, 0.0  ;;  %v1934_v53 = vmax.f32 %v7174_v60, %v1803_v2  ;;  %v1805_v26 = vpop.f32.mrb[99].mxu1  ;;  %v7176_v55 = vld [vmem:[#allocation24_spill] sm:$0xff]  ;;  %v6157_v41 = vld [vmem:[#allocation6 + $0x218] sm:$0xff] }
 0x28f   :  { %4041 = vmatpush1.bf16.msra.mxu0 %v7173_v44  ;;  %v6152_v17 = vsel %vm131_vm7, %v2479_v24, %v2287_v15  ;;  %v2208_v3 = vrot.slane %v2148_v9, 1  ;;  %v2216_v63 = vrot.slane %v2148_v9, 2  ;;  %v2097_v14 = vmax.f32 %v2059_v51, 0.0  ;;  %v6155_v44 = vld [vmem:[#allocation6 + $0x210] sm:$0xff] }
 0x290   :  { %4042 = vmatprep.subr.bf16.mxu0 %v7166_v5  ;;  %7175 = vst [vmem:[#allocation17_spill] sm:$0xff] %v6152_v17  ;;  %v1935_v58 = vmax.f32 %v7176_v55, %v1805_v26  ;;  %v2060_v35 = vadd.f32 %v5653_v11, %v1934_v53  ;;  %v7177_v2 = vrot.slane %v5944_v30, 4  ;;  %v6167_v15 = vsel %vm109_vm4, %v5913_v57, %v2322_v50 }
 0x291   :  { %v7178_v24 = vrot.slane %v5944_v30, 2  ;;  %v2149_v51 = vmax.f32 %v2096_v39, %v2097_v14  ;;  %v1809_v26 = vpop.f32.mrb[100].mxu1  ;;  %v7179_v55 = vpack.c.bf16 %v5795_v61, %v5793_v28  ;;  %v2209_v57 = vsel %vm142_vm0, %v6127_v59, %v2208_v3  ;;  %v7181_v28 = vld [vmem:[#allocation26_spill] sm:$0xff] }
 0x292   :  { %v2559_v60 = vsel %vm131_vm7, %v7177_v2, %v2558_v27  ;;  %v2061_v53 = vadd.f32 %v5655_v46, %v1935_v58  ;;  %v6179_v27 = vsel %vm109_vm4, %v6125_v33, %v2216_v63  ;;  %v2098_v2 = vmax.f32 %v2060_v35, 0.0 }
 0x293   :  { %v6174_v9 = vsel %vm109_vm4, %v2322_v50, %v7178_v24  ;;  %4044 = vmatpush1.bf16.msra.mxu0 %v7179_v55  ;;  %v1936_v45 = vmax.f32 %v7180_v40, %v1809_v26  ;;  %v1811_v50 = vpop.f32.mrb[101].mxu1  ;;  %v2637_v39 = vsel %vm120_vm6, %v2147_v34, %v6179_v27  ;;  %v6192_v58 = vrot.slane %v2149_v51, 1  ;;  %v7185_v26 = vld [vmem:[#allocation28_spill] sm:$0xff] }
 0x294   :  { %4045 = vmatprep.subr.bf16.mxu0 %v7166_v5  ;;  %v2099_v24 = vmax.f32 %v2061_v53, 0.0  ;;  %v1937_v61 = vmax.f32 %v7181_v28, %v1811_v50  ;;  %2848 = vmatprep.mubr.f32.mxu0 %v2637_v39  ;;  %v6195_v55 = vrot.slane %v2149_v51, 2  ;;  %v2407_v34 = vrot.slane %v2149_v51, 4  ;;  %v7184_v28 = vld [vmem:[#allocation27_spill] sm:$0xff] }
 0x295   :  { %v2062_v35 = vadd.f32 %v5653_v11, %v1936_v45  ;;  %2849 = vmatmul.mubr.f32.gmra.mrb[80].mxu0 %v5694_v32  ;;  %v7182_v40 = vrot.slane %v5972_v21, 6  ;;  %v1815_v50 = vpop.f32.mrb[102].mxu1  ;;  %v7183_v45 = vpack.c.bf16 %v5826_v54, %v5824_v8  ;;  %v2213_v32 = vsel %vm142_vm0, %v2208_v3, %v6192_v58 }
 0x296   :  { %v6205_v14 = vmax.f32 %v2098_v2, %v2099_v24  ;;  %v2063_v53 = vadd.f32 %v5655_v46, %v1937_v61  ;;  %v6210_v39 = vsel %vm109_vm4, %v2216_v63, %v6195_v55  ;;  %v2369_v2 = vrot.slane %v2209_v57, 2 }
 0x297   :  { %v6203_v17 = vsel %vm142_vm0, %v2559_v60, %v7182_v40  ;;  %4047 = vmatpush1.bf16.msra.mxu0 %v7183_v45  ;;  %v2100_v51 = vmax.f32 %v2062_v35, 0.0  ;;  %v1938_v60 = vmax.f32 %v7184_v28, %v1815_v50  ;;  %v1817_v40 = vpop.f32.mrb[103].mxu1  ;;  %2853 = vmatprep.mubr.f32.mxu0 %v6210_v39  ;;  %v2370_v24 = vrot.slane %v2213_v32, 2 }
 0x298   :  { %4048 = vmatprep.subr.bf16.mxu0 %v7166_v5  ;;  %v2228_v63 = vrot.slane %v6205_v14, 1  ;;  %v2101_v61 = vmax.f32 %v2063_v53, 0.0  ;;  %v1939_v6 = vmax.f32 %v7185_v26, %v1817_v40  ;;  %v2408_v3 = vrot.slane %v6205_v14, 4  ;;  %v7187_v40 = vld [vmem:[#allocation29_spill] sm:$0xff] }
 0x299   :  { %v2064_v8 = vadd.f32 %v5653_v11, %v1938_v60  ;;  %2854 = vmatmul.mubr.f32.gmra.mrb[82].mxu0 %v5711_v47  ;;  %v2371_v35 = vsel %vm109_vm4, %v2369_v2, %v2370_v24  ;;  %v2380_v50 = vrot.slane %v6192_v58, 2  ;;  %v1821_v32 = vpop.f32.mrb[104].mxu1  ;;  %v7186_v26 = vpack.c.bf16 %v5852_v22, %v5850_v62 }
 0x29a   :  { %v6228_v45 = vmax.f32 %v2100_v51, %v2101_v61  ;;  %v2065_v57 = vadd.f32 %v5655_v46, %v1939_v6  ;;  %v6236_v53 = vsel %vm120_vm6, %v6127_v59, %v2371_v35  ;;  %v2229_v28 = vsel %vm142_vm0, %v6192_v58, %v2228_v63  ;;  %v1823_v54 = vpop.f32.mrb[105].mxu1  ;;  %v7188_v61 = vld [vmem:[#allocation30_spill] sm:$0xff] }
 0x29b   :  { %4050 = vmatpush1.bf16.msra.mxu0 %v7186_v26  ;;  %v2102_v60 = vmax.f32 %v2064_v8, 0.0  ;;  %v1940_v2 = vmax.f32 %v7187_v40, %v1821_v32  ;;  %v2409_v51 = vsel %vm131_vm7, %v2407_v34, %v2408_v3  ;;  %v6244_v6 = vsel %vm109_vm4, %v2370_v24, %v2380_v50 }
 0x29c   :  { %4051 = vmatprep.subr.bf16.mxu0 %v7166_v5  ;;  %v2232_v22 = vrot.slane %v6228_v45, 1  ;;  %v2103_v59 = vmax.f32 %v2065_v57, 0.0  ;;  %v1941_v35 = vmax.f32 %v7188_v61, %v1823_v54  ;;  %v2643_v8 = vsel %vm153_vm3, %v6195_v55, %v2409_v51  ;;  %v7190_v51 = vld [vmem:[#allocation31_spill] sm:$0xff] }
 0x29d   :  { %v2066_v58 = vadd.f32 %v5653_v11, %v1940_v2  ;;  %v2424_v32 = vrot.slane %v6228_v45, 4  ;;  %v2413_v34 = vrot.slane %v2229_v28, 4  ;;  %2858 = vmatprep.mubr.f32.mxu0 %v2643_v8  ;;  %v1827_v40 = vpop.f32.mrb[106].mxu1  ;;  %v7189_v62 = vpack.c.bf16 %v5861_v20, %v5859_v12  ;;  %v7191_v20 = vld [vmem:[#allocation32_spill] sm:$0xff] }
 0x29e   :  { %v6253_v26 = vmax.f32 %v2102_v60, %v2103_v59  ;;  %v2067_v24 = vadd.f32 %v5655_v46, %v1941_v35  ;;  %v2233_v54 = vsel %vm142_vm0, %v2228_v63, %v2232_v22  ;;  %v2428_v57 = vrot.slane %v2232_v22, 4  ;;  %2859 = vmatmul.mubr.f32.gmra.mrb[84].mxu0 %v5744_v43  ;;  %v1829_v47 = vpop.f32.mrb[107].mxu1 }
 0x29f   :  { %4053 = vmatpush1.bf16.msra.mxu0 %v7189_v62  ;;  %v2104_v2 = vmax.f32 %v2066_v58, 0.0  ;;  %v1942_v61 = vmax.f32 %v7190_v51, %v1827_v40  ;;  %v2425_v28 = vsel %vm131_vm7, %v2408_v3, %v2424_v32  ;;  %v2414_v60 = vrot.slane %v2233_v54, 4 }
 0x2a0   :  { %4054 = vmatprep.subr.bf16.mxu0 %v7166_v5  ;;  %v7065_v59 = vrot.slane %v6228_v45, 2  ;;  %v2244_v35 = vrot.slane %v6253_v26, 2  ;;  %v2105_v12 = vmax.f32 %v2067_v24, 0.0  ;;  %v1943_v62 = vmax.f32 %v7191_v20, %v1829_v47  ;;  %2863 = vmatprep.mubr.f32.mxu0 %v2425_v28 }
 0x2a1   :  { %v2068_v63 = vadd.f32 %v5653_v11, %v1942_v61  ;;  %v2453_v43 = vrot.slane %v6253_v26, 6  ;;  %v2415_v22 = vsel %vm131_vm7, %v2413_v34, %v2414_v60  ;;  %v6271_v58 = vsel %vm131_vm7, %v2414_v60, %v2428_v57  ;;  %v1833_v54 = vpop.f32.mrb[108].mxu1  ;;  %v7193_v34 = vld [vmem:[#allocation33_spill] sm:$0xff] }
 0x2a2   :  { %v2253_v3 = vrot.slane %v6253_v26, 1  ;;  %v6274_v8 = vmax.f32 %v2104_v2, %v2105_v12  ;;  %v2069_v40 = vadd.f32 %v5655_v46, %v1943_v62  ;;  %v7192_v47 = vpack.c.bf16 %v5907_v31, %v5900_v13  ;;  %2864 = vmatmul.mubr.f32.gmra.mrb[86].mxu0 %v5761_v56  ;;  %v1835_v28 = vpop.f32.mrb[109].mxu1  ;;  %v7196_v62 = vld [vmem:[#allocation34_spill] sm:$0xff]  ;;  %v7224_v26 = vld [vmem:[#allocation41_spill] sm:$0xff] }
 0x2a3   :  { %v6281_v24 = vsel %vm153_vm3, %v2380_v50, %v2415_v22  ;;  %v2106_v51 = vmax.f32 %v2068_v63, 0.0  ;;  %v1944_v61 = vmax.f32 %v7193_v34, %v1833_v54  ;;  %v2649_v60 = vsel %vm98_vm2, %v2424_v32, %v2453_v43 }
 0x2a4   :  { %4056 = vmatpush1.bf16.msra.mxu0 %v7192_v47  ;;  %v7194_v2 = vrot.slane %v6210_v39, 2  ;;  %v7195_v12 = vrot.slane %v6179_v27, 2  ;;  %v2254_v13 = vrot.slane %v6274_v8, 1  ;;  %v2107_v20 = vmax.f32 %v2069_v40, 0.0  ;;  %2868 = vmatprep.mubr.f32.mxu0 %v2649_v60 }
 0x2a5   :  { %4057 = vmatprep.subr.bf16.mxu0 %v7166_v5  ;;  %v1945_v56 = vmax.f32 %v7196_v62, %v1835_v28  ;;  %v2070_v63 = vadd.f32 %v5653_v11, %v1944_v61  ;;  %v2460_v32 = vrot.slane %v6274_v8, 6  ;;  %v7066_v27 = vrot.slane %v6195_v55, 2  ;;  %v1839_v34 = vpop.f32.mrb[110].mxu1 }
 0x2a6   :  { %v2377_v31 = vsel %vm109_vm4, %v7195_v12, %v7194_v2  ;;  %v6302_v54 = vmax.f32 %v2106_v51, %v2107_v20  ;;  %v7197_v40 = vpack.c.bf16 %v5911_v16, %v5909_v42  ;;  %v2255_v28 = vsel %vm142_vm0, %v2253_v3, %v2254_v13  ;;  %v7199_v2 = vld [vmem:[#allocation55_spill] sm:$0xff]  ;;  %v7201_v3 = vld [vmem:[#allocation36_spill] sm:$0xff] }
 0x2a7   :  { %v6299_v22 = vsel %vm120_vm6, %v6125_v33, %v2377_v31  ;;  %v2071_v47 = vadd.f32 %v5655_v46, %v1945_v56  ;;  %v7198_v61 = vrot.slane %v6205_v14, 2  ;;  %v2108_v60 = vmax.f32 %v2070_v63, 0.0  ;;  %2869 = vmatmul.mubr.f32.gmra.mrb[88].mxu0 %v7199_v2  ;;  %v7200_v51 = vld [vmem:[#allocation35_spill] sm:$0xff]  ;;  %v1841_v31 = vpop.f32.mrb[111].mxu1 }
 0x2a8   :  { %4059 = vmatpush1.bf16.msra.mxu0 %v7197_v40  ;;  %v1946_v12 = vmax.f32 %v7200_v51, %v1839_v34  ;;  %v2461_v20 = vsel %vm153_vm3, %v2453_v43, %v2460_v32  ;;  %v2455_v42 = vrot.slane %v2255_v28, 6  ;;  %v1947_v62 = vmax.f32 %v7201_v3, %v1841_v31 }
 0x2a9   :  { %v6314_v33 = vsel %vm109_vm4, %v7198_v61, %v7065_v59  ;;  %4060 = vmatprep.subr.bf16.mxu0 %v7166_v5  ;;  %v2109_v16 = vmax.f32 %v2071_v47, 0.0  ;;  %2873 = vmatprep.mubr.f32.mxu0 %v2461_v20  ;;  %v2472_v56 = vrot.slane %v6302_v54, 6  ;;  %v2258_v40 = vrot.slane %v6302_v54, 1  ;;  %v1845_v51 = vpop.f32.mrb[112].mxu1  ;;  %v7208_v59 = vld [vmem:[#allocation58_spill] sm:$0xff] }
 0x2aa   :  { %v2072_v63 = vadd.f32 %v5653_v11, %v1946_v12  ;;  %v6325_v61 = vsel %vm98_vm2, %v2428_v57, %v2455_v42  ;;  %v7202_v43 = vrot.slane %v6210_v39, 2  ;;  %v7204_v47 = vrot.slane %v6205_v14, 2  ;;  %v7205_v12 = vld [vmem:[#allocation74_spill] sm:$0xff]  ;;  %v7206_v57 = vld [vmem:[#allocation73_spill] sm:$0xff]  ;;  %v1847_v14 = vpop.f32.mrb[113].mxu1 }
 0x2ab   :  { %v2073_v2 = vadd.f32 %v5655_v46, %v1947_v62  ;;  %v2473_v31 = vsel %vm153_vm3, %v2460_v32, %v2472_v56  ;;  %v6338_v20 = vmax.f32 %v2108_v60, %v2109_v16  ;;  %v7207_v3 = vpack.c.bf16 %v7205_v12, %v7206_v57  ;;  %2874 = vmatmul.mubr.f32.gmra.mrb[90].mxu0 %v7208_v59  ;;  %v7210_v16 = vld [vmem:[#allocation38_spill] sm:$0xff] }
 0x2ac   :  { %v6332_v34 = vsel %vm109_vm4, %v7202_v43, %v7066_v27  ;;  %v2419_v28 = vrot.slane %v7204_v47, 4  ;;  %v2259_v50 = vsel %vm142_vm0, %v2254_v13, %v2258_v40  ;;  %v2110_v39 = vmax.f32 %v2072_v63, 0.0  ;;  %v7209_v43 = vld [vmem:[#allocation37_spill] sm:$0xff] }
 0x2ad   :  { %7203 = vst [vmem:[#allocation18_spill] sm:$0xff] %v6332_v34  ;;  %4062 = vmatpush1.bf16.msra.mxu0 %v7207_v3  ;;  %v1948_v27 = vmax.f32 %v7209_v43, %v1845_v51  ;;  %v2655_v62 = vsel %vm131_vm7, %v2473_v31, %v6302_v54  ;;  %v2464_v32 = vrot.slane %v2259_v50, 6  ;;  %v2111_v60 = vmax.f32 %v2073_v2, 0.0  ;;  %v1851_v57 = vpop.f32.mrb[114].mxu1  ;;  %v7212_v3 = vld [vmem:[#allocation76_spill] sm:$0xff]  ;;  %v7213_v43 = vld [vmem:[#allocation75_spill] sm:$0xff] }
 0x2ae   :  { %4063 = vmatprep.subr.bf16.mxu0 %v7166_v5  ;;  %v1949_v56 = vmax.f32 %v7210_v16, %v1847_v14  ;;  %2878 = vmatprep.mubr.f32.mxu0 %v2655_v62  ;;  %v2274_v47 = vrot.slane %v6338_v20, 1  ;;  %v2476_v12 = vrot.slane %v2258_v40, 6  ;;  %v2420_v63 = vrot.slane %v6314_v33, 4  ;;  %v7215_v62 = vld [vmem:[#allocation60_spill] sm:$0xff]  ;;  %v7216_v16 = vld [vmem:[#allocation39_spill] sm:$0xff]  ;;  %v1853_v34 = vpop.f32.mrb[115].mxu1 }
 0x2af   :  { %v2074_v13 = vadd.f32 %v5653_v11, %v1948_v27  ;;  %v6353_v59 = vsel %vm153_vm3, %v2455_v42, %v2464_v32  ;;  %v7211_v51 = vrot.slane %v6228_v45, 2  ;;  %v6361_v2 = vmax.f32 %v2110_v39, %v2111_v60  ;;  %2879 = vmatmul.mubr.f32.gmra.mrb[92].mxu0 %v7215_v62  ;;  %v7222_v62 = vld [vmem:[#allocation78_spill] sm:$0xff] }
 0x2b0   :  { %v2075_v31 = vadd.f32 %v5655_v46, %v1949_v56  ;;  %v7214_v14 = vpack.c.bf16 %v7212_v3, %v7213_v43  ;;  %v2275_v27 = vsel %vm142_vm0, %v2258_v40, %v2274_v47  ;;  %v2477_v42 = vsel %vm153_vm3, %v2464_v32, %v2476_v12  ;;  %2883 = vmatprep.mubr.f32.mxu0 %v6338_v20  ;;  %v7217_v40 = vld [vmem:[#allocation40_spill] sm:$0xff] }
 0x2b1   :  { %v2245_v50 = vsel %vm109_vm4, %v7211_v51, %v2244_v35  ;;  %v2112_v33 = vmax.f32 %v2074_v13, 0.0  ;;  %v1950_v45 = vmax.f32 %v7216_v16, %v1851_v57  ;;  %v6373_v39 = vsel %vm131_vm7, %v2477_v42, %v2275_v27  ;;  %v7221_v42 = vld [vmem:[#allocation79_spill] sm:$0xff] }
 0x2b2   :  { %4065 = vmatpush1.bf16.msra.mxu0 %v7214_v14  ;;  %v2421_v60 = vsel %vm131_vm7, %v2419_v28, %v2420_v63  ;;  %v2113_v51 = vmax.f32 %v2075_v31, 0.0  ;;  %v1951_v32 = vmax.f32 %v7217_v40, %v1853_v34  ;;  %v7067_v12 = vrot.slane %v6361_v2, 1  ;;  %v1857_v34 = vpop.f32.mrb[116].mxu1 }
 0x2b3   :  { %4066 = vmatprep.subr.bf16.mxu0 %v7166_v5  ;;  %v2076_v13 = vadd.f32 %v5653_v11, %v1950_v45  ;;  %v7218_v57 = vrot.slane %v6195_v55, 2  ;;  %v2432_v43 = vrot.slane %v2245_v50, 4  ;;  %v7220_v14 = vrot.slane %v6274_v8, 2  ;;  %2884 = vmatmul.mubr.f32.gmra.mrb[94].mxu0 %v5817_v37 }
 0x2b4   :  { %v2157_v31 = vmax.f32 %v2112_v33, %v2113_v51  ;;  %v2077_v27 = vadd.f32 %v5655_v46, %v1951_v32  ;;  %v7223_v16 = vpack.c.bf16 %v7221_v42, %v7222_v62  ;;  %v6398_v55 = vsel %vm142_vm0, %v2274_v47, %v7067_v12 }
 0x2b5   :  { %v6384_v3 = vsel %vm153_vm3, %v7218_v57, %v2421_v60  ;;  %v2263_v28 = vsel %vm109_vm4, %v2244_v35, %v7220_v14  ;;  %v2114_v45 = vmax.f32 %v2076_v13, 0.0  ;;  %v1952_v60 = vmax.f32 %v7224_v26, %v1857_v34  ;;  %v1859_v35 = vpop.f32.mrb[117].mxu1  ;;  %v7226_v57 = vld [vmem:[#allocation42_spill] sm:$0xff] }
 0x2b6   :  { %7219 = vst [vmem:[#allocation19_spill] sm:$0xff] %v6384_v3  ;;  %4068 = vmatpush1.bf16.msra.mxu0 %v7223_v16  ;;  %v2457_v50 = vrot.slane %v2263_v28, 6  ;;  %v6404_v33 = vsel %vm131_vm7, %v2420_v63, %v2432_v43  ;;  %v2266_v51 = vrot.slane %v6302_v54, 2  ;;  %v6407_v40 = vrot.slane %v2157_v31, 2  ;;  %v1863_v16 = vpop.f32.mrb[118].mxu1 }
 0x2b7   :  { %4069 = vmatprep.subr.bf16.mxu0 %v7166_v5  ;;  %7225 = vst [vmem:[#allocation20_spill] sm:$0xff] %v6404_v33  ;;  %v2115_v32 = vmax.f32 %v2077_v27, 0.0  ;;  %v1953_v47 = vmax.f32 %v7226_v57, %v1859_v35  ;;  %v6411_v14 = vrot.slane %v6361_v2, 2  ;;  %v2078_v13 = vadd.f32 %v5653_v11, %v1952_v60  ;;  %v7230_v35 = vld [vmem:[#allocation43_spill] sm:$0xff]  ;;  %v1865_v57 = vpop.f32.mrb[119].mxu1 }
 0x2b8   :  { %v6415_v28 = vsel %vm98_vm2, %v2432_v43, %v2457_v50  ;;  %v7228_v34 = vrot.slane %v6274_v8, 2  ;;  %v7068_v42 = vrot.slane %v6338_v20, 2  ;;  %v2307_v54 = vrot.slane %v2157_v31, 1 }
 0x2b9   :  { %7227 = vst [vmem:[#allocation21_spill] sm:$0xff] %v6415_v28  ;;  %v2158_v62 = vmax.f32 %v2114_v45, %v2115_v32  ;;  %v2079_v27 = vadd.f32 %v5655_v46, %v1953_v47  ;;  %v2501_v26 = vsel %vm109_vm4, %v6411_v14, %v6407_v40  ;;  %v7229_v60 = vpack.c.bf16 %v6001_v52, %v5999_v25  ;;  %v7231_v47 = vld [vmem:[#allocation44_spill] sm:$0xff]  ;;  %v7232_v52 = vld [vmem:[#allocation67_spill] sm:$0xff] }
 0x2ba   :  { %v2267_v63 = vsel %vm109_vm4, %v7228_v34, %v2266_v51  ;;  %v2116_v43 = vmax.f32 %v2078_v13, 0.0  ;;  %v1954_v8 = vmax.f32 %v7230_v35, %v1863_v16  ;;  %v2661_v34 = vsel %vm164_vm5, %v6361_v2, %v2501_v26  ;;  %v7234_v35 = vld [vmem:[#allocation82_spill] sm:$0xff] }
 0x2bb   :  { %4071 = vmatpush1.bf16.msra.mxu0 %v7229_v60  ;;  %v2468_v31 = vrot.slane %v2267_v63, 6  ;;  %v2310_v45 = vrot.slane %v2158_v62, 1  ;;  %v2117_v32 = vmax.f32 %v2079_v27, 0.0  ;;  %v1955_v56 = vmax.f32 %v7231_v47, %v1865_v57  ;;  %2888 = vmatprep.mubr.f32.mxu0 %v2661_v34  ;;  %v1869_v60 = vpop.f32.mrb[120].mxu1  ;;  %v7237_v47 = vld [vmem:[#allocation45_spill] sm:$0xff] }
 0x2bc   :  { %4072 = vmatprep.subr.bf16.mxu0 %v7166_v5  ;;  %v6433_v12 = vrot.slane %v2158_v62, 2  ;;  %v2080_v25 = vadd.f32 %v5653_v11, %v1954_v8  ;;  %2889 = vmatmul.mubr.f32.gmra.mrb[96].mxu0 %v7232_v52  ;;  %v2289_v16 = vsel %vm109_vm4, %v2266_v51, %v7068_v42  ;;  %v2480_v26 = vrot.slane %v2266_v51, 6  ;;  %v7235_v8 = vld [vmem:[#allocation81_spill] sm:$0xff]  ;;  %v1871_v51 = vpop.f32.mrb[121].mxu1 }
 0x2bd   :  { %v6438_v13 = vsel %vm153_vm3, %v2457_v50, %v2468_v31  ;;  %v6443_v63 = vmax.f32 %v2116_v43, %v2117_v32  ;;  %v2081_v27 = vadd.f32 %v5655_v46, %v1955_v56  ;;  %v7236_v57 = vpack.c.bf16 %v7234_v35, %v7235_v8 }
 0x2be   :  { %7233 = vst [vmem:[#allocation22_spill] sm:$0xff] %v6438_v13  ;;  %v6449_v62 = vsel %vm109_vm4, %v6407_v40, %v6433_v12  ;;  %v2311_v50 = vsel %vm142_vm0, %v2307_v54, %v2310_v45  ;;  %v2118_v34 = vmax.f32 %v2080_v25, 0.0  ;;  %v1956_v52 = vmax.f32 %v7237_v47, %v1869_v60  ;;  %v7238_v13 = vld [vmem:[#allocation46_spill] sm:$0xff] }
 0x2bf   :  { %4074 = vmatpush1.bf16.msra.mxu0 %v7236_v57  ;;  %2893 = vmatprep.mubr.f32.mxu0 %v6449_v62  ;;  %v2505_v56 = vrot.slane %v2307_v54, 2  ;;  %v2506_v43 = vrot.slane %v2311_v50, 2  ;;  %v2314_v32 = vrot.slane %v6443_v63, 1  ;;  %v2119_v42 = vmax.f32 %v2081_v27, 0.0  ;;  %v7241_v57 = vld [vmem:[#allocation69_spill] sm:$0xff] }
 0x2c0   :  { %4075 = vmatprep.subr.bf16.mxu0 %v7166_v5  ;;  %v1957_v28 = vmax.f32 %v7238_v13, %v1871_v51  ;;  %v7239_v35 = vrot.slane %v6015_v49, 6  ;;  %v7240_v8 = vrot.slane %v5972_v21, 6  ;;  %v2082_v60 = vadd.f32 %v5653_v11, %v1956_v52  ;;  %2894 = vmatmul.mubr.f32.gmra.mrb[98].mxu0 %v7241_v57  ;;  %v1875_v51 = vpop.f32.mrb[122].mxu1 }
 0x2c1   :  { %v2541_v47 = vrot.slane %v6443_v63, 4  ;;  %v2507_v54 = vsel %vm109_vm4, %v2505_v56, %v2506_v43  ;;  %v2481_v50 = vsel %vm153_vm3, %v2468_v31, %v2480_v26  ;;  %v6472_v27 = vmax.f32 %v2118_v34, %v2119_v42  ;;  %v7244_v56 = vld [vmem:[#allocation47_spill] sm:$0xff]  ;;  %v1877_v31 = vpop.f32.mrb[123].mxu1  ;;  %v7246_v34 = vld [vmem:[#allocation72_spill] sm:$0xff] }
 0x2c2   :  { %v6465_v25 = vsel %vm153_vm3, %v7240_v8, %v7239_v35  ;;  %v2083_v13 = vadd.f32 %v5655_v46, %v1957_v28  ;;  %v7242_v33 = vpack.c.bf16 %v6020_v48, %v6008_v7  ;;  %v7243_v35 = vrot.slane %v6361_v2, 1 }
 0x2c3   :  { %v2315_v8 = vsel %vm142_vm0, %v2310_v45, %v2314_v32  ;;  %v2120_v57 = vmax.f32 %v2082_v60, 0.0  ;;  %v1958_v3 = vmax.f32 %v7244_v56, %v1875_v51  ;;  %v2667_v42 = vsel %vm109_vm4, %v6433_v12, %v2541_v47  ;;  %v7248_v56 = vld [vmem:[#allocation85_spill] sm:$0xff] }
 0x2c4   :  { %4077 = vmatpush1.bf16.msra.mxu0 %v7242_v33  ;;  %v6481_v52 = vsel %vm164_vm5, %v7243_v35, %v2507_v54  ;;  %v2516_v28 = vrot.slane %v2315_v8, 2  ;;  %v2332_v48 = vrot.slane %v6472_v27, 1  ;;  %v2121_v7 = vmax.f32 %v2083_v13, 0.0  ;;  %v7245_v33 = vld [vmem:[#allocation48_spill] sm:$0xff]  ;;  %2898 = vmatprep.mubr.f32.mxu0 %v2667_v42  ;;  %v1881_v8 = vpop.f32.mrb[124].mxu1 }
 0x2c5   :  { %4078 = vmatprep.subr.bf16.mxu0 %v7166_v5  ;;  %v1959_v26 = vmax.f32 %v7245_v33, %v1877_v31  ;;  %v2084_v45 = vadd.f32 %v5653_v11, %v1958_v3  ;;  %2899 = vmatmul.mubr.f32.gmra.mrb[100].mxu0 %v7246_v34  ;;  %v2548_v60 = vrot.slane %v6472_v27, 4  ;;  %v6498_v51 = vsel %vm131_vm7, %v2481_v50, %v2289_v16  ;;  %v7249_v31 = vld [vmem:[#allocation84_spill] sm:$0xff]  ;;  %v7253_v16 = vld [vmem:[#allocation49_spill] sm:$0xff] }
 0x2c6   :  { %v6495_v54 = vsel %vm109_vm4, %v2506_v43, %v2516_v28  ;;  %7247 = vst [vmem:[#allocation23_spill] sm:$0xff] %v6498_v51  ;;  %v6500_v35 = vmax.f32 %v2120_v57, %v2121_v7  ;;  %v7250_v42 = vpack.c.bf16 %v7248_v56, %v7249_v31  ;;  %v2333_v3 = vsel %vm142_vm0, %v2314_v32, %v2332_v48  ;;  %v1883_v57 = vpop.f32.mrb[125].mxu1  ;;  %v7254_v56 = vld [vmem:[#allocation50_spill] sm:$0xff] }
 0x2c7   :  { %v2085_v13 = vadd.f32 %v5655_v46, %v1959_v26  ;;  %v7251_v33 = vrot.slane %v6338_v20, 2  ;;  %v2122_v34 = vmax.f32 %v2084_v45, 0.0  ;;  %v1960_v50 = vmax.f32 %v7253_v16, %v1881_v8 }
 0x2c8   :  { %4080 = vmatpush1.bf16.msra.mxu0 %v7250_v42  ;;  %v2549_v7 = vsel %vm131_vm7, %v2541_v47, %v2548_v60  ;;  %v2543_v26 = vrot.slane %v2333_v3, 4  ;;  %v1961_v31 = vmax.f32 %v7254_v56, %v1883_v57  ;;  %v2560_v32 = vrot.slane %v6500_v35, 4 }
 0x2c9   :  { %v6511_v43 = vsel %vm109_vm4, %v7251_v33, %v6411_v14  ;;  %4081 = vmatprep.subr.bf16.mxu0 %v7166_v5  ;;  %v2123_v2 = vmax.f32 %v2085_v13, 0.0  ;;  %2903 = vmatprep.mubr.f32.mxu0 %v2549_v7  ;;  %v2589_v20 = vrot.slane %v6500_v35, 6  ;;  %v2324_v42 = vrot.slane %v6443_v63, 2  ;;  %v7255_v33 = vld [vmem:[#allocation80_spill] sm:$0xff] }
 0x2ca   :  { %7252 = vst [vmem:[#allocation24_spill] sm:$0xff] %v6511_v43  ;;  %v2086_v45 = vadd.f32 %v5653_v11, %v1960_v50  ;;  %2904 = vmatmul.mubr.f32.gmra.mrb[102].mxu0 %v7255_v33  ;;  %v6523_v8 = vsel %vm109_vm4, %v2516_v28, %v2543_v26  ;;  %v2336_v47 = vrot.slane %v6500_v35, 1  ;;  %v2087_v13 = vadd.f32 %v5655_v46, %v1961_v31  ;;  %v7256_v50 = vld [vmem:[#allocation89_spill] sm:$0xff] }
 0x2cb   :  { %v2162_v3 = vmax.f32 %v2122_v34, %v2123_v2  ;;  %v2561_v16 = vsel %vm131_vm7, %v2548_v60, %v2560_v32  ;;  %v2511_v57 = vrot.slane %v6407_v40, 2  ;;  %v2362_v33 = vrot.slane %v7256_v50, 2 }
 0x2cc   :  { %v2124_v7 = vmax.f32 %v2086_v45, 0.0  ;;  %v2673_v56 = vsel %vm142_vm0, %v2561_v16, %v2589_v20  ;;  %v2337_v63 = vsel %vm142_vm0, %v2332_v48, %v2336_v47  ;;  %v2564_v11 = vrot.slane %v2336_v47, 4 }
 0x2cd   :  { %v2352_v43 = vrot.slane %v2162_v3, 1  ;;  %v2125_v28 = vmax.f32 %v2087_v13, 0.0  ;;  %2908 = vmatprep.mubr.f32.mxu0 %v2673_v56  ;;  %v2596_v51 = vrot.slane %v2162_v3, 6  ;;  %v2340_v2 = vrot.slane %v6472_v27, 2 }
 0x2ce   :  { %2909 = vmatmul.mubr.f32.gmra.mrb[104].mxu0 %v6203_v17  ;;  %v2552_v46 = vrot.slane %v2337_v63, 4  ;;  %v7257_v60 = vrot.slane %v6449_v62, 2  ;;  %v2325_v34 = vsel %vm109_vm4, %v6433_v12, %v2324_v42  ;;  %v2544_v63 = vrot.slane %v6174_v9, 4 }
 0x2cf   :  { %v2163_v48 = vmax.f32 %v2124_v7, %v2125_v28  ;;  %v2597_v31 = vsel %vm153_vm3, %v2589_v20, %v2596_v51  ;;  %v2353_v32 = vsel %vm142_vm0, %v2336_v47, %v2352_v43  ;;  %v2520_v16 = vrot.slane %v2325_v34, 2 }
 0x2d0   :  { %v2513_v40 = vsel %vm109_vm4, %v2511_v57, %v7257_v60  ;;  %2913 = vmatprep.mubr.f32.mxu0 %v2597_v31  ;;  %v6546_v17 = vsel %vm131_vm7, %v2543_v26, %v2552_v46  ;;  %v2565_v27 = vsel %vm131_vm7, %v2552_v46, %v2564_v11  ;;  %v2591_v13 = vrot.slane %v2353_v32, 6 }
 0x2d1   :  { %v6543_v45 = vsel %vm164_vm5, %v6411_v14, %v2513_v40  ;;  %v2356_v57 = vrot.slane %v2163_v48, 1  ;;  %v2364_v56 = vrot.slane %v2163_v48, 2  ;;  %v2608_v12 = vrot.slane %v2163_v48, 6 }
 0x2d2   :  { %v2518_v7 = vrot.slane %v6167_v15, 2  ;;  %2914 = vmatmul.mubr.f32.gmra.mrb[106].mxu0 %v6465_v25  ;;  %v6552_v20 = vsel %vm142_vm0, %v2565_v27, %v2591_v13  ;;  %v7258_v14 = vmov %v7257_v60  ;;  %v2341_v26 = vsel %vm109_vm4, %v2324_v42, %v2340_v2 }
 0x2d3   :  { %v6557_v47 = vsel %vm109_vm4, %v7258_v14, %v2520_v16  ;;  %v2360_v11 = vrot.slane %v2162_v3, 2  ;;  %v2609_v28 = vsel %vm153_vm3, %v2596_v51, %v2608_v12  ;;  %v2357_v46 = vsel %vm142_vm0, %v2352_v43, %v2356_v57 }
 0x2d4   :  { %v2612_v60 = vrot.slane %v2356_v57, 6  ;;  %2918 = vmatprep.mubr.f32.mxu0 %v2609_v28  ;;  %v2600_v25 = vrot.slane %v2357_v46, 6  ;;  %v2545_v40 = vrot.slane %v2341_v26, 4  ;;  %v6566_v62 = vsel %vm109_vm4, %v2518_v7, %v2544_v63 }
 0x2d5   :  { %v2344_v34 = vrot.slane %v6500_v35, 2  ;;  %v2342_v42 = vrot.slane %v5972_v21, 2  ;;  %v2365_v9 = vsel %vm109_vm4, %v2360_v11, %v2364_v56  ;;  %v7259_v51 = vrot.slane %v6015_v49, 2 }
 0x2d6   :  { %v2616_v3 = vrot.slane %v2364_v56, 6  ;;  %2919 = vmatmul.mubr.f32.gmra.mrb[108].mxu0 %v6075_v1  ;;  %v6578_v48 = vsel %vm153_vm3, %v2591_v13, %v2600_v25  ;;  %v6581_v31 = vsel %vm153_vm3, %v2600_v25, %v2612_v60  ;;  %v6584_v35 = vsel %vm109_vm4, %v2520_v16, %v2545_v40 }
 0x2d7   :  { %v2363_v43 = vsel %vm109_vm4, %v7259_v51, %v2362_v33  ;;  %v2345_v21 = vsel %vm109_vm4, %v2340_v2, %v2344_v34  ;;  %2988 = vmatprep.mubr.f32.mxu0 %v6112_v29  ;;  %v7260_v27 = vrot.slane %v5944_v30, 2  ;;  %v2361_v1 = vsel %vm109_vm4, %v2344_v34, %v2360_v11  ;;  %v7262_v30 = vld [vmem:[#allocation86_spill] sm:$0xff] }
 0x2d8   :  { %v2556_v32 = vrot.slane %v2345_v21, 4  ;;  %v2568_v56 = vrot.slane %v2344_v34, 4  ;;  %v2593_v12 = vrot.slane %v2361_v1, 6  ;;  %v7261_v14 = vmov %v7259_v51  ;;  %v7263_v34 = vld [vmem:[#allocation88_spill] sm:$0xff] }
 0x2d9   :  { %v2343_v57 = vsel %vm109_vm4, %v7260_v27, %v2342_v42  ;;  %v2359_v26 = vsel %vm109_vm4, %v2342_v42, %v7261_v14  ;;  %v2566_v16 = vrot.slane %v2342_v42, 4  ;;  %v2604_v46 = vrot.slane %v2365_v9, 6  ;;  %v7266_v27 = vld [vmem:[#allocation13_spill] sm:$0xff] }
 0x2da   :  { %v2554_v13 = vrot.slane %v2343_v57, 4  ;;  %v6596_v28 = vsel %vm131_vm7, %v2545_v40, %v2556_v32  ;;  %v2569_v29 = vsel %vm131_vm7, %v2556_v32, %v2568_v56  ;;  %v2592_v2 = vrot.slane %v2359_v26, 6  ;;  %2989 = vmatmul.mubr.f32.vlgmr.msra.gmra.mrb[76].mxu0 %v7262_v30  ;;  %v7264_v40 = vld [vmem:[#allocation14_spill] sm:$0xff]  ;;  %v2750_v26 = vld [vmem:[#allocation6 + $0x240] sm:$0xff]  ;;  %v2755_v30 = vld [vmem:[#allocation6 + $0x268] sm:$0xff] }
 0x2db   :  { %v6604_v11 = vsel %vm142_vm0, %v2569_v29, %v2593_v12  ;;  %v2602_v25 = vrot.slane %v2363_v43, 6  ;;  %2993 = vmatprep.mubr.f32.mxu0 %v6142_v4  ;;  %v7265_v42 = vpack.c.bf16 %v7263_v34, %v7264_v40  ;;  %v6615_v9 = vsel %vm153_vm3, %v2593_v12, %v2604_v46  ;;  %v2746_v43 = vld [vmem:[#allocation6 + $0x220] sm:$0xff]  ;;  %v2747_v4 = vld [vmem:[#allocation6 + $0x228] sm:$0xff]  ;;  %v2753_v29 = vld [vmem:[#allocation6 + $0x258] sm:$0xff] }
 0x2dc   :  { %v6601_v60 = vsel %vm131_vm7, %v2544_v63, %v2554_v13  ;;  %v2567_v49 = vsel %vm131_vm7, %v2554_v13, %v2566_v16  ;;  %v6618_v63 = vsel %vm153_vm3, %v2604_v46, %v2616_v3  ;;  %v2614_v21 = vrot.slane %v2362_v33, 6  ;;  %v2748_v3 = vld [vmem:[#allocation6 + $0x230] sm:$0xff]  ;;  %v2749_v13 = vld [vmem:[#allocation6 + $0x238] sm:$0xff]  ;;  %v2751_v16 = vld [vmem:[#allocation6 + $0x248] sm:$0xff] }
 0x2dd   :  { %4083 = vmatpush1.bf16.msra.mxu0 %v7265_v42  ;;  %v6612_v51 = vsel %vm142_vm0, %v2567_v49, %v2592_v2  ;;  %v6624_v32 = vsel %vm153_vm3, %v2592_v2, %v2602_v25  ;;  %v7267_v57 = vrot.slane %v5671_v18, 1  ;;  %v7268_v50 = vpack.c.bf16 %v6157_v41, %v6155_v44  ;;  %v7269_v12 = vld [vmem:[#allocation53_spill] sm:$0xff]  ;;  %v2754_v46 = vld [vmem:[#allocation6 + $0x260] sm:$0xff]  ;;  %v2757_v34 = vld [vmem:[#allocation6 + $0x278] sm:$0xff] }
 0x2de   :  { %4084 = vmatprep.subr.bf16.mxu0 %v7166_v5  ;;  %v6631_v56 = vsel %vm153_vm3, %v2602_v25, %v2614_v21  ;;  %v4088_v33 = vpack.c.bf16 %v2747_v4, %v2746_v43  ;;  %v4091_v14 = vpack.c.bf16 %v2749_v13, %v2748_v3  ;;  %v4094_v44 = vpack.c.bf16 %v2751_v16, %v2750_v26  ;;  %v2752_v41 = vld [vmem:[#allocation6 + $0x250] sm:$0xff]  ;;  %v7272_v49 = vld [vmem:[#allocation56_spill] sm:$0xff]  ;;  %v7273_v40 = vld [vmem:[#allocation59_spill] sm:$0xff] }
 0x2df   :  { %v2177_v1 = vsel %vm142_vm0, %v7267_v57, %v7266_v27  ;;  %v7271_v2 = vld [vmem:[#allocation57_spill] sm:$0xff]  ;;  %v2758_v42 = vld [vmem:[#allocation6 + $0x280] sm:$0xff]  ;;  %v2761_v27 = vld [vmem:[#allocation6 + $0x298] sm:$0xff] }
 0x2e0   :  { %2994 = vmatmul.mubr.f32.gmra.mrb[78].mxu0 %v2177_v1  ;;  %v2756_v25 = vld [vmem:[#allocation6 + $0x270] sm:$0xff]  ;;  %v2759_v21 = vld [vmem:[#allocation6 + $0x288] sm:$0xff]  ;;  %v7274_v43 = vld [vmem:[#allocation63_spill] sm:$0xff] }
 0x2e1   :  { %2998 = vmatprep.mubr.f32.mxu0 %v6236_v53  ;;  %4086 = vmatpush1.bf16.msra.mxu0 %v7268_v50  ;;  %v7270_v53 = vld [vmem:[#allocation54_spill] sm:$0xff]  ;;  %v7275_v57 = vld [vmem:[#allocation64_spill] sm:$0xff]  ;;  %v7279_v26 = vld [vmem:[#allocation77_spill] sm:$0xff] }
 0x2e2   :  { %4087 = vmatprep.subr.bf16.mxu0 %v7166_v5  ;;  %v2760_v4 = vld [vmem:[#allocation6 + $0x290] sm:$0xff]  ;;  %v2762_v1 = vld [vmem:[#allocation6 + $0x2a0] sm:$0xff]  ;;  %v2763_v50 = vld [vmem:[#allocation6 + $0x2a8] sm:$0xff] }
 0x2e4   :  { %2999 = vmatmul.mubr.f32.gmra.mrb[80].mxu0 %v7269_v12  ;;  %v4112_v12 = vpack.c.bf16 %v2763_v50, %v2762_v1  ;;  %v7300_v1 = vld [vmem:[#allocation17_spill] sm:$0xff]  ;;  %v7301_v50 = vld [vmem:[#allocation24_spill] sm:$0xff] }
 0x2e5   :  { %3003 = vmatprep.mubr.f32.mxu0 %v6244_v6  ;;  %4089 = vmatpush1.bf16.msra.mxu0 %v4088_v33  ;;  %v4097_v6 = vpack.c.bf16 %v2753_v29, %v2752_v41  ;;  %v7276_v33 = vld [vmem:[#allocation62_spill] sm:$0xff]  ;;  %v7280_v41 = vld [vmem:[#allocation83_spill] sm:$0xff] }
 0x2e6   :  { %4090 = vmatprep.subr.bf16.mxu0 %v7166_v5  ;;  %v7277_v3 = vrot.slane %v7276_v33, 1  ;;  %v2768_v29 = vld [vmem:[#allocation6 + $0x2d0] sm:$0xff] }
 0x2e7   :  { %v7302_v33 = vld [vmem:[#allocation65_spill] sm:$0xff] }
 0x2e8   :  { %3004 = vmatmul.mubr.f32.gmra.mrb[82].mxu0 %v7270_v53  ;;  %v2766_v53 = vld [vmem:[#allocation6 + $0x2c0] sm:$0xff] }
 0x2e9   :  { %3008 = vmatprep.mubr.f32.mxu0 %v6281_v24  ;;  %4092 = vmatpush1.bf16.msra.mxu0 %v4091_v14  ;;  %v4100_v24 = vpack.c.bf16 %v2755_v30, %v2754_v46  ;;  %v2765_v14 = vld [vmem:[#allocation6 + $0x2b8] sm:$0xff]  ;;  %v2770_v46 = vld [vmem:[#allocation6 + $0x2e0] sm:$0xff]  ;;  %v2771_v30 = vld [vmem:[#allocation6 + $0x2e8] sm:$0xff] }
 0x2ea   :  { %4093 = vmatprep.subr.bf16.mxu0 %v7166_v5 }
 0x2ec   :  { %3009 = vmatmul.mubr.f32.gmra.mrb[84].mxu0 %v7271_v2  ;;  %v2769_v2 = vld [vmem:[#allocation6 + $0x2d8] sm:$0xff] }
 0x2ed   :  { %3013 = vmatprep.mubr.f32.mxu0 %v6271_v58  ;;  %4095 = vmatpush1.bf16.msra.mxu0 %v4094_v44  ;;  %v4103_v58 = vpack.c.bf16 %v2757_v34, %v2756_v25  ;;  %v2767_v44 = vld [vmem:[#allocation6 + $0x2c8] sm:$0xff]  ;;  %v2773_v25 = vld [vmem:[#allocation6 + $0x2f8] sm:$0xff]  ;;  %v2186_v34 = vrot.slane %v5664_v23, 2 }
 0x2ee   :  { %4096 = vmatprep.subr.bf16.mxu0 %v7166_v5  ;;  %v7288_v23 = vld [vmem:[#allocation52_spill] sm:$0xff] }
 0x2f0   :  { %3014 = vmatmul.mubr.f32.gmra.mrb[86].mxu0 %v7272_v49  ;;  %v7282_v49 = vld [vmem:[#allocation15_spill] sm:$0xff] }
 0x2f1   :  { %3018 = vmatprep.mubr.f32.mxu0 %v6325_v61  ;;  %4098 = vmatpush1.bf16.msra.mxu0 %v4097_v6  ;;  %v4106_v61 = vpack.c.bf16 %v2759_v21, %v2758_v42  ;;  %v7281_v6 = vld [vmem:[#allocation87_spill] sm:$0xff]  ;;  %v7292_v42 = vld [vmem:[#allocation20_spill] sm:$0xff]  ;;  %v7293_v21 = vld [vmem:[#allocation70_spill] sm:$0xff] }
 0x2f2   :  { %4099 = vmatprep.subr.bf16.mxu0 %v7166_v5 }
 0x2f4   :  { %3019 = vmatmul.mubr.f32.gmra.mrb[88].mxu0 %v7273_v40  ;;  %v7289_v40 = vrot.slane %v7288_v23, 2 }
 0x2f5   :  { %3023 = vmatprep.mubr.f32.mxu0 %v6353_v59  ;;  %4101 = vmatpush1.bf16.msra.mxu0 %v4100_v24  ;;  %v4109_v59 = vpack.c.bf16 %v2761_v27, %v2760_v4  ;;  %v2772_v24 = vld [vmem:[#allocation6 + $0x2f0] sm:$0xff]  ;;  %v7297_v4 = vld [vmem:[#allocation16_spill] sm:$0xff]  ;;  %v7298_v27 = vld [vmem:[#allocation23_spill] sm:$0xff] }
 0x2f6   :  { %4102 = vmatprep.subr.bf16.mxu0 %v7166_v5 }
 0x2f8   :  { %3024 = vmatmul.mubr.f32.gmra.mrb[90].mxu0 %v7274_v43  ;;  %v7295_v43 = vld [vmem:[#allocation71_spill] sm:$0xff] }
 0x2f9   :  { %3028 = vmatprep.mubr.f32.mxu0 %v6373_v39  ;;  %4104 = vmatpush1.bf16.msra.mxu0 %v4103_v58  ;;  %v7278_v39 = vrot.slane %v5817_v37, 1  ;;  %v7290_v58 = vld [vmem:[#allocation19_spill] sm:$0xff] }
 0x2fa   :  { %4105 = vmatprep.subr.bf16.mxu0 %v7166_v5 }
 0x2fb   :  { %v2277_v13 = vsel %vm142_vm0, %v7278_v39, %v7277_v3  ;;  %v2508_v3 = vrot.slane %v7302_v33, 2  ;;  %v7303_v39 = vld [vmem:[#allocation66_spill] sm:$0xff]  ;;  %vm6836_vm0 = vmor %vm98_vm2, %vm3430_vm15  ;;  %vm3455_vm2 = vsmask.f32 6416  ;;  %vm3572_vm15 = vcmask 1044484  }
 0x2fc   :  { %3029 = vmatmul.mubr.f32.gmra.mrb[92].mxu0 %v7275_v57  ;;  %v7299_v57 = vld [vmem:[#allocation69_spill] sm:$0xff] }
 0x2fd   :  { %3033 = vmatprep.mubr.f32.mxu0 %v6398_v55  ;;  %4107 = vmatpush1.bf16.msra.mxu0 %v4106_v61  ;;  %v2764_v55 = vld [vmem:[#allocation6 + $0x2b0] sm:$0xff] }
 0x2fe   :  { %4108 = vmatprep.subr.bf16.mxu0 %v7166_v5  ;;  %v4115_v16 = vpack.c.bf16 %v2765_v14, %v2764_v55  ;;  %v7296_v61 = vld [vmem:[#allocation22_spill] sm:$0xff] }
 0x300   :  { %3034 = vmatmul.mubr.f32.gmra.mrb[94].mxu0 %v2277_v13  ;;  %v7304_v13 = vrot.slane %v5817_v37, 2 }
 0x301   :  { %3038 = vmatprep.mubr.f32.mxu0 %v6481_v52  ;;  %4110 = vmatpush1.bf16.msra.mxu0 %v4109_v59  ;;  %v4118_v52 = vpack.c.bf16 %v2767_v44, %v2766_v53  ;;  %v2509_v59 = vrot.slane %v7299_v57, 2 }
 0x302   :  { %4111 = vmatprep.subr.bf16.mxu0 %v7166_v5 }
 0x303   :  { %v2510_v55 = vsel %vm109_vm4, %v2508_v3, %v2509_v59 }
 0x304   :  { %3039 = vmatmul.mubr.f32.gmra.mrb[96].mxu0 %v7279_v26  ;;  %v2664_v14 = vsel %vm164_vm5, %v7303_v39, %v2510_v55  ;;  %v2519_v26 = vsel %vm109_vm4, %v2509_v59, %v2518_v7  ;;  %vm3501_vm5 = vcmask 1045508  }
 0x305   :  { %3043 = vmatprep.mubr.f32.mxu0 %v6495_v54  ;;  %4113 = vmatpush1.bf16.msra.mxu0 %v4112_v12  ;;  %v4121_v54 = vpack.c.bf16 %v2769_v2, %v2768_v29  ;;  %v2291_v12 = vsel %vm109_vm4, %v7304_v13, %v7303_v39  ;;  %vm6884_vm7 = vmor %vm153_vm3, %vm3501_vm5  ;;  %vm3525_vm3 = vsmask.f32 1280 }
 0x306   :  { %4114 = vmatprep.subr.bf16.mxu0 %v7166_v5  ;;  %vm6932_vm11 = vmor %vm3525_vm3, %vm3526_vm8 }
 0x308   :  { %3044 = vmatmul.mubr.f32.gmra.mrb[98].mxu0 %v7280_v41 }
 0x309   :  { %3048 = vmatprep.mubr.f32.mxu0 %v6523_v8  ;;  %4116 = vmatpush1.bf16.msra.mxu0 %v4115_v16  ;;  %v4124_v8 = vpack.c.bf16 %v2771_v30, %v2770_v46 }
 0x30a   :  { %4117 = vmatprep.subr.bf16.mxu0 %v7166_v5 }
 0x30c   :  { %3049 = vmatmul.mubr.f32.gmra.mrb[100].mxu0 %v7281_v6 }
 0x30d   :  { %3053 = vmatprep.mubr.f32.mxu0 %v6546_v17  ;;  %4119 = vmatpush1.bf16.msra.mxu0 %v4118_v52  ;;  %v4127_v17 = vpack.c.bf16 %v2773_v25, %v2772_v24 }
 0x30e   :  { %4120 = vmatprep.subr.bf16.mxu0 %v7166_v5 }
 0x310   :  { %3054 = vmatmul.mubr.f32.gmra.mrb[102].mxu0 %v7282_v49 }
 0x311   :  { %3058 = vmatprep.mubr.f32.mxu0 %v6552_v20  ;;  %4122 = vmatpush1.bf16.msra.mxu0 %v4121_v54  ;;  %v2187_v20 = vrot.slane %v5671_v18, 2  ;;  %v7285_v18 = vld [vmem:[#allocation18_spill] sm:$0xff] }
 0x312   :  { %4123 = vmatprep.subr.bf16.mxu0 %v7166_v5 }
 0x314   :  { %3059 = vmatmul.mubr.f32.gmra.mrb[104].mxu0 %v6081_v0  ;;  %v2188_v0 = vsel %vm109_vm4, %v2186_v34, %v2187_v20 }
 0x315   :  { %3063 = vmatprep.mubr.f32.mxu0 %v6578_v48  ;;  %4125 = vmatpush1.bf16.msra.mxu0 %v4124_v8  ;;  %v7283_v48 = vld [vmem:[#allocation12_spill] sm:$0xff] }
 0x316   :  { %4126 = vmatprep.subr.bf16.mxu0 %v7166_v5  ;;  %v2193_v5 = vsel %vm109_vm4, %v2187_v20, %v7283_v48  ;;  %v6796_v48 = vld [vmem:[#allocation7] ss:$0 sm:$0xff] }
 0x318   :  { %3064 = vmatmul.mubr.f32.gmra.mrb[106].mxu0 %v6096_v19  ;;  %v7284_v19 = vld [vmem:[#allocation61_spill] sm:$0xff] }
 0x319   :  { %3068 = vmatprep.mubr.f32.mxu0 %v6581_v31  ;;  %4128 = vmatpush1.bf16.msra.mxu0 %v4127_v17 }
 0x31c   :  { %3069 = vmatmul.mubr.f32.gmra.mrb[108].mxu0 %v6099_v38  ;;  %v7286_v38 = vld [vmem:[#allocation51_spill] sm:$0xff] }
 0x31d   :  { %3138 = vmatprep.mubr.f32.mxu0 %v6117_v10  ;;  %v7287_v31 = vrot.slane %v7286_v38, 2 }
 0x31f   :  { %v2383_v10 = vsel %vm109_vm4, %v7289_v40, %v7287_v31  ;;  %vm6875_vm4 = vmor %vm3454_vm1, %vm3455_vm2 }
 0x320   :  { %3139 = vmatmul.mubr.f32.vlgmr.msra.gmra.mrb[76].mxu0 %v2188_v0 }
 0x321   :  { %3143 = vmatprep.mubr.f32.mxu0 %v6146_v36  ;;  %v7291_v36 = vld [vmem:[#allocation68_spill] sm:$0xff] }
 0x324   :  { %3144 = vmatmul.mubr.f32.gmra.mrb[78].mxu0 %v2193_v5 }
 0x325   :  { %3148 = vmatprep.mubr.f32.mxu0 %v6299_v22  ;;  %v7294_v22 = vld [vmem:[#allocation21_spill] sm:$0xff] }
 0x328   :  { %3149 = vmatmul.mubr.f32.gmra.mrb[80].mxu0 %v7284_v19 }
 0x329   :  { %3153 = vmatprep.mubr.f32.mxu0 %v7285_v18 }
 0x32c   :  { %3154 = vmatmul.mubr.f32.gmra.mrb[82].mxu0 %v2383_v10  ;;  %v3376_v10 = vld [vmem:[%s7034_s5 + $0x8] sm:$0x1] }
 0x32d   :  { %3158 = vmatprep.mubr.f32.mxu0 %v7290_v58 }
 0x330   :  { %3159 = vmatmul.mubr.f32.gmra.mrb[84].mxu0 %v7291_v36 }
 0x331   :  { %3163 = vmatprep.mubr.f32.mxu0 %v7292_v42 }
 0x334   :  { %3164 = vmatmul.mubr.f32.gmra.mrb[86].mxu0 %v7293_v21 }
 0x335   :  { %3168 = vmatprep.mubr.f32.mxu0 %v7294_v22 }
 0x338   :  { %3169 = vmatmul.mubr.f32.gmra.mrb[88].mxu0 %v7295_v43 }
 0x339   :  { %3173 = vmatprep.mubr.f32.mxu0 %v7296_v61 }
 0x33c   :  { %3174 = vmatmul.mubr.f32.gmra.mrb[90].mxu0 %v7297_v4 }
 0x33d   :  { %3178 = vmatprep.mubr.f32.mxu0 %v7298_v27 }
 0x340   :  { %3179 = vmatmul.mubr.f32.gmra.mrb[92].mxu0 %v7300_v1 }
 0x341   :  { %3183 = vmatprep.mubr.f32.mxu0 %v7301_v50 }
 0x344   :  { %3184 = vmatmul.mubr.f32.gmra.mrb[94].mxu0 %v2291_v12 }
 0x345   :  { %3188 = vmatprep.mubr.f32.mxu0 %v6543_v45 }
 0x348   :  { %3189 = vmatmul.mubr.f32.gmra.mrb[96].mxu0 %v2664_v14 }
 0x349   :  { %3193 = vmatprep.mubr.f32.mxu0 %v6557_v47 }
 0x34c   :  { %3194 = vmatmul.mubr.f32.gmra.mrb[98].mxu0 %v2519_v26 }
 0x34d   :  { %3198 = vmatprep.mubr.f32.mxu0 %v6584_v35 }
 0x350   :  { %3199 = vmatmul.mubr.f32.gmra.mrb[100].mxu0 %v6566_v62 }
 0x351   :  { %3203 = vmatprep.mubr.f32.mxu0 %v6596_v28 }
 0x354   :  { %3204 = vmatmul.mubr.f32.gmra.mrb[102].mxu0 %v6601_v60 }
 0x355   :  { %3208 = vmatprep.mubr.f32.mxu0 %v6604_v11 }
 0x358   :  { %3209 = vmatmul.mubr.f32.gmra.mrb[104].mxu0 %v6612_v51 }
 0x359   :  { %3213 = vmatprep.mubr.f32.mxu0 %v6615_v9 }
 0x35c   :  { %3214 = vmatmul.mubr.f32.gmra.mrb[106].mxu0 %v6624_v32 }
 0x35d   :  { %3218 = vmatprep.mubr.f32.mxu0 %v6618_v63 }
 0x360   :  { %3219 = vmatmul.mubr.f32.gmra.mrb[108].mxu0 %v6631_v56 }
 0x3f3   :  { %v6734_v37 = vpop.f32.mrb[76].mxu0 }
 0x3f4   :  { %v3142_v15 = vpop.f32.mrb[77].mxu0 }
 0x3f7   :  { %v6736_v45 = vpop.f32.mrb[78].mxu0 }
 0x3f8   :  { %v3147_v7 = vpop.f32.mrb[79].mxu0 }
 0x3fb   :  { %v3150_v47 = vpop.f32.mrb[80].mxu0 }
 0x3fc   :  { %3245 = vrot.lane.b32.xlu0 %v3150_v47, %s4466_s15  ;;  %v3152_v62 = vpop.f32.mrb[81].mxu0 }
 0x3ff   :  { %v3155_v35 = vpop.f32.mrb[82].mxu0 }
 0x400   :  { %3247 = vrot.lane.b32.xlu0 %v3155_v35, %s4466_s15  ;;  %v3157_v28 = vpop.f32.mrb[83].mxu0 }
 0x403   :  { %v6740_v60 = vpop.f32.mrb[84].mxu0 }
 0x404   :  { %3249 = vrot.lane.b32.xlu0 %v6740_v60, %s4466_s15  ;;  %v3162_v11 = vpop.f32.mrb[85].mxu0 }
 0x407   :  { %v6744_v51 = vpop.f32.mrb[86].mxu0 }
 0x408   :  { %3251 = vrot.lane.b32.xlu1 %v6744_v51, %s4466_s15  ;;  %v3167_v9 = vpop.f32.mrb[87].mxu0 }
 0x40b   :  { %v6748_v63 = vpop.f32.mrb[88].mxu0 }
 0x40c   :  { %3253 = vrot.lane.b32.xlu1 %v6748_v63, %s4466_s15  ;;  %v3172_v32 = vpop.f32.mrb[89].mxu0 }
 0x40f   :  { %v6752_v56 = vpop.f32.mrb[90].mxu0 }
 0x410   :  { %3255 = vrot.lane.b32.xlu1 %v6752_v56, %s4466_s15  ;;  %v3177_v16 = vpop.f32.mrb[91].mxu0 }
 0x413   :  { %v6756_v53 = vpop.f32.mrb[92].mxu0 }
 0x414   :  { %3257 = vrot.lane.b32.xlu0 %v6756_v53, %s4466_s15  ;;  %v3182_v44 = vpop.f32.mrb[93].mxu0 }
 0x417   :  { %v6760_v41 = vpop.f32.mrb[94].mxu0 }
 0x418   :  { %3259 = vrot.lane.b32.xlu0 %v6760_v41, %s4466_s15  ;;  %v3187_v52 = vpop.f32.mrb[95].mxu0 }
 0x41b   :  { %v6764_v29 = vpop.f32.mrb[96].mxu0 }
 0x41c   :  { %3261 = vrot.lane.b32.xlu0 %v6764_v29, %s4466_s15  ;;  %v3192_v2 = vpop.f32.mrb[97].mxu0 }
 0x41f   :  { %v6768_v6 = vpop.f32.mrb[98].mxu0 }
 0x420   :  { %3263 = vrot.lane.b32.xlu1 %v6768_v6, %s4466_s15  ;;  %v3197_v54 = vpop.f32.mrb[99].mxu0 }
 0x423   :  { %v6772_v46 = vpop.f32.mrb[100].mxu0 }
 0x424   :  { %3265 = vrot.lane.b32.xlu1 %v6772_v46, %s4466_s15  ;;  %v3202_v30 = vpop.f32.mrb[101].mxu0 }
 0x427   :  { %v6776_v49 = vpop.f32.mrb[102].mxu0 }
 0x428   :  { %v3207_v8 = vpop.f32.mrb[103].mxu0 }
 0x42b   :  { %v6778_v24 = vpop.f32.mrb[104].mxu0 }
 0x42c   :  { %v3212_v25 = vpop.f32.mrb[105].mxu0 }
 0x42f   :  { %v6780_v17 = vpop.f32.mrb[106].mxu0 }
 0x430   :  { %3271 = vrot.lane.b32.xlu0 %v6780_v17, %s4466_s15  ;;  %v3217_v20 = vpop.f32.mrb[107].mxu0 }
 0x433   :  { %v6784_v34 = vpop.f32.mrb[108].mxu0 }
 0x434   :  { %3269 = vrot.lane.b32.xlu0 %v6778_v24, %s4466_s15  ;;  %3273 = vrot.lane.b32.xlu1 %v6784_v34, %s4466_s15  ;;  %v3222_v0 = vpop.f32.mrb[109].mxu0 }
 0x438   :  { %3243 = vrot.lane.b32.xlu0 %v6736_v45, %s4466_s15  ;;  %3267 = vrot.lane.b32.xlu1 %v6776_v49, %s4466_s15 }
 0x43c   :  { %3241 = vrot.lane.b32.xlu1 %v6734_v37, %s4466_s15 }
 0x46e   :  { %v3246_v5 = vpop.permute.xlu0 %3245 }
 0x46f   :  { %v3294_v19 = vmax.f32 %v3150_v47, %v3246_v5 }
 0x471   :  { %v3318_v18 = vadd.f32 %v6796_v48, %v3294_v19 }
 0x472   :  { %v3248_v38 = vpop.permute.xlu0 %3247 }
 0x473   :  { %v3335_v31 = vmax.f32 %v3318_v18, 0.0  ;;  %v3295_v23 = vmax.f32 %v3155_v35, %v3248_v38 }
 0x475   :  { %v3842_v58 = vpack.c.bf16 %v3335_v31, %v3335_v31  ;;  %v3319_v36 = vadd.f32 %v6796_v48, %v3295_v23 }
 0x476   :  { %v3250_v42 = vpop.permute.xlu0 %3249 }
 0x477   :  { %v3377_v21 = vsel %vm6800_vm10, %v3842_v58, %v3376_v10  ;;  %v3388_v22 = vshrl.u32 %v3842_v58, 16  ;;  %v3391_v43 = vshll.u32 %v3842_v58, 16  ;;  %v3336_v61 = vmax.f32 %v3319_v36, 0.0 }
 0x478   :  { %3378 = vst [vmem:[%s7034_s5 + $0x8] sm:$0x1] %v3377_v21  ;;  %v3296_v4 = vmax.f32 %v6740_v60, %v3250_v42  ;;  %v3798_v60 = vld [vmem:[%s7034_s5 + $0x14] sm:$0x1]  ;;  %v3805_v42 = vld [vmem:[%s7034_s5 + $0x20] sm:$0x1] }
 0x479   :  { %v3390_v27 = vrot.slane %v3388_v22, 4  ;;  %v3393_v57 = vrot.slane %v3391_v43, 5  ;;  %v3843_v59 = vpack.c.bf16 %v3336_v61, %v3336_v61 }
 0x47a   :  { %v3320_v1 = vadd.f32 %v6796_v48, %v3296_v4  ;;  %v3252_v50 = vpop.permute.xlu1 %3251 }
 0x47b   :  { %v3394_v33 = vor.u32 %v3393_v57, %v3390_v27  ;;  %v3397_v3 = vshll.u32 %v3843_v59, 16  ;;  %v3401_v39 = vshrl.u32 %v3843_v59, 16  ;;  %v3297_v13 = vmax.f32 %v6744_v51, %v3252_v50 }
 0x47c   :  { %v3337_v55 = vmax.f32 %v3320_v1, 0.0 }
 0x47d   :  { %v3395_v14 = vrot.slane %v3394_v33, 4  ;;  %v3399_v26 = vrot.slane %v3397_v3, 5  ;;  %v3403_v15 = vrot.slane %v3401_v39, 4  ;;  %v3321_v7 = vadd.f32 %v6796_v48, %v3297_v13 }
 0x47e   :  { %v3844_v47 = vpack.c.bf16 %v3337_v55, %v3337_v55  ;;  %v3254_v62 = vpop.permute.xlu1 %3253 }
 0x47f   :  { %v3400_v35 = vsel %vm6816_vm14, %v3395_v14, %v3399_v26  ;;  %v3404_v28 = vor.u32 %v3403_v15, %v3399_v26  ;;  %v3338_v11 = vmax.f32 %v3321_v7, 0.0  ;;  %v3298_v51 = vmax.f32 %v6748_v63, %v3254_v62 }
 0x480   :  { %3796 = vst.msk [vmem:[%s7034_s5 + $0xc] sm:$0xf] %vm3370_vm13, %v3400_v35  ;;  %v3407_v9 = vshll.u32 %v3844_v47, 16  ;;  %v3411_v32 = vshrl.u32 %v3844_v47, 16  ;;  %v3802_v8 = vrot.slane %v3844_v47, 9 }
 0x481   :  { %v3405_v16 = vrot.slane %v3404_v28, 4  ;;  %v3845_v44 = vpack.c.bf16 %v3338_v11, %v3338_v11  ;;  %v3322_v52 = vadd.f32 %v6796_v48, %v3298_v51 }
 0x482   :  { %v3409_v2 = vrot.slane %v3407_v9, 5  ;;  %v3422_v54 = vsel %vm6800_vm10, %v3411_v32, %v3798_v60  ;;  %v3256_v63 = vpop.permute.xlu1 %3255 }
 0x483   :  { %3799 = vst [vmem:[%s7034_s5 + $0x14] sm:$0x1] %v3422_v54  ;;  %v3434_v25 = vrot.slane %v3845_v44, 5  ;;  %v3339_v20 = vmax.f32 %v3322_v52, 0.0  ;;  %v3299_v0 = vmax.f32 %v6752_v56, %v3256_v63 }
 0x484   :  { %v3410_v5 = vsel %vm6816_vm14, %v3405_v16, %v3409_v2  ;;  %vm6972_vm14 = vmor %vm3374_vm9, %vm3596_vm12 }
 0x485   :  { %3797 = vst.msk [vmem:[%s7034_s5 + $0x10] sm:$0xf] %vm3370_vm13, %v3410_v5  ;;  %v3435_v19 = vsel %vm6836_vm0, %v3802_v8, %v3434_v25  ;;  %v3846_v18 = vpack.c.bf16 %v3339_v20, %v3339_v20  ;;  %v3323_v38 = vadd.f32 %v6796_v48, %v3299_v0  ;;  %v3436_v31 = vrot.slane %v3434_v25, 4  ;;  %vm6986_vm9 = vmor %vm120_vm6, %vm3572_vm15 }
 0x486   :  { %3803 = vst.msk [vmem:[%s7034_s5 + $0x18] sm:$0xf] %vm3370_vm13, %v3435_v19  ;;  %v3258_v56 = vpop.permute.xlu0 %3257 }
 0x487   :  { %v3437_v23 = vrot.slane %v3846_v18, 5  ;;  %v3458_v10 = vshrl.u32 %v3846_v18, 16  ;;  %v3461_v58 = vshll.u32 %v3846_v18, 16  ;;  %v3340_v36 = vmax.f32 %v3323_v38, 0.0 }
 0x488   :  { %v3300_v21 = vmax.f32 %v6756_v53, %v3258_v56 }
 0x489   :  { %v3438_v22 = vsel %vm6836_vm0, %v3436_v31, %v3437_v23  ;;  %v3439_v43 = vrot.slane %v3437_v23, 4  ;;  %v3460_v61 = vrot.slane %v3458_v10, 5  ;;  %v3463_v4 = vrot.slane %v3461_v58, 6  ;;  %v3818_v58 = vld [vmem:[%s7034_s5 + $0x38] sm:$0x1] }
 0x48a   :  { %3804 = vst.msk [vmem:[%s7034_s5 + $0x1c] sm:$0xf] %vm3370_vm13, %v3438_v22  ;;  %v3847_v27 = vpack.c.bf16 %v3340_v36, %v3340_v36  ;;  %v3324_v57 = vadd.f32 %v6796_v48, %v3300_v21  ;;  %v3260_v59 = vpop.permute.xlu0 %3259 }
 0x48b   :  { %v3447_v1 = vsel %vm6800_vm10, %v3439_v43, %v3805_v42  ;;  %v3301_v53 = vmax.f32 %v6760_v41, %v3260_v59  ;;  %v3464_v50 = vor.u32 %v3463_v4, %v3460_v61 }
 0x48c   :  { %3806 = vst [vmem:[%s7034_s5 + $0x20] sm:$0x1] %v3447_v1  ;;  %v3467_v33 = vshrl.u32 %v3847_v27, 16  ;;  %v3470_v3 = vshll.u32 %v3847_v27, 16  ;;  %v3341_v39 = vmax.f32 %v3324_v57, 0.0 }
 0x48d   :  { %v3325_v13 = vadd.f32 %v6796_v48, %v3301_v53  ;;  %v3465_v47 = vrot.slane %v3464_v50, 4 }
 0x48e   :  { %v3469_v12 = vrot.slane %v3467_v33, 5  ;;  %v3472_v55 = vrot.slane %v3470_v3, 6  ;;  %v3848_v14 = vpack.c.bf16 %v3341_v39, %v3341_v39  ;;  %v3262_v26 = vpop.permute.xlu0 %3261 }
 0x48f   :  { %v3342_v41 = vmax.f32 %v3325_v13, 0.0  ;;  %v3302_v7 = vmax.f32 %v6764_v29, %v3262_v26  ;;  %v3811_v29 = vld [vmem:[%s7034_s5 + $0x2c] sm:$0x1] }
 0x490   :  { %v3473_v62 = vor.u32 %v3472_v55, %v3469_v12  ;;  %v3477_v35 = vshrl.u32 %v3848_v14, 16  ;;  %v3480_v28 = vshll.u32 %v3848_v14, 16  ;;  %v3815_v52 = vrot.slane %v3848_v14, 10 }
 0x491   :  { %v3849_v60 = vpack.c.bf16 %v3342_v41, %v3342_v41  ;;  %v3326_v11 = vadd.f32 %v6796_v48, %v3302_v7  ;;  %v3824_v7 = vld [vmem:[%s7034_s5 + $0x44] sm:$0x1] }
 0x492   :  { %v3474_v51 = vsel %vm6875_vm4, %v3465_v47, %v3473_v62  ;;  %v3479_v9 = vrot.slane %v3477_v35, 5  ;;  %v3482_v32 = vrot.slane %v3480_v28, 6  ;;  %v3264_v44 = vpop.permute.xlu1 %3263  ;;  %v3475_v63 = vrot.slane %v3473_v62, 4 }
 0x493   :  { %3809 = vst.msk [vmem:[%s7034_s5 + $0x24] sm:$0xf] %vm3370_vm13, %v3474_v51  ;;  %v3505_v2 = vrot.slane %v3849_v60, 6  ;;  %v3343_v54 = vmax.f32 %v3326_v11, 0.0  ;;  %v3303_v30 = vmax.f32 %v6768_v6, %v3264_v44 }
 0x494   :  { %v3483_v8 = vor.u32 %v3482_v32, %v3479_v9  ;;  %v3485_v25 = vrot.slane %v3479_v9, 4 }
 0x495   :  { %v3506_v20 = vsel %vm6884_vm7, %v3815_v52, %v3505_v2  ;;  %v3850_v0 = vpack.c.bf16 %v3343_v54, %v3343_v54  ;;  %v3327_v5 = vadd.f32 %v6796_v48, %v3303_v30  ;;  %v3507_v38 = vrot.slane %v3505_v2, 4 }
 0x496   :  { %v3484_v19 = vsel %vm6875_vm4, %v3475_v63, %v3483_v8  ;;  %v3493_v18 = vsel %vm6800_vm10, %v3485_v25, %v3811_v29  ;;  %3816 = vst.msk [vmem:[%s7034_s5 + $0x30] sm:$0xf] %vm3370_vm13, %v3506_v20  ;;  %v3266_v6 = vpop.permute.xlu1 %3265 }
 0x497   :  { %3810 = vst.msk [vmem:[%s7034_s5 + $0x28] sm:$0xf] %vm3370_vm13, %v3484_v19  ;;  %3812 = vst [vmem:[%s7034_s5 + $0x2c] sm:$0x1] %v3493_v18  ;;  %v3508_v31 = vrot.slane %v3850_v0, 6  ;;  %v3529_v56 = vshrl.u32 %v3850_v0, 16  ;;  %v3304_v36 = vmax.f32 %v6772_v46, %v3266_v6 }
 0x498   :  { %v3532_v23 = vshll.u32 %v3850_v0, 16  ;;  %v3344_v10 = vmax.f32 %v3327_v5, 0.0 }
 0x499   :  { %v3509_v42 = vsel %vm6884_vm7, %v3507_v38, %v3508_v31  ;;  %v3510_v21 = vrot.slane %v3508_v31, 4  ;;  %v3531_v22 = vrot.slane %v3529_v56, 6  ;;  %v3328_v4 = vadd.f32 %v6796_v48, %v3304_v36 }
 0x49a   :  { %v3534_v43 = vrot.slane %v3532_v23, 7  ;;  %3817 = vst.msk [vmem:[%s7034_s5 + $0x34] sm:$0xf] %vm3370_vm13, %v3509_v42  ;;  %v3851_v61 = vpack.c.bf16 %v3344_v10, %v3344_v10  ;;  %v3831_v23 = vld [vmem:[%s7034_s5 + $0x50] sm:$0x1] }
 0x49b   :  { %v3518_v27 = vsel %vm6800_vm10, %v3510_v21, %v3818_v58  ;;  %v3345_v1 = vmax.f32 %v3328_v4, 0.0 }
 0x49c   :  { %3819 = vst [vmem:[%s7034_s5 + $0x38] sm:$0x1] %v3518_v27  ;;  %v3535_v46 = vor.u32 %v3534_v43, %v3531_v22  ;;  %v3538_v57 = vshrl.u32 %v3851_v61, 16  ;;  %v3541_v59 = vshll.u32 %v3851_v61, 16 }
 0x49d   :  { %v6930_v33 = vpack.c.bf16 %v3345_v1, %v3345_v1  ;;  %v3838_v1 = vld [vmem:[%s7034_s5 + $0x5c] sm:$0x1] }
 0x49e   :  { %v3540_v53 = vrot.slane %v3538_v57, 6  ;;  %v3543_v50 = vrot.slane %v3541_v59, 7  ;;  %v3536_v39 = vrot.slane %v3535_v46, 4 }
 0x49f   :  { %v3548_v12 = vshrl.u32 %v6930_v33, 16  ;;  %v3551_v55 = vshll.u32 %v6930_v33, 16  ;;  %v3828_v46 = vrot.slane %v6930_v33, 11 }
 0x4a0   :  { %v3544_v13 = vor.u32 %v3543_v50, %v3540_v53 }
 0x4a1   :  { %v3550_v26 = vrot.slane %v3548_v12, 6  ;;  %v3553_v15 = vrot.slane %v3551_v55, 7 }
 0x4a2   :  { %v3545_v14 = vsel %vm6932_vm11, %v3536_v39, %v3544_v13  ;;  %v3272_v41 = vpop.permute.xlu0 %3271  ;;  %v3546_v62 = vrot.slane %v3544_v13, 4 }
 0x4a3   :  { %3822 = vst.msk [vmem:[%s7034_s5 + $0x3c] sm:$0xf] %vm3370_vm13, %v3545_v14  ;;  %v3307_v47 = vmax.f32 %v6780_v17, %v3272_v41  ;;  %v3554_v35 = vor.u32 %v3553_v15, %v3550_v26  ;;  %v3556_v28 = vrot.slane %v3550_v26, 4 }
 0x4a5   :  { %v3331_v60 = vadd.f32 %v6796_v48, %v3307_v47  ;;  %v3555_v11 = vsel %vm6932_vm11, %v3546_v62, %v3554_v35  ;;  %v3564_v51 = vsel %vm6800_vm10, %v3556_v28, %v3824_v7 }
 0x4a6   :  { %v3270_v9 = vpop.permute.xlu0 %3269  ;;  %v3274_v32 = vpop.permute.xlu1 %3273  ;;  %3823 = vst.msk [vmem:[%s7034_s5 + $0x40] sm:$0xf] %vm3370_vm13, %v3555_v11  ;;  %3825 = vst [vmem:[%s7034_s5 + $0x44] sm:$0x1] %v3564_v51 }
 0x4a7   :  { %v3348_v17 = vmax.f32 %v3331_v60, 0.0  ;;  %v3306_v16 = vmax.f32 %v6778_v24, %v3270_v9  ;;  %v3308_v44 = vmax.f32 %v6784_v34, %v3274_v32 }
 0x4a9   :  { %v3855_v29 = vpack.c.bf16 %v3348_v17, %v3348_v17  ;;  %v3330_v52 = vadd.f32 %v6796_v48, %v3306_v16  ;;  %v3332_v2 = vadd.f32 %v6796_v48, %v3308_v44 }
 0x4aa   :  { %v3244_v54 = vpop.permute.xlu0 %3243  ;;  %v3268_v30 = vpop.permute.xlu1 %3267 }
 0x4ab   :  { %v3604_v63 = vshrl.u32 %v3855_v29, 16  ;;  %v3347_v8 = vmax.f32 %v3330_v52, 0.0  ;;  %v3349_v25 = vmax.f32 %v3332_v2, 0.0  ;;  %v3293_v20 = vmax.f32 %v6736_v45, %v3244_v54 }
 0x4ac   :  { %v3305_v0 = vmax.f32 %v6776_v49, %v3268_v30  ;;  %v3607_v6 = vshll.u32 %v3855_v29, 16 }
 0x4ad   :  { %v3606_v5 = vrot.slane %v3604_v63, 7  ;;  %v3854_v19 = vpack.c.bf16 %v3347_v8, %v3347_v8  ;;  %v3856_v24 = vpack.c.bf16 %v3349_v25, %v3349_v25  ;;  %v3317_v34 = vadd.f32 %v6796_v48, %v3293_v20 }
 0x4ae   :  { %v3329_v18 = vadd.f32 %v6796_v48, %v3305_v0  ;;  %v3242_v38 = vpop.permute.xlu1 %3241 }
 0x4af   :  { %v3579_v31 = vrot.slane %v3854_v19, 7  ;;  %v3599_v56 = vshrl.u32 %v3854_v19, 16  ;;  %v3613_v49 = vshrl.u32 %v3856_v24, 16  ;;  %v3334_v10 = vmax.f32 %v3317_v34, 0.0 }
 0x4b0   :  { %v3346_v58 = vmax.f32 %v3329_v18, 0.0  ;;  %v3609_v36 = vor.u32 %v3607_v6, %v3606_v5  ;;  %v3292_v22 = vmax.f32 %v6734_v37, %v3242_v38  ;;  %v3616_v61 = vshll.u32 %v3856_v24, 16 }
 0x4b1   :  { %v3581_v42 = vrot.slane %v3579_v31, 4  ;;  %v3835_v21 = vrot.slane %v3599_v56, 11  ;;  %v3615_v43 = vrot.slane %v3613_v49, 7  ;;  %v3841_v4 = vpack.c.bf16 %v3334_v10, %v3334_v10 }
 0x4b2   :  { %v3853_v27 = vpack.c.bf16 %v3346_v58, %v3346_v58  ;;  %v3316_v37 = vadd.f32 %v6796_v48, %v3292_v22  ;;  %v3611_v50 = vrot.slane %v3606_v5, 4 }
 0x4b3   :  { %v3589_v57 = vsel %vm6800_vm10, %v3581_v42, %v3831_v23  ;;  %v3610_v59 = vsel %vm6972_vm14, %v3835_v21, %v3609_v36  ;;  %v3618_v33 = vor.u32 %v3616_v61, %v3615_v43  ;;  %v3620_v3 = vrot.slane %v3615_v43, 4  ;;  %3372 = vst.msk [vmem:[%s7034_s5 + $0x4] sm:$0xf] %vm3370_vm13, %v3841_v4 }
 0x4b4   :  { %3832 = vst [vmem:[%s7034_s5 + $0x50] sm:$0x1] %v3589_v57  ;;  %3836 = vst.msk [vmem:[%s7034_s5 + $0x54] sm:$0xf] %vm3370_vm13, %v3610_v59  ;;  %v3576_v39 = vrot.slane %v3853_v27, 7  ;;  %v3333_v13 = vmax.f32 %v3316_v37, 0.0 }
 0x4b5   :  { %v3619_v48 = vsel %vm6972_vm14, %v3611_v50, %v3618_v33  ;;  %v3628_v12 = vsel %vm6800_vm10, %v3620_v3, %v3838_v1 }
 0x4b6   :  { %v3577_v55 = vsel %vm6986_vm9, %v3828_v46, %v3576_v39  ;;  %v3578_v14 = vrot.slane %v3576_v39, 4  ;;  %3837 = vst.msk [vmem:[%s7034_s5 + $0x58] sm:$0xf] %vm3370_vm13, %v3619_v48  ;;  %3839 = vst [vmem:[%s7034_s5 + $0x5c] sm:$0x1] %v3628_v12  ;;  %v3840_v40 = vpack.c.bf16 %v3333_v13, %v3333_v13 }
 0x4b7   :  { %3829 = vst.msk [vmem:[%s7034_s5 + $0x48] sm:$0xf] %vm3370_vm13, %v3577_v55 }
 0x4b8   :  { %v3580_v26 = vsel %vm6986_vm9, %v3578_v14, %v3579_v31  ;;  %3371 = vst.msk [vmem:[%s7034_s5] sm:$0xf] %vm3370_vm13, %v3840_v40 }
 0x4b9   :  { %3830 = vst.msk [vmem:[%s7034_s5 + $0x4c] sm:$0xf] %vm3370_vm13, %v3580_v26 }
 0x4ba   :  { %3634 = vsyncpa [#allocation3], 1 }
 0x4bb   :  { %3635 = vsyncpa [#allocation5], 1 }
 0x4bc   :  { %3636 = vsyncpa [#allocation8], 1 }

// kernel: model_forward.3
= control target key start
LH: loop header
LB: loop body
LE: loop exit
PB: predicated region body
PF: predicated region fallthrough
CT: control target
= control target key end

     0   :  { %s9861_s0 = inlined_call_operand.vmem [shape: bf16[8,1088], index: 0, kind: input, shape index: {}]   ;;  %s9862_s1 = inlined_call_operand.hbm [shape: bf16[1088,2560], index: 1, kind: input, shape index: {}]   ;;  %s9863_s2 = inlined_call_operand.hbm [shape: f32[1,2560], index: 2, kind: input, shape index: {}]   ;;  %s9864_s3 = inlined_call_operand.vmem [shape: f32[2560,8], index: 3, kind: input, shape index: {}]   ;;  %s9865_s4 = inlined_call_operand.hbm [shape: f32[1,8], index: 4, kind: input, shape index: {}]   ;;  %s9866_s5 = inlined_call_operand.vmem [shape: f32[8,8], index: 5, kind: output, shape index: {}]  }
   0x1   :  { %9874 = sst [smem:[#allocation11_spill]] %s9862_s1 }
   0x2   :  { %9875 = sst [smem:[#allocation12_spill]] %s9865_s4 }
   0x3   :  { %10 = vsyncpa [#allocation3], 0 }
   0x4   :  { %12 = vsyncpa [#allocation3 + $0x1], 0 }
   0x5   :  { %13 = vsyncpa [#allocation5], 0 }
   0x6   :  { %15 = vsyncpa [#allocation5 + $0x1], 0  ;;  %s8651_s18 = smov 0   ;;  %s8653_s19 = smov 0  }
   0x7   :  { %s8655_s20 = smov 0   ;;  %s8657_s21 = smov 0  }
   0x8   :  { %s8659_s22 = smov 0   ;;  %s8661_s23 = smov 0  }
   0x9 LB: > { %s9872_s24 = sadd.s32 4294967295, %s8612_s23   ;;  %s66_s25 = sadd.s32 1, %s8600_s20  ;;  %s8612_s23 = sphi %s8661_s23, %s21_s23   ;;  %s8608_s22 = sphi %s8659_s22, %s9895_s22   ;;  %s8604_s21 = sphi %s8657_s21, %s9894_s21   ;;  %s8600_s20 = sphi %s8655_s20, %s9893_s20   ;;  %s8596_s19 = sphi %s8653_s19, %s9892_s19   ;;  %s8592_s18 = sphi %s8651_s18, %s9891_s18  }
   0xa   : > { %p73_p0 = scmp.ne.s32.totalorder %s8600_s20, %s8596_s19  ;;  %p74_p1 = scmp.eq.s32.totalorder %s8612_s23, 0 }
   0xb   : > { %p79_p2 = scmp.ne.s32.totalorder %s8596_s19, %s8592_s18  ;;  %p8687_p3 = scmp.eq.s32.totalorder %s9872_s24, 0 }
   0xc   : > { %p75_p4 = por %p74_p1, %p73_p0  ;;  %p6221_p5 = scmp.ge.s32.totalorder %s8612_s23, 1 }
   0xd   : > { %s9876_s26 = scalar_select %p8687_p3, 1, 0 }
   0xe   : > { %p8694_p6 = por %p8687_p3, %p79_p2  ;;  %p189_p7 = scmp.lt.s32.totalorder %s8612_s23, 3 }
   0xf   : > { %s8614_s29 = smov [#allocation6]   ;;  %p7379_p10 = scmp.lt.s32.totalorder %s8612_s23, 2 }
  0x10   : > { %s9877_s27 = scalar_select %p8694_p6, 1, 0 }
  0x11   : > { %p8699_p8 = pnand %p6221_p5, %p189_p7  ;;  %s210_s30 = sshll.u32 %s8614_s29, 4  ;;  %s211_s30 = int_to_ptr.vmem [resolvable:$true] %s210_s30 }
  0x12   : > { %s8707_s6 = sand.u32 1, %s8600_s20   ;;  %p8715_p12 = pnand %p7379_p10, %p75_p4 }
  0x13   : > { %s9878_s28 = scalar_select %p8699_p8, 1, 0 }
  0x14   : > { %p7367_p9 = pneg %p8699_p8  ;;  %s9881_s4 = sld [smem:[#allocation12_spill]] }
  0x15   : > { %s9880_s8 = scalar_select %p8715_p12, 1, 0 }
  0x16   : > { %p8711_p11 = pnand %p7367_p9, %p8687_p3 }
  0x18   : > { %p8468_p0 = pneg %p8711_p11 }
  0x1a   : > { %s8466_s11 = scalar_lea.hbm %s9881_s4, 16 }
  0x1b   : > { %p8467_p13 = scmp.ne.s32.totalorder %s9881_s4, %s8466_s11  ;;  %p8473_p5 = scmp.lt.u32.totalorder %s8466_s11, %s9881_s4 }
  0x1d   : > { %p8469_p1 = pnand %p8468_p0, %p8467_p13 }
  0x1f   : > { %p8470_p2 = pneg %p8469_p1 }
  0x21   : > { %p8475_p4 = pnand %p8473_p5, %p8470_p2 }
  0x23   : > { %8478 = shalt.err (!%p8475_p4)
}
  0x24   : > { %s8479_s16 = scalar_lea.vmem %s211_s30, 16  ;;  %s8486_s17 = scalar_lea.vmem %s211_s30, 32 }
  0x25   : > { %p8480_p7 = scmp.ne.s32.totalorder %s211_s30, %s8479_s16  ;;  %p8487_p3 = scmp.lt.s32.totalorder %s211_s30, %s211_s30 }
  0x26   : > { %p8488_p6 = scmp.lt.s32.totalorder %s8486_s17, %s8479_s16 }
  0x27   : > { %p8482_p9 = pnand %p8480_p7, %p8468_p0 }
  0x28   : > { %p8489_p8 = por %p8488_p6, %p8487_p3 }
  0x29   : > { %p8483_p10 = pneg %p8482_p9 }
  0x2b   : > { %p8490_p12 = pnand %p8489_p8, %p8483_p10 }
  0x2d   : > { %8493 = shalt.err (!%p8490_p12)
}
  0x2e   : > { %7370 = dma.hbm_to_vmem [thread:$0]  (!%p8711_p11), %s9881_s4, 16, %s211_s30, [#allocation5]  }
  0x2f   : > { %s30_s9 = sadd.s32 1, %s8608_s22  ;;  %s7355_s10 = smul.u32 5440, %s8707_s6 }
  0x30   : > { %p31_p3 = scmp.ge.s32.totalorder %s30_s9, 2  ;;  %s6930_s11 = smul.u32 640, %s8608_s22 }
  0x31   : > { %s9883_s1 = sld [smem:[#allocation11_spill]]  ;;  %s225_s14 = scalar_lea.vmem [#allocation2], %s7355_s10 }
  0x32   : > { %s9897_s9 = smov (%p31_p3, %s30_s9), 0  ;;  %s232_s15 = sshll.u32 %s225_s14, 4  ;;  %s8747_s15 = int_to_ptr.vmem [resolvable:$true] %s232_s15 }
  0x33   : > { %9882 = sst [smem:[#allocation10_spill]] %s9897_s9  ;;  %s63_s30 = ssub.s32 %s8608_s22, %s9897_s9 }
  0x34   : > { %p64_p6 = scmp.eq.s32.totalorder %s63_s30, 0  ;;  %s222_s18 = scalar_lea.sflag [#allocation3], %s8707_s6 }
  0x35   : > { %p9884_p11 = scmp.ne.s32.totalorder %s9880_s8, 0 }
  0x36   : > { %s8753_s17 = scalar_select %p64_p6, %s8600_s20, %s66_s25  }
  0x37   : > { %s8743_s13 = scalar_lea.hbm %s9883_s1, %s6930_s11  ;;  %p8496_p12 = pneg %p9884_p11 }
  0x38   : > { %s8494_s29 = scalar_lea.hbm %s8743_s13, 87040  ;;  %s8499_s7 = scalar_lea.hbm %s9883_s1, 174080 }
  0x39   : > { %p8495_p8 = scmp.ne.s32.totalorder %s8743_s13, %s8494_s29  ;;  %p8500_p1 = scmp.lt.u32.totalorder %s8743_s13, %s9883_s1 }
  0x3a   : > { %p8501_p2 = scmp.lt.u32.totalorder %s8499_s7, %s8494_s29  ;;  %p8503_p4 = scmp.lt.u32.totalorder %s8494_s29, %s8743_s13 }
  0x3b   : > { %p8497_p13 = pnand %p8496_p12, %p8495_p8 }
  0x3c   : > { %p8502_p5 = por %p8501_p2, %p8500_p1 }
  0x3d   : > { %p8498_p0 = pneg %p8497_p13 }
  0x3e   : > { %p8504_p7 = por %p8503_p4, %p8502_p5 }
  0x40   : > { %p8505_p9 = pnand %p8504_p7, %p8498_p0 }
  0x42   : > { %8508 = shalt.err (!%p8505_p9)
}
  0x43   : > { %s8509_s25 = scalar_lea.vmem %s8747_s15, 87040  ;;  %s8615_s30 = smov [#allocation2]  }
  0x44   : > { %p8510_p10 = scmp.ne.s32.totalorder %s8747_s15, %s8509_s25  ;;  %s8514_s10 = sshll.u32 %s8615_s30, 4  ;;  %s8515_s10 = int_to_ptr.vmem [resolvable:$false] %s8514_s10 }
  0x45   : > { %s8516_s11 = scalar_lea.vmem %s8515_s10, 174080  ;;  %p8517_p8 = scmp.lt.s32.totalorder %s8747_s15, %s8515_s10 }
  0x46   : > { %p8512_p3 = pnand %p8510_p10, %p8496_p12  ;;  %p8518_p13 = scmp.lt.s32.totalorder %s8516_s11, %s8509_s25 }
  0x48   : > { %p8513_p6 = pneg %p8512_p3  ;;  %p8519_p1 = por %p8518_p13, %p8517_p8 }
  0x4a   : > { %p8520_p2 = pnand %p8519_p1, %p8513_p6 }
  0x4c   : > { %8523 = shalt.err (!%p8520_p2)
}
  0x4d   : > { %s8616_s29 = smov 1280   ;;  %s8617_s7 = smov 640  }
  0x4e   : > { %s8618_s12 = smov 40   ;;  %s7356_s14 = smul.u32 10, %s8707_s6 }
  0x4f   : > { %7374 = dma.hbm_to_vmem [thread:$0]  (!%p9884_p11), %s8743_s13, 87040, %s8747_s15, %s222_s18, %s8616_s29, %s8617_s7, %s8618_s12  }
  0x50   : > { %s6931_s30 = smul.u32 160, %s8608_s22  ;;  %s246_s24 = scalar_lea.vmem [#allocation4], %s7356_s14 }
  0x51   : > { %s254_s16 = sshll.u32 %s246_s24, 4  ;;  %s9885_s1 = sand.u32 1, %s8612_s23   ;;  %s255_s16 = int_to_ptr.vmem [resolvable:$true] %s254_s16 }
  0x52   : > { %s8788_s11 = scalar_lea.hbm %s9863_s2, %s6931_s30  ;;  %s243_s4 = scalar_lea.sflag [#allocation5], %s9885_s1 }
  0x53   : > { %s8524_s9 = scalar_lea.hbm %s8788_s11, 160  ;;  %s8529_s15 = scalar_lea.hbm %s9863_s2, 320 }
  0x54   : > { %p8525_p0 = scmp.ne.s32.totalorder %s8788_s11, %s8524_s9  ;;  %p8530_p7 = scmp.lt.u32.totalorder %s8788_s11, %s9863_s2 }
  0x55   : > { %p8531_p9 = scmp.lt.u32.totalorder %s8529_s15, %s8524_s9  ;;  %p8533_p3 = scmp.lt.u32.totalorder %s8524_s9, %s8788_s11 }
  0x56   : > { %p8527_p5 = pnand %p8525_p0, %p8496_p12 }
  0x57   : > { %p8532_p10 = por %p8531_p9, %p8530_p7 }
  0x58   : > { %p8528_p4 = pneg %p8527_p5 }
  0x59   : > { %p8534_p6 = por %p8533_p3, %p8532_p10 }
  0x5b   : > { %p8535_p8 = pnand %p8534_p6, %p8528_p4 }
  0x5d   : > { %8538 = shalt.err (!%p8535_p8)
}
  0x5e   : > { %s8539_s1 = scalar_lea.vmem %s255_s16, 160  ;;  %s8619_s24 = smov [#allocation4]  }
  0x5f   : > { %p8540_p13 = scmp.ne.s32.totalorder %s255_s16, %s8539_s1  ;;  %s8544_s7 = sshll.u32 %s8619_s24, 4  ;;  %s8545_s7 = int_to_ptr.vmem [resolvable:$false] %s8544_s7 }
  0x60   : > { %s8546_s12 = scalar_lea.vmem %s8545_s7, 320  ;;  %p8547_p0 = scmp.lt.s32.totalorder %s255_s16, %s8545_s7 }
  0x61   : > { %p8542_p1 = pnand %p8540_p13, %p8496_p12  ;;  %p8548_p5 = scmp.lt.s32.totalorder %s8546_s12, %s8539_s1 }
  0x63   : > { %p8543_p2 = pneg %p8542_p1  ;;  %p8549_p7 = por %p8548_p5, %p8547_p0 }
  0x65   : > { %p8550_p9 = pnand %p8549_p7, %p8543_p2 }
  0x67   : > { %8553 = shalt.err (!%p8550_p9)
}
  0x68   : > { %7377 = dma.hbm_to_vmem [thread:$0]  (!%p9884_p11), %s8788_s11, 160, %s255_s16, %s243_s4  }
  0x69   : > { %p9886_p4 = scmp.ne.s32.totalorder %s9878_s28, 0 }
  0x6a   : > { %s274_s9 = sand.u32 (!%p9886_p4), 1, %s8596_s19   ;;  %p9887_p12 = scmp.ne.s32.totalorder (!%p9886_p4), %s9877_s27, 0 }
  0x6b   : > { %272 = sbr.rel (%p9886_p4) target bundleno = 1324 (0x52c), region = 40  ;;  %s275_s30 = scalar_lea.sflag (!%p9886_p4), [#allocation3], %s274_s9 }
  0x6c   : > { %s7357_s14 = smul.u32 (!%p9886_p4), 5440, %s274_s9 }
  0x6e   : > { %s8814_s25 = scalar_lea.vmem (!%p9886_p4), [#allocation2], %s7357_s14 }
  0x72   : > { %8579 = dma.done.wait (%p9887_p12), %s275_s30, 87040  }
  0x73   : > { %8581 = vsyncadd (%p9887_p12), %s275_s30, 4294880256  ;;  %s9888_s10 = sadd.s32 4294967295, %s8612_s23   ;;  %s7358_s4 = smul.u32 10, %s274_s9 }
  0x74   : > { %s283_s8 = sand.u32 1, %s9888_s10  }
  0x75   : > { %s284_s16 = scalar_lea.sflag [#allocation5], %s283_s8  ;;  %s8822_s28 = scalar_lea.vmem [#allocation4], %s7358_s4 }
  0x76   : > { %8583 = dma.done.wait (%p9887_p12), %s284_s16, 160  }
  0x77   : > { %8585 = vsyncadd (%p9887_p12), %s284_s16, 4294967136  ;;  %p9889_p11 = scmp.ne.s32.totalorder %s9876_s26, 0 }
  0x79   : > { %8587 = dma.done.wait (%p9889_p11), [#allocation5], 16  }
  0x7a   : > { %8589 = vsyncadd (%p9889_p11), [#allocation5], 4294967280  ;;  %v7434_v0 = vld [vmem:[%s8814_s25 + $0x4] ss:$40 sps:$4 sm:$0xff]   ;;  %v7438_v2 = vld [vmem:[%s8814_s25] ss:$40 sps:$4 sm:$0xff]  }
  0x7b   : > { %v7436_v1 = vld [vmem:[%s8814_s25 + $0x504] ss:$40 sps:$4 sm:$0xff]   ;;  %4524 = vmatprep.subr.bf16.mxu1 %v7434_v0  ;;  %v7439_v3 = vld [vmem:[%s8814_s25 + $0x500] ss:$40 sps:$4 sm:$0xff]   ;;  %v7440_v4 = vld [vmem:[%s8814_s25 + $0x54] ss:$40 sps:$4 sm:$0xff]  }
  0x7c   : > { %4565 = vmatprep.subr.bf16.mxu0 %v7436_v1  ;;  %4525 = vmatpush1.bf16.msra.mxu1 %v7438_v2  ;;  %v7442_v5 = vld [vmem:[%s8814_s25 + $0x554] ss:$40 sps:$4 sm:$0xff]   ;;  %v7444_v6 = vld [vmem:[%s8814_s25 + $0x50] ss:$40 sps:$4 sm:$0xff]   ;;  %v7446_v8 = vld [vmem:[%s8814_s25 + $0xa4] ss:$40 sps:$4 sm:$0xff]  }
  0x7d   : > { %4566 = vmatpush1.bf16.msra.mxu0 %v7439_v3  ;;  %4526 = vmatprep.subr.bf16.mxu1 %v7440_v4  ;;  %v7445_v7 = vld [vmem:[%s8814_s25 + $0x550] ss:$40 sps:$4 sm:$0xff]   ;;  %v7448_v9 = vld [vmem:[%s8814_s25 + $0x5a4] ss:$40 sps:$4 sm:$0xff]   ;;  %v7450_v10 = vld [vmem:[%s8814_s25 + $0xa0] ss:$40 sps:$4 sm:$0xff]  }
  0x7e   : > { %4567 = vmatprep.subr.bf16.mxu0 %v7442_v5  ;;  %v7451_v11 = vld [vmem:[%s8814_s25 + $0x5a0] ss:$40 sps:$4 sm:$0xff]   ;;  %v7452_v12 = vld [vmem:[%s8814_s25 + $0xf4] ss:$40 sps:$4 sm:$0xff]   ;;  %v7456_v14 = vld [vmem:[%s8814_s25 + $0xf0] ss:$40 sps:$4 sm:$0xff]  }
  0x7f   : > { %v7454_v13 = vld [vmem:[%s8814_s25 + $0x5f4] ss:$40 sps:$4 sm:$0xff]   ;;  %v7457_v15 = vld [vmem:[%s8814_s25 + $0x5f0] ss:$40 sps:$4 sm:$0xff]   ;;  %v7458_v16 = vld [vmem:[%s8814_s25 + $0x144] ss:$40 sps:$4 sm:$0xff]  }
  0x80   : > { %4527 = vmatpush1.bf16.msra.mxu1 %v7444_v6  ;;  %v7460_v17 = vld [vmem:[%s8814_s25 + $0x644] ss:$40 sps:$4 sm:$0xff]   ;;  %v7462_v18 = vld [vmem:[%s8814_s25 + $0x140] ss:$40 sps:$4 sm:$0xff]   ;;  %v7464_v20 = vld [vmem:[%s8814_s25 + $0x194] ss:$40 sps:$4 sm:$0xff]  }
  0x81   : > { %4568 = vmatpush1.bf16.msra.mxu0 %v7445_v7  ;;  %4528 = vmatprep.subr.bf16.mxu1 %v7446_v8  ;;  %v7463_v19 = vld [vmem:[%s8814_s25 + $0x640] ss:$40 sps:$4 sm:$0xff]   ;;  %v7466_v21 = vld [vmem:[%s8814_s25 + $0x694] ss:$40 sps:$4 sm:$0xff]   ;;  %v7468_v22 = vld [vmem:[%s8814_s25 + $0x190] ss:$40 sps:$4 sm:$0xff]  }
  0x82   : > { %4569 = vmatprep.subr.bf16.mxu0 %v7448_v9  ;;  %v7469_v23 = vld [vmem:[%s8814_s25 + $0x690] ss:$40 sps:$4 sm:$0xff]   ;;  %v7470_v24 = vld [vmem:[%s8814_s25 + $0x1e4] ss:$40 sps:$4 sm:$0xff]   ;;  %v7474_v26 = vld [vmem:[%s8814_s25 + $0x1e0] ss:$40 sps:$4 sm:$0xff]  }
  0x83   : > { %v7472_v25 = vld [vmem:[%s8814_s25 + $0x6e4] ss:$40 sps:$4 sm:$0xff]   ;;  %v7475_v27 = vld [vmem:[%s8814_s25 + $0x6e0] ss:$40 sps:$4 sm:$0xff]   ;;  %v7476_v28 = vld [vmem:[%s8814_s25 + $0x234] ss:$40 sps:$4 sm:$0xff]  }
  0x84   : > { %4529 = vmatpush1.bf16.msra.mxu1 %v7450_v10  ;;  %v7478_v29 = vld [vmem:[%s8814_s25 + $0x734] ss:$40 sps:$4 sm:$0xff]   ;;  %v7480_v30 = vld [vmem:[%s8814_s25 + $0x230] ss:$40 sps:$4 sm:$0xff]   ;;  %v7482_v32 = vld [vmem:[%s8814_s25 + $0x284] ss:$40 sps:$4 sm:$0xff]  }
  0x85   : > { %4570 = vmatpush1.bf16.msra.mxu0 %v7451_v11  ;;  %4530 = vmatprep.subr.bf16.mxu1 %v7452_v12  ;;  %v7481_v31 = vld [vmem:[%s8814_s25 + $0x730] ss:$40 sps:$4 sm:$0xff]   ;;  %v7484_v33 = vld [vmem:[%s8814_s25 + $0x784] ss:$40 sps:$4 sm:$0xff]   ;;  %v7486_v34 = vld [vmem:[%s8814_s25 + $0x280] ss:$40 sps:$4 sm:$0xff]  }
  0x86   : > { %4571 = vmatprep.subr.bf16.mxu0 %v7454_v13  ;;  %v7487_v35 = vld [vmem:[%s8814_s25 + $0x780] ss:$40 sps:$4 sm:$0xff]   ;;  %v7488_v36 = vld [vmem:[%s8814_s25 + $0x2d4] ss:$40 sps:$4 sm:$0xff]   ;;  %v7492_v38 = vld [vmem:[%s8814_s25 + $0x2d0] ss:$40 sps:$4 sm:$0xff]  }
  0x87   : > { %v7490_v37 = vld [vmem:[%s8814_s25 + $0x7d4] ss:$40 sps:$4 sm:$0xff]   ;;  %v7493_v39 = vld [vmem:[%s8814_s25 + $0x7d0] ss:$40 sps:$4 sm:$0xff]   ;;  %v7494_v40 = vld [vmem:[%s8814_s25 + $0x324] ss:$40 sps:$4 sm:$0xff]  }
  0x88   : > { %4531 = vmatpush1.bf16.msra.mxu1 %v7456_v14  ;;  %v7496_v41 = vld [vmem:[%s8814_s25 + $0x824] ss:$40 sps:$4 sm:$0xff]   ;;  %v7498_v42 = vld [vmem:[%s8814_s25 + $0x320] ss:$40 sps:$4 sm:$0xff]   ;;  %v7500_v44 = vld [vmem:[%s8814_s25 + $0x374] ss:$40 sps:$4 sm:$0xff]  }
  0x89   : > { %4572 = vmatpush1.bf16.msra.mxu0 %v7457_v15  ;;  %4532 = vmatprep.subr.bf16.mxu1 %v7458_v16  ;;  %v7499_v43 = vld [vmem:[%s8814_s25 + $0x820] ss:$40 sps:$4 sm:$0xff]   ;;  %v7502_v45 = vld [vmem:[%s8814_s25 + $0x874] ss:$40 sps:$4 sm:$0xff]   ;;  %v7504_v49 = vld [vmem:[%s8814_s25 + $0x370] ss:$40 sps:$4 sm:$0xff]  }
  0x8a   : > { %4573 = vmatprep.subr.bf16.mxu0 %v7460_v17  ;;  %v350_v46 = vld [vmem:[%s9861_s0] sm:$0xff]  ;;  %v351_v48 = vld [vmem:[%s9861_s0 + $0x8] sm:$0xff]  ;;  %v7505_v50 = vld [vmem:[%s8814_s25 + $0x870] ss:$40 sps:$4 sm:$0xff]   ;;  %vm4520_vm0 = vcmask 523264   ;;  %s339_s9 = smul.u32 160, %s8604_s21 }
  0x8b   : > { %v8881_v47 = vcombine.high %v350_v46, %v350_v46  ;;  %v8888_v51 = vcombine.high %v351_v48, %v351_v48  ;;  %v7506_v52 = vld [vmem:[%s8814_s25 + $0x3c4] ss:$40 sps:$4 sm:$0xff]   ;;  %v7510_v54 = vld [vmem:[%s8814_s25 + $0x3c0] ss:$40 sps:$4 sm:$0xff]   ;;  %v7512_v56 = vld [vmem:[%s8814_s25 + $0x414] ss:$40 sps:$4 sm:$0xff]   ;;  %v8910_v6 = vcombine.low %v350_v46, %v350_v46  ;;  %v8912_v7 = vcombine.low %v351_v48, %v351_v48 }
  0x8c   : > { %4533 = vmatpush1.bf16.msra.mxu1 %v7462_v18  ;;  %v7508_v53 = vld [vmem:[%s8814_s25 + $0x8c4] ss:$40 sps:$4 sm:$0xff]   ;;  %v7511_v55 = vld [vmem:[%s8814_s25 + $0x8c0] ss:$40 sps:$4 sm:$0xff]   ;;  %v7514_v57 = vld [vmem:[%s8814_s25 + $0x914] ss:$40 sps:$4 sm:$0xff]  }
  0x8d   : > { %4574 = vmatpush1.bf16.msra.mxu0 %v7463_v19  ;;  %4534 = vmatprep.subr.bf16.mxu1 %v7464_v20  ;;  %v7516_v58 = vld [vmem:[%s8814_s25 + $0x410] ss:$40 sps:$4 sm:$0xff]   ;;  %v7518_v60 = vld [vmem:[%s8814_s25 + $0x464] ss:$40 sps:$4 sm:$0xff]   ;;  %v7522_v62 = vld [vmem:[%s8814_s25 + $0x460] ss:$40 sps:$4 sm:$0xff]  }
  0x8e   : > { %4575 = vmatprep.subr.bf16.mxu0 %v7466_v21  ;;  %4556 = vmatprep.mubr.bf16.mxu1 %v8881_v47  ;;  %v7517_v59 = vld [vmem:[%s8814_s25 + $0x910] ss:$40 sps:$4 sm:$0xff]   ;;  %v7520_v61 = vld [vmem:[%s8814_s25 + $0x964] ss:$40 sps:$4 sm:$0xff]   ;;  %v7523_v63 = vld [vmem:[%s8814_s25 + $0x960] ss:$40 sps:$4 sm:$0xff]  }
  0x8f   : > { %4597 = vmatprep.mubr.bf16.mxu0 %v8888_v51  ;;  %v7524_v0 = vld [vmem:[%s8814_s25 + $0x4b4] ss:$40 sps:$4 sm:$0xff]   ;;  %v7528_v2 = vld [vmem:[%s8814_s25 + $0x4b0] ss:$40 sps:$4 sm:$0xff]   ;;  %v7534_v4 = vld [vmem:[%s8814_s25 + $0xa04] ss:$40 sps:$4 sm:$0xff]  }
  0x90   : > { %4535 = vmatpush1.bf16.msra.mxu1 %v7468_v22  ;;  %v7526_v1 = vld [vmem:[%s8814_s25 + $0x9b4] ss:$40 sps:$4 sm:$0xff]   ;;  %v7529_v3 = vld [vmem:[%s8814_s25 + $0x9b0] ss:$40 sps:$4 sm:$0xff]   ;;  %v7532_v8 = vld [vmem:[%s8814_s25 + $0xa00] ss:$40 sps:$4 sm:$0xff]  }
  0x91   : > { %4576 = vmatpush1.bf16.msra.mxu0 %v7469_v23  ;;  %4536 = vmatprep.subr.bf16.mxu1 %v7470_v24  ;;  %v7537_v5 = vld [vmem:[%s8814_s25 + $0xc] ss:$40 sps:$4 sm:$0xff]   ;;  %v7535_v9 = vld [vmem:[%s8814_s25 + $0x8] ss:$40 sps:$4 sm:$0xff]   ;;  %v7545_v11 = vld [vmem:[%s8814_s25 + $0x5c] ss:$40 sps:$4 sm:$0xff]  }
  0x92   : > { %4577 = vmatprep.subr.bf16.mxu0 %v7472_v25  ;;  %v7542_v10 = vld [vmem:[%s8814_s25 + $0xa54] ss:$40 sps:$4 sm:$0xff]   ;;  %v7540_v12 = vld [vmem:[%s8814_s25 + $0xa50] ss:$40 sps:$4 sm:$0xff]   ;;  %v7548_v14 = vld [vmem:[%s8814_s25 + $0xaa4] ss:$40 sps:$4 sm:$0xff]  }
  0x93   : > { %v7543_v13 = vld [vmem:[%s8814_s25 + $0x58] ss:$40 sps:$4 sm:$0xff]   ;;  %v7551_v15 = vld [vmem:[%s8814_s25 + $0xac] ss:$40 sps:$4 sm:$0xff]   ;;  %v7549_v17 = vld [vmem:[%s8814_s25 + $0xa8] ss:$40 sps:$4 sm:$0xff]  }
  0x94   : > { %4537 = vmatpush1.bf16.msra.mxu1 %v7474_v26  ;;  %v7546_v16 = vld [vmem:[%s8814_s25 + $0xaa0] ss:$40 sps:$4 sm:$0xff]   ;;  %v7554_v18 = vld [vmem:[%s8814_s25 + $0xaf4] ss:$40 sps:$4 sm:$0xff]   ;;  %v7552_v20 = vld [vmem:[%s8814_s25 + $0xaf0] ss:$40 sps:$4 sm:$0xff]  }
  0x95   : > { %4578 = vmatpush1.bf16.msra.mxu0 %v7475_v27  ;;  %4538 = vmatprep.subr.bf16.mxu1 %v7476_v28  ;;  %v7557_v19 = vld [vmem:[%s8814_s25 + $0xfc] ss:$40 sps:$4 sm:$0xff]   ;;  %v7555_v21 = vld [vmem:[%s8814_s25 + $0xf8] ss:$40 sps:$4 sm:$0xff]   ;;  %v7563_v23 = vld [vmem:[%s8814_s25 + $0x14c] ss:$40 sps:$4 sm:$0xff]  }
  0x96   : > { %4579 = vmatprep.subr.bf16.mxu0 %v7478_v29  ;;  %v7560_v22 = vld [vmem:[%s8814_s25 + $0xb44] ss:$40 sps:$4 sm:$0xff]   ;;  %v7558_v24 = vld [vmem:[%s8814_s25 + $0xb40] ss:$40 sps:$4 sm:$0xff]   ;;  %v7566_v26 = vld [vmem:[%s8814_s25 + $0xb94] ss:$40 sps:$4 sm:$0xff]  }
  0x97   : > { %v7561_v25 = vld [vmem:[%s8814_s25 + $0x148] ss:$40 sps:$4 sm:$0xff]   ;;  %v7569_v27 = vld [vmem:[%s8814_s25 + $0x19c] ss:$40 sps:$4 sm:$0xff]   ;;  %v7567_v29 = vld [vmem:[%s8814_s25 + $0x198] ss:$40 sps:$4 sm:$0xff]  }
  0x98   : > { %4539 = vmatpush1.bf16.msra.mxu1 %v7480_v30  ;;  %v7564_v28 = vld [vmem:[%s8814_s25 + $0xb90] ss:$40 sps:$4 sm:$0xff]   ;;  %v7572_v30 = vld [vmem:[%s8814_s25 + $0xbe4] ss:$40 sps:$4 sm:$0xff]   ;;  %p340_p10 = scmp.lt.s32.totalorder %s339_s9, 319  ;;  %p6924_p3 = scmp.ne.s32.totalorder %s8604_s21, 0 }
  0x99   : > { %4580 = vmatpush1.bf16.msra.mxu0 %v7481_v31  ;;  %4540 = vmatprep.subr.bf16.mxu1 %v7482_v32  ;;  %v7575_v31 = vld [vmem:[%s8814_s25 + $0x1ec] ss:$40 sps:$4 sm:$0xff]   ;;  %v7588_v46 = vld [vmem:[%s8814_s25 + $0xcd0] ss:$40 sps:$4 sm:$0xff]   ;;  %vm6081_vm1 = vcmask (!%p6924_p3), 64512  }
  0x9a   : > { %4581 = vmatprep.subr.bf16.mxu0 %v7484_v33  ;;  %v8944_v32 = vld [vmem:[%s9861_s0 + $0x10] sm:$0xff]  ;;  %v7570_v33 = vld [vmem:[%s8814_s25 + $0xbe0] ss:$40 sps:$4 sm:$0xff]   ;;  %s9899_s9 = smov (!%p340_p10, %s339_s9), 319 }
  0x9b   : > { %v7591_v48 = vld [vmem:[%s8814_s25 + $0x2d8] ss:$40 sps:$4 sm:$0xff]   ;;  %s6229_s14 = sshll.u32 %s9899_s9, 3 }
  0x9c   : > { %4541 = vmatpush1.bf16.msra.mxu1 %v7486_v34  ;;  %v8949_v34 = vcombine.high %v8944_v32, %v8944_v32  ;;  %s9553_s8 = scalar_lea.vmem %s9864_s3, %s6229_s14 }
  0x9d   : > { %4582 = vmatpush1.bf16.msra.mxu0 %v7487_v35  ;;  %4542 = vmatprep.subr.bf16.mxu1 %v7488_v36  ;;  %v7573_v35 = vld [vmem:[%s8814_s25 + $0x1e8] ss:$40 sps:$4 sm:$0xff]   ;;  %v7578_v36 = vld [vmem:[%s8814_s25 + $0xc34] ss:$40 sps:$4 sm:$0xff]  }
  0x9e   : > { %4583 = vmatprep.subr.bf16.mxu0 %v7490_v37  ;;  %v7581_v37 = vld [vmem:[%s8814_s25 + $0x23c] ss:$40 sps:$4 sm:$0xff]  }
  0xa0   : > { %4543 = vmatpush1.bf16.msra.mxu1 %v7492_v38  ;;  %v7576_v38 = vld [vmem:[%s8814_s25 + $0xc30] ss:$40 sps:$4 sm:$0xff]  }
  0xa1   : > { %4584 = vmatpush1.bf16.msra.mxu0 %v7493_v39  ;;  %4544 = vmatprep.subr.bf16.mxu1 %v7494_v40  ;;  %v7579_v39 = vld [vmem:[%s8814_s25 + $0x238] ss:$40 sps:$4 sm:$0xff]   ;;  %v7584_v40 = vld [vmem:[%s8814_s25 + $0xc84] ss:$40 sps:$4 sm:$0xff]  }
  0xa2   : > { %4585 = vmatprep.subr.bf16.mxu0 %v7496_v41  ;;  %v7587_v41 = vld [vmem:[%s8814_s25 + $0x28c] ss:$40 sps:$4 sm:$0xff]  }
  0xa4   : > { %4545 = vmatpush1.bf16.msra.mxu1 %v7498_v42  ;;  %v7582_v42 = vld [vmem:[%s8814_s25 + $0xc80] ss:$40 sps:$4 sm:$0xff]  }
  0xa5   : > { %4586 = vmatpush1.bf16.msra.mxu0 %v7499_v43  ;;  %4546 = vmatprep.subr.bf16.mxu1 %v7500_v44  ;;  %v7585_v43 = vld [vmem:[%s8814_s25 + $0x288] ss:$40 sps:$4 sm:$0xff]   ;;  %v7590_v44 = vld [vmem:[%s8814_s25 + $0xcd4] ss:$40 sps:$4 sm:$0xff]  }
  0xa6   : > { %4587 = vmatprep.subr.bf16.mxu0 %v7502_v45  ;;  %v7593_v45 = vld [vmem:[%s8814_s25 + $0x2dc] ss:$40 sps:$4 sm:$0xff]  }
  0xa8   : > { %4547 = vmatpush1.bf16.msra.mxu1 %v7504_v49  ;;  %v7596_v49 = vld [vmem:[%s8814_s25 + $0xd24] ss:$40 sps:$4 sm:$0xff]  }
  0xa9   : > { %4588 = vmatpush1.bf16.msra.mxu0 %v7505_v50  ;;  %4548 = vmatprep.subr.bf16.mxu1 %v7506_v52  ;;  %v7599_v50 = vld [vmem:[%s8814_s25 + $0x32c] ss:$40 sps:$4 sm:$0xff]   ;;  %v7594_v52 = vld [vmem:[%s8814_s25 + $0xd20] ss:$40 sps:$4 sm:$0xff]  }
  0xaa   : > { %4589 = vmatprep.subr.bf16.mxu0 %v7508_v53  ;;  %v7597_v53 = vld [vmem:[%s8814_s25 + $0x328] ss:$40 sps:$4 sm:$0xff]  }
  0xac   : > { %4549 = vmatpush1.bf16.msra.mxu1 %v7510_v54  ;;  %v7602_v54 = vld [vmem:[%s8814_s25 + $0xd74] ss:$40 sps:$4 sm:$0xff]  }
  0xad   : > { %4590 = vmatpush1.bf16.msra.mxu0 %v7511_v55  ;;  %4550 = vmatprep.subr.bf16.mxu1 %v7512_v56  ;;  %v7605_v55 = vld [vmem:[%s8814_s25 + $0x37c] ss:$40 sps:$4 sm:$0xff]   ;;  %v7600_v56 = vld [vmem:[%s8814_s25 + $0xd70] ss:$40 sps:$4 sm:$0xff]  }
  0xae   : > { %4591 = vmatprep.subr.bf16.mxu0 %v7514_v57  ;;  %v7603_v57 = vld [vmem:[%s8814_s25 + $0x378] ss:$40 sps:$4 sm:$0xff]  }
  0xb0   : > { %4551 = vmatpush1.bf16.msra.mxu1 %v7516_v58  ;;  %v7608_v58 = vld [vmem:[%s8814_s25 + $0xdc4] ss:$40 sps:$4 sm:$0xff]  }
  0xb1   : > { %4592 = vmatpush1.bf16.msra.mxu0 %v7517_v59  ;;  %4552 = vmatprep.subr.bf16.mxu1 %v7518_v60  ;;  %v7611_v59 = vld [vmem:[%s8814_s25 + $0x3cc] ss:$40 sps:$4 sm:$0xff]   ;;  %v7606_v60 = vld [vmem:[%s8814_s25 + $0xdc0] ss:$40 sps:$4 sm:$0xff]  }
  0xb2   : > { %4593 = vmatprep.subr.bf16.mxu0 %v7520_v61  ;;  %v7609_v61 = vld [vmem:[%s8814_s25 + $0x3c8] ss:$40 sps:$4 sm:$0xff]  }
  0xb4   : > { %4553 = vmatpush1.bf16.msra.mxu1 %v7522_v62  ;;  %v7614_v62 = vld [vmem:[%s8814_s25 + $0xe14] ss:$40 sps:$4 sm:$0xff]  }
  0xb5   : > { %4594 = vmatpush1.bf16.msra.mxu0 %v7523_v63  ;;  %4554 = vmatprep.subr.bf16.mxu1 %v7524_v0  ;;  %v7617_v63 = vld [vmem:[%s8814_s25 + $0x41c] ss:$40 sps:$4 sm:$0xff]   ;;  %v7612_v0 = vld [vmem:[%s8814_s25 + $0xe10] ss:$40 sps:$4 sm:$0xff]  }
  0xb6   : > { %4595 = vmatprep.subr.bf16.mxu0 %v7526_v1  ;;  %v7615_v1 = vld [vmem:[%s8814_s25 + $0x418] ss:$40 sps:$4 sm:$0xff]  }
  0xb8   : > { %4555 = vmatpush1.bf16.msra.mxu1 %v7528_v2  ;;  %v7620_v2 = vld [vmem:[%s8814_s25 + $0xe64] ss:$40 sps:$4 sm:$0xff]  }
  0xb9   : > { %4596 = vmatpush1.bf16.msra.mxu0 %v7529_v3  ;;  %4729 = vmatprep.subr.bf16.mxu1 %v7537_v5  ;;  %v7623_v3 = vld [vmem:[%s8814_s25 + $0x46c] ss:$40 sps:$4 sm:$0xff]   ;;  %v7621_v5 = vld [vmem:[%s8814_s25 + $0x468] ss:$40 sps:$4 sm:$0xff]  }
  0xba   : > { %4606 = vmatprep.subr.bf16.mxu0 %v7534_v4  ;;  %v7618_v4 = vld [vmem:[%s8814_s25 + $0xe60] ss:$40 sps:$4 sm:$0xff]  }
  0xbb   : > { %4557 = vmatmul.mubr.bf16.vlgmr.msra.gmra.mrb[0].mxu1 %v8910_v6 }
  0xbc   : > { %4598 = vmatmul.mubr.bf16.vlgmr.msra.gmra.mrb[0].mxu0 %v8912_v7  ;;  %4730 = vmatpush1.bf16.msra.mxu1 %v7535_v9  ;;  %v7629_v9 = vld [vmem:[%s8814_s25 + $0x4bc] ss:$40 sps:$4 sm:$0xff]  }
  0xbd   : > { %4607 = vmatpush1.bf16.msra.mxu0 %v7532_v8  ;;  %4731 = vmatprep.subr.bf16.mxu1 %v7545_v11  ;;  %v7626_v8 = vld [vmem:[%s8814_s25 + $0xeb4] ss:$40 sps:$4 sm:$0xff]   ;;  %v7627_v11 = vld [vmem:[%s8814_s25 + $0x4b8] ss:$40 sps:$4 sm:$0xff]  }
  0xbe   : > { %4608 = vmatprep.subr.bf16.mxu0 %v7542_v10  ;;  %4761 = vmatprep.mubr.bf16.mxu1 %v8881_v47  ;;  %v7624_v10 = vld [vmem:[%s8814_s25 + $0xeb0] ss:$40 sps:$4 sm:$0xff]  }
  0xbf   : > { %4638 = vmatprep.mubr.bf16.mxu0 %v8949_v34 }
  0xc0   : > { %4732 = vmatpush1.bf16.msra.mxu1 %v7543_v13  ;;  %v7636_v13 = vld [vmem:[%s8814_s25 + $0x50c] ss:$40 sps:$4 sm:$0xff]  }
  0xc1   : > { %4609 = vmatpush1.bf16.msra.mxu0 %v7540_v12  ;;  %4733 = vmatprep.subr.bf16.mxu1 %v7551_v15  ;;  %v7633_v12 = vld [vmem:[%s8814_s25 + $0xf04] ss:$40 sps:$4 sm:$0xff]   ;;  %v7634_v15 = vld [vmem:[%s8814_s25 + $0x508] ss:$40 sps:$4 sm:$0xff]  }
  0xc2   : > { %4610 = vmatprep.subr.bf16.mxu0 %v7548_v14  ;;  %v7631_v14 = vld [vmem:[%s8814_s25 + $0xf00] ss:$40 sps:$4 sm:$0xff]  }
  0xc4   : > { %4734 = vmatpush1.bf16.msra.mxu1 %v7549_v17  ;;  %v7640_v17 = vld [vmem:[%s8814_s25 + $0xf54] ss:$40 sps:$4 sm:$0xff]  }
  0xc5   : > { %4611 = vmatpush1.bf16.msra.mxu0 %v7546_v16  ;;  %4735 = vmatprep.subr.bf16.mxu1 %v7557_v19  ;;  %v8995_v16 = vcombine.low %v8944_v32, %v8944_v32  ;;  %v9002_v19 = vld [vmem:[%s9861_s0 + $0x18] sm:$0xff]  ;;  %v7661_v32 = vld [vmem:[%s8814_s25 + $0x64c] ss:$40 sps:$4 sm:$0xff]  }
  0xc6   : > { %4612 = vmatprep.subr.bf16.mxu0 %v7554_v18  ;;  %v7643_v18 = vld [vmem:[%s8814_s25 + $0x55c] ss:$40 sps:$4 sm:$0xff]  }
  0xc8   : > { %4736 = vmatpush1.bf16.msra.mxu1 %v7555_v21  ;;  %v7638_v21 = vld [vmem:[%s8814_s25 + $0xf50] ss:$40 sps:$4 sm:$0xff]  }
  0xc9   : > { %4613 = vmatpush1.bf16.msra.mxu0 %v7552_v20  ;;  %4737 = vmatprep.subr.bf16.mxu1 %v7563_v23  ;;  %v9006_v20 = vcombine.high %v9002_v19, %v9002_v19  ;;  %v7646_v23 = vld [vmem:[%s8814_s25 + $0xfa4] ss:$40 sps:$4 sm:$0xff]  }
  0xca   : > { %4614 = vmatprep.subr.bf16.mxu0 %v7560_v22  ;;  %v7641_v22 = vld [vmem:[%s8814_s25 + $0x558] ss:$40 sps:$4 sm:$0xff]  }
  0xcc   : > { %4738 = vmatpush1.bf16.msra.mxu1 %v7561_v25  ;;  %v7644_v25 = vld [vmem:[%s8814_s25 + $0xfa0] ss:$40 sps:$4 sm:$0xff]  }
  0xcd   : > { %4615 = vmatpush1.bf16.msra.mxu0 %v7558_v24  ;;  %4739 = vmatprep.subr.bf16.mxu1 %v7569_v27  ;;  %v7649_v24 = vld [vmem:[%s8814_s25 + $0x5ac] ss:$40 sps:$4 sm:$0xff]  }
  0xce   : > { %4616 = vmatprep.subr.bf16.mxu0 %v7566_v26  ;;  %v7647_v26 = vld [vmem:[%s8814_s25 + $0x5a8] ss:$40 sps:$4 sm:$0xff]   ;;  %v7652_v27 = vld [vmem:[%s8814_s25 + $0xff4] ss:$40 sps:$4 sm:$0xff]  }
  0xd0   : > { %4740 = vmatpush1.bf16.msra.mxu1 %v7567_v29  ;;  %v7650_v29 = vld [vmem:[%s8814_s25 + $0xff0] ss:$40 sps:$4 sm:$0xff]  }
  0xd1   : > { %4617 = vmatpush1.bf16.msra.mxu0 %v7564_v28  ;;  %4741 = vmatprep.subr.bf16.mxu1 %v7575_v31  ;;  %v7655_v28 = vld [vmem:[%s8814_s25 + $0x5fc] ss:$40 sps:$4 sm:$0xff]  }
  0xd2   : > { %4618 = vmatprep.subr.bf16.mxu0 %v7572_v30  ;;  %v7653_v30 = vld [vmem:[%s8814_s25 + $0x5f8] ss:$40 sps:$4 sm:$0xff]   ;;  %v7658_v31 = vld [vmem:[%s8814_s25 + $0x1044] ss:$40 sps:$4 sm:$0xff]  }
  0xd4   : > { %4742 = vmatpush1.bf16.msra.mxu1 %v7573_v35  ;;  %v7659_v35 = vld [vmem:[%s8814_s25 + $0x648] ss:$40 sps:$4 sm:$0xff]  }
  0xd5   : > { %4619 = vmatpush1.bf16.msra.mxu0 %v7570_v33  ;;  %4743 = vmatprep.subr.bf16.mxu1 %v7581_v37  ;;  %v7656_v33 = vld [vmem:[%s8814_s25 + $0x1040] ss:$40 sps:$4 sm:$0xff]   ;;  %v7667_v37 = vld [vmem:[%s8814_s25 + $0x69c] ss:$40 sps:$4 sm:$0xff]  }
  0xd6   : > { %4620 = vmatprep.subr.bf16.mxu0 %v7578_v36  ;;  %v7664_v36 = vld [vmem:[%s8814_s25 + $0x1094] ss:$40 sps:$4 sm:$0xff]  }
  0xd8   : > { %4744 = vmatpush1.bf16.msra.mxu1 %v7579_v39  ;;  %v7665_v39 = vld [vmem:[%s8814_s25 + $0x698] ss:$40 sps:$4 sm:$0xff]  }
  0xd9   : > { %4621 = vmatpush1.bf16.msra.mxu0 %v7576_v38  ;;  %4745 = vmatprep.subr.bf16.mxu1 %v7587_v41  ;;  %v7662_v38 = vld [vmem:[%s8814_s25 + $0x1090] ss:$40 sps:$4 sm:$0xff]   ;;  %v7673_v41 = vld [vmem:[%s8814_s25 + $0x6ec] ss:$40 sps:$4 sm:$0xff]  }
  0xda   : > { %4622 = vmatprep.subr.bf16.mxu0 %v7584_v40  ;;  %v7670_v40 = vld [vmem:[%s8814_s25 + $0x10e4] ss:$40 sps:$4 sm:$0xff]  }
  0xdc   : > { %4746 = vmatpush1.bf16.msra.mxu1 %v7585_v43  ;;  %v7671_v43 = vld [vmem:[%s8814_s25 + $0x6e8] ss:$40 sps:$4 sm:$0xff]  }
  0xdd   : > { %4623 = vmatpush1.bf16.msra.mxu0 %v7582_v42  ;;  %4747 = vmatprep.subr.bf16.mxu1 %v7593_v45  ;;  %v7668_v42 = vld [vmem:[%s8814_s25 + $0x10e0] ss:$40 sps:$4 sm:$0xff]   ;;  %v7679_v45 = vld [vmem:[%s8814_s25 + $0x73c] ss:$40 sps:$4 sm:$0xff]  }
  0xde   : > { %4624 = vmatprep.subr.bf16.mxu0 %v7590_v44  ;;  %v7676_v44 = vld [vmem:[%s8814_s25 + $0x1134] ss:$40 sps:$4 sm:$0xff]  }
  0xe0   : > { %4748 = vmatpush1.bf16.msra.mxu1 %v7591_v48  ;;  %v7677_v48 = vld [vmem:[%s8814_s25 + $0x738] ss:$40 sps:$4 sm:$0xff]  }
  0xe1   : > { %4625 = vmatpush1.bf16.msra.mxu0 %v7588_v46  ;;  %4749 = vmatprep.subr.bf16.mxu1 %v7599_v50  ;;  %v7674_v46 = vld [vmem:[%s8814_s25 + $0x1130] ss:$40 sps:$4 sm:$0xff]   ;;  %v7685_v50 = vld [vmem:[%s8814_s25 + $0x78c] ss:$40 sps:$4 sm:$0xff]  }
  0xe2   : > { %4626 = vmatprep.subr.bf16.mxu0 %v7596_v49  ;;  %v7682_v49 = vld [vmem:[%s8814_s25 + $0x1184] ss:$40 sps:$4 sm:$0xff]  }
  0xe4   : > { %4750 = vmatpush1.bf16.msra.mxu1 %v7597_v53  ;;  %v7683_v53 = vld [vmem:[%s8814_s25 + $0x788] ss:$40 sps:$4 sm:$0xff]  }
  0xe5   : > { %4627 = vmatpush1.bf16.msra.mxu0 %v7594_v52  ;;  %4751 = vmatprep.subr.bf16.mxu1 %v7605_v55  ;;  %v7680_v52 = vld [vmem:[%s8814_s25 + $0x1180] ss:$40 sps:$4 sm:$0xff]   ;;  %v7691_v55 = vld [vmem:[%s8814_s25 + $0x7dc] ss:$40 sps:$4 sm:$0xff]  }
  0xe6   : > { %4628 = vmatprep.subr.bf16.mxu0 %v7602_v54  ;;  %v7688_v54 = vld [vmem:[%s8814_s25 + $0x11d4] ss:$40 sps:$4 sm:$0xff]  }
  0xe8   : > { %4752 = vmatpush1.bf16.msra.mxu1 %v7603_v57  ;;  %v7689_v57 = vld [vmem:[%s8814_s25 + $0x7d8] ss:$40 sps:$4 sm:$0xff]  }
  0xe9   : > { %4629 = vmatpush1.bf16.msra.mxu0 %v7600_v56  ;;  %4753 = vmatprep.subr.bf16.mxu1 %v7611_v59  ;;  %v7686_v56 = vld [vmem:[%s8814_s25 + $0x11d0] ss:$40 sps:$4 sm:$0xff]   ;;  %v7697_v59 = vld [vmem:[%s8814_s25 + $0x82c] ss:$40 sps:$4 sm:$0xff]  }
  0xea   : > { %4630 = vmatprep.subr.bf16.mxu0 %v7608_v58  ;;  %v7694_v58 = vld [vmem:[%s8814_s25 + $0x1224] ss:$40 sps:$4 sm:$0xff]  }
  0xec   : > { %4754 = vmatpush1.bf16.msra.mxu1 %v7609_v61  ;;  %v7695_v61 = vld [vmem:[%s8814_s25 + $0x828] ss:$40 sps:$4 sm:$0xff]  }
  0xed   : > { %4631 = vmatpush1.bf16.msra.mxu0 %v7606_v60  ;;  %4755 = vmatprep.subr.bf16.mxu1 %v7617_v63  ;;  %v7692_v60 = vld [vmem:[%s8814_s25 + $0x1220] ss:$40 sps:$4 sm:$0xff]   ;;  %v7703_v63 = vld [vmem:[%s8814_s25 + $0x87c] ss:$40 sps:$4 sm:$0xff]  }
  0xee   : > { %4632 = vmatprep.subr.bf16.mxu0 %v7614_v62  ;;  %v7700_v62 = vld [vmem:[%s8814_s25 + $0x1274] ss:$40 sps:$4 sm:$0xff]  }
  0xf0   : > { %4756 = vmatpush1.bf16.msra.mxu1 %v7615_v1  ;;  %v7701_v1 = vld [vmem:[%s8814_s25 + $0x878] ss:$40 sps:$4 sm:$0xff]  }
  0xf1   : > { %4633 = vmatpush1.bf16.msra.mxu0 %v7612_v0  ;;  %4757 = vmatprep.subr.bf16.mxu1 %v7623_v3  ;;  %v7698_v0 = vld [vmem:[%s8814_s25 + $0x1270] ss:$40 sps:$4 sm:$0xff]   ;;  %v7709_v3 = vld [vmem:[%s8814_s25 + $0x8cc] ss:$40 sps:$4 sm:$0xff]  }
  0xf2   : > { %4634 = vmatprep.subr.bf16.mxu0 %v7620_v2  ;;  %v7706_v2 = vld [vmem:[%s8814_s25 + $0x12c4] ss:$40 sps:$4 sm:$0xff]  }
  0xf4   : > { %4758 = vmatpush1.bf16.msra.mxu1 %v7621_v5  ;;  %v7707_v5 = vld [vmem:[%s8814_s25 + $0x8c8] ss:$40 sps:$4 sm:$0xff]  }
  0xf5   : > { %4635 = vmatpush1.bf16.msra.mxu0 %v7618_v4  ;;  %4759 = vmatprep.subr.bf16.mxu1 %v7629_v9  ;;  %v7704_v4 = vld [vmem:[%s8814_s25 + $0x12c0] ss:$40 sps:$4 sm:$0xff]   ;;  %v7715_v9 = vld [vmem:[%s8814_s25 + $0x91c] ss:$40 sps:$4 sm:$0xff]  }
  0xf6   : > { %4636 = vmatprep.subr.bf16.mxu0 %v7626_v8  ;;  %v7712_v8 = vld [vmem:[%s8814_s25 + $0x1314] ss:$40 sps:$4 sm:$0xff]  }
  0xf8   : > { %4760 = vmatpush1.bf16.msra.mxu1 %v7627_v11  ;;  %v7713_v11 = vld [vmem:[%s8814_s25 + $0x918] ss:$40 sps:$4 sm:$0xff]  }
  0xf9   : > { %4637 = vmatpush1.bf16.msra.mxu0 %v7624_v10  ;;  %4770 = vmatprep.subr.bf16.mxu1 %v7636_v13  ;;  %v7710_v10 = vld [vmem:[%s8814_s25 + $0x1310] ss:$40 sps:$4 sm:$0xff]   ;;  %v7721_v13 = vld [vmem:[%s8814_s25 + $0x96c] ss:$40 sps:$4 sm:$0xff]  }
  0xfa   : > { %4647 = vmatprep.subr.bf16.mxu0 %v7633_v12  ;;  %v7718_v12 = vld [vmem:[%s8814_s25 + $0x1364] ss:$40 sps:$4 sm:$0xff]  }
  0xfb   : > { %4762 = vmatmul.mubr.bf16.vlgmr.msra.gmra.mrb[4].mxu1 %v8910_v6 }
  0xfc   : > { %4639 = vmatmul.mubr.bf16.vlgmr.msra.gmra.mrb[0].mxu0 %v8995_v16  ;;  %4771 = vmatpush1.bf16.msra.mxu1 %v7634_v15  ;;  %v7719_v15 = vld [vmem:[%s8814_s25 + $0x968] ss:$40 sps:$4 sm:$0xff]  }
  0xfd   : > { %4648 = vmatpush1.bf16.msra.mxu0 %v7631_v14  ;;  %4772 = vmatprep.subr.bf16.mxu1 %v7643_v18  ;;  %v7716_v14 = vld [vmem:[%s8814_s25 + $0x1360] ss:$40 sps:$4 sm:$0xff]   ;;  %v7727_v18 = vld [vmem:[%s8814_s25 + $0x9bc] ss:$40 sps:$4 sm:$0xff]  }
  0xfe   : > { %4649 = vmatprep.subr.bf16.mxu0 %v7640_v17  ;;  %4679 = vmatprep.mubr.bf16.mxu0 %v9006_v20  ;;  %v7724_v17 = vld [vmem:[%s8814_s25 + $0x13b4] ss:$40 sps:$4 sm:$0xff]  }
  0xff   : > { %4802 = vmatprep.mubr.bf16.mxu1 %v8888_v51 }
 0x100   : > { %4773 = vmatpush1.bf16.msra.mxu1 %v7641_v22  ;;  %v7725_v22 = vld [vmem:[%s8814_s25 + $0x9b8] ss:$40 sps:$4 sm:$0xff]  }
 0x101   : > { %4650 = vmatpush1.bf16.msra.mxu0 %v7638_v21  ;;  %4774 = vmatprep.subr.bf16.mxu1 %v7649_v24  ;;  %v7722_v21 = vld [vmem:[%s8814_s25 + $0x13b0] ss:$40 sps:$4 sm:$0xff]   ;;  %v7734_v24 = vld [vmem:[%s8814_s25 + $0xa0c] ss:$40 sps:$4 sm:$0xff]  }
 0x102   : > { %4651 = vmatprep.subr.bf16.mxu0 %v7646_v23  ;;  %v7731_v23 = vld [vmem:[%s8814_s25 + $0x1404] ss:$40 sps:$4 sm:$0xff]  }
 0x104   : > { %4775 = vmatpush1.bf16.msra.mxu1 %v7647_v26  ;;  %v7729_v26 = vld [vmem:[%s8814_s25 + $0x1400] ss:$40 sps:$4 sm:$0xff]  }
 0x105   : > { %4652 = vmatpush1.bf16.msra.mxu0 %v7644_v25  ;;  %4776 = vmatprep.subr.bf16.mxu1 %v7655_v28  ;;  %v9074_v25 = vcombine.low %v9002_v19, %v9002_v19  ;;  %v7738_v28 = vld [vmem:[%s8814_s25 + $0x1454] ss:$40 sps:$4 sm:$0xff]   ;;  %v7736_v19 = vld [vmem:[%s8814_s25 + $0x1450] ss:$40 sps:$4 sm:$0xff]  }
 0x106   : > { %4653 = vmatprep.subr.bf16.mxu0 %v7652_v27  ;;  %v7732_v27 = vld [vmem:[%s8814_s25 + $0xa08] ss:$40 sps:$4 sm:$0xff]  }
 0x108   : > { %4777 = vmatpush1.bf16.msra.mxu1 %v7653_v30  ;;  %v7739_v30 = vld [vmem:[%s8814_s25 + $0xa58] ss:$40 sps:$4 sm:$0xff]  }
 0x109   : > { %4654 = vmatpush1.bf16.msra.mxu0 %v7650_v29  ;;  %4778 = vmatprep.subr.bf16.mxu1 %v7661_v32  ;;  %v7741_v29 = vld [vmem:[%s8814_s25 + $0xa5c] ss:$40 sps:$4 sm:$0xff]   ;;  %v7747_v32 = vld [vmem:[%s8814_s25 + $0xaac] ss:$40 sps:$4 sm:$0xff]  }
 0x10a   : > { %4655 = vmatprep.subr.bf16.mxu0 %v7658_v31  ;;  %v7744_v31 = vld [vmem:[%s8814_s25 + $0x14a4] ss:$40 sps:$4 sm:$0xff]  }
 0x10c   : > { %4779 = vmatpush1.bf16.msra.mxu1 %v7659_v35  ;;  %v7742_v35 = vld [vmem:[%s8814_s25 + $0x14a0] ss:$40 sps:$4 sm:$0xff]  }
 0x10d   : > { %4656 = vmatpush1.bf16.msra.mxu0 %v7656_v33  ;;  %4780 = vmatprep.subr.bf16.mxu1 %v7667_v37  ;;  %v8620_v33 = vmov 0   ;;  %v7750_v37 = vld [vmem:[%s8814_s25 + $0x14f4] ss:$40 sps:$4 sm:$0xff]  }
 0x10e   : > { %4657 = vmatprep.subr.bf16.mxu0 %v7664_v36  ;;  %v7745_v36 = vld [vmem:[%s8814_s25 + $0xaa8] ss:$40 sps:$4 sm:$0xff]  }
 0x110   : > { %4781 = vmatpush1.bf16.msra.mxu1 %v7665_v39  ;;  %v7748_v39 = vld [vmem:[%s8814_s25 + $0x14f0] ss:$40 sps:$4 sm:$0xff]  }
 0x111   : > { %4658 = vmatpush1.bf16.msra.mxu0 %v7662_v38  ;;  %4782 = vmatprep.subr.bf16.mxu1 %v7673_v41  ;;  %v7753_v38 = vld [vmem:[%s8814_s25 + $0xafc] ss:$40 sps:$4 sm:$0xff]   ;;  %v7757_v41 = vld [vmem:[%s8814_s25 + $0xb4c] ss:$40 sps:$4 sm:$0xff]  }
 0x112   : > { %4659 = vmatprep.subr.bf16.mxu0 %v7670_v40  ;;  %v7751_v40 = vld [vmem:[%s8814_s25 + $0xaf8] ss:$40 sps:$4 sm:$0xff]  }
 0x114   : > { %4783 = vmatpush1.bf16.msra.mxu1 %v7671_v43  ;;  %v7754_v43 = vld [vmem:[%s9861_s0 + $0x20] ss:$0 sps:$4 sm:$0xff]  }
 0x115   : > { %4660 = vmatpush1.bf16.msra.mxu0 %v7668_v42  ;;  %4784 = vmatprep.subr.bf16.mxu1 %v7679_v45  ;;  %v7760_v42 = vld [vmem:[%s8814_s25 + $0x14] ss:$40 sps:$4 sm:$0xff]   ;;  %v7758_v45 = vld [vmem:[%s8814_s25 + $0x10] ss:$40 sps:$4 sm:$0xff]  }
 0x116   : > { %4661 = vmatprep.subr.bf16.mxu0 %v7676_v44  ;;  %v7755_v44 = vld [vmem:[%s8814_s25 + $0xb48] ss:$40 sps:$4 sm:$0xff]  }
 0x118   : > { %4785 = vmatpush1.bf16.msra.mxu1 %v7677_v48  ;;  %v7766_v48 = vld [vmem:[%s8814_s25 + $0x64] ss:$40 sps:$4 sm:$0xff]  }
 0x119   : > { %4662 = vmatpush1.bf16.msra.mxu0 %v7674_v46  ;;  %4786 = vmatprep.subr.bf16.mxu1 %v7685_v50  ;;  %v7763_v46 = vld [vmem:[%s8814_s25 + $0xb9c] ss:$40 sps:$4 sm:$0xff]   ;;  %v7764_v50 = vld [vmem:[%s8814_s25 + $0x60] ss:$40 sps:$4 sm:$0xff]  }
 0x11a   : > { %4663 = vmatprep.subr.bf16.mxu0 %v7682_v49  ;;  %v7761_v49 = vld [vmem:[%s8814_s25 + $0xb98] ss:$40 sps:$4 sm:$0xff]  }
 0x11c   : > { %4787 = vmatpush1.bf16.msra.mxu1 %v7683_v53  ;;  %v7772_v53 = vld [vmem:[%s8814_s25 + $0xb4] ss:$40 sps:$4 sm:$0xff]  }
 0x11d   : > { %4664 = vmatpush1.bf16.msra.mxu0 %v7680_v52  ;;  %4788 = vmatprep.subr.bf16.mxu1 %v7691_v55  ;;  %v7769_v52 = vld [vmem:[%s8814_s25 + $0xbec] ss:$40 sps:$4 sm:$0xff]   ;;  %v7770_v55 = vld [vmem:[%s8814_s25 + $0xb0] ss:$40 sps:$4 sm:$0xff]  }
 0x11e   : > { %4665 = vmatprep.subr.bf16.mxu0 %v7688_v54  ;;  %v7767_v54 = vld [vmem:[%s8814_s25 + $0xbe8] ss:$40 sps:$4 sm:$0xff]  }
 0x120   : > { %4789 = vmatpush1.bf16.msra.mxu1 %v7689_v57  ;;  %v7778_v57 = vld [vmem:[%s8814_s25 + $0x104] ss:$40 sps:$4 sm:$0xff]  }
 0x121   : > { %4666 = vmatpush1.bf16.msra.mxu0 %v7686_v56  ;;  %4790 = vmatprep.subr.bf16.mxu1 %v7697_v59  ;;  %v7775_v56 = vld [vmem:[%s8814_s25 + $0xc3c] ss:$40 sps:$4 sm:$0xff]   ;;  %v7776_v59 = vld [vmem:[%s8814_s25 + $0x100] ss:$40 sps:$4 sm:$0xff]  }
 0x122   : > { %4667 = vmatprep.subr.bf16.mxu0 %v7694_v58  ;;  %v7773_v58 = vld [vmem:[%s8814_s25 + $0xc38] ss:$40 sps:$4 sm:$0xff]  }
 0x124   : > { %4791 = vmatpush1.bf16.msra.mxu1 %v7695_v61  ;;  %v7784_v61 = vld [vmem:[%s8814_s25 + $0x154] ss:$40 sps:$4 sm:$0xff]  }
 0x125   : > { %4668 = vmatpush1.bf16.msra.mxu0 %v7692_v60  ;;  %4792 = vmatprep.subr.bf16.mxu1 %v7703_v63  ;;  %v7781_v60 = vld [vmem:[%s8814_s25 + $0xc8c] ss:$40 sps:$4 sm:$0xff]   ;;  %v7782_v63 = vld [vmem:[%s8814_s25 + $0x150] ss:$40 sps:$4 sm:$0xff]  }
 0x126   : > { %4669 = vmatprep.subr.bf16.mxu0 %v7700_v62  ;;  %v7779_v62 = vld [vmem:[%s8814_s25 + $0xc88] ss:$40 sps:$4 sm:$0xff]  }
 0x128   : > { %4793 = vmatpush1.bf16.msra.mxu1 %v7701_v1  ;;  %v7790_v1 = vld [vmem:[%s8814_s25 + $0x1a4] ss:$40 sps:$4 sm:$0xff]  }
 0x129   : > { %4670 = vmatpush1.bf16.msra.mxu0 %v7698_v0  ;;  %4794 = vmatprep.subr.bf16.mxu1 %v7709_v3  ;;  %v7787_v0 = vld [vmem:[%s8814_s25 + $0xcdc] ss:$40 sps:$4 sm:$0xff]   ;;  %v7788_v3 = vld [vmem:[%s8814_s25 + $0x1a0] ss:$40 sps:$4 sm:$0xff]  }
 0x12a   : > { %4671 = vmatprep.subr.bf16.mxu0 %v7706_v2  ;;  %v7785_v2 = vld [vmem:[%s8814_s25 + $0xcd8] ss:$40 sps:$4 sm:$0xff]  }
 0x12c   : > { %4795 = vmatpush1.bf16.msra.mxu1 %v7707_v5  ;;  %v7796_v5 = vld [vmem:[%s8814_s25 + $0x1f4] ss:$40 sps:$4 sm:$0xff]  }
 0x12d   : > { %4672 = vmatpush1.bf16.msra.mxu0 %v7704_v4  ;;  %4796 = vmatprep.subr.bf16.mxu1 %v7715_v9  ;;  %v7793_v4 = vld [vmem:[%s8814_s25 + $0xd2c] ss:$40 sps:$4 sm:$0xff]   ;;  %v7794_v9 = vld [vmem:[%s8814_s25 + $0x1f0] ss:$40 sps:$4 sm:$0xff]  }
 0x12e   : > { %4673 = vmatprep.subr.bf16.mxu0 %v7712_v8  ;;  %v7791_v8 = vld [vmem:[%s8814_s25 + $0xd28] ss:$40 sps:$4 sm:$0xff]  }
 0x130   : > { %4797 = vmatpush1.bf16.msra.mxu1 %v7713_v11  ;;  %v7802_v11 = vld [vmem:[%s8814_s25 + $0x244] ss:$40 sps:$4 sm:$0xff]  }
 0x131   : > { %4674 = vmatpush1.bf16.msra.mxu0 %v7710_v10  ;;  %4798 = vmatprep.subr.bf16.mxu1 %v7721_v13  ;;  %v7799_v10 = vld [vmem:[%s8814_s25 + $0xd7c] ss:$40 sps:$4 sm:$0xff]   ;;  %v7800_v13 = vld [vmem:[%s8814_s25 + $0x240] ss:$40 sps:$4 sm:$0xff]  }
 0x132   : > { %4675 = vmatprep.subr.bf16.mxu0 %v7718_v12  ;;  %v7797_v12 = vld [vmem:[%s8814_s25 + $0xd78] ss:$40 sps:$4 sm:$0xff]  }
 0x134   : > { %4799 = vmatpush1.bf16.msra.mxu1 %v7719_v15  ;;  %v7808_v15 = vld [vmem:[%s8814_s25 + $0x294] ss:$40 sps:$4 sm:$0xff]  }
 0x135   : > { %4676 = vmatpush1.bf16.msra.mxu0 %v7716_v14  ;;  %4800 = vmatprep.subr.bf16.mxu1 %v7727_v18  ;;  %v7805_v14 = vld [vmem:[%s8814_s25 + $0xdcc] ss:$40 sps:$4 sm:$0xff]   ;;  %v7806_v18 = vld [vmem:[%s8814_s25 + $0x290] ss:$40 sps:$4 sm:$0xff]  }
 0x136   : > { %4677 = vmatprep.subr.bf16.mxu0 %v7724_v17  ;;  %v7803_v17 = vld [vmem:[%s8814_s25 + $0xdc8] ss:$40 sps:$4 sm:$0xff]  }
 0x138   : > { %4801 = vmatpush1.bf16.msra.mxu1 %v7725_v22  ;;  %v7814_v22 = vld [vmem:[%s8814_s25 + $0x2e4] ss:$40 sps:$4 sm:$0xff]  }
 0x139   : > { %4678 = vmatpush1.bf16.msra.mxu0 %v7722_v21  ;;  %4811 = vmatprep.subr.bf16.mxu1 %v7734_v24  ;;  %v7811_v21 = vld [vmem:[%s8814_s25 + $0xe1c] ss:$40 sps:$4 sm:$0xff]   ;;  %v7812_v24 = vld [vmem:[%s8814_s25 + $0x2e0] ss:$40 sps:$4 sm:$0xff]  }
 0x13a   : > { %4688 = vmatprep.subr.bf16.mxu0 %v7731_v23  ;;  %v7809_v23 = vld [vmem:[%s8814_s25 + $0xe18] ss:$40 sps:$4 sm:$0xff]  }
 0x13b   : > { %4803 = vmatmul.mubr.bf16.vlgmr.msra.gmra.mrb[4].mxu1 %v8912_v7 }
 0x13c   : > { %4680 = vmatmul.mubr.bf16.vlgmr.msra.gmra.mrb[0].mxu0 %v9074_v25  ;;  %4812 = vmatpush1.bf16.msra.mxu1 %v7732_v27  ;;  %v7820_v27 = vld [vmem:[%s8814_s25 + $0x334] ss:$40 sps:$4 sm:$0xff]  }
 0x13d   : > { %4689 = vmatpush1.bf16.msra.mxu0 %v7729_v26  ;;  %4813 = vmatprep.subr.bf16.mxu1 %v7741_v29  ;;  %v7817_v26 = vld [vmem:[%s8814_s25 + $0xe6c] ss:$40 sps:$4 sm:$0xff]   ;;  %v7818_v29 = vld [vmem:[%s8814_s25 + $0x330] ss:$40 sps:$4 sm:$0xff]  }
 0x13e   : > { %4690 = vmatprep.subr.bf16.mxu0 %v7738_v28  ;;  %4720 = vmatprep.mubr.bf16.mxu0 %v8620_v33  ;;  %v7815_v28 = vld [vmem:[%s8814_s25 + $0xe68] ss:$40 sps:$4 sm:$0xff]  }
 0x13f   : > { %4843 = vmatprep.mubr.bf16.mxu1 %v8949_v34 }
 0x140   : > { %4814 = vmatpush1.bf16.msra.mxu1 %v7739_v30  ;;  %v7826_v30 = vld [vmem:[%s8814_s25 + $0x384] ss:$40 sps:$4 sm:$0xff]  }
 0x141   : > { %4691 = vmatpush1.bf16.msra.mxu0 %v7736_v19  ;;  %4815 = vmatprep.subr.bf16.mxu1 %v7747_v32  ;;  %v7823_v19 = vld [vmem:[%s8814_s25 + $0xebc] ss:$40 sps:$4 sm:$0xff]   ;;  %v7824_v32 = vld [vmem:[%s8814_s25 + $0x380] ss:$40 sps:$4 sm:$0xff]  }
 0x142   : > { %4692 = vmatprep.subr.bf16.mxu0 %v7744_v31  ;;  %v7821_v31 = vld [vmem:[%s8814_s25 + $0xeb8] ss:$40 sps:$4 sm:$0xff]  }
 0x144   : > { %4816 = vmatpush1.bf16.msra.mxu1 %v7745_v36  ;;  %v7832_v36 = vld [vmem:[%s8814_s25 + $0x3d4] ss:$40 sps:$4 sm:$0xff]  }
 0x145   : > { %4693 = vmatpush1.bf16.msra.mxu0 %v7742_v35  ;;  %4817 = vmatprep.subr.bf16.mxu1 %v7753_v38  ;;  %v7829_v35 = vld [vmem:[%s8814_s25 + $0xf0c] ss:$40 sps:$4 sm:$0xff]   ;;  %v7830_v38 = vld [vmem:[%s8814_s25 + $0x3d0] ss:$40 sps:$4 sm:$0xff]  }
 0x146   : > { %4694 = vmatprep.subr.bf16.mxu0 %v7750_v37  ;;  %v7827_v37 = vld [vmem:[%s8814_s25 + $0xf08] ss:$40 sps:$4 sm:$0xff]  }
 0x148   : > { %4818 = vmatpush1.bf16.msra.mxu1 %v7751_v40  ;;  %v7838_v40 = vld [vmem:[%s8814_s25 + $0x424] ss:$40 sps:$4 sm:$0xff]  }
 0x149   : > { %4695 = vmatpush1.bf16.msra.mxu0 %v7748_v39  ;;  %4819 = vmatprep.subr.bf16.mxu1 %v7757_v41  ;;  %v7835_v39 = vld [vmem:[%s8814_s25 + $0xf5c] ss:$40 sps:$4 sm:$0xff]   ;;  %v7833_v41 = vld [vmem:[%s8814_s25 + $0xf58] ss:$40 sps:$4 sm:$0xff]  }
 0x14a   : > { %4934 = vmatprep.subr.bf16.mxu0 %v7760_v42  ;;  %v7836_v42 = vld [vmem:[%s8814_s25 + $0x420] ss:$40 sps:$4 sm:$0xff]  }
 0x14c   : > { %6919 = vmatmul.mubr.msk.bf16.vlgmr.msra.gmra.mrb[0].mxu0 %vm4520_vm0, %v7754_v43  ;;  %4820 = vmatpush1.bf16.msra.mxu1 %v7755_v44  ;;  %v7841_v43 = vld [vmem:[%s8814_s25 + $0xfac] ss:$40 sps:$4 sm:$0xff]  }
 0x14d   : > { %4935 = vmatpush1.bf16.msra.mxu0 %v7758_v45  ;;  %4821 = vmatprep.subr.bf16.mxu1 %v7763_v46  ;;  %v7844_v44 = vld [vmem:[%s8814_s25 + $0x474] ss:$40 sps:$4 sm:$0xff]   ;;  %v7839_v45 = vld [vmem:[%s8814_s25 + $0xfa8] ss:$40 sps:$4 sm:$0xff]  }
 0x14e   : > { %4936 = vmatprep.subr.bf16.mxu0 %v7766_v48  ;;  %4966 = vmatprep.mubr.bf16.mxu0 %v8881_v47  ;;  %v7842_v46 = vld [vmem:[%s8814_s25 + $0x470] ss:$40 sps:$4 sm:$0xff]   ;;  %v7847_v48 = vld [vmem:[%s8814_s25 + $0xffc] ss:$40 sps:$4 sm:$0xff]  }
 0x150   : > { %4822 = vmatpush1.bf16.msra.mxu1 %v7761_v49  ;;  %v7850_v49 = vld [vmem:[%s8814_s25 + $0x4c4] ss:$40 sps:$4 sm:$0xff]  }
 0x151   : > { %4937 = vmatpush1.bf16.msra.mxu0 %v7764_v50  ;;  %4823 = vmatprep.subr.bf16.mxu1 %v7769_v52  ;;  %v7845_v50 = vld [vmem:[%s8814_s25 + $0xff8] ss:$40 sps:$4 sm:$0xff]  }
 0x152   : > { %4938 = vmatprep.subr.bf16.mxu0 %v7772_v53  ;;  %v7848_v52 = vld [vmem:[%s8814_s25 + $0x4c0] ss:$40 sps:$4 sm:$0xff]   ;;  %v7853_v53 = vld [vmem:[%s8814_s25 + $0x104c] ss:$40 sps:$4 sm:$0xff]  }
 0x154   : > { %4824 = vmatpush1.bf16.msra.mxu1 %v7767_v54  ;;  %v7856_v54 = vld [vmem:[%s8814_s25 + $0x514] ss:$40 sps:$4 sm:$0xff]  }
 0x155   : > { %4939 = vmatpush1.bf16.msra.mxu0 %v7770_v55  ;;  %4825 = vmatprep.subr.bf16.mxu1 %v7775_v56  ;;  %v7851_v55 = vld [vmem:[%s8814_s25 + $0x1048] ss:$40 sps:$4 sm:$0xff]  }
 0x156   : > { %4940 = vmatprep.subr.bf16.mxu0 %v7778_v57  ;;  %v7854_v56 = vld [vmem:[%s8814_s25 + $0x510] ss:$40 sps:$4 sm:$0xff]   ;;  %v7859_v57 = vld [vmem:[%s8814_s25 + $0x109c] ss:$40 sps:$4 sm:$0xff]  }
 0x158   : > { %4826 = vmatpush1.bf16.msra.mxu1 %v7773_v58  ;;  %v7862_v58 = vld [vmem:[%s8814_s25 + $0x564] ss:$40 sps:$4 sm:$0xff]  }
 0x159   : > { %4941 = vmatpush1.bf16.msra.mxu0 %v7776_v59  ;;  %4827 = vmatprep.subr.bf16.mxu1 %v7781_v60  ;;  %v7857_v59 = vld [vmem:[%s8814_s25 + $0x1098] ss:$40 sps:$4 sm:$0xff]  }
 0x15a   : > { %4942 = vmatprep.subr.bf16.mxu0 %v7784_v61  ;;  %v7860_v60 = vld [vmem:[%s8814_s25 + $0x560] ss:$40 sps:$4 sm:$0xff]   ;;  %v7865_v61 = vld [vmem:[%s8814_s25 + $0x10ec] ss:$40 sps:$4 sm:$0xff]  }
 0x15c   : > { %4828 = vmatpush1.bf16.msra.mxu1 %v7779_v62  ;;  %v7868_v62 = vld [vmem:[%s8814_s25 + $0x5b4] ss:$40 sps:$4 sm:$0xff]  }
 0x15d   : > { %4943 = vmatpush1.bf16.msra.mxu0 %v7782_v63  ;;  %4829 = vmatprep.subr.bf16.mxu1 %v7787_v0 }
 0x15e   : > { %4944 = vmatprep.subr.bf16.mxu0 %v7790_v1  ;;  %v7863_v1 = vld [vmem:[%s8814_s25 + $0x10e8] ss:$40 sps:$4 sm:$0xff]  }
 0x160   : > { %4830 = vmatpush1.bf16.msra.mxu1 %v7785_v2  ;;  %v7866_v2 = vld [vmem:[%s8814_s25 + $0x5b0] ss:$40 sps:$4 sm:$0xff]  }
 0x161   : > { %4945 = vmatpush1.bf16.msra.mxu0 %v7788_v3  ;;  %4831 = vmatprep.subr.bf16.mxu1 %v7793_v4  ;;  %v7871_v4 = vld [vmem:[%s8814_s25 + $0x113c] ss:$40 sps:$4 sm:$0xff]  }
 0x162   : > { %4946 = vmatprep.subr.bf16.mxu0 %v7796_v5  ;;  %v7874_v5 = vld [vmem:[%s8814_s25 + $0x604] ss:$40 sps:$4 sm:$0xff]  }
 0x164   : > { %4832 = vmatpush1.bf16.msra.mxu1 %v7791_v8 }
 0x165   : > { %4947 = vmatpush1.bf16.msra.mxu0 %v7794_v9  ;;  %4833 = vmatprep.subr.bf16.mxu1 %v7799_v10  ;;  %v7869_v9 = vld [vmem:[%s8814_s25 + $0x1138] ss:$40 sps:$4 sm:$0xff]  }
 0x166   : > { %4948 = vmatprep.subr.bf16.mxu0 %v7802_v11  ;;  %v7872_v10 = vld [vmem:[%s8814_s25 + $0x600] ss:$40 sps:$4 sm:$0xff]   ;;  %v7877_v11 = vld [vmem:[%s8814_s25 + $0x118c] ss:$40 sps:$4 sm:$0xff]  }
 0x168   : > { %4834 = vmatpush1.bf16.msra.mxu1 %v7797_v12  ;;  %v7880_v12 = vld [vmem:[%s8814_s25 + $0x654] ss:$40 sps:$4 sm:$0xff]  }
 0x169   : > { %4949 = vmatpush1.bf16.msra.mxu0 %v7800_v13  ;;  %4835 = vmatprep.subr.bf16.mxu1 %v7805_v14  ;;  %v7875_v13 = vld [vmem:[%s8814_s25 + $0x1188] ss:$40 sps:$4 sm:$0xff]  }
 0x16a   : > { %4950 = vmatprep.subr.bf16.mxu0 %v7808_v15  ;;  %v7878_v14 = vld [vmem:[%s8814_s25 + $0x650] ss:$40 sps:$4 sm:$0xff]   ;;  %v7883_v15 = vld [vmem:[%s8814_s25 + $0x11dc] ss:$40 sps:$4 sm:$0xff]  }
 0x16c   : > { %4836 = vmatpush1.bf16.msra.mxu1 %v7803_v17  ;;  %v7886_v17 = vld [vmem:[%s8814_s25 + $0x6a4] ss:$40 sps:$4 sm:$0xff]  }
 0x16d   : > { %4951 = vmatpush1.bf16.msra.mxu0 %v7806_v18  ;;  %4837 = vmatprep.subr.bf16.mxu1 %v7811_v21  ;;  %v7881_v18 = vld [vmem:[%s8814_s25 + $0x11d8] ss:$40 sps:$4 sm:$0xff]  }
 0x16e   : > { %4952 = vmatprep.subr.bf16.mxu0 %v7814_v22  ;;  %v7884_v21 = vld [vmem:[%s8814_s25 + $0x6a0] ss:$40 sps:$4 sm:$0xff]   ;;  %v7889_v22 = vld [vmem:[%s8814_s25 + $0x122c] ss:$40 sps:$4 sm:$0xff]  }
 0x170   : > { %4838 = vmatpush1.bf16.msra.mxu1 %v7809_v23  ;;  %v7892_v23 = vld [vmem:[%s8814_s25 + $0x6f4] ss:$40 sps:$4 sm:$0xff]  }
 0x171   : > { %4953 = vmatpush1.bf16.msra.mxu0 %v7812_v24  ;;  %4839 = vmatprep.subr.bf16.mxu1 %v7817_v26  ;;  %v7887_v24 = vld [vmem:[%s8814_s25 + $0x1228] ss:$40 sps:$4 sm:$0xff]  }
 0x172   : > { %4954 = vmatprep.subr.bf16.mxu0 %v7820_v27  ;;  %v7890_v26 = vld [vmem:[%s8814_s25 + $0x6f0] ss:$40 sps:$4 sm:$0xff]   ;;  %v7895_v27 = vld [vmem:[%s8814_s25 + $0x127c] ss:$40 sps:$4 sm:$0xff]  }
 0x174   : > { %4840 = vmatpush1.bf16.msra.mxu1 %v7815_v28  ;;  %v7898_v28 = vld [vmem:[%s8814_s25 + $0x744] ss:$40 sps:$4 sm:$0xff]  }
 0x175   : > { %4955 = vmatpush1.bf16.msra.mxu0 %v7818_v29  ;;  %4841 = vmatprep.subr.bf16.mxu1 %v7823_v19  ;;  %v7893_v29 = vld [vmem:[%s8814_s25 + $0x1278] ss:$40 sps:$4 sm:$0xff]  }
 0x176   : > { %4956 = vmatprep.subr.bf16.mxu0 %v7826_v30  ;;  %v7896_v19 = vld [vmem:[%s8814_s25 + $0x740] ss:$40 sps:$4 sm:$0xff]   ;;  %v7901_v30 = vld [vmem:[%s8814_s25 + $0x12cc] ss:$40 sps:$4 sm:$0xff]  }
 0x178   : > { %4842 = vmatpush1.bf16.msra.mxu1 %v7821_v31  ;;  %v7904_v31 = vld [vmem:[%s8814_s25 + $0x794] ss:$40 sps:$4 sm:$0xff]  }
 0x179   : > { %4957 = vmatpush1.bf16.msra.mxu0 %v7824_v32  ;;  %4852 = vmatprep.subr.bf16.mxu1 %v7829_v35  ;;  %v7899_v32 = vld [vmem:[%s8814_s25 + $0x12c8] ss:$40 sps:$4 sm:$0xff]  }
 0x17a   : > { %4958 = vmatprep.subr.bf16.mxu0 %v7832_v36  ;;  %v7902_v35 = vld [vmem:[%s8814_s25 + $0x790] ss:$40 sps:$4 sm:$0xff]   ;;  %v7907_v36 = vld [vmem:[%s8814_s25 + $0x131c] ss:$40 sps:$4 sm:$0xff]  }
 0x17b   : > { %4844 = vmatmul.mubr.bf16.vlgmr.msra.gmra.mrb[4].mxu1 %v8995_v16 }
 0x17c   : > { %4853 = vmatpush1.bf16.msra.mxu1 %v7827_v37  ;;  %4884 = vmatprep.mubr.bf16.mxu1 %v9006_v20  ;;  %v7910_v37 = vld [vmem:[%s8814_s25 + $0x7e4] ss:$40 sps:$4 sm:$0xff]  }
 0x17d   : > { %4959 = vmatpush1.bf16.msra.mxu0 %v7830_v38  ;;  %4854 = vmatprep.subr.bf16.mxu1 %v7835_v39  ;;  %v7905_v38 = vld [vmem:[%s8814_s25 + $0x1318] ss:$40 sps:$4 sm:$0xff]  }
 0x17e   : > { %4960 = vmatprep.subr.bf16.mxu0 %v7838_v40  ;;  %v7908_v39 = vld [vmem:[%s8814_s25 + $0x7e0] ss:$40 sps:$4 sm:$0xff]   ;;  %v7913_v40 = vld [vmem:[%s8814_s25 + $0x136c] ss:$40 sps:$4 sm:$0xff]  }
 0x180   : > { %4855 = vmatpush1.bf16.msra.mxu1 %v7833_v41  ;;  %v7916_v41 = vld [vmem:[%s8814_s25 + $0x834] ss:$40 sps:$4 sm:$0xff]  }
 0x181   : > { %4961 = vmatpush1.bf16.msra.mxu0 %v7836_v42  ;;  %4856 = vmatprep.subr.bf16.mxu1 %v7841_v43  ;;  %v7911_v42 = vld [vmem:[%s8814_s25 + $0x1368] ss:$40 sps:$4 sm:$0xff]  }
 0x182   : > { %4962 = vmatprep.subr.bf16.mxu0 %v7844_v44  ;;  %v7914_v43 = vld [vmem:[%s8814_s25 + $0x830] ss:$40 sps:$4 sm:$0xff]   ;;  %v7919_v44 = vld [vmem:[%s8814_s25 + $0x13bc] ss:$40 sps:$4 sm:$0xff]  }
 0x184   : > { %4857 = vmatpush1.bf16.msra.mxu1 %v7839_v45  ;;  %v7922_v45 = vld [vmem:[%s8814_s25 + $0x884] ss:$40 sps:$4 sm:$0xff]  }
 0x185   : > { %4963 = vmatpush1.bf16.msra.mxu0 %v7842_v46  ;;  %4858 = vmatprep.subr.bf16.mxu1 %v7847_v48  ;;  %v7917_v46 = vld [vmem:[%s8814_s25 + $0x13b8] ss:$40 sps:$4 sm:$0xff]  }
 0x186   : > { %4964 = vmatprep.subr.bf16.mxu0 %v7850_v49  ;;  %v7920_v48 = vld [vmem:[%s8814_s25 + $0x880] ss:$40 sps:$4 sm:$0xff]   ;;  %v7925_v49 = vld [vmem:[%s8814_s25 + $0x140c] ss:$40 sps:$4 sm:$0xff]  }
 0x188   : > { %4859 = vmatpush1.bf16.msra.mxu1 %v7845_v50  ;;  %v7928_v50 = vld [vmem:[%s8814_s25 + $0x8d4] ss:$40 sps:$4 sm:$0xff]  }
 0x189   : > { %4965 = vmatpush1.bf16.msra.mxu0 %v7848_v52  ;;  %4860 = vmatprep.subr.bf16.mxu1 %v7853_v53  ;;  %v7923_v52 = vld [vmem:[%s8814_s25 + $0x1408] ss:$40 sps:$4 sm:$0xff]  }
 0x18a   : > { %4975 = vmatprep.subr.bf16.mxu0 %v7856_v54  ;;  %v7926_v53 = vld [vmem:[%s8814_s25 + $0x8d0] ss:$40 sps:$4 sm:$0xff]   ;;  %v7931_v54 = vld [vmem:[%s8814_s25 + $0x145c] ss:$40 sps:$4 sm:$0xff]  }
 0x18c   : > { %4967 = vmatmul.mubr.bf16.vlgmr.msra.gmra.mrb[4].mxu0 %v8910_v6  ;;  %4861 = vmatpush1.bf16.msra.mxu1 %v7851_v55  ;;  %v7934_v55 = vld [vmem:[%s8814_s25 + $0x924] ss:$40 sps:$4 sm:$0xff]  }
 0x18d   : > { %4976 = vmatpush1.bf16.msra.mxu0 %v7854_v56  ;;  %4862 = vmatprep.subr.bf16.mxu1 %v7859_v57  ;;  %v7929_v56 = vld [vmem:[%s8814_s25 + $0x1458] ss:$40 sps:$4 sm:$0xff]  }
 0x18e   : > { %4977 = vmatprep.subr.bf16.mxu0 %v7862_v58  ;;  %5007 = vmatprep.mubr.bf16.mxu0 %v8888_v51  ;;  %v9177_v63 = vpop.f32.mrb[0].mxu1  ;;  %v7932_v57 = vld [vmem:[%s8814_s25 + $0x920] ss:$40 sps:$4 sm:$0xff]   ;;  %v7937_v58 = vld [vmem:[%s8814_s25 + $0x14ac] ss:$40 sps:$4 sm:$0xff]  }
 0x18f   : > { %v9179_v0 = vpop.f32.mrb[1].mxu1 }
 0x190   : > { %4863 = vmatpush1.bf16.msra.mxu1 %v7857_v59  ;;  %v4562_v3 = vpop.f32.mrb[2].mxu1  ;;  %v7940_v59 = vld [vmem:[%s8814_s25 + $0x974] ss:$40 sps:$4 sm:$0xff]  }
 0x191   : > { %4978 = vmatpush1.bf16.msra.mxu0 %v7860_v60  ;;  %4864 = vmatprep.subr.bf16.mxu1 %v7865_v61  ;;  %v4563_v8 = vpop.f32.mrb[3].mxu1  ;;  %v7935_v60 = vld [vmem:[%s8814_s25 + $0x14a8] ss:$40 sps:$4 sm:$0xff]  }
 0x192   : > { %4979 = vmatprep.subr.bf16.mxu0 %v7868_v62  ;;  %v7938_v61 = vld [vmem:[%s8814_s25 + $0x970] ss:$40 sps:$4 sm:$0xff]   ;;  %v7943_v62 = vld [vmem:[%s8814_s25 + $0x14fc] ss:$40 sps:$4 sm:$0xff]   ;;  %v7944_v3 = vld [vmem:[%s8814_s25 + $0x9c0] ss:$40 sps:$4 sm:$0xff]  }
 0x193   : > { %v7947_v8 = vld [vmem:[%s8814_s25 + $0xa10] ss:$40 sps:$4 sm:$0xff]  }
 0x194   : > { %4865 = vmatpush1.bf16.msra.mxu1 %v7863_v1  ;;  %v7946_v1 = vld [vmem:[%s8814_s25 + $0x9c4] ss:$40 sps:$4 sm:$0xff]  }
 0x195   : > { %4980 = vmatpush1.bf16.msra.mxu0 %v7866_v2  ;;  %4866 = vmatprep.subr.bf16.mxu1 %v7871_v4  ;;  %v7941_v2 = vld [vmem:[%s8814_s25 + $0x14f8] ss:$40 sps:$4 sm:$0xff]   ;;  %v7949_v4 = vld [vmem:[%s8814_s25 + $0xa14] ss:$40 sps:$4 sm:$0xff]  }
 0x196   : > { %4981 = vmatprep.subr.bf16.mxu0 %v7874_v5  ;;  %v7952_v5 = vld [vmem:[%s8814_s25 + $0x1c] ss:$40 sps:$4 sm:$0xff]  }
 0x198   : > { %4867 = vmatpush1.bf16.msra.mxu1 %v7869_v9  ;;  %v7950_v9 = vld [vmem:[%s8814_s25 + $0x18] ss:$40 sps:$4 sm:$0xff]  }
 0x199   : > { %4982 = vmatpush1.bf16.msra.mxu0 %v7872_v10  ;;  %4868 = vmatprep.subr.bf16.mxu1 %v7877_v11  ;;  %v7955_v10 = vld [vmem:[%s8814_s25 + $0xa64] ss:$40 sps:$4 sm:$0xff]  }
 0x19a   : > { %4983 = vmatprep.subr.bf16.mxu0 %v7880_v12  ;;  %v7958_v11 = vld [vmem:[%s8814_s25 + $0x6c] ss:$40 sps:$4 sm:$0xff]   ;;  %v9246_v12 = vld [vmem:[%s9861_s0 + $0x20] ss:$0 sps:$4 sm:$0xff]  }
 0x19c   : > { %4869 = vmatpush1.bf16.msra.mxu1 %v7875_v13  ;;  %v7953_v13 = vld [vmem:[%s8814_s25 + $0xa60] ss:$40 sps:$4 sm:$0xff]  }
 0x19d   : > { %4984 = vmatpush1.bf16.msra.mxu0 %v7878_v14  ;;  %4870 = vmatprep.subr.bf16.mxu1 %v7883_v15  ;;  %v7956_v14 = vld [vmem:[%s8814_s25 + $0x68] ss:$40 sps:$4 sm:$0xff]   ;;  %v7961_v15 = vld [vmem:[%s8814_s25 + $0xab4] ss:$40 sps:$4 sm:$0xff]  }
 0x19e   : > { %4985 = vmatprep.subr.bf16.mxu0 %v7886_v17  ;;  %v7964_v17 = vld [vmem:[%s8814_s25 + $0xbc] ss:$40 sps:$4 sm:$0xff]  }
 0x1a0   : > { %4871 = vmatpush1.bf16.msra.mxu1 %v7881_v18  ;;  %v7959_v18 = vld [vmem:[%s8814_s25 + $0xab0] ss:$40 sps:$4 sm:$0xff]  }
 0x1a1   : > { %4986 = vmatpush1.bf16.msra.mxu0 %v7884_v21  ;;  %4872 = vmatprep.subr.bf16.mxu1 %v7889_v22  ;;  %v7962_v21 = vld [vmem:[%s8814_s25 + $0xb8] ss:$40 sps:$4 sm:$0xff]   ;;  %v7967_v22 = vld [vmem:[%s8814_s25 + $0xb04] ss:$40 sps:$4 sm:$0xff]  }
 0x1a2   : > { %4987 = vmatprep.subr.bf16.mxu0 %v7892_v23  ;;  %v7970_v23 = vld [vmem:[%s8814_s25 + $0x10c] ss:$40 sps:$4 sm:$0xff]  }
 0x1a4   : > { %4873 = vmatpush1.bf16.msra.mxu1 %v7887_v24  ;;  %v7965_v24 = vld [vmem:[%s8814_s25 + $0xb00] ss:$40 sps:$4 sm:$0xff]  }
 0x1a5   : > { %4988 = vmatpush1.bf16.msra.mxu0 %v7890_v26  ;;  %4874 = vmatprep.subr.bf16.mxu1 %v7895_v27  ;;  %v7968_v26 = vld [vmem:[%s8814_s25 + $0x108] ss:$40 sps:$4 sm:$0xff]   ;;  %v7973_v27 = vld [vmem:[%s8814_s25 + $0xb54] ss:$40 sps:$4 sm:$0xff]  }
 0x1a6   : > { %4989 = vmatprep.subr.bf16.mxu0 %v7898_v28  ;;  %v7976_v28 = vld [vmem:[%s8814_s25 + $0x15c] ss:$40 sps:$4 sm:$0xff]  }
 0x1a8   : > { %4875 = vmatpush1.bf16.msra.mxu1 %v7893_v29  ;;  %v7971_v29 = vld [vmem:[%s8814_s25 + $0xb50] ss:$40 sps:$4 sm:$0xff]  }
 0x1a9   : > { %4990 = vmatpush1.bf16.msra.mxu0 %v7896_v19  ;;  %4876 = vmatprep.subr.bf16.mxu1 %v7901_v30  ;;  %v7974_v19 = vld [vmem:[%s8814_s25 + $0x158] ss:$40 sps:$4 sm:$0xff]   ;;  %v7979_v30 = vld [vmem:[%s8814_s25 + $0xba4] ss:$40 sps:$4 sm:$0xff]  }
 0x1aa   : > { %4991 = vmatprep.subr.bf16.mxu0 %v7904_v31  ;;  %v7982_v31 = vld [vmem:[%s8814_s25 + $0x1ac] ss:$40 sps:$4 sm:$0xff]  }
 0x1ac   : > { %4877 = vmatpush1.bf16.msra.mxu1 %v7899_v32  ;;  %v7977_v32 = vld [vmem:[%s8814_s25 + $0xba0] ss:$40 sps:$4 sm:$0xff]  }
 0x1ad   : > { %4992 = vmatpush1.bf16.msra.mxu0 %v7902_v35  ;;  %4878 = vmatprep.subr.bf16.mxu1 %v7907_v36  ;;  %v7980_v35 = vld [vmem:[%s8814_s25 + $0x1a8] ss:$40 sps:$4 sm:$0xff]   ;;  %v7985_v36 = vld [vmem:[%s8814_s25 + $0xbf4] ss:$40 sps:$4 sm:$0xff]  }
 0x1ae   : > { %4993 = vmatprep.subr.bf16.mxu0 %v7910_v37  ;;  %v7988_v37 = vld [vmem:[%s8814_s25 + $0x1fc] ss:$40 sps:$4 sm:$0xff]  }
 0x1b0   : > { %4879 = vmatpush1.bf16.msra.mxu1 %v7905_v38  ;;  %v7983_v38 = vld [vmem:[%s8814_s25 + $0xbf0] ss:$40 sps:$4 sm:$0xff]  }
 0x1b1   : > { %4994 = vmatpush1.bf16.msra.mxu0 %v7908_v39  ;;  %4880 = vmatprep.subr.bf16.mxu1 %v7913_v40  ;;  %v7986_v39 = vld [vmem:[%s8814_s25 + $0x1f8] ss:$40 sps:$4 sm:$0xff]   ;;  %v7991_v40 = vld [vmem:[%s8814_s25 + $0xc44] ss:$40 sps:$4 sm:$0xff]  }
 0x1b2   : > { %4995 = vmatprep.subr.bf16.mxu0 %v7916_v41  ;;  %v7994_v41 = vld [vmem:[%s8814_s25 + $0x24c] ss:$40 sps:$4 sm:$0xff]  }
 0x1b4   : > { %4881 = vmatpush1.bf16.msra.mxu1 %v7911_v42  ;;  %v7989_v42 = vld [vmem:[%s8814_s25 + $0xc40] ss:$40 sps:$4 sm:$0xff]  }
 0x1b5   : > { %4996 = vmatpush1.bf16.msra.mxu0 %v7914_v43  ;;  %4882 = vmatprep.subr.bf16.mxu1 %v7919_v44  ;;  %v7992_v43 = vld [vmem:[%s8814_s25 + $0x248] ss:$40 sps:$4 sm:$0xff]   ;;  %v7997_v44 = vld [vmem:[%s8814_s25 + $0xc94] ss:$40 sps:$4 sm:$0xff]  }
 0x1b6   : > { %4997 = vmatprep.subr.bf16.mxu0 %v7922_v45  ;;  %v8000_v45 = vld [vmem:[%s8814_s25 + $0x29c] ss:$40 sps:$4 sm:$0xff]  }
 0x1b8   : > { %4883 = vmatpush1.bf16.msra.mxu1 %v7917_v46  ;;  %v7995_v46 = vld [vmem:[%s8814_s25 + $0xc90] ss:$40 sps:$4 sm:$0xff]  }
 0x1b9   : > { %4998 = vmatpush1.bf16.msra.mxu0 %v7920_v48  ;;  %4893 = vmatprep.subr.bf16.mxu1 %v7925_v49  ;;  %v7998_v48 = vld [vmem:[%s8814_s25 + $0x298] ss:$40 sps:$4 sm:$0xff]   ;;  %v8003_v49 = vld [vmem:[%s8814_s25 + $0xce4] ss:$40 sps:$4 sm:$0xff]  }
 0x1ba   : > { %4999 = vmatprep.subr.bf16.mxu0 %v7928_v50  ;;  %v8006_v50 = vld [vmem:[%s8814_s25 + $0x2ec] ss:$40 sps:$4 sm:$0xff]  }
 0x1bb   : > { %4885 = vmatmul.mubr.bf16.vlgmr.msra.gmra.mrb[4].mxu1 %v9074_v25 }
 0x1bc   : > { %4894 = vmatpush1.bf16.msra.mxu1 %v7923_v52  ;;  %4925 = vmatprep.mubr.bf16.mxu1 %v8620_v33  ;;  %v8001_v52 = vld [vmem:[%s8814_s25 + $0xce0] ss:$40 sps:$4 sm:$0xff]  }
 0x1bd   : > { %5000 = vmatpush1.bf16.msra.mxu0 %v7926_v53  ;;  %4895 = vmatprep.subr.bf16.mxu1 %v7931_v54  ;;  %v8004_v53 = vld [vmem:[%s8814_s25 + $0x2e8] ss:$40 sps:$4 sm:$0xff]   ;;  %v8009_v54 = vld [vmem:[%s8814_s25 + $0xd34] ss:$40 sps:$4 sm:$0xff]  }
 0x1be   : > { %5001 = vmatprep.subr.bf16.mxu0 %v7934_v55  ;;  %v8012_v55 = vld [vmem:[%s8814_s25 + $0x33c] ss:$40 sps:$4 sm:$0xff]  }
 0x1c0   : > { %4896 = vmatpush1.bf16.msra.mxu1 %v7929_v56  ;;  %v8007_v56 = vld [vmem:[%s8814_s25 + $0xd30] ss:$40 sps:$4 sm:$0xff]  }
 0x1c1   : > { %5002 = vmatpush1.bf16.msra.mxu0 %v7932_v57  ;;  %4897 = vmatprep.subr.bf16.mxu1 %v7937_v58  ;;  %v8010_v57 = vld [vmem:[%s8814_s25 + $0x338] ss:$40 sps:$4 sm:$0xff]   ;;  %v8015_v58 = vld [vmem:[%s8814_s25 + $0xd84] ss:$40 sps:$4 sm:$0xff]  }
 0x1c2   : > { %5003 = vmatprep.subr.bf16.mxu0 %v7940_v59  ;;  %v8018_v59 = vld [vmem:[%s8814_s25 + $0x38c] ss:$40 sps:$4 sm:$0xff]  }
 0x1c4   : > { %4898 = vmatpush1.bf16.msra.mxu1 %v7935_v60  ;;  %v8013_v60 = vld [vmem:[%s8814_s25 + $0xd80] ss:$40 sps:$4 sm:$0xff]  }
 0x1c5   : > { %5004 = vmatpush1.bf16.msra.mxu0 %v7938_v61  ;;  %4899 = vmatprep.subr.bf16.mxu1 %v7943_v62  ;;  %v8016_v61 = vld [vmem:[%s8814_s25 + $0x388] ss:$40 sps:$4 sm:$0xff]   ;;  %v8021_v62 = vld [vmem:[%s8814_s25 + $0xdd4] ss:$40 sps:$4 sm:$0xff]  }
 0x1c6   : > { %5005 = vmatprep.subr.bf16.mxu0 %v7946_v1  ;;  %v8024_v1 = vld [vmem:[%s8814_s25 + $0x3dc] ss:$40 sps:$4 sm:$0xff]  }
 0x1c8   : > { %4900 = vmatpush1.bf16.msra.mxu1 %v7941_v2  ;;  %v8019_v2 = vld [vmem:[%s8814_s25 + $0xdd0] ss:$40 sps:$4 sm:$0xff]  }
 0x1c9   : > { %5006 = vmatpush1.bf16.msra.mxu0 %v7944_v3  ;;  %5139 = vmatprep.subr.bf16.mxu1 %v7952_v5  ;;  %v8022_v3 = vld [vmem:[%s8814_s25 + $0x3d8] ss:$40 sps:$4 sm:$0xff]   ;;  %v8030_v5 = vld [vmem:[%s8814_s25 + $0x42c] ss:$40 sps:$4 sm:$0xff]  }
 0x1ca   : > { %5016 = vmatprep.subr.bf16.mxu0 %v7949_v4  ;;  %v8027_v4 = vld [vmem:[%s8814_s25 + $0xe24] ss:$40 sps:$4 sm:$0xff]  }
 0x1cb   : > { %6920 = vmatmul.mubr.msk.bf16.vlgmr.msra.gmra.mrb[4].mxu1 %vm4520_vm0, %v9246_v12 }
 0x1cc   : > { %5008 = vmatmul.mubr.bf16.vlgmr.msra.gmra.mrb[4].mxu0 %v8912_v7  ;;  %5140 = vmatpush1.bf16.msra.mxu1 %v7950_v9  ;;  %v8028_v9 = vld [vmem:[%s8814_s25 + $0x428] ss:$40 sps:$4 sm:$0xff]  }
 0x1cd   : > { %5017 = vmatpush1.bf16.msra.mxu0 %v7947_v8  ;;  %5141 = vmatprep.subr.bf16.mxu1 %v7958_v11  ;;  %v8025_v8 = vld [vmem:[%s8814_s25 + $0xe20] ss:$40 sps:$4 sm:$0xff]   ;;  %v8036_v11 = vld [vmem:[%s8814_s25 + $0x47c] ss:$40 sps:$4 sm:$0xff]  }
 0x1ce   : > { %5018 = vmatprep.subr.bf16.mxu0 %v7955_v10  ;;  %5048 = vmatprep.mubr.bf16.mxu0 %v8949_v34  ;;  %v8033_v10 = vld [vmem:[%s8814_s25 + $0xe74] ss:$40 sps:$4 sm:$0xff]  }
 0x1cf   : > { %5171 = vmatprep.mubr.bf16.mxu1 %v8881_v47 }
 0x1d0   : > { %5142 = vmatpush1.bf16.msra.mxu1 %v7956_v14  ;;  %v8034_v14 = vld [vmem:[%s8814_s25 + $0x478] ss:$40 sps:$4 sm:$0xff]  }
 0x1d1   : > { %5019 = vmatpush1.bf16.msra.mxu0 %v7953_v13  ;;  %5143 = vmatprep.subr.bf16.mxu1 %v7964_v17  ;;  %v8031_v13 = vld [vmem:[%s8814_s25 + $0xe70] ss:$40 sps:$4 sm:$0xff]   ;;  %v8042_v17 = vld [vmem:[%s8814_s25 + $0x4cc] ss:$40 sps:$4 sm:$0xff]  }
 0x1d2   : > { %5020 = vmatprep.subr.bf16.mxu0 %v7961_v15  ;;  %v8039_v15 = vld [vmem:[%s8814_s25 + $0xec4] ss:$40 sps:$4 sm:$0xff]  }
 0x1d4   : > { %5144 = vmatpush1.bf16.msra.mxu1 %v7962_v21  ;;  %v8040_v21 = vld [vmem:[%s8814_s25 + $0x4c8] ss:$40 sps:$4 sm:$0xff]  }
 0x1d5   : > { %5021 = vmatpush1.bf16.msra.mxu0 %v7959_v18  ;;  %5145 = vmatprep.subr.bf16.mxu1 %v7970_v23  ;;  %v8037_v18 = vld [vmem:[%s8814_s25 + $0xec0] ss:$40 sps:$4 sm:$0xff]   ;;  %v8048_v23 = vld [vmem:[%s8814_s25 + $0x51c] ss:$40 sps:$4 sm:$0xff]  }
 0x1d6   : > { %5022 = vmatprep.subr.bf16.mxu0 %v7967_v22  ;;  %v8045_v22 = vld [vmem:[%s8814_s25 + $0xf14] ss:$40 sps:$4 sm:$0xff]  }
 0x1d8   : > { %5146 = vmatpush1.bf16.msra.mxu1 %v7968_v26  ;;  %v8046_v26 = vld [vmem:[%s8814_s25 + $0x518] ss:$40 sps:$4 sm:$0xff]  }
 0x1d9   : > { %5023 = vmatpush1.bf16.msra.mxu0 %v7965_v24  ;;  %5147 = vmatprep.subr.bf16.mxu1 %v7976_v28  ;;  %v8043_v24 = vld [vmem:[%s8814_s25 + $0xf10] ss:$40 sps:$4 sm:$0xff]   ;;  %v8054_v28 = vld [vmem:[%s8814_s25 + $0x56c] ss:$40 sps:$4 sm:$0xff]  }
 0x1da   : > { %5024 = vmatprep.subr.bf16.mxu0 %v7973_v27  ;;  %v8051_v27 = vld [vmem:[%s8814_s25 + $0xf64] ss:$40 sps:$4 sm:$0xff]  }
 0x1dc   : > { %5148 = vmatpush1.bf16.msra.mxu1 %v7974_v19  ;;  %v8052_v19 = vld [vmem:[%s8814_s25 + $0x568] ss:$40 sps:$4 sm:$0xff]  }
 0x1dd   : > { %5025 = vmatpush1.bf16.msra.mxu0 %v7971_v29  ;;  %5149 = vmatprep.subr.bf16.mxu1 %v7982_v31  ;;  %v8049_v29 = vld [vmem:[%s8814_s25 + $0xf60] ss:$40 sps:$4 sm:$0xff]   ;;  %v8057_v31 = vld [vmem:[%s8814_s25 + $0xfb4] ss:$40 sps:$4 sm:$0xff]  }
 0x1de   : > { %5026 = vmatprep.subr.bf16.mxu0 %v7979_v30  ;;  %v1039_v30 = vlaneseq }
 0x1e0   : > { %5150 = vmatpush1.bf16.msra.mxu1 %v7980_v35  ;;  %v8055_v35 = vld [vmem:[%s8814_s25 + $0xfb0] ss:$40 sps:$4 sm:$0xff]  }
 0x1e1   : > { %5027 = vmatpush1.bf16.msra.mxu0 %v7977_v32  ;;  %5151 = vmatprep.subr.bf16.mxu1 %v7988_v37  ;;  %v8060_v32 = vld [vmem:[%s8814_s25 + $0x5bc] ss:$40 sps:$4 sm:$0xff]   ;;  %v9327_v37 = vshrl.u32 %v1039_v30, 7  ;;  %v8112_v30 = vld [vmem:[%s8814_s25 + $0x888] ss:$40 sps:$4 sm:$0xff]  }
 0x1e2   : > { %5028 = vmatprep.subr.bf16.mxu0 %v7985_v36  ;;  %v8058_v36 = vld [vmem:[%s8814_s25 + $0x5b8] ss:$40 sps:$4 sm:$0xff]  }
 0x1e4   : > { %5152 = vmatpush1.bf16.msra.mxu1 %v7986_v39  ;;  %v8066_v39 = vld [vmem:[%s8814_s25 + $0x60c] ss:$40 sps:$4 sm:$0xff]  }
 0x1e5   : > { %5029 = vmatpush1.bf16.msra.mxu0 %v7983_v38  ;;  %5153 = vmatprep.subr.bf16.mxu1 %v7994_v41  ;;  %v8063_v38 = vld [vmem:[%s8814_s25 + $0x1004] ss:$40 sps:$4 sm:$0xff]   ;;  %v8064_v41 = vld [vmem:[%s8814_s25 + $0x608] ss:$40 sps:$4 sm:$0xff]  }
 0x1e6   : > { %5030 = vmatprep.subr.bf16.mxu0 %v7991_v40  ;;  %v8061_v40 = vld [vmem:[%s8814_s25 + $0x1000] ss:$40 sps:$4 sm:$0xff]  }
 0x1e8   : > { %5154 = vmatpush1.bf16.msra.mxu1 %v7992_v43  ;;  %v8069_v43 = vld [vmem:[%s8814_s25 + $0x1054] ss:$40 sps:$4 sm:$0xff]  }
 0x1e9   : > { %5031 = vmatpush1.bf16.msra.mxu0 %v7989_v42  ;;  %5155 = vmatprep.subr.bf16.mxu1 %v8000_v45  ;;  %v1041_v42 = vsub.s32 0, %v9327_v37  ;;  %v1035_v45 = vld [vmem:[%s8822_s28] sm:$0xff] }
 0x1ea   : > { %5032 = vmatprep.subr.bf16.mxu0 %v7997_v44  ;;  %v8072_v44 = vld [vmem:[%s8814_s25 + $0x65c] ss:$40 sps:$4 sm:$0xff]  }
 0x1ec   : > { %5156 = vmatpush1.bf16.msra.mxu1 %v7998_v48  ;;  %v8067_v48 = vld [vmem:[%s8814_s25 + $0x1050] ss:$40 sps:$4 sm:$0xff]  }
 0x1ed   : > { %5033 = vmatpush1.bf16.msra.mxu0 %v7995_v46  ;;  %5157 = vmatprep.subr.bf16.mxu1 %v8006_v50  ;;  %v1045_v46 = vsub.s32 1, %v9327_v37  ;;  %v1042_v50 = vrot.slane %v1035_v45, %v1041_v42 }
 0x1ee   : > { %5034 = vmatprep.subr.bf16.mxu0 %v8003_v49  ;;  %v8070_v49 = vld [vmem:[%s8814_s25 + $0x658] ss:$40 sps:$4 sm:$0xff]  }
 0x1f0   : > { %5158 = vmatpush1.bf16.msra.mxu1 %v8004_v53  ;;  %v8078_v53 = vld [vmem:[%s8814_s25 + $0x6ac] ss:$40 sps:$4 sm:$0xff]  }
 0x1f1   : > { %5035 = vmatpush1.bf16.msra.mxu0 %v8001_v52  ;;  %5159 = vmatprep.subr.bf16.mxu1 %v8012_v55  ;;  %v8075_v52 = vld [vmem:[%s8814_s25 + $0x10a4] ss:$40 sps:$4 sm:$0xff]   ;;  %v8073_v55 = vld [vmem:[%s8814_s25 + $0x10a0] ss:$40 sps:$4 sm:$0xff]  }
 0x1f2   : > { %5036 = vmatprep.subr.bf16.mxu0 %v8009_v54  ;;  %v1046_v54 = vrot.slane %v1035_v45, %v1045_v46  ;;  %v8127_v45 = vld [vmem:[%s8814_s25 + $0x1370] ss:$40 sps:$4 sm:$0xff]  }
 0x1f4   : > { %5160 = vmatpush1.bf16.msra.mxu1 %v8010_v57  ;;  %v4559_v57 = vadd.f32 %v9177_v63, %v1042_v50  ;;  %v8079_v63 = vld [vmem:[%s8814_s25 + $0x10f0] ss:$40 sps:$4 sm:$0xff]   ;;  %v8138_v50 = vld [vmem:[%s8814_s25 + $0x9cc] ss:$40 sps:$4 sm:$0xff]  }
 0x1f5   : > { %5037 = vmatpush1.bf16.msra.mxu0 %v8007_v56  ;;  %5161 = vmatprep.subr.bf16.mxu1 %v8018_v59  ;;  %v8076_v56 = vld [vmem:[%s8814_s25 + $0x6a8] ss:$40 sps:$4 sm:$0xff]   ;;  %v8084_v59 = vld [vmem:[%s8814_s25 + $0x6fc] ss:$40 sps:$4 sm:$0xff]  }
 0x1f6   : > { %5038 = vmatprep.subr.bf16.mxu0 %v8015_v58  ;;  %v8081_v58 = vld [vmem:[%s8814_s25 + $0x10f4] ss:$40 sps:$4 sm:$0xff]  }
 0x1f8   : > { %5162 = vmatpush1.bf16.msra.mxu1 %v8016_v61 }
 0x1f9   : > { %5039 = vmatpush1.bf16.msra.mxu0 %v8013_v60  ;;  %5163 = vmatprep.subr.bf16.mxu1 %v8024_v1  ;;  %v4561_v60 = vadd.f32 %v9179_v0, %v1046_v54  ;;  %v8087_v0 = vld [vmem:[%s8814_s25 + $0x1144] ss:$40 sps:$4 sm:$0xff]   ;;  %v8141_v54 = vld [vmem:[%s8814_s25 + $0x1414] ss:$40 sps:$4 sm:$0xff]  }
 0x1fa   : > { %5040 = vmatprep.subr.bf16.mxu0 %v8021_v62 }
 0x1fc   : > { %5164 = vmatpush1.bf16.msra.mxu1 %v8022_v3 }
 0x1fd   : > { %5041 = vmatpush1.bf16.msra.mxu0 %v8019_v2  ;;  %5165 = vmatprep.subr.bf16.mxu1 %v8030_v5 }
 0x1fe   : > { %5042 = vmatprep.subr.bf16.mxu0 %v8027_v4  ;;  %v8082_v4 = vld [vmem:[%s8814_s25 + $0x6f8] ss:$40 sps:$4 sm:$0xff]  }
 0x200   : > { %5166 = vmatpush1.bf16.msra.mxu1 %v8028_v9  ;;  %v8085_v9 = vld [vmem:[%s8814_s25 + $0x1140] ss:$40 sps:$4 sm:$0xff]  }
 0x201   : > { %5043 = vmatpush1.bf16.msra.mxu0 %v8025_v8  ;;  %5167 = vmatprep.subr.bf16.mxu1 %v8036_v11  ;;  %v8090_v8 = vld [vmem:[%s8814_s25 + $0x74c] ss:$40 sps:$4 sm:$0xff]  }
 0x202   : > { %5044 = vmatprep.subr.bf16.mxu0 %v8033_v10  ;;  %v8088_v10 = vld [vmem:[%s8814_s25 + $0x748] ss:$40 sps:$4 sm:$0xff]   ;;  %v8093_v11 = vld [vmem:[%s8814_s25 + $0x1194] ss:$40 sps:$4 sm:$0xff]  }
 0x204   : > { %5168 = vmatpush1.bf16.msra.mxu1 %v8034_v14  ;;  %v8091_v14 = vld [vmem:[%s8814_s25 + $0x1190] ss:$40 sps:$4 sm:$0xff]  }
 0x205   : > { %5045 = vmatpush1.bf16.msra.mxu0 %v8031_v13  ;;  %5169 = vmatprep.subr.bf16.mxu1 %v8042_v17  ;;  %v8096_v13 = vld [vmem:[%s8814_s25 + $0x79c] ss:$40 sps:$4 sm:$0xff]  }
 0x206   : > { %5046 = vmatprep.subr.bf16.mxu0 %v8039_v15  ;;  %v8094_v15 = vld [vmem:[%s8814_s25 + $0x798] ss:$40 sps:$4 sm:$0xff]   ;;  %v8099_v17 = vld [vmem:[%s8814_s25 + $0x11e4] ss:$40 sps:$4 sm:$0xff]  }
 0x208   : > { %5170 = vmatpush1.bf16.msra.mxu1 %v8040_v21  ;;  %v8097_v21 = vld [vmem:[%s8814_s25 + $0x11e0] ss:$40 sps:$4 sm:$0xff]  }
 0x209   : > { %5047 = vmatpush1.bf16.msra.mxu0 %v8037_v18  ;;  %5180 = vmatprep.subr.bf16.mxu1 %v8048_v23  ;;  %v8102_v18 = vld [vmem:[%s8814_s25 + $0x7ec] ss:$40 sps:$4 sm:$0xff]  }
 0x20a   : > { %5057 = vmatprep.subr.bf16.mxu0 %v8045_v22  ;;  %v8100_v22 = vld [vmem:[%s8814_s25 + $0x7e8] ss:$40 sps:$4 sm:$0xff]   ;;  %v8105_v23 = vld [vmem:[%s8814_s25 + $0x1234] ss:$40 sps:$4 sm:$0xff]  }
 0x20b   : > { %5172 = vmatmul.mubr.bf16.vlgmr.msra.gmra.mrb[8].mxu1 %v8910_v6 }
 0x20c   : > { %5049 = vmatmul.mubr.bf16.vlgmr.msra.gmra.mrb[4].mxu0 %v8995_v16  ;;  %5181 = vmatpush1.bf16.msra.mxu1 %v8046_v26  ;;  %v8103_v26 = vld [vmem:[%s8814_s25 + $0x1230] ss:$40 sps:$4 sm:$0xff]  }
 0x20d   : > { %5058 = vmatpush1.bf16.msra.mxu0 %v8043_v24  ;;  %5182 = vmatprep.subr.bf16.mxu1 %v8054_v28  ;;  %v8108_v24 = vld [vmem:[%s8814_s25 + $0x83c] ss:$40 sps:$4 sm:$0xff]  }
 0x20e   : > { %5059 = vmatprep.subr.bf16.mxu0 %v8051_v27  ;;  %5089 = vmatprep.mubr.bf16.mxu0 %v9006_v20  ;;  %v8106_v27 = vld [vmem:[%s8814_s25 + $0x838] ss:$40 sps:$4 sm:$0xff]   ;;  %v8111_v28 = vld [vmem:[%s8814_s25 + $0x1284] ss:$40 sps:$4 sm:$0xff]  }
 0x20f   : > { %5212 = vmatprep.mubr.bf16.mxu1 %v8888_v51 }
 0x210   : > { %5183 = vmatpush1.bf16.msra.mxu1 %v8052_v19  ;;  %v8109_v19 = vld [vmem:[%s8814_s25 + $0x1280] ss:$40 sps:$4 sm:$0xff]  }
 0x211   : > { %5060 = vmatpush1.bf16.msra.mxu0 %v8049_v29  ;;  %5184 = vmatprep.subr.bf16.mxu1 %v8060_v32  ;;  %v8114_v29 = vld [vmem:[%s8814_s25 + $0x88c] ss:$40 sps:$4 sm:$0xff]   ;;  %v8120_v32 = vld [vmem:[%s8814_s25 + $0x8dc] ss:$40 sps:$4 sm:$0xff]  }
 0x212   : > { %5061 = vmatprep.subr.bf16.mxu0 %v8057_v31  ;;  %v8117_v31 = vld [vmem:[%s8814_s25 + $0x12d4] ss:$40 sps:$4 sm:$0xff]  }
 0x214   : > { %5185 = vmatpush1.bf16.msra.mxu1 %v8058_v36  ;;  %v8118_v36 = vld [vmem:[%s8814_s25 + $0x8d8] ss:$40 sps:$4 sm:$0xff]  }
 0x215   : > { %5062 = vmatpush1.bf16.msra.mxu0 %v8055_v35  ;;  %5186 = vmatprep.subr.bf16.mxu1 %v8066_v39  ;;  %v8115_v35 = vld [vmem:[%s8814_s25 + $0x12d0] ss:$40 sps:$4 sm:$0xff]   ;;  %v8126_v39 = vld [vmem:[%s8814_s25 + $0x92c] ss:$40 sps:$4 sm:$0xff]  }
 0x216   : > { %5063 = vmatprep.subr.bf16.mxu0 %v8063_v38  ;;  %v8123_v38 = vld [vmem:[%s8814_s25 + $0x1324] ss:$40 sps:$4 sm:$0xff]  }
 0x218   : > { %5187 = vmatpush1.bf16.msra.mxu1 %v8064_v41  ;;  %v8124_v41 = vld [vmem:[%s8814_s25 + $0x928] ss:$40 sps:$4 sm:$0xff]  }
 0x219   : > { %5064 = vmatpush1.bf16.msra.mxu0 %v8061_v40  ;;  %5188 = vmatprep.subr.bf16.mxu1 %v8072_v44  ;;  %v8121_v40 = vld [vmem:[%s8814_s25 + $0x1320] ss:$40 sps:$4 sm:$0xff]   ;;  %v8132_v44 = vld [vmem:[%s8814_s25 + $0x97c] ss:$40 sps:$4 sm:$0xff]  }
 0x21a   : > { %5065 = vmatprep.subr.bf16.mxu0 %v8069_v43  ;;  %v8129_v43 = vld [vmem:[%s8814_s25 + $0x1374] ss:$40 sps:$4 sm:$0xff]  }
 0x21c   : > { %5189 = vmatpush1.bf16.msra.mxu1 %v8070_v49  ;;  %v8135_v49 = vld [vmem:[%s8814_s25 + $0x13c4] ss:$40 sps:$4 sm:$0xff]  }
 0x21d   : > { %5066 = vmatpush1.bf16.msra.mxu0 %v8067_v48  ;;  %5190 = vmatprep.subr.bf16.mxu1 %v8078_v53  ;;  %v8130_v48 = vld [vmem:[%s8814_s25 + $0x978] ss:$40 sps:$4 sm:$0xff]   ;;  %v8136_v53 = vld [vmem:[%s8814_s25 + $0x9c8] ss:$40 sps:$4 sm:$0xff]  }
 0x21e   : > { %5067 = vmatprep.subr.bf16.mxu0 %v8075_v52  ;;  %v8133_v52 = vld [vmem:[%s8814_s25 + $0x13c0] ss:$40 sps:$4 sm:$0xff]  }
 0x21f   : > { %v4722_v61 = vpop.f32.mrb[0].mxu0 }
 0x220   : > { %v9352_v62 = vadd.f32 %v4722_v61, %v4559_v57  ;;  %v4724_v1 = vpop.f32.mrb[1].mxu0  ;;  %5191 = vmatpush1.bf16.msra.mxu1 %v8076_v56  ;;  %v8139_v56 = vld [vmem:[%s8814_s25 + $0x1410] ss:$40 sps:$4 sm:$0xff]  }
 0x221   : > { %v9354_v2 = vadd.f32 %v4724_v1, %v4561_v60  ;;  %v4726_v3 = vpop.f32.mrb[2].mxu0  ;;  %5068 = vmatpush1.bf16.msra.mxu0 %v8073_v55  ;;  %5192 = vmatprep.subr.bf16.mxu1 %v8084_v59  ;;  %v8144_v55 = vld [vmem:[%s8814_s25 + $0xa1c] ss:$40 sps:$4 sm:$0xff]   ;;  %v8142_v57 = vld [vmem:[%s8814_s25 + $0xa18] ss:$40 sps:$4 sm:$0xff]  }
 0x222   : > { %v4727_v5 = vpop.f32.mrb[3].mxu0  ;;  %5069 = vmatprep.subr.bf16.mxu0 %v8081_v58  ;;  %v8147_v58 = vld [vmem:[%s8814_s25 + $0x1464] ss:$40 sps:$4 sm:$0xff]   ;;  %v8145_v60 = vld [vmem:[%s8814_s25 + $0x1460] ss:$40 sps:$4 sm:$0xff]  }
 0x223   : > { %v8150_v59 = vld [vmem:[%s8814_s25 + $0xa6c] ss:$40 sps:$4 sm:$0xff]   ;;  %v8148_v61 = vld [vmem:[%s8814_s25 + $0xa68] ss:$40 sps:$4 sm:$0xff]   ;;  %v8156_v3 = vld [vmem:[%s8814_s25 + $0xabc] ss:$40 sps:$4 sm:$0xff]  }
 0x224   : > { %5193 = vmatpush1.bf16.msra.mxu1 %v8082_v4  ;;  %v8153_v1 = vld [vmem:[%s8814_s25 + $0x14b4] ss:$40 sps:$4 sm:$0xff]   ;;  %v8154_v4 = vld [vmem:[%s8814_s25 + $0xab8] ss:$40 sps:$4 sm:$0xff]   ;;  %v8159_v5 = vld [vmem:[%s8814_s25 + $0x1504] ss:$40 sps:$4 sm:$0xff]  }
 0x225   : > { %5070 = vmatpush1.bf16.msra.mxu0 %v8079_v63  ;;  %5194 = vmatprep.subr.bf16.mxu1 %v8090_v8  ;;  %v8151_v63 = vld [vmem:[%s8814_s25 + $0x14b0] ss:$40 sps:$4 sm:$0xff]   ;;  %v8157_v8 = vld [vmem:[%s8814_s25 + $0x1500] ss:$40 sps:$4 sm:$0xff]  }
 0x226   : > { %5071 = vmatprep.subr.bf16.mxu0 %v8087_v0  ;;  %v8162_v0 = vld [vmem:[%s8814_s25 + $0xb0c] ss:$40 sps:$4 sm:$0xff]  }
 0x228   : > { %5195 = vmatpush1.bf16.msra.mxu1 %v8088_v10  ;;  %v8165_v10 = vld [vmem:[%s8814_s25 + $0xb5c] ss:$40 sps:$4 sm:$0xff]  }
 0x229   : > { %5072 = vmatpush1.bf16.msra.mxu0 %v8085_v9  ;;  %5196 = vmatprep.subr.bf16.mxu1 %v8096_v13  ;;  %v8160_v9 = vld [vmem:[%s8814_s25 + $0xb08] ss:$40 sps:$4 sm:$0xff]   ;;  %v8163_v13 = vld [vmem:[%s8814_s25 + $0xb58] ss:$40 sps:$4 sm:$0xff]  }
 0x22a   : > { %5073 = vmatprep.subr.bf16.mxu0 %v8093_v11  ;;  %v8168_v11 = vld [vmem:[%s8814_s25 + $0x24] ss:$40 sps:$4 sm:$0xff]  }
 0x22c   : > { %5197 = vmatpush1.bf16.msra.mxu1 %v8094_v15  ;;  %v8171_v15 = vld [vmem:[%s8814_s25 + $0xbac] ss:$40 sps:$4 sm:$0xff]  }
 0x22d   : > { %5074 = vmatpush1.bf16.msra.mxu0 %v8091_v14  ;;  %5198 = vmatprep.subr.bf16.mxu1 %v8102_v18  ;;  %v8166_v14 = vld [vmem:[%s8814_s25 + $0x20] ss:$40 sps:$4 sm:$0xff]  }
 0x22e   : > { %5075 = vmatprep.subr.bf16.mxu0 %v8099_v17  ;;  %v8174_v17 = vld [vmem:[%s8814_s25 + $0x74] ss:$40 sps:$4 sm:$0xff]   ;;  %v8169_v18 = vld [vmem:[%s8814_s25 + $0xba8] ss:$40 sps:$4 sm:$0xff]  }
 0x230   : > { %5199 = vmatpush1.bf16.msra.mxu1 %v8100_v22  ;;  %v8177_v22 = vld [vmem:[%s8814_s25 + $0xbfc] ss:$40 sps:$4 sm:$0xff]  }
 0x231   : > { %5076 = vmatpush1.bf16.msra.mxu0 %v8097_v21  ;;  %5200 = vmatprep.subr.bf16.mxu1 %v8108_v24  ;;  %v8172_v21 = vld [vmem:[%s8814_s25 + $0x70] ss:$40 sps:$4 sm:$0xff]  }
 0x232   : > { %5077 = vmatprep.subr.bf16.mxu0 %v8105_v23  ;;  %v8180_v23 = vld [vmem:[%s8814_s25 + $0xc4] ss:$40 sps:$4 sm:$0xff]   ;;  %v8175_v24 = vld [vmem:[%s8814_s25 + $0xbf8] ss:$40 sps:$4 sm:$0xff]  }
 0x234   : > { %5201 = vmatpush1.bf16.msra.mxu1 %v8106_v27  ;;  %v8186_v27 = vld [vmem:[%s8814_s25 + $0x114] ss:$40 sps:$4 sm:$0xff]  }
 0x235   : > { %5078 = vmatpush1.bf16.msra.mxu0 %v8103_v26  ;;  %5202 = vmatprep.subr.bf16.mxu1 %v8114_v29  ;;  %v8183_v26 = vld [vmem:[%s8814_s25 + $0xc4c] ss:$40 sps:$4 sm:$0xff]   ;;  %v8184_v29 = vld [vmem:[%s8814_s25 + $0x110] ss:$40 sps:$4 sm:$0xff]  }
 0x236   : > { %5079 = vmatprep.subr.bf16.mxu0 %v8111_v28  ;;  %v8181_v28 = vld [vmem:[%s8814_s25 + $0xc48] ss:$40 sps:$4 sm:$0xff]  }
 0x238   : > { %5203 = vmatpush1.bf16.msra.mxu1 %v8112_v30  ;;  %v8187_v30 = vld [vmem:[%s8814_s25 + $0xc98] ss:$40 sps:$4 sm:$0xff]  }
 0x239   : > { %5080 = vmatpush1.bf16.msra.mxu0 %v8109_v19  ;;  %5204 = vmatprep.subr.bf16.mxu1 %v8120_v32  ;;  %v8192_v19 = vld [vmem:[%s8814_s25 + $0x164] ss:$40 sps:$4 sm:$0xff]  }
 0x23a   : > { %5081 = vmatprep.subr.bf16.mxu0 %v8117_v31  ;;  %v8190_v31 = vld [vmem:[%s8814_s25 + $0x160] ss:$40 sps:$4 sm:$0xff]   ;;  %v8195_v32 = vld [vmem:[%s8814_s25 + $0xcec] ss:$40 sps:$4 sm:$0xff]  }
 0x23c   : > { %5205 = vmatpush1.bf16.msra.mxu1 %v8118_v36  ;;  %v8193_v36 = vld [vmem:[%s8814_s25 + $0xce8] ss:$40 sps:$4 sm:$0xff]  }
 0x23d   : > { %5082 = vmatpush1.bf16.msra.mxu0 %v8115_v35  ;;  %5206 = vmatprep.subr.bf16.mxu1 %v8126_v39  ;;  %v8198_v35 = vld [vmem:[%s8814_s25 + $0x1b4] ss:$40 sps:$4 sm:$0xff]  }
 0x23e   : > { %5083 = vmatprep.subr.bf16.mxu0 %v8123_v38  ;;  %v8196_v38 = vld [vmem:[%s8814_s25 + $0x1b0] ss:$40 sps:$4 sm:$0xff]   ;;  %v8201_v39 = vld [vmem:[%s8814_s25 + $0xd3c] ss:$40 sps:$4 sm:$0xff]  }
 0x240   : > { %5207 = vmatpush1.bf16.msra.mxu1 %v8124_v41  ;;  %v8199_v41 = vld [vmem:[%s8814_s25 + $0xd38] ss:$40 sps:$4 sm:$0xff]  }
 0x241   : > { %5084 = vmatpush1.bf16.msra.mxu0 %v8121_v40  ;;  %5208 = vmatprep.subr.bf16.mxu1 %v8132_v44  ;;  %v8204_v40 = vld [vmem:[%s8814_s25 + $0x204] ss:$40 sps:$4 sm:$0xff]  }
 0x242   : > { %5085 = vmatprep.subr.bf16.mxu0 %v8129_v43  ;;  %v8202_v43 = vld [vmem:[%s8814_s25 + $0x200] ss:$40 sps:$4 sm:$0xff]   ;;  %v8207_v44 = vld [vmem:[%s8814_s25 + $0xd8c] ss:$40 sps:$4 sm:$0xff]  }
 0x244   : > { %5209 = vmatpush1.bf16.msra.mxu1 %v8130_v48  ;;  %v8205_v48 = vld [vmem:[%s8814_s25 + $0xd88] ss:$40 sps:$4 sm:$0xff]  }
 0x245   : > { %5086 = vmatpush1.bf16.msra.mxu0 %v8127_v45  ;;  %5210 = vmatprep.subr.bf16.mxu1 %v8138_v50  ;;  %v8210_v45 = vld [vmem:[%s8814_s25 + $0x254] ss:$40 sps:$4 sm:$0xff]  }
 0x246   : > { %5087 = vmatprep.subr.bf16.mxu0 %v8135_v49  ;;  %v8208_v49 = vld [vmem:[%s8814_s25 + $0x250] ss:$40 sps:$4 sm:$0xff]   ;;  %v8213_v50 = vld [vmem:[%s8814_s25 + $0xddc] ss:$40 sps:$4 sm:$0xff]  }
 0x248   : > { %5211 = vmatpush1.bf16.msra.mxu1 %v8136_v53  ;;  %v8211_v53 = vld [vmem:[%s8814_s25 + $0xdd8] ss:$40 sps:$4 sm:$0xff]  }
 0x249   : > { %5088 = vmatpush1.bf16.msra.mxu0 %v8133_v52  ;;  %5221 = vmatprep.subr.bf16.mxu1 %v8144_v55  ;;  %v8216_v52 = vld [vmem:[%s8814_s25 + $0x2a4] ss:$40 sps:$4 sm:$0xff]  }
 0x24a   : > { %5098 = vmatprep.subr.bf16.mxu0 %v8141_v54  ;;  %v8214_v54 = vld [vmem:[%s8814_s25 + $0x2a0] ss:$40 sps:$4 sm:$0xff]   ;;  %v8219_v55 = vld [vmem:[%s8814_s25 + $0xe2c] ss:$40 sps:$4 sm:$0xff]  }
 0x24b   : > { %5213 = vmatmul.mubr.bf16.vlgmr.msra.gmra.mrb[8].mxu1 %v8912_v7 }
 0x24c   : > { %5090 = vmatmul.mubr.bf16.vlgmr.msra.gmra.mrb[4].mxu0 %v9074_v25  ;;  %5222 = vmatpush1.bf16.msra.mxu1 %v8142_v57  ;;  %v8217_v57 = vld [vmem:[%s8814_s25 + $0xe28] ss:$40 sps:$4 sm:$0xff]  }
 0x24d   : > { %5099 = vmatpush1.bf16.msra.mxu0 %v8139_v56  ;;  %5223 = vmatprep.subr.bf16.mxu1 %v8150_v59  ;;  %v8222_v56 = vld [vmem:[%s8814_s25 + $0x2f4] ss:$40 sps:$4 sm:$0xff]  }
 0x24e   : > { %5100 = vmatprep.subr.bf16.mxu0 %v8147_v58  ;;  %5130 = vmatprep.mubr.bf16.mxu0 %v8620_v33  ;;  %v8220_v58 = vld [vmem:[%s8814_s25 + $0x2f0] ss:$40 sps:$4 sm:$0xff]   ;;  %v8225_v59 = vld [vmem:[%s8814_s25 + $0xe7c] ss:$40 sps:$4 sm:$0xff]  }
 0x24f   : > { %5253 = vmatprep.mubr.bf16.mxu1 %v8949_v34 }
 0x250   : > { %5224 = vmatpush1.bf16.msra.mxu1 %v8148_v61  ;;  %v8223_v61 = vld [vmem:[%s8814_s25 + $0xe78] ss:$40 sps:$4 sm:$0xff]  }
 0x251   : > { %5101 = vmatpush1.bf16.msra.mxu0 %v8145_v60  ;;  %5225 = vmatprep.subr.bf16.mxu1 %v8156_v3  ;;  %v8228_v60 = vld [vmem:[%s8814_s25 + $0x344] ss:$40 sps:$4 sm:$0xff]  }
 0x252   : > { %5102 = vmatprep.subr.bf16.mxu0 %v8153_v1  ;;  %v8226_v1 = vld [vmem:[%s8814_s25 + $0x340] ss:$40 sps:$4 sm:$0xff]   ;;  %v8231_v3 = vld [vmem:[%s8814_s25 + $0xecc] ss:$40 sps:$4 sm:$0xff]  }
 0x254   : > { %5226 = vmatpush1.bf16.msra.mxu1 %v8154_v4  ;;  %v8229_v4 = vld [vmem:[%s8814_s25 + $0xec8] ss:$40 sps:$4 sm:$0xff]  }
 0x255   : > { %5103 = vmatpush1.bf16.msra.mxu0 %v8151_v63  ;;  %5227 = vmatprep.subr.bf16.mxu1 %v8162_v0  ;;  %v8234_v63 = vld [vmem:[%s8814_s25 + $0x394] ss:$40 sps:$4 sm:$0xff]  }
 0x256   : > { %5104 = vmatprep.subr.bf16.mxu0 %v8159_v5  ;;  %v8232_v5 = vld [vmem:[%s8814_s25 + $0x390] ss:$40 sps:$4 sm:$0xff]   ;;  %v8237_v0 = vld [vmem:[%s8814_s25 + $0xf1c] ss:$40 sps:$4 sm:$0xff]  }
 0x258   : > { %5228 = vmatpush1.bf16.msra.mxu1 %v8160_v9  ;;  %v8235_v9 = vld [vmem:[%s8814_s25 + $0xf18] ss:$40 sps:$4 sm:$0xff]  }
 0x259   : > { %5105 = vmatpush1.bf16.msra.mxu0 %v8157_v8  ;;  %5229 = vmatprep.subr.bf16.mxu1 %v8165_v10  ;;  %v8240_v8 = vld [vmem:[%s8814_s25 + $0x3e4] ss:$40 sps:$4 sm:$0xff]   ;;  %v8238_v10 = vld [vmem:[%s8814_s25 + $0x3e0] ss:$40 sps:$4 sm:$0xff]  }
 0x25a   : > { %5344 = vmatprep.subr.bf16.mxu0 %v8168_v11  ;;  %v8243_v11 = vld [vmem:[%s8814_s25 + $0xf6c] ss:$40 sps:$4 sm:$0xff]  }
 0x25c   : > { %6921 = vmatmul.mubr.msk.bf16.vlgmr.msra.gmra.mrb[4].mxu0 %vm4520_vm0, %v9246_v12  ;;  %5230 = vmatpush1.bf16.msra.mxu1 %v8163_v13  ;;  %v8178_v12 = vld [vmem:[%s8814_s25 + $0xc0] ss:$40 sps:$4 sm:$0xff]   ;;  %v8246_v13 = vld [vmem:[%s8814_s25 + $0x434] ss:$40 sps:$4 sm:$0xff]  }
 0x25d   : > { %5345 = vmatpush1.bf16.msra.mxu0 %v8166_v14  ;;  %5231 = vmatprep.subr.bf16.mxu1 %v8171_v15  ;;  %v8241_v14 = vld [vmem:[%s8814_s25 + $0xf68] ss:$40 sps:$4 sm:$0xff]  }
 0x25e   : > { %5346 = vmatprep.subr.bf16.mxu0 %v8174_v17  ;;  %5376 = vmatprep.mubr.bf16.mxu0 %v8881_v47  ;;  %v8189_v47 = vld [vmem:[%s8814_s25 + $0xc9c] ss:$40 sps:$4 sm:$0xff]   ;;  %v8244_v15 = vld [vmem:[%s8814_s25 + $0x430] ss:$40 sps:$4 sm:$0xff]  }
 0x25f   : > { %v8249_v17 = vld [vmem:[%s8814_s25 + $0xfbc] ss:$40 sps:$4 sm:$0xff]  }
 0x260   : > { %5232 = vmatpush1.bf16.msra.mxu1 %v8169_v18  ;;  %v8252_v18 = vld [vmem:[%s8814_s25 + $0x484] ss:$40 sps:$4 sm:$0xff]  }
 0x261   : > { %5347 = vmatpush1.bf16.msra.mxu0 %v8172_v21  ;;  %5233 = vmatprep.subr.bf16.mxu1 %v8177_v22  ;;  %v8247_v21 = vld [vmem:[%s8814_s25 + $0xfb8] ss:$40 sps:$4 sm:$0xff]  }
 0x262   : > { %5348 = vmatprep.subr.bf16.mxu0 %v8180_v23  ;;  %v8250_v22 = vld [vmem:[%s8814_s25 + $0x480] ss:$40 sps:$4 sm:$0xff]   ;;  %v8255_v23 = vld [vmem:[%s8814_s25 + $0x100c] ss:$40 sps:$4 sm:$0xff]  }
 0x264   : > { %5234 = vmatpush1.bf16.msra.mxu1 %v8175_v24  ;;  %v8258_v24 = vld [vmem:[%s8814_s25 + $0x4d4] ss:$40 sps:$4 sm:$0xff]  }
 0x265   : > { %5349 = vmatpush1.bf16.msra.mxu0 %v8178_v12  ;;  %5235 = vmatprep.subr.bf16.mxu1 %v8183_v26  ;;  %v8253_v12 = vld [vmem:[%s8814_s25 + $0x1008] ss:$40 sps:$4 sm:$0xff]  }
 0x266   : > { %5350 = vmatprep.subr.bf16.mxu0 %v8186_v27  ;;  %v8256_v26 = vld [vmem:[%s8814_s25 + $0x4d0] ss:$40 sps:$4 sm:$0xff]   ;;  %v8261_v27 = vld [vmem:[%s8814_s25 + $0x105c] ss:$40 sps:$4 sm:$0xff]  }
 0x268   : > { %5236 = vmatpush1.bf16.msra.mxu1 %v8181_v28  ;;  %v8264_v28 = vld [vmem:[%s8814_s25 + $0x524] ss:$40 sps:$4 sm:$0xff]  }
 0x269   : > { %5351 = vmatpush1.bf16.msra.mxu0 %v8184_v29  ;;  %5237 = vmatprep.subr.bf16.mxu1 %v8189_v47  ;;  %v8259_v29 = vld [vmem:[%s8814_s25 + $0x1058] ss:$40 sps:$4 sm:$0xff]  }
 0x26a   : > { %5352 = vmatprep.subr.bf16.mxu0 %v8192_v19  ;;  %v8262_v47 = vld [vmem:[%s8814_s25 + $0x520] ss:$40 sps:$4 sm:$0xff]   ;;  %v8267_v19 = vld [vmem:[%s8814_s25 + $0x10ac] ss:$40 sps:$4 sm:$0xff]  }
 0x26c   : > { %5238 = vmatpush1.bf16.msra.mxu1 %v8187_v30  ;;  %v8270_v30 = vld [vmem:[%s8814_s25 + $0x574] ss:$40 sps:$4 sm:$0xff]  }
 0x26d   : > { %5353 = vmatpush1.bf16.msra.mxu0 %v8190_v31  ;;  %5239 = vmatprep.subr.bf16.mxu1 %v8195_v32  ;;  %v8265_v31 = vld [vmem:[%s8814_s25 + $0x10a8] ss:$40 sps:$4 sm:$0xff]  }
 0x26e   : > { %5354 = vmatprep.subr.bf16.mxu0 %v8198_v35  ;;  %v8268_v32 = vld [vmem:[%s8814_s25 + $0x570] ss:$40 sps:$4 sm:$0xff]   ;;  %v8273_v35 = vld [vmem:[%s8814_s25 + $0x10fc] ss:$40 sps:$4 sm:$0xff]  }
 0x270   : > { %5240 = vmatpush1.bf16.msra.mxu1 %v8193_v36  ;;  %v8276_v36 = vld [vmem:[%s8814_s25 + $0x5c4] ss:$40 sps:$4 sm:$0xff]  }
 0x271   : > { %5355 = vmatpush1.bf16.msra.mxu0 %v8196_v38  ;;  %5241 = vmatprep.subr.bf16.mxu1 %v8201_v39 }
 0x272   : > { %5356 = vmatprep.subr.bf16.mxu0 %v8204_v40  ;;  %v8271_v40 = vld [vmem:[%s8814_s25 + $0x10f8] ss:$40 sps:$4 sm:$0xff]  }
 0x274   : > { %5242 = vmatpush1.bf16.msra.mxu1 %v8199_v41  ;;  %v8274_v41 = vld [vmem:[%s8814_s25 + $0x5c0] ss:$40 sps:$4 sm:$0xff]  }
 0x275   : > { %5357 = vmatpush1.bf16.msra.mxu0 %v8202_v43  ;;  %5243 = vmatprep.subr.bf16.mxu1 %v8207_v44  ;;  %v8279_v44 = vld [vmem:[%s8814_s25 + $0x114c] ss:$40 sps:$4 sm:$0xff]  }
 0x276   : > { %5358 = vmatprep.subr.bf16.mxu0 %v8210_v45  ;;  %v8282_v45 = vld [vmem:[%s8814_s25 + $0x614] ss:$40 sps:$4 sm:$0xff]  }
 0x278   : > { %5244 = vmatpush1.bf16.msra.mxu1 %v8205_v48  ;;  %v8280_v48 = vld [vmem:[%s8814_s25 + $0x610] ss:$40 sps:$4 sm:$0xff]  }
 0x279   : > { %5359 = vmatpush1.bf16.msra.mxu0 %v8208_v49  ;;  %5245 = vmatprep.subr.bf16.mxu1 %v8213_v50  ;;  %v8285_v49 = vld [vmem:[%s8814_s25 + $0x119c] ss:$40 sps:$4 sm:$0xff]  }
 0x27a   : > { %5360 = vmatprep.subr.bf16.mxu0 %v8216_v52  ;;  %v8288_v50 = vld [vmem:[%s8814_s25 + $0x664] ss:$40 sps:$4 sm:$0xff]   ;;  %v8283_v52 = vld [vmem:[%s8814_s25 + $0x1198] ss:$40 sps:$4 sm:$0xff]  }
 0x27c   : > { %5246 = vmatpush1.bf16.msra.mxu1 %v8211_v53  ;;  %v8286_v53 = vld [vmem:[%s8814_s25 + $0x660] ss:$40 sps:$4 sm:$0xff]  }
 0x27d   : > { %5361 = vmatpush1.bf16.msra.mxu0 %v8214_v54  ;;  %5247 = vmatprep.subr.bf16.mxu1 %v8219_v55  ;;  %v8291_v54 = vld [vmem:[%s8814_s25 + $0x11ec] ss:$40 sps:$4 sm:$0xff]  }
 0x27e   : > { %5362 = vmatprep.subr.bf16.mxu0 %v8222_v56  ;;  %v8294_v55 = vld [vmem:[%s8814_s25 + $0x6b4] ss:$40 sps:$4 sm:$0xff]   ;;  %v8289_v56 = vld [vmem:[%s8814_s25 + $0x11e8] ss:$40 sps:$4 sm:$0xff]  }
 0x280   : > { %5248 = vmatpush1.bf16.msra.mxu1 %v8217_v57  ;;  %v8292_v57 = vld [vmem:[%s8814_s25 + $0x6b0] ss:$40 sps:$4 sm:$0xff]  }
 0x281   : > { %5363 = vmatpush1.bf16.msra.mxu0 %v8220_v58  ;;  %5249 = vmatprep.subr.bf16.mxu1 %v8225_v59  ;;  %v8297_v58 = vld [vmem:[%s8814_s25 + $0x123c] ss:$40 sps:$4 sm:$0xff]  }
 0x282   : > { %5364 = vmatprep.subr.bf16.mxu0 %v8228_v60  ;;  %v8300_v59 = vld [vmem:[%s8814_s25 + $0x704] ss:$40 sps:$4 sm:$0xff]   ;;  %v8295_v60 = vld [vmem:[%s8814_s25 + $0x1238] ss:$40 sps:$4 sm:$0xff]  }
 0x284   : > { %5250 = vmatpush1.bf16.msra.mxu1 %v8223_v61  ;;  %v8298_v61 = vld [vmem:[%s8814_s25 + $0x700] ss:$40 sps:$4 sm:$0xff]  }
 0x285   : > { %5365 = vmatpush1.bf16.msra.mxu0 %v8226_v1  ;;  %5251 = vmatprep.subr.bf16.mxu1 %v8231_v3  ;;  %v8303_v1 = vld [vmem:[%s8814_s25 + $0x128c] ss:$40 sps:$4 sm:$0xff]  }
 0x286   : > { %5366 = vmatprep.subr.bf16.mxu0 %v8234_v63  ;;  %v8306_v3 = vld [vmem:[%s8814_s25 + $0x754] ss:$40 sps:$4 sm:$0xff]   ;;  %v8301_v63 = vld [vmem:[%s8814_s25 + $0x1288] ss:$40 sps:$4 sm:$0xff]  }
 0x288   : > { %5252 = vmatpush1.bf16.msra.mxu1 %v8229_v4  ;;  %v8304_v4 = vld [vmem:[%s8814_s25 + $0x750] ss:$40 sps:$4 sm:$0xff]  }
 0x289   : > { %5367 = vmatpush1.bf16.msra.mxu0 %v8232_v5  ;;  %5262 = vmatprep.subr.bf16.mxu1 %v8237_v0  ;;  %v8309_v5 = vld [vmem:[%s8814_s25 + $0x12dc] ss:$40 sps:$4 sm:$0xff]  }
 0x28a   : > { %5368 = vmatprep.subr.bf16.mxu0 %v8240_v8  ;;  %v8312_v0 = vld [vmem:[%s8814_s25 + $0x7a4] ss:$40 sps:$4 sm:$0xff]   ;;  %v8307_v8 = vld [vmem:[%s8814_s25 + $0x12d8] ss:$40 sps:$4 sm:$0xff]  }
 0x28b   : > { %5254 = vmatmul.mubr.bf16.vlgmr.msra.gmra.mrb[8].mxu1 %v8995_v16 }
 0x28c   : > { %5263 = vmatpush1.bf16.msra.mxu1 %v8235_v9  ;;  %5294 = vmatprep.mubr.bf16.mxu1 %v9006_v20  ;;  %v8310_v9 = vld [vmem:[%s8814_s25 + $0x7a0] ss:$40 sps:$4 sm:$0xff]  }
 0x28d   : > { %5369 = vmatpush1.bf16.msra.mxu0 %v8238_v10  ;;  %5264 = vmatprep.subr.bf16.mxu1 %v8243_v11  ;;  %v8315_v10 = vld [vmem:[%s8814_s25 + $0x132c] ss:$40 sps:$4 sm:$0xff]  }
 0x28e   : > { %5370 = vmatprep.subr.bf16.mxu0 %v8246_v13  ;;  %v8318_v11 = vld [vmem:[%s8814_s25 + $0x7f4] ss:$40 sps:$4 sm:$0xff]   ;;  %v8313_v13 = vld [vmem:[%s8814_s25 + $0x1328] ss:$40 sps:$4 sm:$0xff]  }
 0x290   : > { %5265 = vmatpush1.bf16.msra.mxu1 %v8241_v14  ;;  %v8316_v14 = vld [vmem:[%s8814_s25 + $0x7f0] ss:$40 sps:$4 sm:$0xff]  }
 0x291   : > { %5371 = vmatpush1.bf16.msra.mxu0 %v8244_v15  ;;  %5266 = vmatprep.subr.bf16.mxu1 %v8249_v17  ;;  %v8321_v15 = vld [vmem:[%s8814_s25 + $0x137c] ss:$40 sps:$4 sm:$0xff]  }
 0x292   : > { %5372 = vmatprep.subr.bf16.mxu0 %v8252_v18  ;;  %v8324_v17 = vld [vmem:[%s8814_s25 + $0x844] ss:$40 sps:$4 sm:$0xff]   ;;  %v8319_v18 = vld [vmem:[%s8814_s25 + $0x1378] ss:$40 sps:$4 sm:$0xff]  }
 0x294   : > { %5267 = vmatpush1.bf16.msra.mxu1 %v8247_v21  ;;  %v8322_v21 = vld [vmem:[%s8814_s25 + $0x840] ss:$40 sps:$4 sm:$0xff]  }
 0x295   : > { %5373 = vmatpush1.bf16.msra.mxu0 %v8250_v22  ;;  %5268 = vmatprep.subr.bf16.mxu1 %v8255_v23  ;;  %v8327_v22 = vld [vmem:[%s8814_s25 + $0x13cc] ss:$40 sps:$4 sm:$0xff]  }
 0x296   : > { %5374 = vmatprep.subr.bf16.mxu0 %v8258_v24  ;;  %v8330_v23 = vld [vmem:[%s8814_s25 + $0x894] ss:$40 sps:$4 sm:$0xff]   ;;  %v8325_v24 = vld [vmem:[%s8814_s25 + $0x13c8] ss:$40 sps:$4 sm:$0xff]  }
 0x298   : > { %5269 = vmatpush1.bf16.msra.mxu1 %v8253_v12  ;;  %v8328_v12 = vld [vmem:[%s8814_s25 + $0x890] ss:$40 sps:$4 sm:$0xff]  }
 0x299   : > { %5375 = vmatpush1.bf16.msra.mxu0 %v8256_v26  ;;  %5270 = vmatprep.subr.bf16.mxu1 %v8261_v27  ;;  %v8333_v26 = vld [vmem:[%s8814_s25 + $0x141c] ss:$40 sps:$4 sm:$0xff]  }
 0x29a   : > { %5385 = vmatprep.subr.bf16.mxu0 %v8264_v28  ;;  %v8336_v27 = vld [vmem:[%s8814_s25 + $0x8e4] ss:$40 sps:$4 sm:$0xff]   ;;  %v8331_v28 = vld [vmem:[%s8814_s25 + $0x1418] ss:$40 sps:$4 sm:$0xff]  }
 0x29c   : > { %5377 = vmatmul.mubr.bf16.vlgmr.msra.gmra.mrb[8].mxu0 %v8910_v6  ;;  %5271 = vmatpush1.bf16.msra.mxu1 %v8259_v29  ;;  %v8334_v29 = vld [vmem:[%s8814_s25 + $0x8e0] ss:$40 sps:$4 sm:$0xff]  }
 0x29d   : > { %5386 = vmatpush1.bf16.msra.mxu0 %v8262_v47  ;;  %5272 = vmatprep.subr.bf16.mxu1 %v8267_v19  ;;  %v8339_v47 = vld [vmem:[%s8814_s25 + $0x146c] ss:$40 sps:$4 sm:$0xff]  }
 0x29e   : > { %5387 = vmatprep.subr.bf16.mxu0 %v8270_v30  ;;  %v9494_v38 = vpop.f32.mrb[4].mxu1  ;;  %5417 = vmatprep.mubr.bf16.mxu0 %v8888_v51  ;;  %v8277_v51 = vld [vmem:[%s8814_s25 + $0x1148] ss:$40 sps:$4 sm:$0xff]   ;;  %v8342_v19 = vld [vmem:[%s8814_s25 + $0x934] ss:$40 sps:$4 sm:$0xff]  }
 0x29f   : > { %v9497_v39 = vpop.f32.mrb[5].mxu1  ;;  %v8337_v30 = vld [vmem:[%s8814_s25 + $0x1468] ss:$40 sps:$4 sm:$0xff]  }
 0x2a0   : > { %v4931_v6 = vpop.f32.mrb[6].mxu1  ;;  %5273 = vmatpush1.bf16.msra.mxu1 %v8265_v31  ;;  %v8340_v31 = vld [vmem:[%s8814_s25 + $0x930] ss:$40 sps:$4 sm:$0xff]  }
 0x2a1   : > { %5388 = vmatpush1.bf16.msra.mxu0 %v8268_v32  ;;  %v4932_v43 = vpop.f32.mrb[7].mxu1  ;;  %5274 = vmatprep.subr.bf16.mxu1 %v8273_v35  ;;  %v8345_v32 = vld [vmem:[%s8814_s25 + $0x14bc] ss:$40 sps:$4 sm:$0xff]   ;;  %v8346_v6 = vld [vmem:[%s8814_s25 + $0x980] ss:$40 sps:$4 sm:$0xff]  }
 0x2a2   : > { %5389 = vmatprep.subr.bf16.mxu0 %v8276_v36  ;;  %v8348_v35 = vld [vmem:[%s8814_s25 + $0x984] ss:$40 sps:$4 sm:$0xff]   ;;  %v8343_v36 = vld [vmem:[%s8814_s25 + $0x14b8] ss:$40 sps:$4 sm:$0xff]  }
 0x2a3   : > { %v5575_v43 = vld [vmem:[%s9553_s8 + $0x80] sm:$0xff] }
 0x2a4   : > { %5275 = vmatpush1.bf16.msra.mxu1 %v8271_v40  ;;  %v8351_v40 = vld [vmem:[%s8814_s25 + $0x150c] ss:$40 sps:$4 sm:$0xff]  }
 0x2a5   : > { %5390 = vmatpush1.bf16.msra.mxu0 %v8274_v41  ;;  %5276 = vmatprep.subr.bf16.mxu1 %v8279_v44  ;;  %v8354_v41 = vld [vmem:[%s8814_s25 + $0x9d4] ss:$40 sps:$4 sm:$0xff]   ;;  %v5576_v44 = vld [vmem:[%s9553_s8 + $0x88] sm:$0xff] }
 0x2a6   : > { %5391 = vmatprep.subr.bf16.mxu0 %v8282_v45  ;;  %v8349_v45 = vld [vmem:[%s8814_s25 + $0x1508] ss:$40 sps:$4 sm:$0xff]  }
 0x2a8   : > { %5277 = vmatpush1.bf16.msra.mxu1 %v8277_v51  ;;  %v8352_v51 = vld [vmem:[%s8814_s25 + $0x9d0] ss:$40 sps:$4 sm:$0xff]  }
 0x2a9   : > { %5392 = vmatpush1.bf16.msra.mxu0 %v8280_v48  ;;  %5278 = vmatprep.subr.bf16.mxu1 %v8285_v49  ;;  %v8357_v48 = vld [vmem:[%s8814_s25 + $0xa24] ss:$40 sps:$4 sm:$0xff]   ;;  %v7107_v49 = vpack.c.bf16 %v5576_v44, %v5575_v43 }
 0x2aa   : > { %5393 = vmatprep.subr.bf16.mxu0 %v8288_v50  ;;  %v5559_v50 = vld [vmem:[%s9553_s8] sm:$0xff] }
 0x2ab   : > { %v8375_v43 = vld [vmem:[%s8814_s25 + $0xc04] ss:$40 sps:$4 sm:$0xff]  }
 0x2ac   : > { %5279 = vmatpush1.bf16.msra.mxu1 %v8283_v52  ;;  %v5560_v52 = vld [vmem:[%s9553_s8 + $0x8] sm:$0xff] }
 0x2ad   : > { %5394 = vmatpush1.bf16.msra.mxu0 %v8286_v53  ;;  %5280 = vmatprep.subr.bf16.mxu1 %v8291_v54  ;;  %v5577_v53 = vld [vmem:[%s9553_s8 + $0x90] sm:$0xff]  ;;  %v5578_v54 = vld [vmem:[%s9553_s8 + $0x98] sm:$0xff] }
 0x2ae   : > { %5395 = vmatprep.subr.bf16.mxu0 %v8294_v55  ;;  %v8355_v55 = vld [vmem:[%s8814_s25 + $0xa20] ss:$40 sps:$4 sm:$0xff]  }
 0x2b0   : > { %5281 = vmatpush1.bf16.msra.mxu1 %v8289_v56  ;;  %v7109_v56 = vpack.c.bf16 %v5560_v52, %v5559_v50  ;;  %v1053_v50 = vsub.s32 3, %v9327_v37  ;;  %v8373_v52 = vld [vmem:[%s8814_s25 + $0xc00] ss:$40 sps:$4 sm:$0xff]  }
 0x2b1   : > { %5396 = vmatpush1.bf16.msra.mxu0 %v8292_v57  ;;  %5282 = vmatprep.subr.bf16.mxu1 %v8297_v58  ;;  %v8360_v57 = vld [vmem:[%s8814_s25 + $0xa74] ss:$40 sps:$4 sm:$0xff]  }
 0x2b2   : > { %5397 = vmatprep.subr.bf16.mxu0 %v8300_v59  ;;  %v5561_v58 = vld [vmem:[%s9553_s8 + $0x10] sm:$0xff]  ;;  %v5562_v59 = vld [vmem:[%s9553_s8 + $0x18] sm:$0xff] }
 0x2b4   : > { %5283 = vmatpush1.bf16.msra.mxu1 %v8295_v60  ;;  %v7111_v60 = vpack.c.bf16 %v5578_v54, %v5577_v53  ;;  %v8378_v54 = vld [vmem:[%s8814_s25 + $0xc54] ss:$40 sps:$4 sm:$0xff]  }
 0x2b5   : > { %5398 = vmatpush1.bf16.msra.mxu0 %v8298_v61  ;;  %5284 = vmatprep.subr.bf16.mxu1 %v8303_v1  ;;  %v5579_v61 = vld [vmem:[%s9553_s8 + $0xa0] sm:$0xff]  ;;  %v5580_v1 = vld [vmem:[%s9553_s8 + $0xa8] sm:$0xff] }
 0x2b6   : > { %5399 = vmatprep.subr.bf16.mxu0 %v8306_v3  ;;  %v5550_v3 = vmax.f32 %v9354_v2, 0.0  ;;  %v8363_v2 = vld [vmem:[%s8814_s25 + $0xac4] ss:$40 sps:$4 sm:$0xff]  }
 0x2b8   : > { %5285 = vmatpush1.bf16.msra.mxu1 %v8301_v63  ;;  %v9578_v63 = vld [vmem:[%s9861_s0 + $0x20] ss:$0 sps:$4 sm:$0xff]  }
 0x2b9   : > { %5400 = vmatpush1.bf16.msra.mxu0 %v8304_v4  ;;  %5286 = vmatprep.subr.bf16.mxu1 %v8309_v5  ;;  %v8358_v4 = vld [vmem:[%s8814_s25 + $0xa70] ss:$40 sps:$4 sm:$0xff]   ;;  %v7113_v5 = vpack.c.bf16 %v5562_v59, %v5561_v58  ;;  %v5607_v58 = vld [vmem:[%s9553_s8 + $0x180] sm:$0xff]  ;;  %v5608_v59 = vld [vmem:[%s9553_s8 + $0x188] sm:$0xff] }
 0x2ba   : > { %5401 = vmatprep.subr.bf16.mxu0 %v8312_v0  ;;  %v7115_v0 = vpack.c.bf16 %v5580_v1, %v5579_v61  ;;  %v8376_v1 = vld [vmem:[%s8814_s25 + $0xc50] ss:$40 sps:$4 sm:$0xff]  }
 0x2bc   : > { %5287 = vmatpush1.bf16.msra.mxu1 %v8307_v8  ;;  %v5563_v8 = vld [vmem:[%s9553_s8 + $0x20] sm:$0xff] }
 0x2bd   : > { %5402 = vmatpush1.bf16.msra.mxu0 %v8310_v9  ;;  %5288 = vmatprep.subr.bf16.mxu1 %v8315_v10  ;;  %v5564_v9 = vld [vmem:[%s9553_s8 + $0x28] sm:$0xff]  ;;  %v5581_v10 = vld [vmem:[%s9553_s8 + $0xb0] sm:$0xff] }
 0x2be   : > { %5403 = vmatprep.subr.bf16.mxu0 %v8318_v11  ;;  %v5582_v11 = vld [vmem:[%s9553_s8 + $0xb8] sm:$0xff] }
 0x2c0   : > { %5289 = vmatpush1.bf16.msra.mxu1 %v8313_v13  ;;  %v7117_v13 = vpack.c.bf16 %v5564_v9, %v5563_v8  ;;  %v5609_v9 = vld [vmem:[%s9553_s8 + $0x190] sm:$0xff] }
 0x2c1   : > { %5404 = vmatpush1.bf16.msra.mxu0 %v8316_v14  ;;  %5290 = vmatprep.subr.bf16.mxu1 %v8321_v15  ;;  %v8366_v14 = vld [vmem:[%s8814_s25 + $0xb14] ss:$40 sps:$4 sm:$0xff]   ;;  %v7119_v15 = vpack.c.bf16 %v5582_v11, %v5581_v10  ;;  %v8379_v11 = vld [vmem:[%s8814_s25 + $0xca0] ss:$40 sps:$4 sm:$0xff]  }
 0x2c2   : > { %5405 = vmatprep.subr.bf16.mxu0 %v8324_v17  ;;  %v5565_v17 = vld [vmem:[%s9553_s8 + $0x30] sm:$0xff]  ;;  %v5610_v10 = vld [vmem:[%s9553_s8 + $0x198] sm:$0xff] }
 0x2c4   : > { %5291 = vmatpush1.bf16.msra.mxu1 %v8319_v18  ;;  %v5566_v18 = vld [vmem:[%s9553_s8 + $0x38] sm:$0xff] }
 0x2c5   : > { %5406 = vmatpush1.bf16.msra.mxu0 %v8322_v21  ;;  %5292 = vmatprep.subr.bf16.mxu1 %v8327_v22  ;;  %v5583_v21 = vld [vmem:[%s9553_s8 + $0xc0] sm:$0xff]  ;;  %v5584_v22 = vld [vmem:[%s9553_s8 + $0xc8] sm:$0xff] }
 0x2c6   : > { %5407 = vmatprep.subr.bf16.mxu0 %v8330_v23  ;;  %v7121_v23 = vpack.c.bf16 %v5566_v18, %v5565_v17  ;;  %v5594_v17 = vld [vmem:[%s9553_s8 + $0x118] sm:$0xff]  ;;  %v7143_v18 = vpack.c.bf16 %v5610_v10, %v5609_v9 }
 0x2c8   : > { %5293 = vmatpush1.bf16.msra.mxu1 %v8325_v24  ;;  %v8369_v24 = vld [vmem:[%s8814_s25 + $0xb64] ss:$40 sps:$4 sm:$0xff]  }
 0x2c9   : > { %5408 = vmatpush1.bf16.msra.mxu0 %v8328_v12  ;;  %5303 = vmatprep.subr.bf16.mxu1 %v8333_v26  ;;  %v7123_v12 = vpack.c.bf16 %v5584_v22, %v5583_v21  ;;  %v5567_v26 = vld [vmem:[%s9553_s8 + $0x40] sm:$0xff]  ;;  %v5612_v21 = vld [vmem:[%s9553_s8 + $0x1a8] sm:$0xff] }
 0x2ca   : > { %5409 = vmatprep.subr.bf16.mxu0 %v8336_v27  ;;  %v5568_v27 = vld [vmem:[%s9553_s8 + $0x48] sm:$0xff] }
 0x2cb   : > { %5295 = vmatmul.mubr.bf16.vlgmr.msra.gmra.mrb[8].mxu1 %v9074_v25 }
 0x2cc   : > { %5304 = vmatpush1.bf16.msra.mxu1 %v8331_v28  ;;  %5335 = vmatprep.mubr.bf16.mxu1 %v8620_v33  ;;  %v5585_v28 = vld [vmem:[%s9553_s8 + $0xd0] sm:$0xff] }
 0x2cd   : > { %5410 = vmatpush1.bf16.msra.mxu0 %v8334_v29  ;;  %5305 = vmatprep.subr.bf16.mxu1 %v8339_v47  ;;  %v5586_v29 = vld [vmem:[%s9553_s8 + $0xd8] sm:$0xff]  ;;  %v8367_v47 = vld [vmem:[%s8814_s25 + $0xb60] ss:$40 sps:$4 sm:$0xff]  }
 0x2ce   : > { %5411 = vmatprep.subr.bf16.mxu0 %v8342_v19  ;;  %v7125_v19 = vpack.c.bf16 %v5568_v27, %v5567_v26  ;;  %v5596_v26 = vld [vmem:[%s9553_s8 + $0x128] sm:$0xff]  ;;  %v5613_v27 = vld [vmem:[%s9553_s8 + $0x1b0] sm:$0xff] }
 0x2d0   : > { %5306 = vmatpush1.bf16.msra.mxu1 %v8337_v30  ;;  %v8372_v30 = vld [vmem:[%s8814_s25 + $0xbb4] ss:$40 sps:$4 sm:$0xff]  }
 0x2d1   : > { %5412 = vmatpush1.bf16.msra.mxu0 %v8340_v31  ;;  %5307 = vmatprep.subr.bf16.mxu1 %v8345_v32  ;;  %v7127_v31 = vpack.c.bf16 %v5586_v29, %v5585_v28  ;;  %v5569_v32 = vld [vmem:[%s9553_s8 + $0x50] sm:$0xff]  ;;  %v5614_v28 = vld [vmem:[%s9553_s8 + $0x1b8] sm:$0xff]  ;;  %v8385_v29 = vld [vmem:[%s8814_s25 + $0xd40] ss:$40 sps:$4 sm:$0xff]  }
 0x2d2   : > { %5413 = vmatprep.subr.bf16.mxu0 %v8348_v35  ;;  %v5570_v35 = vld [vmem:[%s9553_s8 + $0x58] sm:$0xff] }
 0x2d4   : > { %5308 = vmatpush1.bf16.msra.mxu1 %v8343_v36  ;;  %v5587_v36 = vld [vmem:[%s9553_s8 + $0xe0] sm:$0xff] }
 0x2d5   : > { %5414 = vmatpush1.bf16.msra.mxu0 %v8346_v6  ;;  %5309 = vmatprep.subr.bf16.mxu1 %v8351_v40  ;;  %v5588_v6 = vld [vmem:[%s9553_s8 + $0xe8] sm:$0xff]  ;;  %v8370_v40 = vld [vmem:[%s8814_s25 + $0xbb0] ss:$40 sps:$4 sm:$0xff]  }
 0x2d6   : > { %5415 = vmatprep.subr.bf16.mxu0 %v8354_v41  ;;  %v7129_v41 = vpack.c.bf16 %v5570_v35, %v5569_v32  ;;  %v7131_v44 = vpack.c.bf16 %v5588_v6, %v5587_v36  ;;  %v5598_v32 = vld [vmem:[%s9553_s8 + $0x138] sm:$0xff]  ;;  %v5615_v35 = vld [vmem:[%s9553_s8 + $0x1c0] sm:$0xff]  ;;  %v5616_v36 = vld [vmem:[%s9553_s8 + $0x1c8] sm:$0xff] }
 0x2d7   : > { %v8388_v6 = vld [vmem:[%s8814_s25 + $0xd90] ss:$40 sps:$4 sm:$0xff]  }
 0x2d8   : > { %5310 = vmatpush1.bf16.msra.mxu1 %v8349_v45  ;;  %v5571_v45 = vld [vmem:[%s9553_s8 + $0x60] sm:$0xff] }
 0x2d9   : > { %5416 = vmatpush1.bf16.msra.mxu0 %v8352_v51  ;;  %7108 = vmatprep.subr.bf16.mxu1 %v7107_v49  ;;  %v5572_v51 = vld [vmem:[%s9553_s8 + $0x68] sm:$0xff]  ;;  %v5590_v49 = vld [vmem:[%s9553_s8 + $0xf8] sm:$0xff] }
 0x2da   : > { %5426 = vmatprep.subr.bf16.mxu0 %v8357_v48  ;;  %v5589_v48 = vld [vmem:[%s9553_s8 + $0xf0] sm:$0xff]  ;;  %v7133_v53 = vpack.c.bf16 %v5572_v51, %v5571_v45  ;;  %v5600_v45 = vld [vmem:[%s9553_s8 + $0x148] sm:$0xff] }
 0x2db   : > { %6922 = vmatmul.mubr.msk.bf16.vlgmr.msra.gmra.mrb[8].mxu1 %vm4520_vm0, %v9578_v63  ;;  %v5617_v51 = vld [vmem:[%s9553_s8 + $0x1d0] sm:$0xff] }
 0x2dc   : > { %5418 = vmatmul.mubr.bf16.vlgmr.msra.gmra.mrb[8].mxu0 %v8912_v7  ;;  %7110 = vmatpush3.bf16.msra.mxu1 %v7109_v56  ;;  %v8361_v7 = vld [vmem:[%s8814_s25 + $0xac0] ss:$40 sps:$4 sm:$0xff]   ;;  %v5573_v56 = vld [vmem:[%s9553_s8 + $0x70] sm:$0xff] }
 0x2dd   : > { %5427 = vmatpush1.bf16.msra.mxu0 %v8355_v55  ;;  %5783 = vmatprep.mubr.f32.mxu1 %v5550_v3  ;;  %v7135_v55 = vpack.c.bf16 %v5590_v49, %v5589_v48  ;;  %v5618_v48 = vld [vmem:[%s9553_s8 + $0x1d8] sm:$0xff]  ;;  %v8391_v49 = vld [vmem:[%s8814_s25 + $0xde0] ss:$40 sps:$4 sm:$0xff]  }
 0x2de   : > { %5428 = vmatprep.subr.bf16.mxu0 %v8360_v57  ;;  %7112 = vmatprep.subr.bf16.mxu1 %v7111_v60  ;;  %v5574_v57 = vld [vmem:[%s9553_s8 + $0x78] sm:$0xff]  ;;  %v9622_v60 = vld [vmem:[%s8822_s28] sm:$0xff] }
 0x2df   : > { %5458 = vmatprep.mubr.bf16.mxu0 %v8949_v34  ;;  %v8364_v34 = vld [vmem:[%s8814_s25 + $0xb10] ss:$40 sps:$4 sm:$0xff]   ;;  %v1054_v61 = vrot.slane %v9622_v60, %v1053_v50  ;;  %v7137_v3 = vpack.c.bf16 %v5574_v57, %v5573_v56  ;;  %v5619_v56 = vld [vmem:[%s9553_s8 + $0x1e0] sm:$0xff]  ;;  %v5620_v57 = vld [vmem:[%s9553_s8 + $0x1e8] sm:$0xff] }
 0x2e0   : > { %7114 = vmatpush3.bf16.msra.mxu1 %v7113_v5  ;;  %v7139_v5 = vpack.c.bf16 %v5608_v59, %v5607_v58  ;;  %v8394_v58 = vld [vmem:[%s8814_s25 + $0xe30] ss:$40 sps:$4 sm:$0xff]  }
 0x2e1   : > { %5429 = vmatpush1.bf16.msra.mxu0 %v8358_v4  ;;  %7116 = vmatprep.subr.bf16.mxu1 %v7115_v0  ;;  %v8381_v4 = vld [vmem:[%s8814_s25 + $0xca4] ss:$40 sps:$4 sm:$0xff]   ;;  %v7272_v8 = vadd.f32 %v9497_v39, %v1054_v61  ;;  %v1049_v61 = vsub.s32 2, %v9327_v37 }
 0x2e2   : > { %5430 = vmatprep.subr.bf16.mxu0 %v8363_v2  ;;  %v5591_v2 = vld [vmem:[%s9553_s8 + $0x100] sm:$0xff]  ;;  %v5592_v0 = vld [vmem:[%s9553_s8 + $0x108] sm:$0xff] }
 0x2e3   : > { %v5611_v39 = vld [vmem:[%s9553_s8 + $0x1a0] sm:$0xff]  ;;  %v5552_v22 = vmax.f32 %v7272_v8, 0.0  ;;  %v1050_v10 = vrot.slane %v9622_v60, %v1049_v61  ;;  %v5650_v61 = vld [vmem:[%s9553_s8 + $0x2d8] sm:$0xff] }
 0x2e4   : > { %7118 = vmatpush3.bf16.msra.mxu1 %v7117_v13  ;;  %v5549_v13 = vmax.f32 %v9352_v62, 0.0  ;;  %v8397_v8 = vld [vmem:[%s8814_s25 + $0xe80] ss:$40 sps:$4 sm:$0xff]  }
 0x2e5   : > { %5431 = vmatpush1.bf16.msra.mxu0 %v8361_v7  ;;  %7120 = vmatprep.subr.bf16.mxu1 %v7119_v15  ;;  %v7141_v7 = vpack.c.bf16 %v5592_v0, %v5591_v2  ;;  %v5593_v15 = vld [vmem:[%s9553_s8 + $0x110] sm:$0xff]  ;;  %v5622_v0 = vld [vmem:[%s9553_s8 + $0x1f8] sm:$0xff] }
 0x2e6   : > { %5432 = vmatprep.subr.bf16.mxu0 %v8366_v14  ;;  %v8384_v14 = vld [vmem:[%s8814_s25 + $0xcf4] ss:$40 sps:$4 sm:$0xff]   ;;  %v7145_v62 = vpack.c.bf16 %v5594_v17, %v5593_v15  ;;  %v5639_v15 = vld [vmem:[%s9553_s8 + $0x280] sm:$0xff]  ;;  %v5640_v17 = vld [vmem:[%s9553_s8 + $0x288] sm:$0xff] }
 0x2e7   : > { %v5621_v2 = vld [vmem:[%s9553_s8 + $0x1f0] sm:$0xff] }
 0x2e8   : > { %7122 = vmatpush3.bf16.msra.mxu1 %v7121_v23  ;;  %v8387_v23 = vld [vmem:[%s8814_s25 + $0xd44] ss:$40 sps:$4 sm:$0xff]  }
 0x2e9   : > { %5433 = vmatpush1.bf16.msra.mxu0 %v8364_v34  ;;  %7124 = vmatprep.subr.bf16.mxu1 %v7123_v12  ;;  %v8382_v34 = vld [vmem:[%s8814_s25 + $0xcf0] ss:$40 sps:$4 sm:$0xff]   ;;  %v5595_v12 = vld [vmem:[%s9553_s8 + $0x120] sm:$0xff] }
 0x2ea   : > { %5434 = vmatprep.subr.bf16.mxu0 %v8369_v24  ;;  %v7147_v24 = vpack.c.bf16 %v5612_v21, %v5611_v39  ;;  %v7271_v21 = vadd.f32 %v9494_v38, %v1050_v10  ;;  %v8408_v38 = vld [vmem:[%s8814_s25 + $0xf74] ss:$40 sps:$4 sm:$0xff]   ;;  %v5652_v10 = vld [vmem:[%s9553_s8 + $0x2e8] sm:$0xff] }
 0x2ec   : > { %7126 = vmatpush3.bf16.msra.mxu1 %v7125_v19  ;;  %v8390_v19 = vld [vmem:[%s8814_s25 + $0xd94] ss:$40 sps:$4 sm:$0xff]  }
 0x2ed   : > { %5435 = vmatpush1.bf16.msra.mxu0 %v8367_v47  ;;  %7128 = vmatprep.subr.bf16.mxu1 %v7127_v31  ;;  %v7149_v47 = vpack.c.bf16 %v5596_v26, %v5595_v12  ;;  %v5597_v31 = vld [vmem:[%s9553_s8 + $0x130] sm:$0xff]  ;;  %v5642_v12 = vld [vmem:[%s9553_s8 + $0x298] sm:$0xff]  ;;  %v8403_v26 = vld [vmem:[%s8814_s25 + $0xf20] ss:$40 sps:$4 sm:$0xff]  }
 0x2ee   : > { %5436 = vmatprep.subr.bf16.mxu0 %v8372_v30  ;;  %v7151_v30 = vpack.c.bf16 %v5614_v28, %v5613_v27  ;;  %v5551_v28 = vmax.f32 %v7271_v21, 0.0 }
 0x2f0   : > { %7130 = vmatpush3.bf16.msra.mxu1 %v7129_v41  ;;  %v8393_v41 = vld [vmem:[%s8814_s25 + $0xde4] ss:$40 sps:$4 sm:$0xff]  }
 0x2f1   : > { %5437 = vmatpush1.bf16.msra.mxu0 %v8370_v40  ;;  %7132 = vmatprep.subr.bf16.mxu1 %v7131_v44  ;;  %v7153_v40 = vpack.c.bf16 %v5598_v32, %v5597_v31  ;;  %v5599_v44 = vld [vmem:[%s9553_s8 + $0x140] sm:$0xff]  ;;  %v5644_v31 = vld [vmem:[%s9553_s8 + $0x2a8] sm:$0xff]  ;;  %v8406_v32 = vld [vmem:[%s8814_s25 + $0xf70] ss:$40 sps:$4 sm:$0xff]  }
 0x2f2   : > { %5438 = vmatprep.subr.bf16.mxu0 %v8375_v43  ;;  %v7155_v43 = vpack.c.bf16 %v5616_v36, %v5615_v35  ;;  %v7157_v50 = vpack.c.bf16 %v5600_v45, %v5599_v44  ;;  %v8411_v36 = vld [vmem:[%s8814_s25 + $0xfc4] ss:$40 sps:$4 sm:$0xff]   ;;  %v5646_v44 = vld [vmem:[%s9553_s8 + $0x2b8] sm:$0xff] }
 0x2f4   : > { %7134 = vmatpush3.bf16.msra.mxu1 %v7133_v53  ;;  %v7159_v53 = vpack.c.bf16 %v5618_v48, %v5617_v51  ;;  %v8414_v51 = vld [vmem:[%s8814_s25 + $0x1014] ss:$40 sps:$4 sm:$0xff]  }
 0x2f5   : > { %5439 = vmatpush1.bf16.msra.mxu0 %v8373_v52  ;;  %7136 = vmatprep.subr.bf16.mxu1 %v7135_v55  ;;  %v8396_v52 = vld [vmem:[%s8814_s25 + $0xe34] ss:$40 sps:$4 sm:$0xff]  }
 0x2f6   : > { %5440 = vmatprep.subr.bf16.mxu0 %v8378_v54  ;;  %v5601_v54 = vld [vmem:[%s9553_s8 + $0x150] sm:$0xff]  ;;  %v5602_v55 = vld [vmem:[%s9553_s8 + $0x158] sm:$0xff] }
 0x2f7   : > { %v7161_v59 = vpack.c.bf16 %v5602_v55, %v5601_v54  ;;  %v8417_v55 = vld [vmem:[%s8814_s25 + $0x1064] ss:$40 sps:$4 sm:$0xff]  }
 0x2f8   : > { %7138 = vmatpush3.bf16.msra.mxu1 %v7137_v3  ;;  %v7163_v3 = vpack.c.bf16 %v5620_v57, %v5619_v56  ;;  %v5631_v57 = vld [vmem:[%s9553_s8 + $0x240] sm:$0xff] }
 0x2f9   : > { %5441 = vmatpush1.bf16.msra.mxu0 %v8376_v1  ;;  %7140 = vmatprep.subr.bf16.mxu1 %v7139_v5  ;;  %v8399_v1 = vld [vmem:[%s8814_s25 + $0xe84] ss:$40 sps:$4 sm:$0xff]  }
 0x2fa   : > { %5442 = vmatprep.subr.bf16.mxu0 %v8381_v4  ;;  %v5603_v4 = vld [vmem:[%s9553_s8 + $0x160] sm:$0xff]  ;;  %v5604_v5 = vld [vmem:[%s9553_s8 + $0x168] sm:$0xff] }
 0x2fb   : > { %5784 = vmatmul.mubr.f32.vlgmr.msra.gmra.mrb[12].mxu1 %v5549_v13  ;;  %v7165_v9 = vpack.c.bf16 %v5604_v5, %v5603_v4  ;;  %v5605_v13 = vld [vmem:[%s9553_s8 + $0x170] sm:$0xff]  ;;  %v1061_v4 = vsub.s32 5, %v9327_v37 }
 0x2fc   : > { %7142 = vmatpush3.bf16.msra.mxu1 %v7141_v7  ;;  %5853 = vmatprep.mubr.f32.mxu1 %v5552_v22  ;;  %v7167_v7 = vpack.c.bf16 %v5622_v0, %v5621_v2  ;;  %v8405_v22 = vld [vmem:[%s8814_s25 + $0xf24] ss:$40 sps:$4 sm:$0xff]   ;;  %v8420_v5 = vld [vmem:[%s8814_s25 + $0x10b4] ss:$40 sps:$4 sm:$0xff]  }
 0x2fd   : > { %5443 = vmatpush1.bf16.msra.mxu0 %v8379_v11  ;;  %7144 = vmatprep.subr.bf16.mxu1 %v7143_v18  ;;  %v8402_v11 = vld [vmem:[%s8814_s25 + $0xed4] ss:$40 sps:$4 sm:$0xff]   ;;  %v8400_v18 = vld [vmem:[%s8814_s25 + $0xed0] ss:$40 sps:$4 sm:$0xff]  }
 0x2fe   : > { %5444 = vmatprep.subr.bf16.mxu0 %v8384_v14  ;;  %v5606_v14 = vld [vmem:[%s9553_s8 + $0x178] sm:$0xff]  ;;  %v5633_v0 = vld [vmem:[%s9553_s8 + $0x250] sm:$0xff] }
 0x2ff   : > { %v7169_v39 = vpack.c.bf16 %v5606_v14, %v5605_v13  ;;  %v1057_v14 = vsub.s32 4, %v9327_v37 }
 0x300   : > { %7146 = vmatpush3.bf16.msra.mxu1 %v7145_v62  ;;  %v5623_v62 = vld [vmem:[%s9553_s8 + $0x200] sm:$0xff] }
 0x301   : > { %5445 = vmatpush1.bf16.msra.mxu0 %v8382_v34  ;;  %7148 = vmatprep.subr.bf16.mxu1 %v7147_v24  ;;  %v7171_v34 = vpack.c.bf16 %v5640_v17, %v5639_v15  ;;  %v5641_v24 = vld [vmem:[%s9553_s8 + $0x290] sm:$0xff]  ;;  %v8423_v15 = vld [vmem:[%s8814_s25 + $0x1104] ss:$40 sps:$4 sm:$0xff]  }
 0x302   : > { %5446 = vmatprep.subr.bf16.mxu0 %v8387_v23  ;;  %v5624_v23 = vld [vmem:[%s9553_s8 + $0x208] sm:$0xff] }
 0x303   : > { %v7173_v27 = vpack.c.bf16 %v5624_v23, %v5623_v62  ;;  %v5654_v62 = vld [vmem:[%s9553_s8 + $0x2f8] sm:$0xff] }
 0x304   : > { %7150 = vmatpush3.bf16.msra.mxu1 %v7149_v47  ;;  %v5625_v47 = vld [vmem:[%s9553_s8 + $0x210] sm:$0xff] }
 0x305   : > { %5447 = vmatpush1.bf16.msra.mxu0 %v8385_v29  ;;  %7152 = vmatprep.subr.bf16.mxu1 %v7151_v30  ;;  %v7175_v29 = vpack.c.bf16 %v5642_v12, %v5641_v24  ;;  %v5643_v30 = vld [vmem:[%s9553_s8 + $0x2a0] sm:$0xff] }
 0x306   : > { %5448 = vmatprep.subr.bf16.mxu0 %v8390_v19  ;;  %v5626_v19 = vld [vmem:[%s9553_s8 + $0x218] sm:$0xff]  ;;  %v8421_v12 = vld [vmem:[%s8814_s25 + $0x1100] ss:$40 sps:$4 sm:$0xff]  }
 0x307   : > { %v7177_v35 = vpack.c.bf16 %v5626_v19, %v5625_v47  ;;  %v5638_v47 = vld [vmem:[%s9553_s8 + $0x278] sm:$0xff] }
 0x308   : > { %7154 = vmatpush3.bf16.msra.mxu1 %v7153_v40  ;;  %v5627_v40 = vld [vmem:[%s9553_s8 + $0x220] sm:$0xff] }
 0x309   : > { %5449 = vmatpush1.bf16.msra.mxu0 %v8388_v6  ;;  %7156 = vmatprep.subr.bf16.mxu1 %v7155_v43  ;;  %v7179_v6 = vpack.c.bf16 %v5644_v31, %v5643_v30  ;;  %v5645_v43 = vld [vmem:[%s9553_s8 + $0x2b0] sm:$0xff]  ;;  %v5671_v31 = vld [vmem:[%s9553_s8 + $0x380] sm:$0xff] }
 0x30a   : > { %5450 = vmatprep.subr.bf16.mxu0 %v8393_v41  ;;  %v5628_v41 = vld [vmem:[%s9553_s8 + $0x228] sm:$0xff]  ;;  %v7183_v48 = vpack.c.bf16 %v5646_v44, %v5645_v43  ;;  %v5655_v43 = vld [vmem:[%s9553_s8 + $0x300] sm:$0xff] }
 0x30b   : > { %v7181_v45 = vpack.c.bf16 %v5628_v41, %v5627_v40  ;;  %v8429_v40 = vld [vmem:[%s8814_s25 + $0x11a4] ss:$40 sps:$4 sm:$0xff]  }
 0x30c   : > { %7158 = vmatpush3.bf16.msra.mxu1 %v7157_v50  ;;  %v5630_v50 = vld [vmem:[%s9553_s8 + $0x238] sm:$0xff]  ;;  %v5656_v44 = vld [vmem:[%s9553_s8 + $0x308] sm:$0xff] }
 0x30d   : > { %5451 = vmatpush1.bf16.msra.mxu0 %v8391_v49  ;;  %7160 = vmatprep.subr.bf16.mxu1 %v7159_v53  ;;  %v5629_v49 = vld [vmem:[%s9553_s8 + $0x230] sm:$0xff]  ;;  %v5648_v53 = vld [vmem:[%s9553_s8 + $0x2c8] sm:$0xff] }
 0x30e   : > { %5452 = vmatprep.subr.bf16.mxu0 %v8396_v52  ;;  %v5647_v52 = vld [vmem:[%s9553_s8 + $0x2c0] sm:$0xff]  ;;  %v7185_v54 = vpack.c.bf16 %v5630_v50, %v5629_v49  ;;  %v8432_v50 = vld [vmem:[%s8814_s25 + $0x11f4] ss:$40 sps:$4 sm:$0xff]  }
 0x30f   : > { %v7187_v56 = vpack.c.bf16 %v5648_v53, %v5647_v52  ;;  %v5657_v53 = vld [vmem:[%s9553_s8 + $0x310] sm:$0xff] }
 0x310   : > { %7162 = vmatpush3.bf16.msra.mxu1 %v7161_v59  ;;  %v5649_v59 = vld [vmem:[%s9553_s8 + $0x2d0] sm:$0xff] }
 0x311   : > { %5453 = vmatpush1.bf16.msra.mxu0 %v8394_v58  ;;  %7164 = vmatprep.subr.bf16.mxu1 %v7163_v3  ;;  %v5632_v58 = vld [vmem:[%s9553_s8 + $0x248] sm:$0xff]  ;;  %v7191_v2 = vpack.c.bf16 %v5650_v61, %v5649_v59  ;;  %v5659_v61 = vld [vmem:[%s9553_s8 + $0x320] sm:$0xff] }
 0x312   : > { %5454 = vmatprep.subr.bf16.mxu0 %v8399_v1  ;;  %v8415_v1 = vld [vmem:[%s8814_s25 + $0x1060] ss:$40 sps:$4 sm:$0xff]   ;;  %v7189_v3 = vpack.c.bf16 %v5632_v58, %v5631_v57  ;;  %v8435_v58 = vld [vmem:[%s8814_s25 + $0x1244] ss:$40 sps:$4 sm:$0xff]  }
 0x314   : > { %7166 = vmatpush3.bf16.msra.mxu1 %v7165_v9  ;;  %v5651_v9 = vld [vmem:[%s9553_s8 + $0x2e0] sm:$0xff] }
 0x315   : > { %5455 = vmatpush1.bf16.msra.mxu0 %v8397_v8  ;;  %7168 = vmatprep.subr.bf16.mxu1 %v7167_v7  ;;  %v5634_v8 = vld [vmem:[%s9553_s8 + $0x258] sm:$0xff]  ;;  %v7195_v17 = vpack.c.bf16 %v5652_v10, %v5651_v9  ;;  %v5661_v9 = vld [vmem:[%s9553_s8 + $0x330] sm:$0xff] }
 0x316   : > { %5456 = vmatprep.subr.bf16.mxu0 %v8402_v11  ;;  %v1062_v11 = vrot.slane %v9622_v60, %v1061_v4  ;;  %v8418_v7 = vld [vmem:[%s8814_s25 + $0x10b0] ss:$40 sps:$4 sm:$0xff]   ;;  %v7193_v13 = vpack.c.bf16 %v5634_v8, %v5633_v0  ;;  %v8438_v0 = vld [vmem:[%s8814_s25 + $0x1294] ss:$40 sps:$4 sm:$0xff]  }
 0x317   : > { %v5678_v4 = vld [vmem:[%s9553_s8 + $0x3b8] sm:$0xff] }
 0x318   : > { %7170 = vmatpush3.bf16.msra.mxu1 %v7169_v39  ;;  %v5636_v39 = vld [vmem:[%s9553_s8 + $0x268] sm:$0xff]  ;;  %v5662_v10 = vld [vmem:[%s9553_s8 + $0x338] sm:$0xff] }
 0x319   : > { %5457 = vmatpush1.bf16.msra.mxu0 %v8400_v18  ;;  %7172 = vmatprep.subr.bf16.mxu1 %v7171_v34  ;;  %v5635_v18 = vld [vmem:[%s9553_s8 + $0x260] sm:$0xff]  ;;  %v5653_v34 = vld [vmem:[%s9553_s8 + $0x2f0] sm:$0xff] }
 0x31a   : > { %5467 = vmatprep.subr.bf16.mxu0 %v8405_v22  ;;  %v7199_v30 = vpack.c.bf16 %v5654_v62, %v5653_v34  ;;  %v8439_v34 = vld [vmem:[%s8814_s25 + $0x12e0] ss:$40 sps:$4 sm:$0xff]  }
 0x31b   : > { %5854 = vmatmul.mubr.f32.vlgmr.msra.gmra.mrb[14].mxu1 %v5551_v28 }
 0x31c   : > { %5459 = vmatmul.mubr.bf16.vlgmr.msra.gmra.mrb[8].mxu0 %v8995_v16  ;;  %7174 = vmatpush3.bf16.msra.mxu1 %v7173_v27  ;;  %v8409_v16 = vld [vmem:[%s8814_s25 + $0xfc0] ss:$40 sps:$4 sm:$0xff]   ;;  %v1058_v27 = vrot.slane %v9622_v60, %v1057_v14  ;;  %v7217_v14 = vpack.c.bf16 %v5662_v10, %v5661_v9 }
 0x31d   : > { %5468 = vmatpush1.bf16.msra.mxu0 %v8403_v26  ;;  %7176 = vmatprep.subr.bf16.mxu1 %v7175_v29  ;;  %v7197_v26 = vpack.c.bf16 %v5636_v39, %v5635_v18  ;;  %v5637_v29 = vld [vmem:[%s9553_s8 + $0x270] sm:$0xff]  ;;  %v5663_v18 = vld [vmem:[%s9553_s8 + $0x340] sm:$0xff]  ;;  %v5664_v39 = vld [vmem:[%s9553_s8 + $0x348] sm:$0xff] }
 0x31e   : > { %5469 = vmatprep.subr.bf16.mxu0 %v8408_v38  ;;  %5499 = vmatprep.mubr.bf16.mxu0 %v9006_v20  ;;  %v8412_v20 = vld [vmem:[%s8814_s25 + $0x1010] ss:$40 sps:$4 sm:$0xff]   ;;  %v8426_v38 = vld [vmem:[%s8814_s25 + $0x1154] ss:$40 sps:$4 sm:$0xff]   ;;  %v7221_v62 = vpack.c.bf16 %v5664_v39, %v5663_v18 }
 0x320   : > { %7178 = vmatpush3.bf16.msra.mxu1 %v7177_v35  ;;  %v8424_v35 = vld [vmem:[%s8814_s25 + $0x1150] ss:$40 sps:$4 sm:$0xff]  }
 0x321   : > { %5470 = vmatpush1.bf16.msra.mxu0 %v8406_v32  ;;  %7180 = vmatprep.subr.bf16.mxu1 %v7179_v6  ;;  %v5672_v32 = vld [vmem:[%s9553_s8 + $0x388] sm:$0xff] }
 0x322   : > { %5471 = vmatprep.subr.bf16.mxu0 %v8411_v36  ;;  %v7201_v36 = vpack.c.bf16 %v5638_v47, %v5637_v29  ;;  %v7203_v41 = vpack.c.bf16 %v5672_v32, %v5671_v31  ;;  %v8447_v47 = vld [vmem:[%s8814_s25 + $0x1384] ss:$40 sps:$4 sm:$0xff]   ;;  %v5685_v32 = vld [vmem:[%s9553_s8 + $0x3f0] sm:$0xff] }
 0x323   : > { %v5668_v31 = vld [vmem:[%s9553_s8 + $0x368] sm:$0xff] }
 0x324   : > { %7182 = vmatpush3.bf16.msra.mxu1 %v7181_v45  ;;  %v5674_v45 = vld [vmem:[%s9553_s8 + $0x398] sm:$0xff] }
 0x325   : > { %5472 = vmatpush1.bf16.msra.mxu0 %v8409_v16  ;;  %7184 = vmatprep.subr.bf16.mxu1 %v7183_v48  ;;  %v5673_v16 = vld [vmem:[%s9553_s8 + $0x390] sm:$0xff]  ;;  %v7205_v48 = vpack.c.bf16 %v5656_v44, %v5655_v43  ;;  %v5670_v44 = vld [vmem:[%s9553_s8 + $0x378] sm:$0xff] }
 0x326   : > { %5473 = vmatprep.subr.bf16.mxu0 %v8414_v51  ;;  %v8427_v51 = vld [vmem:[%s8814_s25 + $0x11a0] ss:$40 sps:$4 sm:$0xff]   ;;  %v7207_v52 = vpack.c.bf16 %v5674_v45, %v5673_v16  ;;  %v5669_v43 = vld [vmem:[%s9553_s8 + $0x370] sm:$0xff] }
 0x327   : > { %v8448_v16 = vld [vmem:[%s8814_s25 + $0x13d0] ss:$40 sps:$4 sm:$0xff]   ;;  %v7233_v45 = vpack.c.bf16 %v5670_v44, %v5669_v43 }
 0x328   : > { %7186 = vmatpush3.bf16.msra.mxu1 %v7185_v54  ;;  %v5675_v54 = vld [vmem:[%s9553_s8 + $0x3a0] sm:$0xff] }
 0x329   : > { %5474 = vmatpush1.bf16.msra.mxu0 %v8412_v20  ;;  %7188 = vmatprep.subr.bf16.mxu1 %v7187_v56  ;;  %v5658_v20 = vld [vmem:[%s9553_s8 + $0x318] sm:$0xff] }
 0x32a   : > { %5475 = vmatprep.subr.bf16.mxu0 %v8417_v55  ;;  %v5676_v55 = vld [vmem:[%s9553_s8 + $0x3a8] sm:$0xff]  ;;  %v8430_v56 = vld [vmem:[%s8814_s25 + $0x11f0] ss:$40 sps:$4 sm:$0xff]   ;;  %v7209_v57 = vpack.c.bf16 %v5658_v20, %v5657_v53  ;;  %v8462_v20 = vld [vmem:[%s8814_s25 + $0x1514] ss:$40 sps:$4 sm:$0xff]  }
 0x32b   : > { %v7211_v59 = vpack.c.bf16 %v5676_v55, %v5675_v54  ;;  %v8457_v53 = vld [vmem:[%s8814_s25 + $0x14c0] ss:$40 sps:$4 sm:$0xff]   ;;  %v8460_v54 = vld [vmem:[%s8814_s25 + $0x1510] ss:$40 sps:$4 sm:$0xff]  }
 0x32c   : > { %7190 = vmatpush3.bf16.msra.mxu1 %v7189_v3  ;;  %v5677_v3 = vld [vmem:[%s9553_s8 + $0x3b0] sm:$0xff]  ;;  %v5704_v55 = vld [vmem:[%s9553_s8 + $0x488] sm:$0xff] }
 0x32d   : > { %5476 = vmatpush1.bf16.msra.mxu0 %v8415_v1  ;;  %7192 = vmatprep.subr.bf16.mxu1 %v7191_v2  ;;  %v5660_v1 = vld [vmem:[%s9553_s8 + $0x328] sm:$0xff]  ;;  %v7215_v8 = vpack.c.bf16 %v5678_v4, %v5677_v3  ;;  %v5687_v3 = vld [vmem:[%s9553_s8 + $0x400] sm:$0xff] }
 0x32e   : > { %5477 = vmatprep.subr.bf16.mxu0 %v8420_v5  ;;  %v8433_v5 = vld [vmem:[%s8814_s25 + $0x1240] ss:$40 sps:$4 sm:$0xff]   ;;  %v7213_v2 = vpack.c.bf16 %v5660_v1, %v5659_v61 }
 0x32f   : > { %v5132_v21 = vpop.f32.mrb[4].mxu0  ;;  %v5688_v4 = vld [vmem:[%s9553_s8 + $0x408] sm:$0xff] }
 0x330   : > { %v5134_v22 = vpop.f32.mrb[5].mxu0  ;;  %7194 = vmatpush3.bf16.msra.mxu1 %v7193_v13  ;;  %v7273_v6 = vadd.f32 %v5132_v21, %v1058_v27  ;;  %v8436_v13 = vld [vmem:[%s8814_s25 + $0x1290] ss:$40 sps:$4 sm:$0xff]   ;;  %v5683_v27 = vld [vmem:[%s9553_s8 + $0x3e0] sm:$0xff] }
 0x331   : > { %v7274_v23 = vadd.f32 %v5134_v22, %v1062_v11  ;;  %v5136_v24 = vpop.f32.mrb[6].mxu0  ;;  %5478 = vmatpush1.bf16.msra.mxu0 %v8418_v7  ;;  %7196 = vmatprep.subr.bf16.mxu1 %v7195_v17  ;;  %v5679_v11 = vld [vmem:[%s9553_s8 + $0x3c0] sm:$0xff]  ;;  %v5680_v7 = vld [vmem:[%s9553_s8 + $0x3c8] sm:$0xff]  ;;  %v5681_v21 = vld [vmem:[%s9553_s8 + $0x3d0] sm:$0xff] }
 0x332   : > { %v5137_v28 = vpop.f32.mrb[7].mxu0  ;;  %5479 = vmatprep.subr.bf16.mxu0 %v8423_v15  ;;  %v5553_v49 = vmax.f32 %v7273_v6, 0.0  ;;  %v8441_v15 = vld [vmem:[%s8814_s25 + $0x12e4] ss:$40 sps:$4 sm:$0xff]   ;;  %v7219_v17 = vpack.c.bf16 %v5680_v7, %v5679_v11  ;;  %v5682_v22 = vld [vmem:[%s9553_s8 + $0x3d8] sm:$0xff]  ;;  %v7237_v11 = vpack.c.bf16 %v5688_v4, %v5687_v3 }
 0x333   : > { %v5554_v19 = vmax.f32 %v7274_v23, 0.0  ;;  %v8444_v23 = vld [vmem:[%s8814_s25 + $0x1334] ss:$40 sps:$4 sm:$0xff]   ;;  %v7223_v24 = vpack.c.bf16 %v5682_v22, %v5681_v21  ;;  %v5684_v28 = vld [vmem:[%s9553_s8 + $0x3e8] sm:$0xff]  ;;  %v5691_v21 = vld [vmem:[%s9553_s8 + $0x420] sm:$0xff] }
 0x334   : > { %7198 = vmatpush3.bf16.msra.mxu1 %v7197_v26  ;;  %v5666_v26 = vld [vmem:[%s9553_s8 + $0x358] sm:$0xff]  ;;  %v5692_v22 = vld [vmem:[%s9553_s8 + $0x428] sm:$0xff] }
 0x335   : > { %5480 = vmatpush1.bf16.msra.mxu0 %v8421_v12  ;;  %5923 = vmatprep.mubr.f32.mxu1 %v5554_v19  ;;  %v5665_v12 = vld [vmem:[%s9553_s8 + $0x350] sm:$0xff]  ;;  %v7227_v19 = vpack.c.bf16 %v5684_v28, %v5683_v27  ;;  %v5711_v27 = vld [vmem:[%s9553_s8 + $0x4c0] sm:$0xff]  ;;  %v5712_v28 = vld [vmem:[%s9553_s8 + $0x4c8] sm:$0xff] }
 0x336   : > { %5481 = vmatprep.subr.bf16.mxu0 %v8426_v38  ;;  %7200 = vmatprep.subr.bf16.mxu1 %v7199_v30  ;;  %v8442_v38 = vld [vmem:[%s8814_s25 + $0x1330] ss:$40 sps:$4 sm:$0xff]   ;;  %v7225_v29 = vpack.c.bf16 %v5666_v26, %v5665_v12  ;;  %v5667_v30 = vld [vmem:[%s9553_s8 + $0x360] sm:$0xff] }
 0x337   : > { %v7229_v6 = vpack.c.bf16 %v5668_v31, %v5667_v30  ;;  %v5693_v12 = vld [vmem:[%s9553_s8 + $0x430] sm:$0xff]  ;;  %v5694_v26 = vld [vmem:[%s9553_s8 + $0x438] sm:$0xff] }
 0x338   : > { %7202 = vmatpush3.bf16.msra.mxu1 %v7201_v36  ;;  %v8445_v36 = vld [vmem:[%s8814_s25 + $0x1380] ss:$40 sps:$4 sm:$0xff]   ;;  %v5713_v30 = vld [vmem:[%s9553_s8 + $0x4d0] sm:$0xff]  ;;  %v5714_v31 = vld [vmem:[%s9553_s8 + $0x4d8] sm:$0xff] }
 0x339   : > { %5482 = vmatpush1.bf16.msra.mxu0 %v8424_v35  ;;  %7204 = vmatprep.subr.bf16.mxu1 %v7203_v41  ;;  %v5686_v35 = vld [vmem:[%s9553_s8 + $0x3f8] sm:$0xff]  ;;  %v1036_v3 = vld [vmem:[%s8822_s28 + $0x8] sm:$0x3] }
 0x33a   : > { %5483 = vmatprep.subr.bf16.mxu0 %v8429_v40  ;;  %v8450_v40 = vld [vmem:[%s8814_s25 + $0x13d4] ss:$40 sps:$4 sm:$0xff]   ;;  %v7231_v41 = vpack.c.bf16 %v5686_v35, %v5685_v32  ;;  %v7255_v35 = vpack.c.bf16 %v5714_v31, %v5713_v30  ;;  %v1074_v4 = vrot.slane %v1036_v3, %v1041_v42 }
 0x33b   : > { %5924 = vmatmul.mubr.f32.vlgmr.msra.gmra.mrb[16].mxu1 %v5553_v49  ;;  %v8456_v49 = vld [vmem:[%s8814_s25 + $0x1474] ss:$40 sps:$4 sm:$0xff]  }
 0x33c   : > { %7206 = vmatpush3.bf16.msra.mxu1 %v7205_v48  ;;  %v8451_v48 = vld [vmem:[%s8814_s25 + $0x1420] ss:$40 sps:$4 sm:$0xff]  }
 0x33d   : > { %5484 = vmatpush1.bf16.msra.mxu0 %v8427_v51  ;;  %7208 = vmatprep.subr.bf16.mxu1 %v7207_v52  ;;  %v8453_v51 = vld [vmem:[%s8814_s25 + $0x1424] ss:$40 sps:$4 sm:$0xff]  }
 0x33e   : > { %5485 = vmatprep.subr.bf16.mxu0 %v8432_v50  ;;  %v8454_v50 = vld [vmem:[%s8814_s25 + $0x1470] ss:$40 sps:$4 sm:$0xff]   ;;  %v8459_v52 = vld [vmem:[%s8814_s25 + $0x14c4] ss:$40 sps:$4 sm:$0xff]  }
 0x340   : > { %7210 = vmatpush3.bf16.msra.mxu1 %v7209_v57  ;;  %v1069_v57 = vsub.s32 7, %v9327_v37 }
 0x341   : > { %5486 = vmatpush1.bf16.msra.mxu0 %v8430_v56  ;;  %7212 = vmatprep.subr.bf16.mxu1 %v7211_v59  ;;  %v1065_v56 = vsub.s32 6, %v9327_v37  ;;  %v6925_v37 = vld [vmem:[#allocation6] ss:$0 sm:$0xff] (!%p6924_p3) }
 0x342   : > { %5487 = vmatprep.subr.bf16.mxu0 %v8435_v58  ;;  %v1070_v59 = vrot.slane %v9622_v60, %v1069_v57 }
 0x343   : > { %v1066_v58 = vrot.slane %v9622_v60, %v1065_v56 }
 0x344   : > { %7214 = vmatpush3.bf16.msra.mxu1 %v7213_v2 }
 0x345   : > { %5488 = vmatpush1.bf16.msra.mxu0 %v8433_v5  ;;  %7216 = vmatprep.subr.bf16.mxu1 %v7215_v8  ;;  %v5706_v8 = vld [vmem:[%s9553_s8 + $0x498] sm:$0xff] }
 0x346   : > { %5489 = vmatprep.subr.bf16.mxu0 %v8438_v0  ;;  %v5705_v0 = vld [vmem:[%s9553_s8 + $0x490] sm:$0xff] }
 0x347   : > { %v7239_v7 = vpack.c.bf16 %v5706_v8, %v5705_v0 }
 0x348   : > { %7218 = vmatpush3.bf16.msra.mxu1 %v7217_v14  ;;  %v5690_v14 = vld [vmem:[%s9553_s8 + $0x418] sm:$0xff] }
 0x349   : > { %5490 = vmatpush1.bf16.msra.mxu0 %v8436_v13  ;;  %7220 = vmatprep.subr.bf16.mxu1 %v7219_v17  ;;  %v5689_v13 = vld [vmem:[%s9553_s8 + $0x410] sm:$0xff]  ;;  %v5708_v17 = vld [vmem:[%s9553_s8 + $0x4a8] sm:$0xff] }
 0x34a   : > { %5491 = vmatprep.subr.bf16.mxu0 %v8441_v15  ;;  %v5707_v15 = vld [vmem:[%s9553_s8 + $0x4a0] sm:$0xff]  ;;  %v7241_v18 = vpack.c.bf16 %v5690_v14, %v5689_v13 }
 0x34b   : > { %v7243_v39 = vpack.c.bf16 %v5708_v17, %v5707_v15 }
 0x34c   : > { %7222 = vmatpush3.bf16.msra.mxu1 %v7221_v62  ;;  %v5710_v62 = vld [vmem:[%s9553_s8 + $0x4b8] sm:$0xff] }
 0x34d   : > { %5492 = vmatpush1.bf16.msra.mxu0 %v8439_v34  ;;  %7224 = vmatprep.subr.bf16.mxu1 %v7223_v24  ;;  %v5709_v34 = vld [vmem:[%s9553_s8 + $0x4b0] sm:$0xff] }
 0x34e   : > { %5493 = vmatprep.subr.bf16.mxu0 %v8444_v23  ;;  %v7245_v23 = vpack.c.bf16 %v5692_v22, %v5691_v21  ;;  %v7247_v24 = vpack.c.bf16 %v5710_v62, %v5709_v34 }
 0x350   : > { %7226 = vmatpush3.bf16.msra.mxu1 %v7225_v29  ;;  %v7251_v29 = vpack.c.bf16 %v5712_v28, %v5711_v27 }
 0x351   : > { %5494 = vmatpush1.bf16.msra.mxu0 %v8442_v38  ;;  %7228 = vmatprep.subr.bf16.mxu1 %v7227_v19  ;;  %v7249_v38 = vpack.c.bf16 %v5694_v26, %v5693_v12  ;;  %v5696_v19 = vld [vmem:[%s9553_s8 + $0x448] sm:$0xff] }
 0x352   : > { %5495 = vmatprep.subr.bf16.mxu0 %v8447_v47  ;;  %v5695_v47 = vld [vmem:[%s9553_s8 + $0x440] sm:$0xff] }
 0x353   : > { %v7253_v32 = vpack.c.bf16 %v5696_v19, %v5695_v47 }
 0x354   : > { %7230 = vmatpush3.bf16.msra.mxu1 %v7229_v6  ;;  %v5698_v6 = vld [vmem:[%s9553_s8 + $0x458] sm:$0xff] }
 0x355   : > { %5496 = vmatpush1.bf16.msra.mxu0 %v8445_v36  ;;  %7232 = vmatprep.subr.bf16.mxu1 %v7231_v41  ;;  %v5697_v36 = vld [vmem:[%s9553_s8 + $0x450] sm:$0xff]  ;;  %v5716_v41 = vld [vmem:[%s9553_s8 + $0x4e8] sm:$0xff] }
 0x356   : > { %5497 = vmatprep.subr.bf16.mxu0 %v8450_v40  ;;  %v5715_v40 = vld [vmem:[%s9553_s8 + $0x4e0] sm:$0xff]  ;;  %v7257_v43 = vpack.c.bf16 %v5698_v6, %v5697_v36 }
 0x357   : > { %v7259_v44 = vpack.c.bf16 %v5716_v41, %v5715_v40 }
 0x358   : > { %7234 = vmatpush3.bf16.msra.mxu1 %v7233_v45  ;;  %v5700_v45 = vld [vmem:[%s9553_s8 + $0x468] sm:$0xff] }
 0x359   : > { %5498 = vmatpush1.bf16.msra.mxu0 %v8448_v16  ;;  %v5699_v16 = vld [vmem:[%s9553_s8 + $0x460] sm:$0xff] }
 0x35a   : > { %5508 = vmatprep.subr.bf16.mxu0 %v8453_v51  ;;  %v5717_v51 = vld [vmem:[%s9553_s8 + $0x4f0] sm:$0xff] }
 0x35c   : > { %5500 = vmatmul.mubr.bf16.vlgmr.msra.gmra.mrb[8].mxu0 %v9074_v25  ;;  %v5703_v25 = vld [vmem:[%s9553_s8 + $0x480] sm:$0xff] }
 0x35d   : > { %5509 = vmatpush1.bf16.msra.mxu0 %v8451_v48  ;;  %5540 = vmatprep.mubr.bf16.mxu0 %v8620_v33  ;;  %v7235_v33 = vpack.c.bf16 %v5704_v55, %v5703_v25  ;;  %v5718_v48 = vld [vmem:[%s9553_s8 + $0x4f8] sm:$0xff] }
 0x35e   : > { %5510 = vmatprep.subr.bf16.mxu0 %v8456_v49  ;;  %v7261_v49 = vpack.c.bf16 %v5700_v45, %v5699_v16 }
 0x35f   : > { %7236 = vmatprep.subr.bf16.mxu1 %v7235_v33 }
 0x361   : > { %5511 = vmatpush1.bf16.msra.mxu0 %v8454_v50  ;;  %v7263_v50 = vpack.c.bf16 %v5718_v48, %v5717_v51 }
 0x362   : > { %5512 = vmatprep.subr.bf16.mxu0 %v8459_v52  ;;  %v5701_v52 = vld [vmem:[%s9553_s8 + $0x470] sm:$0xff] }
 0x365   : > { %5513 = vmatpush1.bf16.msra.mxu0 %v8457_v53  ;;  %v5702_v53 = vld [vmem:[%s9553_s8 + $0x478] sm:$0xff] }
 0x366   : > { %5514 = vmatprep.subr.bf16.mxu0 %v8462_v20 }
 0x369   : > { %5515 = vmatpush1.bf16.msra.mxu0 %v8460_v54  ;;  %v7265_v54 = vpack.c.bf16 %v5702_v53, %v5701_v52 }
 0x36c   : > { %6923 = vmatmul.mubr.msk.bf16.vlgmr.msra.gmra.mrb[8].mxu0 %vm4520_vm0, %v9578_v63 }
 0x3ae   : > { %v5337_v61 = vpop.f32.mrb[8].mxu1 }
 0x3af   : > { %v7275_v1 = vadd.f32 %v5337_v61, %v1066_v58  ;;  %v5339_v63 = vpop.f32.mrb[9].mxu1 }
 0x3b0   : > { %v7276_v5 = vadd.f32 %v5339_v63, %v1070_v59  ;;  %v5341_v2 = vpop.f32.mrb[10].mxu1 }
 0x3b1   : > { %v5342_v9 = vpop.f32.mrb[11].mxu1  ;;  %v5555_v60 = vmax.f32 %v7275_v1, 0.0 }
 0x3b2   : > { %v5556_v10 = vmax.f32 %v7276_v5, 0.0  ;;  %v1078_v5 = vrot.slane %v1036_v3, %v1045_v46 }
 0x3b4   : > { %5993 = vmatprep.mubr.f32.mxu1 %v5556_v10 }
 0x3b5   : > { %5994 = vmatmul.mubr.f32.vlgmr.msra.gmra.mrb[18].mxu1 %v5555_v60 }
 0x3b6   : > { %7238 = vmatpush3.bf16.msra.mxu1 %v7237_v11 }
 0x3b7   : > { %7240 = vmatprep.subr.bf16.mxu1 %v7239_v7 }
 0x3ba   : > { %7242 = vmatpush3.bf16.msra.mxu1 %v7241_v18 }
 0x3bb   : > { %7244 = vmatprep.subr.bf16.mxu1 %v7243_v39 }
 0x3be   : > { %7246 = vmatpush3.bf16.msra.mxu1 %v7245_v23 }
 0x3bf   : > { %7248 = vmatprep.subr.bf16.mxu1 %v7247_v24 }
 0x3c2   : > { %7250 = vmatpush3.bf16.msra.mxu1 %v7249_v38 }
 0x3c3   : > { %7252 = vmatprep.subr.bf16.mxu1 %v7251_v29 }
 0x3c6   : > { %7254 = vmatpush3.bf16.msra.mxu1 %v7253_v32 }
 0x3c7   : > { %7256 = vmatprep.subr.bf16.mxu1 %v7255_v35 }
 0x3ca   : > { %7258 = vmatpush3.bf16.msra.mxu1 %v7257_v43 }
 0x3cb   : > { %7260 = vmatprep.subr.bf16.mxu1 %v7259_v44 }
 0x3ce   : > { %v6964_v20 = vpop.f32.mrb[12].mxu1  ;;  %7262 = vmatpush3.bf16.msra.mxu1 %v7261_v49 }
 0x3cf   : > { %v6965_v25 = vpop.f32.mrb[13].mxu1  ;;  %7264 = vmatprep.subr.bf16.mxu1 %v7263_v50 }
 0x3d0   : > { %v6966_v55 = vadd.f32 %v6965_v25, %v6964_v20 }
 0x3d2   : > { %7266 = vmatpush3.bf16.msra.mxu1 %v7265_v54 }
 0x3ee   : > { %v6999_v33 = vpop.f32.mrb[14].mxu1 }
 0x3ef   : > { %v7000_v56 = vpop.f32.mrb[15].mxu1 }
 0x3f0   : > { %v7001_v57 = vadd.f32 %v7000_v56, %v6999_v33 }
 0x3f2   : > { %v5856_v58 = vadd.f32 %v7001_v57, %v6966_v55 }
 0x40e   : > { %v7034_v59 = vpop.f32.mrb[16].mxu1 }
 0x40f   : > { %v7035_v61 = vpop.f32.mrb[17].mxu1 }
 0x410   : > { %v7036_v1 = vadd.f32 %v7035_v61, %v7034_v59 }
 0x412   : > { %v5926_v63 = vadd.f32 %v7036_v1, %v5856_v58 }
 0x43f   : > { %v5542_v2 = vpop.f32.mrb[8].mxu0 }
 0x440   : > { %v7277_v0 = vadd.f32 %v5542_v2, %v1074_v4  ;;  %v5544_v8 = vpop.f32.mrb[9].mxu0 }
 0x441   : > { %v7278_v9 = vadd.f32 %v5544_v8, %v1078_v5  ;;  %v5546_v10 = vpop.f32.mrb[10].mxu0 }
 0x442   : > { %v5547_v11 = vpop.f32.mrb[11].mxu0  ;;  %v5557_v7 = vmax.f32 %v7277_v0, 0.0 }
 0x443   : > { %v5558_v60 = vmax.f32 %v7278_v9, 0.0 }
 0x445   : > { %6063 = vmatprep.mubr.f32.mxu1 %v5558_v60 }
 0x446   : > { %6064 = vmatmul.mubr.f32.vlgmr.msra.gmra.mrb[20].mxu1 %v5557_v7 }
 0x488   : > { %v7069_v13 = vpop.f32.mrb[18].mxu1 }
 0x489   : > { %v7070_v14 = vpop.f32.mrb[19].mxu1 }
 0x48a   : > { %v7071_v15 = vadd.f32 %v7070_v14, %v7069_v13 }
 0x48c   : > { %v5996_v17 = vadd.f32 %v7071_v15, %v5926_v63 }
 0x517   : > { %6072 = sbr.rel (%p6924_p3) target bundleno = 1314 (0x522), region = 56 }
 0x519   : > { %v7104_v18 = vpop.f32.mrb[20].mxu1 }
 0x51a   : > { %v7105_v39 = vpop.f32.mrb[21].mxu1 }
 0x51b   : > { %v7106_v42 = vadd.f32 %v7105_v39, %v7104_v18 }
 0x51d   : > { %v6066_v21 = vadd.f32 %v7106_v42, %v5996_v17 }
 0x51f   : > { %v6080_v46 = vadd.f32 %v6925_v37, %v6066_v21 }
 0x521   : > { %6082 = vst.msk [vmem:[%s9866_s5] sm:$0xff] %vm6081_vm1, %v6080_v46 }
 0x522 PF: > { %p6926_p6 = scmp.eq.s32.totalorder %s8604_s21, 0 }
 0x523   : > { %vm6089_vm2 = vcmask (!%p6926_p6), 64512  }
 0x524   : > { %6086 = sbr.rel (%p6926_p6) target bundleno = 1324 (0x52c), region = 60 }
 0x528   : > { %v6087_v22 = vld [vmem:[%s9866_s5] sm:$0xff] (!%p6926_p6) }
 0x529   : > { %v6088_v34 = vadd.f32 (!%p6926_p6), %v6087_v22, %v6066_v21 }
 0x52b   : > { %6090 = vst.msk [vmem:[%s9866_s5] sm:$0xff] %vm6089_vm2, %v6088_v34 }
 0x52c PF: > { %s21_s23 = sadd.s32 1, %s8612_s23   ;;  %s9890_s13 = sld [smem:[#allocation10_spill]] }
 0x52d   : > { %p18_p8 = scmp.ge.s32.totalorder %s21_s23, 4   ;;  %s9891_s18 = smov %s8596_s19 }
 0x52e   : > { %s9892_s19 = smov %s8600_s20  ;;  %s9893_s20 = smov %s8753_s17 }
 0x52f   : > { %s9894_s21 = smov %s8608_s22  ;;  %20 = sbr.rel (!%p18_p8) target bundleno = 9 (0x9), region = 111 }
 0x532   : > { %s9895_s22 = smov %s9890_s13 }
 0x536   :  { %6110 = vsyncpa [#allocation3], 1 }
 0x537   :  { %6112 = vsyncpa [#allocation3 + $0x1], 1 }
 0x538   :  { %6113 = vsyncpa [#allocation5], 1 }
 0x539   :  { %6115 = vsyncpa [#allocation5 + $0x1], 1 }

</bundles_post_ra>
